<compile_context>
chip_gen: v5e
topology: v5e:2x2
jax: 0.10.0
libtpu: 0.0.40
codegen_flags: <defaults>
</compile_context>

<pallas_src>
import functools

import jax
import jax.numpy as jnp
from jax.experimental import pallas as pl
from jax.experimental.pallas import tpu as pltpu

IN_DIM = 2
H_DIM = 400
OUT_DIM = 2

H_PAD = 512     # multiple of 256 -> dense MXU K/N tiles on v5e/v6e/v7x
OUT_PAD = 128   # lane-dense output stores (full-lane vst instead of vst.msk)


def _generator_kernel(z_ref,
                      w1_ref, b1_ref,
                      w2_ref, b2_ref,
                      w3_ref, b3_ref,
                      w4_ref, b4_ref,
                      o_ref):
    # Layer 1: in_features = 2, so an MXU matmul would use <2% of the systolic
    # array. Do it as two VPU broadcast-FMAs instead (kept in f32: v5e has no
    # bf16 VALU, and on v6e/v7x the VPU has slack under the MXU-bound layers).
    z = z_ref[...]                                   # (block_b, 2) f32
    h = (z[:, 0:1] * w1_ref[0:1, :]
         + z[:, 1:2] * w1_ref[1:2, :]
         + b1_ref[...])                              # (block_b, H_PAD) f32
    h = jnp.maximum(h, 0.0)

    # Layers 2/3: dense 512x512 MXU matmuls (bf16 operands by default), f32 acc.
    h = jnp.dot(h.astype(w2_ref.dtype), w2_ref[...],
                preferred_element_type=jnp.float32) + b2_ref[...]
    h = jnp.maximum(h, 0.0)

    h = jnp.dot(h.astype(w3_ref.dtype), w3_ref[...],
                preferred_element_type=jnp.float32) + b3_ref[...]
    h = jnp.maximum(h, 0.0)

    # Layer 4: 512 x 128 (output padded to 128 lanes; padded columns are zero).
    out = jnp.dot(h.astype(w4_ref.dtype), w4_ref[...],
                  preferred_element_type=jnp.float32) + b4_ref[...]
    o_ref[...] = out.astype(o_ref.dtype)


def _resident_spec(shape):
    # Grid-invariant block (constant index_map): fetched once, stays resident
    # in VMEM across the batch grid. Buffered(1): no point double-buffering a
    # block that never changes -- halves resident-weight VMEM (matters under
    # v5e's 16 MiB default scoped limit and v7x's 64 MiB physical VMEM).
    n = len(shape)
    return pl.BlockSpec(shape, lambda i, n=n: (0,) * n,
                        pipeline_mode=pl.Buffered(1))


def _pick_block_b(batch, target=1024):
    """Pick the batch tile.

    Big enough to amortize the ~0.35 us/step pipeline overhead (each step only
    does ~0.3 GFLOP at block_b=256), but not over-padding tiny batches, and
    preferring >= 2 grid steps so the "parallel" batch axis can shard across
    v7x's two TensorCores (harmless on single-TC v5e/v6e).
    """
    b256 = ((max(batch, 1) + 255) // 256) * 256      # batch rounded up to 256
    blk = min(target, b256)
    if b256 > 256 and b256 <= blk:                   # would be a 1-step grid
        blk = ((b256 // 2 + 255) // 256) * 256       # split into >= 2 steps
    return blk


@functools.partial(jax.jit, static_argnames=("block_b", "out_dtype"))
def generator_forward(z, padded_params, block_b=None, out_dtype=jnp.float32):
    """z: [B, 2] float32 -> [B, 2] out_dtype. Params must come from pad_params()."""
    w1, b1, w2, b2, w3, b3, w4, b4 = padded_params
    B = z.shape[0]
    if block_b is None:
        block_b = _pick_block_b(B)
    B_pad = ((B + block_b - 1) // block_b) * block_b
    if B_pad != B:
        z = jnp.pad(z, ((0, B_pad - B), (0, 0)))     # zero rows, sliced off below
    grid = (B_pad // block_b,)

    compiler_params = pltpu.CompilerParams(
        # Batch axis is independent -> shards across the 2 TCs on v7x.
        dimension_semantics=("parallel",),
        # Explicit scoped-VMEM limit for large batch tiles: above the 16 MiB
        # (v5e) / 32 MiB (v6e, v7x) defaults, below v7x's 64 MiB physical.
        vmem_limit_bytes=(48 * 1024 * 1024) if block_b >= 512 else None,
    )

    out = pl.pallas_call(
        _generator_kernel,
        out_shape=jax.ShapeDtypeStruct((B_pad, OUT_PAD), out_dtype),
        grid_spec=pl.GridSpec(
            grid=grid,
            in_specs=[
                pl.BlockSpec((block_b, IN_DIM), lambda i: (i, 0)),             # z tile
                _resident_spec((IN_DIM, H_PAD)), _resident_spec((1, H_PAD)),   # layer 1
                _resident_spec((H_PAD, H_PAD)), _resident_spec((1, H_PAD)),    # layer 2
                _resident_spec((H_PAD, H_PAD)), _resident_spec((1, H_PAD)),    # layer 3
                _resident_spec((H_PAD, OUT_PAD)), _resident_spec((1, OUT_PAD)),  # layer 4
            ],
            out_specs=pl.BlockSpec((block_b, OUT_PAD), lambda i: (i, 0)),
        ),
        compiler_params=compiler_params,
    )(z, w1, b1, w2, b2, w3, b3, w4, b4)

    # Narrow slice stays fused inside this jit (no separate host-visible pass).
    return out[:B, :OUT_DIM]


def init_params(key):
    """Deterministic synthetic init (PyTorch-Linear-like uniform bounds)."""
    def linear(key, fan_in, fan_out):
        kw, kb = jax.random.split(key)
        bound = 1.0 / jnp.sqrt(fan_in)
        w = jax.random.uniform(kw, (fan_in, fan_out), jnp.float32, -bound, bound)
        b = jax.random.uniform(kb, (1, fan_out), jnp.float32, -bound, bound)
        return w, b

    k1, k2, k3, k4 = jax.random.split(key, 4)
    w1, b1 = linear(k1, IN_DIM, H_DIM)
    w2, b2 = linear(k2, H_DIM, H_DIM)
    w3, b3 = linear(k3, H_DIM, H_DIM)
    w4, b4 = linear(k4, H_DIM, OUT_DIM)
    return (w1, b1, w2, b2, w3, b3, w4, b4)


def pad_params(params, matmul_dtype=jnp.bfloat16):
    """Zero-pad hidden dim 400->512 and out dim 2->128; cast matmul weights.

    bf16 is the default (MXU-native, ~2-3x faster than multi-pass f32 on the
    MXU, half the weight VMEM); pass matmul_dtype=jnp.float32 only for
    debug/verification. Zero padding of weight rows/cols AND biases, combined
    with ReLU(0)=0, keeps the forward pass mathematically identical to the
    unpadded model.
    """
    w1, b1, w2, b2, w3, b3, w4, b4 = params
    ph = H_PAD - H_DIM
    po = OUT_PAD - OUT_DIM
    w1p = jnp.pad(w1, ((0, 0), (0, ph)))                        # (2, 512)   f32 (VPU path)
    b1p = jnp.pad(b1, ((0, 0), (0, ph)))                        # (1, 512)   f32
    w2p = jnp.pad(w2, ((0, ph), (0, ph))).astype(matmul_dtype)  # (512, 512)
    b2p = jnp.pad(b2, ((0, 0), (0, ph)))                        # (1, 512)   f32
    w3p = jnp.pad(w3, ((0, ph), (0, ph))).astype(matmul_dtype)  # (512, 512)
    b3p = jnp.pad(b3, ((0, 0), (0, ph)))                        # (1, 512)   f32
    w4p = jnp.pad(w4, ((0, ph), (0, po))).astype(matmul_dtype)  # (512, 128)
    b4p = jnp.pad(b4, ((0, 0), (0, po)))                        # (1, 128)   f32
    return (w1p, b1p, w2p, b2p, w3p, b3p, w4p, b4p)


def generator_ref(z, params):
    """Pure-JAX reference for correctness checking (high-precision matmuls)."""
    w1, b1, w2, b2, w3, b3, w4, b4 = params
    h = jnp.maximum(jnp.dot(z, w1, precision="highest") + b1, 0.0)
    h = jnp.maximum(jnp.dot(h, w2, precision="highest") + b2, 0.0)
    h = jnp.maximum(jnp.dot(h, w3, precision="highest") + b3, 0.0)
    return jnp.dot(h, w4, precision="highest") + b4


if __name__ == "__main__":
    key = jax.random.PRNGKey(0)
    kp, kz = jax.random.split(key)

    params = init_params(kp)

    # Small batch: exercises batch padding (300 -> 512) and a 2-step grid.
    batch = 300
    z = jax.random.normal(kz, (batch, IN_DIM), jnp.float32)
    ref = generator_ref(z, params)

    # Default fast path: bf16 MXU operands, f32 accumulation, f32 output.
    out = jax.block_until_ready(generator_forward(z, pad_params(params)))
    assert out.shape == (batch, OUT_DIM) and out.dtype == jnp.float32
    assert jnp.allclose(out, ref, atol=3e-2, rtol=3e-2), "bf16 path mismatch"

    # Debug/verification path: f32 MXU operands (near-exact semantics).
    out_f32 = jax.block_until_ready(
        generator_forward(z, pad_params(params, jnp.float32)))
    assert jnp.allclose(out_f32, ref, atol=1e-2, rtol=1e-2), "f32 path mismatch"

    # Reduced-writeback path (v6e HBM-bandwidth item): bf16 kernel output.
    out_bf16 = jax.block_until_ready(
        generator_forward(z, pad_params(params), out_dtype=jnp.bfloat16))
    assert out_bf16.dtype == jnp.bfloat16
    assert jnp.allclose(out_bf16.astype(jnp.float32), ref,
                        atol=3e-2, rtol=3e-2), "bf16-output path mismatch"

    # Larger batch: exercises the block_b=1024 tile and a multi-step grid.
    z_big = jax.random.normal(kz, (1300, IN_DIM), jnp.float32)
    ref_big = generator_ref(z_big, params)
    out_big = jax.block_until_ready(generator_forward(z_big, pad_params(params)))
    assert out_big.shape == (1300, OUT_DIM)
    assert jnp.allclose(out_big, ref_big, atol=3e-2, rtol=3e-2), "large-batch mismatch"

    print("KERNEL_OK")
</pallas_src>

<mosaic_0001>
module attributes {stable_mosaic.version = 11 : i64} {
  func.func @_generator_kernel(%arg0: i32, %arg1: memref<256x2xf32, #tpu.memory_space<vmem>>, %arg2: memref<2x512xf32, #tpu.memory_space<vmem>>, %arg3: memref<1x512xf32, #tpu.memory_space<vmem>>, %arg4: memref<512x512xbf16, #tpu.memory_space<vmem>>, %arg5: memref<1x512xf32, #tpu.memory_space<vmem>>, %arg6: memref<512x512xbf16, #tpu.memory_space<vmem>>, %arg7: memref<1x512xf32, #tpu.memory_space<vmem>>, %arg8: memref<512x128xbf16, #tpu.memory_space<vmem>>, %arg9: memref<1x128xf32, #tpu.memory_space<vmem>>, %arg10: memref<256x128xf32, #tpu.memory_space<vmem>>) attributes {dimension_semantics = [#tpu.dimension_semantics<parallel>], iteration_bounds = array<i64: 2>, scalar_prefetch = 0 : i64, scratch_operands = 0 : i64, tpu.core_type = #tpu.core_type<tc>, window_params = [{transform_indices = @transform_0, window_bounds = array<i64: 256, 2>}, {pipeline_mode = #tpu.pipeline_mode<synchronous>, transform_indices = @transform_1, window_bounds = array<i64: 2, 512>}, {pipeline_mode = #tpu.pipeline_mode<synchronous>, transform_indices = @transform_2, window_bounds = array<i64: 1, 512>}, {pipeline_mode = #tpu.pipeline_mode<synchronous>, transform_indices = @transform_3, window_bounds = array<i64: 512, 512>}, {pipeline_mode = #tpu.pipeline_mode<synchronous>, transform_indices = @transform_4, window_bounds = array<i64: 1, 512>}, {pipeline_mode = #tpu.pipeline_mode<synchronous>, transform_indices = @transform_5, window_bounds = array<i64: 512, 512>}, {pipeline_mode = #tpu.pipeline_mode<synchronous>, transform_indices = @transform_6, window_bounds = array<i64: 1, 512>}, {pipeline_mode = #tpu.pipeline_mode<synchronous>, transform_indices = @transform_7, window_bounds = array<i64: 512, 128>}, {pipeline_mode = #tpu.pipeline_mode<synchronous>, transform_indices = @transform_8, window_bounds = array<i64: 1, 128>}, {transform_indices = @transform_9, window_bounds = array<i64: 256, 128>}]} {
    %c0 = arith.constant 0 : index
    %c0_0 = arith.constant 0 : index
    %0 = vector.load %arg1[%c0, %c0_0] : memref<256x2xf32, #tpu.memory_space<vmem>>, vector<256x2xf32>
    %1 = vector.extract_strided_slice %0 {offsets = [0, 0], sizes = [256, 1], strides = [1, 1]} : vector<256x2xf32> to vector<256x1xf32>
    %c0_1 = arith.constant 0 : index
    %c0_2 = arith.constant 0 : index
    %2 = vector.load %arg2[%c0_1, %c0_2] : memref<2x512xf32, #tpu.memory_space<vmem>>, vector<1x512xf32>
    %3 = vector.broadcast %1 : vector<256x1xf32> to vector<256x512xf32>
    %4 = vector.broadcast %2 : vector<1x512xf32> to vector<256x512xf32>
    %5 = arith.mulf %3, %4 : vector<256x512xf32>
    %6 = vector.extract_strided_slice %0 {offsets = [0, 1], sizes = [256, 1], strides = [1, 1]} : vector<256x2xf32> to vector<256x1xf32>
    %c1 = arith.constant 1 : index
    %c0_3 = arith.constant 0 : index
    %7 = vector.load %arg2[%c1, %c0_3] : memref<2x512xf32, #tpu.memory_space<vmem>>, vector<1x512xf32>
    %8 = vector.broadcast %6 : vector<256x1xf32> to vector<256x512xf32>
    %9 = vector.broadcast %7 : vector<1x512xf32> to vector<256x512xf32>
    %10 = arith.mulf %8, %9 : vector<256x512xf32>
    %11 = arith.addf %5, %10 : vector<256x512xf32>
    %c0_4 = arith.constant 0 : index
    %c0_5 = arith.constant 0 : index
    %12 = vector.load %arg3[%c0_4, %c0_5] : memref<1x512xf32, #tpu.memory_space<vmem>>, vector<1x512xf32>
    %13 = vector.broadcast %12 : vector<1x512xf32> to vector<256x512xf32>
    %14 = arith.addf %11, %13 : vector<256x512xf32>
    %cst = arith.constant 0.000000e+00 : f32
    %15 = vector.broadcast %cst : f32 to vector<256x512xf32>
    %16 = arith.maximumf %14, %15 : vector<256x512xf32>
    %17 = arith.truncf %16 : vector<256x512xf32> to vector<256x512xbf16>
    %c0_6 = arith.constant 0 : index
    %c0_7 = arith.constant 0 : index
    %18 = vector.load %arg4[%c0_6, %c0_7] : memref<512x512xbf16, #tpu.memory_space<vmem>>, vector<512x512xbf16>
    %cst_8 = arith.constant dense<0.000000e+00> : vector<256x512xf32>
    %19 = tpu.matmul %17, %18, %cst_8 {dimension_numbers = #tpu.dot_dimension_numbers<[1], [0], [0], [1], [0, 0, 1, 1], [], []>} : vector<256x512xbf16>, vector<512x512xbf16>, vector<256x512xf32> -> vector<256x512xf32>
    %c0_9 = arith.constant 0 : index
    %c0_10 = arith.constant 0 : index
    %20 = vector.load %arg5[%c0_9, %c0_10] : memref<1x512xf32, #tpu.memory_space<vmem>>, vector<1x512xf32>
    %21 = vector.broadcast %20 : vector<1x512xf32> to vector<256x512xf32>
    %22 = arith.addf %19, %21 : vector<256x512xf32>
    %cst_11 = arith.constant 0.000000e+00 : f32
    %23 = vector.broadcast %cst_11 : f32 to vector<256x512xf32>
    %24 = arith.maximumf %22, %23 : vector<256x512xf32>
    %25 = arith.truncf %24 : vector<256x512xf32> to vector<256x512xbf16>
    %c0_12 = arith.constant 0 : index
    %c0_13 = arith.constant 0 : index
    %26 = vector.load %arg6[%c0_12, %c0_13] : memref<512x512xbf16, #tpu.memory_space<vmem>>, vector<512x512xbf16>
    %cst_14 = arith.constant dense<0.000000e+00> : vector<256x512xf32>
    %27 = tpu.matmul %25, %26, %cst_14 {dimension_numbers = #tpu.dot_dimension_numbers<[1], [0], [0], [1], [0, 0, 1, 1], [], []>} : vector<256x512xbf16>, vector<512x512xbf16>, vector<256x512xf32> -> vector<256x512xf32>
    %c0_15 = arith.constant 0 : index
    %c0_16 = arith.constant 0 : index
    %28 = vector.load %arg7[%c0_15, %c0_16] : memref<1x512xf32, #tpu.memory_space<vmem>>, vector<1x512xf32>
    %29 = vector.broadcast %28 : vector<1x512xf32> to vector<256x512xf32>
    %30 = arith.addf %27, %29 : vector<256x512xf32>
    %cst_17 = arith.constant 0.000000e+00 : f32
    %31 = vector.broadcast %cst_17 : f32 to vector<256x512xf32>
    %32 = arith.maximumf %30, %31 : vector<256x512xf32>
    %33 = arith.truncf %32 : vector<256x512xf32> to vector<256x512xbf16>
    %c0_18 = arith.constant 0 : index
    %c0_19 = arith.constant 0 : index
    %34 = vector.load %arg8[%c0_18, %c0_19] : memref<512x128xbf16, #tpu.memory_space<vmem>>, vector<512x128xbf16>
    %cst_20 = arith.constant dense<0.000000e+00> : vector<256x128xf32>
    %35 = tpu.matmul %33, %34, %cst_20 {dimension_numbers = #tpu.dot_dimension_numbers<[1], [0], [0], [1], [0, 0, 1, 1], [], []>} : vector<256x512xbf16>, vector<512x128xbf16>, vector<256x128xf32> -> vector<256x128xf32>
    %c0_21 = arith.constant 0 : index
    %c0_22 = arith.constant 0 : index
    %36 = vector.load %arg9[%c0_21, %c0_22] : memref<1x128xf32, #tpu.memory_space<vmem>>, vector<1x128xf32>
    %37 = vector.broadcast %36 : vector<1x128xf32> to vector<256x128xf32>
    %38 = arith.addf %35, %37 : vector<256x128xf32>
    %c0_23 = arith.constant 0 : index
    %c0_24 = arith.constant 0 : index
    %39 = vector.load %arg10[%c0_23, %c0_24] : memref<256x128xf32, #tpu.memory_space<vmem>>, vector<256x128xf32>
    tpu.vector_store %arg10[%c0_23, %c0_24], %38 {strides = array<i32>} : memref<256x128xf32, #tpu.memory_space<vmem>>, vector<256x128xf32>,
    return
  }
  func.func @transform_0(%arg0: i32) -> (i32, i32) {
    %c0_i32 = arith.constant 0 : i32
    %c0_i32_0 = arith.constant 0 : i32
    return %arg0, %c0_i32 : i32, i32
  }
  func.func @transform_1(%arg0: i32) -> (i32, i32) {
    %c0_i32 = arith.constant 0 : i32
    %c0_i32_0 = arith.constant 0 : i32
    %c0_i32_1 = arith.constant 0 : i32
    return %c0_i32, %c0_i32_0 : i32, i32
  }
  func.func @transform_2(%arg0: i32) -> (i32, i32) {
    %c0_i32 = arith.constant 0 : i32
    %c0_i32_0 = arith.constant 0 : i32
    %c0_i32_1 = arith.constant 0 : i32
    return %c0_i32, %c0_i32_0 : i32, i32
  }
  func.func @transform_3(%arg0: i32) -> (i32, i32) {
    %c0_i32 = arith.constant 0 : i32
    %c0_i32_0 = arith.constant 0 : i32
    %c0_i32_1 = arith.constant 0 : i32
    return %c0_i32, %c0_i32_0 : i32, i32
  }
  func.func @transform_4(%arg0: i32) -> (i32, i32) {
    %c0_i32 = arith.constant 0 : i32
    %c0_i32_0 = arith.constant 0 : i32
    %c0_i32_1 = arith.constant 0 : i32
    return %c0_i32, %c0_i32_0 : i32, i32
  }
  func.func @transform_5(%arg0: i32) -> (i32, i32) {
    %c0_i32 = arith.constant 0 : i32
    %c0_i32_0 = arith.constant 0 : i32
    %c0_i32_1 = arith.constant 0 : i32
    return %c0_i32, %c0_i32_0 : i32, i32
  }
  func.func @transform_6(%arg0: i32) -> (i32, i32) {
    %c0_i32 = arith.constant 0 : i32
    %c0_i32_0 = arith.constant 0 : i32
    %c0_i32_1 = arith.constant 0 : i32
    return %c0_i32, %c0_i32_0 : i32, i32
  }
  func.func @transform_7(%arg0: i32) -> (i32, i32) {
    %c0_i32 = arith.constant 0 : i32
    %c0_i32_0 = arith.constant 0 : i32
    %c0_i32_1 = arith.constant 0 : i32
    return %c0_i32, %c0_i32_0 : i32, i32
  }
  func.func @transform_8(%arg0: i32) -> (i32, i32) {
    %c0_i32 = arith.constant 0 : i32
    %c0_i32_0 = arith.constant 0 : i32
    %c0_i32_1 = arith.constant 0 : i32
    return %c0_i32, %c0_i32_0 : i32, i32
  }
  func.func @transform_9(%arg0: i32) -> (i32, i32) {
    %c0_i32 = arith.constant 0 : i32
    %c0_i32_0 = arith.constant 0 : i32
    return %arg0, %c0_i32 : i32, i32
  }
}

</mosaic_0001>

<bundles_post_ra>
// kernel: generator_forward.1
= control target key start
LH: loop header
LB: loop body
LE: loop exit
PB: predicated region body
PF: predicated region fallthrough
CT: control target
= control target key end

     0   :  { %14 = vsyncpa [#allocation3], 0  ;;  %s11321_s0 = inlined_call_operand.vmem [shape: f32[512,2], index: 0, kind: input, shape index: {}]   ;;  %s11322_s1 = inlined_call_operand.vmem [shape: f32[2,512], index: 1, kind: input, shape index: {}]   ;;  %s11323_s2 = inlined_call_operand.vmem [shape: f32[1,512], index: 2, kind: input, shape index: {}]   ;;  %s11324_s3 = inlined_call_operand.vmem [shape: bf16[512,512], index: 3, kind: input, shape index: {}]   ;;  %s11325_s4 = inlined_call_operand.vmem [shape: f32[1,512], index: 4, kind: input, shape index: {}]   ;;  %s11326_s5 = inlined_call_operand.hbm [shape: bf16[512,512], index: 5, kind: input, shape index: {}]   ;;  %s11327_s6 = inlined_call_operand.vmem [shape: f32[1,512], index: 6, kind: input, shape index: {}]   ;;  %s11328_s7 = inlined_call_operand.hbm [shape: bf16[512,128], index: 7, kind: input, shape index: {}]   ;;  %s11329_s8 = inlined_call_operand.vmem [shape: f32[1,128], index: 8, kind: input, shape index: {}]   ;;  %s11330_s9 = inlined_call_operand.vmem [shape: f32[512,128], index: 9, kind: output, shape index: {}]  }
   0x1   :  { %15 = vsyncpa [#allocation5], 0  ;;  %s8606_s30 = smov 0  }
   0x2 LB: > { %s269_s12 = sshll.u32 %s11326_s5, 4  ;;  %s6939_s13 = sadd.s32 4294967295, %s8546_s30   ;;  %s8546_s30 = sphi %s8606_s30, %s21_s30   ;;  %s270_s12 = int_to_ptr.hbm [resolvable:$true] %s269_s12 }
   0x3   : > { %p6941_p0 = scmp.ge.s32.totalorder %s8546_s30, 1  ;;  %p246_p1 = scmp.lt.s32.totalorder %s8546_s30, 3 }
   0x4   : > { %p8617_p2 = scmp.eq.s32.totalorder %s6939_s13, 0  ;;  %s8548_s16 = smov [#allocation2]  }
   0x5   : > { %p8621_p3 = pnand %p6941_p0, %p246_p1  ;;  %s271_s17 = sshll.u32 %s8548_s16, 4  ;;  %s272_s17 = int_to_ptr.vmem [resolvable:$true] %s271_s17 }
   0x6   : > { %s286_s20 = sshll.u32 %s11328_s7, 4  ;;  %s8549_s21 = smov [#allocation4]   ;;  %s287_s20 = int_to_ptr.hbm [resolvable:$true] %s286_s20 }
   0x7   : > { %p8403_p4 = pneg %p8621_p3  ;;  %s288_s22 = sshll.u32 %s8549_s21, 4  ;;  %s289_s22 = int_to_ptr.vmem [resolvable:$true] %s288_s22 }
   0x8   : > { %s8550_s23 = smov 256   ;;  %s8551_s24 = smov 16  }
   0x9   : > { %p8404_p5 = pnand %p8617_p2, %p8403_p4  ;;  %s8552_s25 = smov 64  }
   0xa   : > { %s8553_s26 = smov 4   ;;  %316 = sbr.rel (%p8621_p3) target bundleno = 2593 (0xa21), region = 56 }
   0xb   : > { %8406 = dma.hbm_to_vmem [thread:$0]  (!%p8404_p5), %s270_s12, 16384, %s272_s17, [#allocation3], %s8550_s23, %s8550_s23, %s8551_s24  }
   0xc   : > { %8409 = dma.hbm_to_vmem [thread:$0]  (!%p8404_p5), %s287_s20, 4096, %s289_s22, [#allocation5], %s8552_s25, %s8552_s25, %s8553_s26  }
   0xf   : > { %8537 = dma.done.wait (%p8617_p2), [#allocation3], 16384  }
  0x10   : > { %8539 = vsyncadd (%p8617_p2), [#allocation3], 4294950912 }
  0x11   : > { %8541 = dma.done.wait (%p8617_p2), [#allocation5], 4096  }
  0x12   : > { %8543 = vsyncadd (%p8617_p2), [#allocation5], 4294963200  ;;  %s6948_s27 = sshll.u32 %s6939_s13, 5  ;;  %v8554_v0 = vmov 1   ;;  %v8555_v1 = vmov 0  }
  0x13   : > { %8431 = vset.pattern.permute.xlu1 %v8554_v0  ;;  %8430 = vset.pattern.permute.xlu0 %v8555_v1  ;;  %p359_p6 = scmp.lt.s32.totalorder %s6948_s27, 63  ;;  %v7067_v15 = vld [vmem:[%s11324_s3 + $0xe0] sm:$0xf]  ;;  %v8137_v16 = vld [vmem:[%s11324_s3 + $0xec] sm:$0xf0] }
  0x14   : > { %8432 = vset.pattern.permute.xlu2 %v8555_v1  ;;  %v7068_v17 = vor.u32 %v8137_v16, %v7067_v15  ;;  %v7195_v18 = vld [vmem:[%s11324_s3 + $0x1e0] sm:$0xf]  ;;  %v8169_v19 = vld [vmem:[%s11324_s3 + $0x1ec] sm:$0xf0] }
  0x15   : > { %s11855_s27 = smov (!%p359_p6, %s6948_s27), 63  ;;  %v7323_v20 = vld [vmem:[%s11324_s3 + $0x2e0] sm:$0xf]  ;;  %v7196_v21 = vor.u32 %v8169_v19, %v7195_v18  ;;  %v8201_v22 = vld [vmem:[%s11324_s3 + $0x2ec] sm:$0xf0] }
  0x16   : > { %s6949_s28 = sshll.u32 %s11855_s27, 3  ;;  %v7451_v23 = vld [vmem:[%s11324_s3 + $0x3e0] sm:$0xf]  ;;  %v8233_v24 = vld [vmem:[%s11324_s3 + $0x3ec] sm:$0xf0]  ;;  %2203 = vmatpush.bf16.msra.mxu0 %v7068_v17  ;;  %v7324_v25 = vor.u32 %v8201_v22, %v7323_v20 }
  0x17   : > { %s8653_s11 = scalar_lea.vmem %s11321_s0, %s6949_s28  ;;  %v7452_v26 = vor.u32 %v8233_v24, %v7451_v23  ;;  %v7051_v27 = vld [vmem:[%s11324_s3 + $0xc0] sm:$0xf]  ;;  %2292 = vmatpush.bf16.msra.mxu1 %v7196_v21  ;;  %v8133_v30 = vld [vmem:[%s11324_s3 + $0xcc] sm:$0xf0]  ;;  %s11225_s14 = scalar_lea.vmem %s11330_s9, %s6949_s28 }
  0x18   : > { %v370_v2 = vld [vmem:[%s8653_s11] sm:$0xff]  ;;  %v372_v3 = vld [vmem:[%s8653_s11 + $0x10] sm:$0xff]  ;;  %v371_v4 = vld [vmem:[%s8653_s11 + $0x8] sm:$0xff]  ;;  %v7052_v31 = vor.u32 %v8133_v30, %v7051_v27  ;;  %2381 = vmatpush.bf16.msra.mxu2 %v7324_v25 }
  0x19   : > { %703 = vperm.xlu1 %8431, %v370_v2   ;;  %405 = vperm.xlu0 %8430, %v370_v2   ;;  %v373_v5 = vld [vmem:[%s8653_s11 + $0x18] sm:$0xff]  ;;  %v374_v6 = vld [vmem:[%s8653_s11 + $0x20] sm:$0xff]  ;;  %v375_v7 = vld [vmem:[%s8653_s11 + $0x28] sm:$0xff] }
  0x1a   : > { %415 = vperm.xlu2 %8432, %v372_v3   ;;  %v376_v8 = vld [vmem:[%s8653_s11 + $0x30] sm:$0xff]  ;;  %v377_v9 = vld [vmem:[%s8653_s11 + $0x38] sm:$0xff]  ;;  %v379_v10 = vld [vmem:[%s8653_s11 + $0x48] sm:$0xff]  ;;  %2470 = vmatpush.bf16.msra.mxu3 %v7452_v26 }
  0x1b   : > { %v378_v11 = vld [vmem:[%s8653_s11 + $0x40] sm:$0xff]  ;;  %v380_v12 = vld [vmem:[%s8653_s11 + $0x50] sm:$0xff]  ;;  %v8676_v13 = vld [vmem:[%s8653_s11 + $0x68] sm:$0xff]  ;;  %2204 = vmatpush.bf16.msra.mxu0 %v7052_v31 }
  0x1c   : > { %v381_v14 = vld [vmem:[%s8653_s11 + $0x58] sm:$0xff]  ;;  %v384_v28 = vld [vmem:[%s8653_s11 + $0x70] sm:$0xff]  ;;  %v382_v29 = vld [vmem:[%s8653_s11 + $0x60] sm:$0xff] }
  0x1d   : > { %v7179_v32 = vld [vmem:[%s11324_s3 + $0x1c0] sm:$0xf]  ;;  %v8165_v33 = vld [vmem:[%s11324_s3 + $0x1cc] sm:$0xf0]  ;;  %v8811_v15 = vld [vmem:[%s8653_s11 + $0x88] sm:$0xff] }
  0x1e   : > { %v7307_v34 = vld [vmem:[%s11324_s3 + $0x2c0] sm:$0xf]  ;;  %v7180_v35 = vor.u32 %v8165_v33, %v7179_v32  ;;  %v8197_v36 = vld [vmem:[%s11324_s3 + $0x2cc] sm:$0xf0] }
  0x1f   : > { %v7435_v37 = vld [vmem:[%s11324_s3 + $0x3c0] sm:$0xf]  ;;  %v8229_v38 = vld [vmem:[%s11324_s3 + $0x3cc] sm:$0xf0]  ;;  %v7308_v39 = vor.u32 %v8197_v36, %v7307_v34 }
  0x20   : > { %v7436_v40 = vor.u32 %v8229_v38, %v7435_v37  ;;  %2293 = vmatpush.bf16.msra.mxu1 %v7180_v35  ;;  %v7035_v41 = vld [vmem:[%s11324_s3 + $0xa0] sm:$0xf]  ;;  %v8129_v42 = vld [vmem:[%s11324_s3 + $0xac] sm:$0xf0] }
  0x21   : > { %707 = vperm.xlu1 %8431, %v371_v4   ;;  %410 = vperm.xlu0 %8430, %v371_v4   ;;  %v7163_v43 = vld [vmem:[%s11324_s3 + $0x1a0] sm:$0xf]  ;;  %v7036_v44 = vor.u32 %v8129_v42, %v7035_v41  ;;  %v8161_v45 = vld [vmem:[%s11324_s3 + $0x1ac] sm:$0xf0]  ;;  %v385_v4 = vld [vmem:[%s8653_s11 + $0x78] sm:$0xff] }
  0x22   : > { %420 = vperm.xlu2 %8432, %v373_v5   ;;  %v7291_v46 = vld [vmem:[%s11324_s3 + $0x2a0] sm:$0xf]  ;;  %v8193_v47 = vld [vmem:[%s11324_s3 + $0x2ac] sm:$0xf0]  ;;  %2382 = vmatpush.bf16.msra.mxu2 %v7308_v39  ;;  %v7164_v48 = vor.u32 %v8161_v45, %v7163_v43 }
  0x23   : > { %v7292_v49 = vor.u32 %v8193_v47, %v7291_v46  ;;  %v7419_v50 = vld [vmem:[%s11324_s3 + $0x3a0] sm:$0xf]  ;;  %v8225_v51 = vld [vmem:[%s11324_s3 + $0x3ac] sm:$0xf0]  ;;  %2471 = vmatpush.bf16.msra.mxu3 %v7436_v40  ;;  %2205 = vmatpush.bf16.msra.mxu0 %v7036_v44 }
  0x24   : > { %v7019_v52 = vld [vmem:[%s11324_s3 + $0x80] sm:$0xf]  ;;  %v7420_v53 = vor.u32 %v8225_v51, %v7419_v50  ;;  %v8125_v54 = vld [vmem:[%s11324_s3 + $0x8c] sm:$0xf0]  ;;  %2294 = vmatpush.bf16.msra.mxu1 %v7164_v48 }
  0x25   : > { %v7147_v55 = vld [vmem:[%s11324_s3 + $0x180] sm:$0xf]  ;;  %v8157_v56 = vld [vmem:[%s11324_s3 + $0x18c] sm:$0xf0]  ;;  %v7020_v57 = vor.u32 %v8125_v54, %v7019_v52 }
  0x26   : > { %v7275_v58 = vld [vmem:[%s11324_s3 + $0x280] sm:$0xf]  ;;  %v8189_v59 = vld [vmem:[%s11324_s3 + $0x28c] sm:$0xf0]  ;;  %v7148_v61 = vor.u32 %v8157_v56, %v7147_v55  ;;  %2383 = vmatpush.bf16.msra.mxu2 %v7292_v49  ;;  %v8199_v55 = vld [vmem:[%s11324_s3 + $0x2e4] sm:$0xf] }
  0x27   : > { %v7403_v60 = vld [vmem:[%s11324_s3 + $0x380] sm:$0xf]  ;;  %v8221_v62 = vld [vmem:[%s11324_s3 + $0x38c] sm:$0xf0]  ;;  %v7276_v63 = vor.u32 %v8189_v59, %v7275_v58  ;;  %2472 = vmatpush.bf16.msra.mxu3 %v7420_v53  ;;  %2206 = vmatpush.bf16.msra.mxu0 %v7020_v57  ;;  %v7325_v56 = vld [vmem:[%s11324_s3 + $0x2f0] sm:$0xf0] }
  0x28   : > { %v7404_v2 = vor.u32 %v8221_v62, %v7403_v60  ;;  %2295 = vmatpush.bf16.msra.mxu1 %v7148_v61  ;;  %v6987_v17 = vld [vmem:[%s11324_s3 + $0x40] sm:$0xf]  ;;  %v8117_v18 = vld [vmem:[%s11324_s3 + $0x4c] sm:$0xf0]  ;;  %v8135_v57 = vld [vmem:[%s11324_s3 + $0xe4] sm:$0xf]  ;;  %v7328_v58 = vor.u32 %v8199_v55, %v7325_v56 }
  0x29   : > { %715 = vperm.xlu1 %8431, %v373_v5   ;;  %8433 = vset.pattern.permute.xlu0 %v8554_v0  ;;  %v8121_v5 = vld [vmem:[%s11324_s3 + $0x6c] sm:$0xf0]  ;;  %v7115_v19 = vld [vmem:[%s11324_s3 + $0x140] sm:$0xf]  ;;  %v6988_v20 = vor.u32 %v8117_v18, %v6987_v17  ;;  %v7069_v59 = vld [vmem:[%s11324_s3 + $0xf0] sm:$0xf0] }
  0x2a   : > { %711 = vperm.xlu0 %8433, %v372_v3   ;;  %425 = vperm.xlu2 %8432, %v374_v6   ;;  %v7003_v3 = vld [vmem:[%s11324_s3 + $0x60] sm:$0xf]  ;;  %v8149_v21 = vld [vmem:[%s11324_s3 + $0x14c] sm:$0xf0]  ;;  %v8231_v60 = vld [vmem:[%s11324_s3 + $0x3e4] sm:$0xf]  ;;  %v7072_v62 = vor.u32 %v8135_v57, %v7069_v59 }
  0x2b   : > { %2384 = vmatpush.bf16.msra.mxu2 %v7276_v63  ;;  %2473 = vmatpush.bf16.msra.mxu3 %v7404_v2  ;;  %v7243_v22 = vld [vmem:[%s11324_s3 + $0x240] sm:$0xf]  ;;  %v8181_v23 = vld [vmem:[%s11324_s3 + $0x24c] sm:$0xf0]  ;;  %v7116_v24 = vor.u32 %v8149_v21, %v7115_v19  ;;  %v7453_v61 = vld [vmem:[%s11324_s3 + $0x3f0] sm:$0xf0] }
  0x2c   : > { %v7244_v25 = vor.u32 %v8181_v23, %v7243_v22  ;;  %v7371_v26 = vld [vmem:[%s11324_s3 + $0x340] sm:$0xf]  ;;  %v8213_v27 = vld [vmem:[%s11324_s3 + $0x34c] sm:$0xf0]  ;;  %v7456_v63 = vor.u32 %v8231_v60, %v7453_v61  ;;  %v8167_v2 = vld [vmem:[%s11324_s3 + $0x1e4] sm:$0xf] }
  0x2d   : > { %v8113_v30 = vld [vmem:[%s11324_s3 + $0x2c] sm:$0xf0]  ;;  %v7099_v31 = vld [vmem:[%s11324_s3 + $0x120] sm:$0xf] }
  0x2e   : > { %v8145_v33 = vld [vmem:[%s11324_s3 + $0x12c] sm:$0xf0]  ;;  %v7227_v34 = vld [vmem:[%s11324_s3 + $0x220] sm:$0xf] }
  0x2f   : > { %v8177_v35 = vld [vmem:[%s11324_s3 + $0x22c] sm:$0xf0]  ;;  %v7100_v36 = vor.u32 %v8145_v33, %v7099_v31  ;;  %v7355_v38 = vld [vmem:[%s11324_s3 + $0x320] sm:$0xf] }
  0x30   : > { %v7228_v37 = vor.u32 %v8177_v35, %v7227_v34  ;;  %v8209_v39 = vld [vmem:[%s11324_s3 + $0x32c] sm:$0xf0]  ;;  %v386_v40 = vld [vmem:[%s8653_s11 + $0x80] sm:$0xff] }
  0x31   : > { %8434 = vset.pattern.permute.xlu1 %v8555_v1  ;;  %v7356_v41 = vor.u32 %v8209_v39, %v7355_v38  ;;  %v6955_v42 = vld [vmem:[%s11324_s3] sm:$0xf]  ;;  %v8109_v43 = vld [vmem:[%s11324_s3 + $0xc] sm:$0xf0] }
  0x32   : > { %430 = vperm.xlu1 %8434, %v375_v7   ;;  %723 = vperm.xlu0 %8433, %v375_v7   ;;  %v7004_v7 = vor.u32 %v8121_v5, %v7003_v3  ;;  %v7083_v44 = vld [vmem:[%s11324_s3 + $0x100] sm:$0xf]  ;;  %v6956_v45 = vor.u32 %v8109_v43, %v6955_v42  ;;  %v8141_v46 = vld [vmem:[%s11324_s3 + $0x10c] sm:$0xf0]  ;;  %v7197_v3 = vld [vmem:[%s11324_s3 + $0x1f0] sm:$0xf0] }
  0x33   : > { %8435 = vset.pattern.permute.xlu2 %v8554_v0  ;;  %v7211_v47 = vld [vmem:[%s11324_s3 + $0x200] sm:$0xf]  ;;  %v8173_v48 = vld [vmem:[%s11324_s3 + $0x20c] sm:$0xf0]  ;;  %v7084_v50 = vor.u32 %v8141_v46, %v7083_v44  ;;  %v391_v5 = vld [vmem:[%s8653_s11 + $0xa8] sm:$0xff] }
  0x34   : > { %719 = vperm.xlu2 %8435, %v374_v6   ;;  %v7131_v6 = vld [vmem:[%s11324_s3 + $0x160] sm:$0xf]  ;;  %2207 = vmatpush.bf16.msra.mxu0 %v7004_v7  ;;  %v388_v49 = vld [vmem:[%s8653_s11 + $0x90] sm:$0xff]  ;;  %v7212_v51 = vor.u32 %v8173_v48, %v7211_v47 }
  0x35   : > { %v7339_v52 = vld [vmem:[%s11324_s3 + $0x300] sm:$0xf]  ;;  %v8205_v53 = vld [vmem:[%s11324_s3 + $0x30c] sm:$0xf0] }
  0x36   : > { %v7340_v54 = vor.u32 %v8205_v53, %v7339_v52  ;;  %v402_v7 = vld [vmem:[%s11322_s1] ss:$2 sm:$0xf]  ;;  %v8951_v23 = vld [vmem:[%s8653_s11 + $0xb0] sm:$0xff] }
  0x37   : > { %v8938_v17 = vperm.slane %v402_v7, 3  ;;  %v390_v57 = vld [vmem:[%s8653_s11 + $0xa0] sm:$0xff] }
  0x38   : > { %2208 = vmatpush.bf16.msra.mxu0 %v6988_v20  ;;  %v1095_v20 = vld [vmem:[%s11323_s2] sm:$0xf] }
  0x39   : > { %v8972_v42 = vperm.slane %v1095_v20, 2 }
  0x3a   : > { %435 = vperm.xlu1 %8434, %v376_v8   ;;  %727 = vperm.xlu0 %8433, %v376_v8   ;;  %v8153_v8 = vld [vmem:[%s11324_s3 + $0x16c] sm:$0xf0] }
  0x3c   : > { %8436 = vset.pattern.permute.xlu2 %v8555_v1 }
  0x3d   : > { %440 = vperm.xlu2 %8436, %v377_v9  }
  0x42   : > { %8437 = vset.pattern.permute.xlu1 %v8554_v0  ;;  %8438 = vset.pattern.permute.xlu0 %v8555_v1 }
  0x43   : > { %731 = vperm.xlu1 %8437, %v377_v9   ;;  %450 = vperm.xlu0 %8438, %v379_v10   ;;  %v7259_v9 = vld [vmem:[%s11324_s3 + $0x260] sm:$0xf] }
  0x45   : > { %445 = vperm.xlu2 %8436, %v378_v11  }
  0x4b   : > { %735 = vperm.xlu1 %8437, %v378_v11   ;;  %8442 = vset.pattern.permute.xlu0 %v8554_v0  ;;  %v7132_v11 = vor.u32 %v8153_v8, %v7131_v6  ;;  %v6952_v6 = vld [vmem:[%s11322_s1 + $0x1] ss:$2 sm:$0xf] }
  0x4c   : > { %743 = vperm.xlu0 %8442, %v380_v12   ;;  %v8942_v19 = vperm.slane %v6952_v6, 3 }
  0x4d   : > { %8439 = vset.pattern.permute.xlu2 %v8554_v0  ;;  %2296 = vmatpush.bf16.msra.mxu1 %v7132_v11  ;;  %v8926_v11 = vperm.slane %v6952_v6, 0 }
  0x4e   : > { %739 = vperm.xlu2 %8439, %v379_v10   ;;  %v8185_v10 = vld [vmem:[%s11324_s3 + $0x26c] sm:$0xf0] }
  0x51   : > { %2297 = vmatpush.bf16.msra.mxu1 %v7116_v24 }
  0x53   : > { %8440 = vset.pattern.permute.xlu1 %v8555_v1 }
  0x54   : > { %455 = vperm.xlu1 %8440, %v380_v12   ;;  %755 = vperm.xlu0 %8442, %v8676_v13   ;;  %v7260_v12 = vor.u32 %v8185_v10, %v7259_v9  ;;  %v389_v10 = vld [vmem:[%s8653_s11 + $0x98] sm:$0xff] }
  0x55   : > { %2298 = vmatpush.bf16.msra.mxu1 %v7100_v36 }
  0x56   : > { %8441 = vset.pattern.permute.xlu2 %v8555_v1  ;;  %2385 = vmatpush.bf16.msra.mxu2 %v7260_v12  ;;  %v8928_v12 = vperm.slane %v6952_v6, 1 }
  0x57   : > { %460 = vperm.xlu2 %8441, %v381_v14  }
  0x59   : > { %2299 = vmatpush.bf16.msra.mxu1 %v7084_v50  ;;  %v8974_v50 = vperm.slane %v1095_v20, 3 }
  0x5a   : > { %2386 = vmatpush.bf16.msra.mxu2 %v7244_v25 }
  0x5c   : > { %8443 = vset.pattern.permute.xlu1 %v8554_v0  ;;  %759 = vperm.xlu0 %8442, %v384_v28  }
  0x5d   : > { %747 = vperm.xlu1 %8443, %v381_v14   ;;  %v8217_v14 = vld [vmem:[%s11324_s3 + $0x36c] sm:$0xf0] }
  0x5e   : > { %2387 = vmatpush.bf16.msra.mxu2 %v7228_v37 }
  0x5f   : > { %465 = vperm.xlu2 %8441, %v382_v29  }
  0x62   : > { %2388 = vmatpush.bf16.msra.mxu2 %v7212_v51 }
  0x64   : > { %8448 = vset.pattern.permute.xlu0 %v8555_v1 }
  0x65   : > { %8444 = vset.pattern.permute.xlu1 %v8555_v1  ;;  %490 = vperm.xlu0 %8448, %v8811_v15  }
  0x66   : > { %470 = vperm.xlu1 %8444, %v8676_v13   ;;  %v7387_v13 = vld [vmem:[%s11324_s3 + $0x360] sm:$0xf]  ;;  %2737 = vmatpush.bf16.msrb.mxu2 %v7328_v58 }
  0x67   : > { %8445 = vset.pattern.permute.xlu2 %v8554_v0  ;;  %v7388_v16 = vor.u32 %v8217_v14, %v7387_v13  ;;  %v8930_v13 = vperm.slane %v402_v7, 0  ;;  %v8932_v14 = vperm.slane %v402_v7, 1 }
  0x68   : > { %751 = vperm.xlu2 %8445, %v382_v29   ;;  %v6971_v29 = vld [vmem:[%s11324_s3 + $0x20] sm:$0xf] }
  0x69   : > { %2474 = vmatpush.bf16.msra.mxu3 %v7388_v16  ;;  %v6972_v32 = vor.u32 %v8113_v30, %v6971_v29  ;;  %v8936_v16 = vperm.slane %v6952_v6, 2  ;;  %v8959_v29 = vperm.slane %v1095_v20, 0  ;;  %v8961_v30 = vperm.slane %v1095_v20, 1 }
  0x6b   : > { %2209 = vmatpush.bf16.msra.mxu0 %v6972_v32 }
  0x6d   : > { %8452 = vset.pattern.permute.xlu0 %v8554_v0 }
  0x6e   : > { %475 = vperm.xlu1 %8444, %v384_v28   ;;  %v7372_v28 = vor.u32 %v8213_v27, %v7371_v26  ;;  %775 = vperm.xlu0 %8452, %v388_v49  }
  0x6f   : > { %2210 = vmatpush.bf16.msra.mxu0 %v6956_v45 }
  0x70   : > { %8446 = vset.pattern.permute.xlu2 %v8555_v1  ;;  %2475 = vmatpush.bf16.msra.mxu3 %v7372_v28 }
  0x71   : > { %480 = vperm.xlu2 %8446, %v385_v4  }
  0x73   : > { %2559 = vmatpush.bf16.msrb.mxu0 %v7072_v62 }
  0x74   : > { %2476 = vmatpush.bf16.msra.mxu3 %v7356_v41  ;;  %v8940_v18 = vpop.permute.xlu2 %415 }
  0x76   : > { %8447 = vset.pattern.permute.xlu1 %v8554_v0  ;;  %787 = vperm.xlu0 %8452, %v391_v5  }
  0x77   : > { %763 = vperm.xlu1 %8447, %v385_v4   ;;  %v7200_v4 = vor.u32 %v8167_v2, %v7197_v3 }
  0x78   : > { %2477 = vmatpush.bf16.msra.mxu3 %v7340_v54 }
  0x79   : > { %485 = vperm.xlu2 %8446, %v386_v40   ;;  %2648 = vmatpush.bf16.msrb.mxu1 %v7200_v4 }
  0x7c   : > { %2826 = vmatpush.bf16.msrb.mxu3 %v7456_v63  ;;  %v421_v52 = vpop.permute.xlu2 %420 }
  0x7d   : > { %v584_v62 = vmul.f32 %v8930_v13, %v421_v52  ;;  %v585_v63 = vmul.f32 %v8932_v14, %v421_v52 }
  0x7e   : > { %791 = vperm.xlu0 %8452, %v8951_v23  }
  0x7f   : > { %767 = vperm.xlu1 %8447, %v386_v40  }
  0x81   : > { %8449 = vset.pattern.permute.xlu2 %v8554_v0 }
  0x82   : > { %771 = vperm.xlu2 %8449, %v8811_v15   ;;  %v8934_v15 = vperm.slane %v402_v7, 2 }
  0x84   : > { %v586_v2 = vmul.f32 %v8934_v15, %v421_v52 }
  0x86   : > { %8458 = vset.pattern.permute.xlu0 %v8555_v1 }
  0x87   : > { %8450 = vset.pattern.permute.xlu1 %v8555_v1 }
  0x88   : > { %495 = vperm.xlu1 %8450, %v388_v49  }
  0x8a   : > { %8451 = vset.pattern.permute.xlu2 %v8555_v1 }
  0x8b   : > { %v704_v8 = vpop.permute.xlu1 %703  ;;  %v406_v9 = vpop.permute.xlu0 %405  ;;  %500 = vperm.xlu2 %8451, %v389_v10  }
  0x8c   : > { %v839_v21 = vmul.f32 %v8926_v11, %v704_v8  ;;  %v840_v22 = vmul.f32 %v8928_v12, %v704_v8  ;;  %v841_v24 = vmul.f32 %v8936_v16, %v704_v8  ;;  %v572_v25 = vmul.f32 %v8930_v13, %v406_v9 }
  0x8d   : > { %v573_v26 = vmul.f32 %v8932_v14, %v406_v9  ;;  %v574_v27 = vmul.f32 %v8934_v15, %v406_v9  ;;  %v842_v28 = vmul.f32 %v8942_v19, %v704_v8  ;;  %v575_v31 = vmul.f32 %v8938_v17, %v406_v9 }
  0x8e   : > { %v967_v43 = vadd.f32 %v839_v21, %v572_v25  ;;  %v587_v9 = vmul.f32 %v8938_v17, %v421_v52 }
  0x8f   : > { %v968_v44 = vadd.f32 %v840_v22, %v573_v26  ;;  %v969_v45 = vadd.f32 %v841_v24, %v574_v27  ;;  %v970_v51 = vadd.f32 %v842_v28, %v575_v31 }
  0x90   : > { %8453 = vset.pattern.permute.xlu1 %v8554_v0  ;;  %v1105_v58 = vadd.f32 %v8959_v29, %v967_v43  ;;  %v583_v43 = vmul.f32 %v8938_v17, %v8940_v18 }
  0x91   : > { %779 = vperm.xlu1 %8453, %v389_v10   ;;  %v1106_v59 = vadd.f32 %v8961_v30, %v968_v44  ;;  %v1107_v60 = vadd.f32 %v8972_v42, %v969_v45  ;;  %v1108_v61 = vadd.f32 %v8974_v50, %v970_v51  ;;  %v393_v51 = vld [vmem:[%s8653_s11 + $0xb8] sm:$0xff] }
  0x92   : > { %v1233_v10 = vmax.f32 %v1105_v58, 0.0 }
  0x93   : > { %v708_v32 = vpop.permute.xlu1 %707  ;;  %v411_v33 = vpop.permute.xlu0 %410  ;;  %505 = vperm.xlu2 %8451, %v390_v57   ;;  %v1234_v20 = vmax.f32 %v1106_v59, 0.0  ;;  %v1235_v21 = vmax.f32 %v1107_v60, 0.0  ;;  %v1236_v26 = vmax.f32 %v1108_v61, 0.0  ;;  %v8163_v61 = vld [vmem:[%s11324_s3 + $0x1c4] sm:$0xf] }
  0x94   : > { %v843_v34 = vmul.f32 %v8926_v11, %v708_v32  ;;  %v844_v35 = vmul.f32 %v8928_v12, %v708_v32  ;;  %v845_v36 = vmul.f32 %v8936_v16, %v708_v32  ;;  %v846_v37 = vmul.f32 %v8942_v19, %v708_v32 }
  0x95   : > { %v576_v38 = vmul.f32 %v8930_v13, %v411_v33  ;;  %v577_v39 = vmul.f32 %v8932_v14, %v411_v33  ;;  %v578_v40 = vmul.f32 %v8934_v15, %v411_v33  ;;  %v579_v41 = vmul.f32 %v8938_v17, %v411_v33 }
  0x97   : > { %v971_v46 = vadd.f32 %v843_v34, %v576_v38  ;;  %v972_v47 = vadd.f32 %v844_v35, %v577_v39  ;;  %v973_v48 = vadd.f32 %v845_v36, %v578_v40  ;;  %v974_v49 = vadd.f32 %v846_v37, %v579_v41  ;;  %v426_v38 = vpop.permute.xlu2 %425 }
  0x98   : > { %v580_v37 = vmul.f32 %v8930_v13, %v8940_v18  ;;  %v581_v40 = vmul.f32 %v8932_v14, %v8940_v18  ;;  %v582_v41 = vmul.f32 %v8934_v15, %v8940_v18  ;;  %v8195_v18 = vld [vmem:[%s11324_s3 + $0x2c4] sm:$0xf] }
  0x99   : > { %v1109_v53 = vadd.f32 %v8959_v29, %v971_v46  ;;  %8454 = vset.pattern.permute.xlu1 %v8555_v1  ;;  %v1110_v54 = vadd.f32 %v8961_v30, %v972_v47  ;;  %v1111_v55 = vadd.f32 %v8972_v42, %v973_v48  ;;  %v1112_v56 = vadd.f32 %v8974_v50, %v974_v49 }
  0x9a   : > { %510 = vperm.xlu1 %8454, %v391_v5  }
  0x9b   : > { %v716_v3 = vpop.permute.xlu1 %715  ;;  %v1237_v5 = vmax.f32 %v1109_v53, 0.0  ;;  %v1238_v6 = vmax.f32 %v1110_v54, 0.0  ;;  %v1239_v7 = vmax.f32 %v1111_v55, 0.0  ;;  %v1240_v8 = vmax.f32 %v1112_v56, 0.0  ;;  %8455 = vset.pattern.permute.xlu2 %v8554_v0  ;;  %v7309_v53 = vld [vmem:[%s11324_s3 + $0x2d0] sm:$0xf0] }
  0x9c   : > { %v712_v4 = vpop.permute.xlu0 %711  ;;  %v851_v22 = vmul.f32 %v8926_v11, %v716_v3  ;;  %v852_v24 = vmul.f32 %v8928_v12, %v716_v3  ;;  %v853_v25 = vmul.f32 %v8936_v16, %v716_v3  ;;  %v854_v27 = vmul.f32 %v8942_v19, %v716_v3  ;;  %783 = vperm.xlu2 %8455, %v390_v57   ;;  %v8131_v54 = vld [vmem:[%s11324_s3 + $0xc4] sm:$0xf]  ;;  %v7053_v55 = vld [vmem:[%s11324_s3 + $0xd0] sm:$0xf0] }
  0x9d   : > { %v847_v28 = vmul.f32 %v8926_v11, %v712_v4  ;;  %v848_v31 = vmul.f32 %v8928_v12, %v712_v4  ;;  %v849_v32 = vmul.f32 %v8936_v16, %v712_v4  ;;  %v8998_v33 = vpack.c.bf16 %v1237_v5, %v1233_v10  ;;  %v8227_v56 = vld [vmem:[%s11324_s3 + $0x3c4] sm:$0xf]  ;;  %v7437_v57 = vld [vmem:[%s11324_s3 + $0x3d0] sm:$0xf0] }
  0x9e   : > { %v9000_v34 = vpack.c.bf16 %v1238_v6, %v1234_v20  ;;  %v9002_v35 = vpack.c.bf16 %v1239_v7, %v1235_v21  ;;  %v9004_v36 = vpack.c.bf16 %v1240_v8, %v1236_v26  ;;  %v850_v39 = vmul.f32 %v8942_v19, %v712_v4 }
  0x9f   : > { %2211 = vmatmul.bf16.vlgmr.msra.gmra.mxu0 %v8998_v33  ;;  %v980_v44 = vadd.f32 %v852_v24, %v585_v63  ;;  %v981_v45 = vadd.f32 %v853_v25, %v586_v2  ;;  %v982_v46 = vadd.f32 %v854_v27, %v587_v9  ;;  %v975_v47 = vadd.f32 %v847_v28, %v580_v37  ;;  %v720_v21 = vpop.permute.xlu2 %719 }
  0xa0   : > { %2300 = vmatmul.bf16.vlgmr.msra.gmra.mxu1 %v9000_v34  ;;  %2389 = vmatmul.bf16.vlgmr.msra.gmra.mxu2 %v9002_v35  ;;  %v976_v48 = vadd.f32 %v848_v31, %v581_v40  ;;  %v977_v49 = vadd.f32 %v849_v32, %v582_v41  ;;  %v978_v52 = vadd.f32 %v850_v39, %v583_v43 }
  0xa1   : > { %2478 = vmatmul.bf16.vlgmr.msra.gmra.mxu3 %v9004_v36  ;;  %v1118_v59 = vadd.f32 %v8961_v30, %v980_v44  ;;  %v1119_v60 = vadd.f32 %v8972_v42, %v981_v45  ;;  %v1120_v63 = vadd.f32 %v8974_v50, %v982_v46  ;;  %v1113_v2 = vadd.f32 %v8959_v29, %v975_v47 }
  0xa2   : > { %515 = vperm.xlu1 %8454, %v8951_v23   ;;  %v979_v23 = vadd.f32 %v851_v22, %v584_v62  ;;  %v7181_v62 = vld [vmem:[%s11324_s3 + $0x1d0] sm:$0xf0]  ;;  %v1114_v3 = vadd.f32 %v8961_v30, %v976_v48  ;;  %v1115_v4 = vadd.f32 %v8972_v42, %v977_v49  ;;  %v1116_v5 = vadd.f32 %v8974_v50, %v978_v52 }
  0xa3   : > { %v7312_v7 = vor.u32 %v8195_v18, %v7309_v53  ;;  %v7056_v8 = vor.u32 %v8131_v54, %v7053_v55  ;;  %v7440_v9 = vor.u32 %v8227_v56, %v7437_v57  ;;  %v7184_v10 = vor.u32 %v8163_v61, %v7181_v62 }
  0xa4   : > { %v1117_v58 = vadd.f32 %v8959_v29, %v979_v23  ;;  %v431_v6 = vpop.permute.xlu1 %430  ;;  %v588_v20 = vmul.f32 %v8930_v13, %v426_v38  ;;  %v1241_v22 = vmax.f32 %v1113_v2, 0.0  ;;  %v1242_v25 = vmax.f32 %v1114_v3, 0.0  ;;  %v724_v27 = vpop.permute.xlu0 %723  ;;  %v394_v23 = vld [vmem:[%s8653_s11 + $0xc0] sm:$0xff]  ;;  %8456 = vset.pattern.permute.xlu2 %v8555_v1 }
  0xa5   : > { %2738 = vmatpush.bf16.msrb.mxu2 %v7312_v7  ;;  %v1246_v26 = vmax.f32 %v1118_v59, 0.0  ;;  %2560 = vmatpush.bf16.msrb.mxu0 %v7056_v8  ;;  %v1243_v28 = vmax.f32 %v1115_v4, 0.0  ;;  %v1247_v31 = vmax.f32 %v1119_v60, 0.0  ;;  %v1244_v32 = vmax.f32 %v1116_v5, 0.0  ;;  %v395_v59 = vld [vmem:[%s8653_s11 + $0xc8] sm:$0xff]  ;;  %v396_v7 = vld [vmem:[%s8653_s11 + $0xd0] sm:$0xff] }
  0xa6   : > { %v1245_v24 = vmax.f32 %v1117_v58, 0.0  ;;  %v1248_v37 = vmax.f32 %v1120_v63, 0.0  ;;  %2827 = vmatpush.bf16.msrb.mxu3 %v7440_v9  ;;  %2649 = vmatpush.bf16.msrb.mxu1 %v7184_v10  ;;  %v589_v39 = vmul.f32 %v8932_v14, %v426_v38  ;;  %v590_v40 = vmul.f32 %v8934_v15, %v426_v38 }
  0xa7   : > { %v591_v41 = vmul.f32 %v8938_v17, %v426_v38  ;;  %v855_v43 = vmul.f32 %v8926_v11, %v720_v21  ;;  %v592_v44 = vmul.f32 %v8930_v13, %v431_v6  ;;  %v593_v45 = vmul.f32 %v8932_v14, %v431_v6  ;;  %520 = vperm.xlu2 %8456, %v393_v51   ;;  %v441_v3 = vpop.permute.xlu2 %440 }
  0xa8   : > { %v594_v46 = vmul.f32 %v8934_v15, %v431_v6  ;;  %v595_v47 = vmul.f32 %v8938_v17, %v431_v6  ;;  %v859_v48 = vmul.f32 %v8926_v11, %v724_v27  ;;  %v860_v49 = vmul.f32 %v8928_v12, %v724_v27  ;;  %530 = vperm.xlu0 %8458, %v395_v59  }
  0xa9   : > { %v9068_v38 = vpack.c.bf16 %v1245_v24, %v1241_v22  ;;  %v9070_v52 = vpack.c.bf16 %v1246_v26, %v1242_v25  ;;  %v861_v18 = vmul.f32 %v8936_v16, %v724_v27  ;;  %v862_v53 = vmul.f32 %v8942_v19, %v724_v27 }
  0xaa   : > { %8457 = vset.pattern.permute.xlu1 %v8554_v0  ;;  %v9074_v54 = vpack.c.bf16 %v1247_v31, %v1243_v28  ;;  %v9076_v55 = vpack.c.bf16 %v1248_v37, %v1244_v32  ;;  %v857_v56 = vmul.f32 %v8936_v16, %v720_v21  ;;  %v858_v57 = vmul.f32 %v8942_v19, %v720_v21 }
  0xab   : > { %795 = vperm.xlu1 %8457, %v393_v51   ;;  %v856_v51 = vmul.f32 %v8928_v12, %v720_v21  ;;  %v987_v60 = vadd.f32 %v859_v48, %v592_v44  ;;  %v988_v61 = vadd.f32 %v860_v49, %v593_v45  ;;  %v983_v62 = vadd.f32 %v855_v43, %v588_v20 }
  0xac   : > { %11487 = vst [vmem:[#allocation8_spill] sm:$0xff] %v9076_v55  ;;  %v436_v58 = vpop.permute.xlu1 %435  ;;  %v989_v63 = vadd.f32 %v861_v18, %v594_v46  ;;  %v990_v2 = vadd.f32 %v862_v53, %v595_v47  ;;  %v985_v5 = vadd.f32 %v857_v56, %v590_v40  ;;  %v986_v6 = vadd.f32 %v858_v57, %v591_v41  ;;  %v728_v27 = vpop.permute.xlu0 %727 }
  0xad   : > { %v984_v4 = vadd.f32 %v856_v51, %v589_v39  ;;  %v1125_v8 = vadd.f32 %v8959_v29, %v987_v60  ;;  %v1126_v9 = vadd.f32 %v8961_v30, %v988_v61  ;;  %v1121_v10 = vadd.f32 %v8959_v29, %v983_v62 }
  0xae   : > { %v1127_v21 = vadd.f32 %v8972_v42, %v989_v63  ;;  %v1128_v22 = vadd.f32 %v8974_v50, %v990_v2  ;;  %v1123_v24 = vadd.f32 %v8972_v42, %v985_v5  ;;  %v1124_v25 = vadd.f32 %v8974_v50, %v986_v6 }
  0xaf   : > { %2216 = vmatmul.bf16.gmra.mxu0 %v9068_v38  ;;  %525 = vperm.xlu2 %8456, %v394_v23   ;;  %v1122_v20 = vadd.f32 %v8961_v30, %v984_v4  ;;  %v600_v26 = vmul.f32 %v8930_v13, %v441_v3  ;;  %v601_v28 = vmul.f32 %v8932_v14, %v441_v3  ;;  %v1253_v32 = vmax.f32 %v1125_v8, 0.0  ;;  %v446_v51 = vpop.permute.xlu2 %445 }
  0xb0   : > { %2305 = vmatmul.bf16.gmra.mxu1 %v9070_v52  ;;  %2394 = vmatmul.bf16.gmra.mxu2 %v9074_v54  ;;  %v602_v31 = vmul.f32 %v8934_v15, %v441_v3  ;;  %v1254_v37 = vmax.f32 %v1126_v9, 0.0  ;;  %v603_v39 = vmul.f32 %v8938_v17, %v441_v3  ;;  %v1249_v41 = vmax.f32 %v1121_v10, 0.0  ;;  %v7293_v9 = vld [vmem:[%s11324_s3 + $0x2b0] sm:$0xf0] }
  0xb1   : > { %2483 = vmatmul.bf16.gmra.mxu3 %v9076_v55  ;;  %8462 = vset.pattern.permute.xlu0 %v8554_v0  ;;  %v1255_v43 = vmax.f32 %v1127_v21, 0.0  ;;  %v596_v44 = vmul.f32 %v8930_v13, %v436_v58  ;;  %v1250_v45 = vmax.f32 %v1122_v20, 0.0  ;;  %v1251_v46 = vmax.f32 %v1123_v24, 0.0  ;;  %v8127_v24 = vld [vmem:[%s11324_s3 + $0xa4] sm:$0xf] }
  0xb2   : > { %807 = vperm.xlu0 %8462, %v396_v7   ;;  %v1252_v47 = vmax.f32 %v1124_v25, 0.0  ;;  %v597_v48 = vmul.f32 %v8932_v14, %v436_v58  ;;  %v598_v49 = vmul.f32 %v8934_v15, %v436_v58  ;;  %v863_v18 = vmul.f32 %v8926_v11, %v728_v27  ;;  %v7037_v25 = vld [vmem:[%s11324_s3 + $0xb0] sm:$0xf0] }
  0xb3   : > { %799 = vperm.xlu1 %8457, %v394_v23   ;;  %v1256_v23 = vmax.f32 %v1128_v22, 0.0  ;;  %v864_v53 = vmul.f32 %v8928_v12, %v728_v27  ;;  %v9109_v60 = vpack.c.bf16 %v1253_v32, %v1249_v41  ;;  %v9111_v61 = vpack.c.bf16 %v1254_v37, %v1250_v45  ;;  %v7421_v37 = vld [vmem:[%s11324_s3 + $0x3b0] sm:$0xf0] }
  0xb4   : > { %v9115_v2 = vpack.c.bf16 %v1255_v43, %v1251_v46  ;;  %v599_v4 = vmul.f32 %v8938_v17, %v436_v58  ;;  %v865_v5 = vmul.f32 %v8936_v16, %v728_v27  ;;  %v866_v6 = vmul.f32 %v8942_v19, %v728_v27  ;;  %v8191_v58 = vld [vmem:[%s11324_s3 + $0x2a4] sm:$0xf] }
  0xb5   : > { %v732_v40 = vpop.permute.xlu1 %731  ;;  %11488 = vst [vmem:[#allocation9_spill] sm:$0xff] %v9109_v60  ;;  %v9117_v3 = vpack.c.bf16 %v1256_v23, %v1252_v47  ;;  %v991_v10 = vadd.f32 %v863_v18, %v596_v44  ;;  %v992_v21 = vadd.f32 %v864_v53, %v597_v48  ;;  %v604_v32 = vmul.f32 %v8930_v13, %v446_v51  ;;  %v8159_v23 = vld [vmem:[%s11324_s3 + $0x1a4] sm:$0xf]  ;;  %v7165_v44 = vld [vmem:[%s11324_s3 + $0x1b0] sm:$0xf0] }
  0xb6   : > { %v867_v56 = vmul.f32 %v8926_v11, %v732_v40  ;;  %v868_v57 = vmul.f32 %v8928_v12, %v732_v40  ;;  %11489 = vst [vmem:[#allocation10_spill] sm:$0xff] %v9111_v61  ;;  %v869_v62 = vmul.f32 %v8936_v16, %v732_v40  ;;  %v870_v63 = vmul.f32 %v8942_v19, %v732_v40 }
  0xb7   : > { %8459 = vset.pattern.permute.xlu2 %v8554_v0  ;;  %11490 = vst [vmem:[#allocation11_spill] sm:$0xff] %v9115_v2  ;;  %v993_v27 = vadd.f32 %v865_v5, %v598_v49  ;;  %v7296_v41 = vor.u32 %v8191_v58, %v7293_v9  ;;  %v7040_v43 = vor.u32 %v8127_v24, %v7037_v25  ;;  %v740_v18 = vpop.permute.xlu2 %739 }
  0xb8   : > { %803 = vperm.xlu2 %8459, %v395_v59   ;;  %11491 = vst [vmem:[#allocation12_spill] sm:$0xff] %v9117_v3  ;;  %v397_v59 = vld [vmem:[%s8653_s11 + $0xd8] sm:$0xff]  ;;  %v996_v8 = vadd.f32 %v868_v57, %v601_v28  ;;  %v997_v22 = vadd.f32 %v869_v62, %v602_v31  ;;  %v998_v20 = vadd.f32 %v870_v63, %v603_v39  ;;  %v8223_v31 = vld [vmem:[%s11324_s3 + $0x3a4] sm:$0xf] }
  0xb9   : > { %v994_v28 = vadd.f32 %v866_v6, %v599_v4  ;;  %v1129_v45 = vadd.f32 %v8959_v29, %v991_v10  ;;  %v1130_v46 = vadd.f32 %v8961_v30, %v992_v21  ;;  %v1131_v53 = vadd.f32 %v8972_v42, %v993_v27  ;;  %2739 = vmatpush.bf16.msrb.mxu2 %v7296_v41  ;;  %v400_v27 = vld [vmem:[%s8653_s11 + $0xf0] sm:$0xff] }
  0xba   : > { %v1134_v40 = vadd.f32 %v8961_v30, %v996_v8  ;;  %v1135_v47 = vadd.f32 %v8972_v42, %v997_v22  ;;  %v1136_v48 = vadd.f32 %v8974_v50, %v998_v20  ;;  %2561 = vmatpush.bf16.msrb.mxu0 %v7040_v43  ;;  %v7424_v57 = vor.u32 %v8223_v31, %v7421_v37 }
  0xbb   : > { %8460 = vset.pattern.permute.xlu1 %v8555_v1  ;;  %v605_v62 = vmul.f32 %v8932_v14, %v446_v51  ;;  %v606_v63 = vmul.f32 %v8934_v15, %v446_v51  ;;  %v607_v4 = vmul.f32 %v8938_v17, %v446_v51  ;;  %v7168_v5 = vor.u32 %v8159_v23, %v7165_v44 }
  0xbc   : > { %535 = vperm.xlu1 %8460, %v396_v7   ;;  %v995_v7 = vadd.f32 %v867_v56, %v600_v26  ;;  %v399_v26 = vld [vmem:[%s8653_s11 + $0xe8] sm:$0xff]  ;;  %v1132_v56 = vadd.f32 %v8974_v50, %v994_v28  ;;  %v875_v6 = vmul.f32 %v8926_v11, %v740_v18  ;;  %v1262_v58 = vmax.f32 %v1134_v40, 0.0  ;;  %2828 = vmatpush.bf16.msrb.mxu3 %v7424_v57 }
  0xbd   : > { %819 = vperm.xlu0 %8462, %v399_v26   ;;  %v736_v49 = vpop.permute.xlu1 %735  ;;  %v877_v9 = vmul.f32 %v8936_v16, %v740_v18  ;;  %v878_v10 = vmul.f32 %v8942_v19, %v740_v18  ;;  %v1263_v21 = vmax.f32 %v1135_v47, 0.0  ;;  %v1264_v22 = vmax.f32 %v1136_v48, 0.0  ;;  %2650 = vmatpush.bf16.msrb.mxu1 %v7168_v5 }
  0xbe   : > { %v1133_v39 = vadd.f32 %v8959_v29, %v995_v7  ;;  %v876_v7 = vmul.f32 %v8928_v12, %v740_v18  ;;  %v1257_v51 = vmax.f32 %v1129_v45, 0.0  ;;  %v1258_v20 = vmax.f32 %v1130_v46, 0.0 }
  0xbf   : > { %2221 = vmatmul.bf16.gmra.mxu0 %v9109_v60  ;;  %v1259_v24 = vmax.f32 %v1131_v53, 0.0  ;;  %v1260_v25 = vmax.f32 %v1132_v56, 0.0  ;;  %v871_v28 = vmul.f32 %v8926_v11, %v736_v49  ;;  %v872_v40 = vmul.f32 %v8928_v12, %v736_v49  ;;  %v398_v53 = vld [vmem:[%s8653_s11 + $0xe0] sm:$0xff] }
  0xc0   : > { %2310 = vmatmul.bf16.gmra.mxu1 %v9111_v61  ;;  %2399 = vmatmul.bf16.gmra.mxu2 %v9115_v2  ;;  %v1261_v8 = vmax.f32 %v1133_v39, 0.0  ;;  %v9180_v23 = vpack.c.bf16 %v1262_v58, %v1258_v20  ;;  %v874_v44 = vmul.f32 %v8942_v19, %v736_v49 }
  0xc1   : > { %2488 = vmatmul.bf16.gmra.mxu3 %v9117_v3  ;;  %8461 = vset.pattern.permute.xlu2 %v8555_v1  ;;  %v9184_v45 = vpack.c.bf16 %v1263_v21, %v1259_v24  ;;  %v9186_v46 = vpack.c.bf16 %v1264_v22, %v1260_v25  ;;  %v999_v47 = vadd.f32 %v871_v28, %v604_v32  ;;  %v461_v32 = vpop.permute.xlu2 %460 }
  0xc2   : > { %540 = vperm.xlu2 %8461, %v397_v59   ;;  %v9178_v43 = vpack.c.bf16 %v1261_v8, %v1257_v51  ;;  %11493 = vst [vmem:[#allocation14_spill] sm:$0xff] %v9180_v23  ;;  %v1000_v56 = vadd.f32 %v872_v40, %v605_v62  ;;  %v1002_v5 = vadd.f32 %v874_v44, %v607_v4 }
  0xc3   : > { %11494 = vst [vmem:[#allocation15_spill] sm:$0xff] %v9184_v45  ;;  %v1137_v58 = vadd.f32 %v8959_v29, %v999_v47  ;;  %v618_v24 = vmul.f32 %v8934_v15, %v461_v32  ;;  %v619_v25 = vmul.f32 %v8938_v17, %v461_v32 }
  0xc4   : > { %8463 = vset.pattern.permute.xlu1 %v8554_v0  ;;  %11492 = vst [vmem:[#allocation13_spill] sm:$0xff] %v9178_v43  ;;  %v1140_v62 = vadd.f32 %v8974_v50, %v1002_v5 }
  0xc5   : > { %811 = vperm.xlu1 %8463, %v397_v59   ;;  %v451_v59 = vpop.permute.xlu0 %450  ;;  %823 = vperm.xlu0 %8462, %v400_v27   ;;  %11495 = vst [vmem:[#allocation16_spill] sm:$0xff] %v9186_v46 }
  0xc6   : > { %v608_v31 = vmul.f32 %v8930_v13, %v451_v59  ;;  %v609_v37 = vmul.f32 %v8932_v14, %v451_v59  ;;  %v610_v39 = vmul.f32 %v8934_v15, %v451_v59  ;;  %v611_v41 = vmul.f32 %v8938_v17, %v451_v59  ;;  %v456_v18 = vpop.permute.xlu1 %455 }
  0xc7   : > { %v613_v5 = vmul.f32 %v8932_v14, %v456_v18 }
  0xc8   : > { %v1003_v48 = vadd.f32 %v875_v6, %v608_v31  ;;  %v1004_v57 = vadd.f32 %v876_v7, %v609_v37  ;;  %v1005_v59 = vadd.f32 %v877_v9, %v610_v39  ;;  %v1006_v8 = vadd.f32 %v878_v10, %v611_v41  ;;  %v9206_v31 = vld [vmem:[%s8653_s11 + $0xf8] sm:$0xff] }
  0xc9   : > { %v1138_v6 = vadd.f32 %v8961_v30, %v1000_v56  ;;  %v616_v7 = vmul.f32 %v8930_v13, %v461_v32  ;;  %v617_v9 = vmul.f32 %v8932_v14, %v461_v32  ;;  %v1265_v10 = vmax.f32 %v1137_v58, 0.0 }
  0xca   : > { %545 = vperm.xlu2 %8461, %v398_v53   ;;  %v1141_v21 = vadd.f32 %v8959_v29, %v1003_v48  ;;  %v1142_v22 = vadd.f32 %v8961_v30, %v1004_v57  ;;  %v1144_v4 = vadd.f32 %v8974_v50, %v1006_v8 }
  0xcc   : > { %v1269_v20 = vmax.f32 %v1141_v21, 0.0  ;;  %v1270_v28 = vmax.f32 %v1142_v22, 0.0  ;;  %v1272_v44 = vmax.f32 %v1144_v4, 0.0  ;;  %v466_v22 = vpop.permute.xlu2 %465 }
  0xcd   : > { %8464 = vset.pattern.permute.xlu1 %v8555_v1  ;;  %v744_v39 = vpop.permute.xlu0 %743 }
  0xce   : > { %550 = vperm.xlu1 %8464, %v399_v26   ;;  %v873_v26 = vmul.f32 %v8936_v16, %v736_v49  ;;  %v879_v47 = vmul.f32 %v8926_v11, %v744_v39  ;;  %v880_v48 = vmul.f32 %v8928_v12, %v744_v39  ;;  %v881_v56 = vmul.f32 %v8936_v16, %v744_v39 }
  0xcf   : > { %2226 = vmatmul.bf16.gmra.mxu0 %v9178_v43  ;;  %v748_v37 = vpop.permute.xlu1 %747  ;;  %v882_v57 = vmul.f32 %v8942_v19, %v744_v39  ;;  %v9217_v8 = vpack.c.bf16 %v1269_v20, %v1265_v10  ;;  %v8187_v10 = vld [vmem:[%s11324_s3 + $0x284] sm:$0xf]  ;;  %v7277_v20 = vld [vmem:[%s11324_s3 + $0x290] sm:$0xf0] }
  0xd0   : > { %2315 = vmatmul.bf16.gmra.mxu1 %v9180_v23  ;;  %2404 = vmatmul.bf16.gmra.mxu2 %v9184_v45  ;;  %v1001_v49 = vadd.f32 %v873_v26, %v606_v63  ;;  %v1143_v63 = vadd.f32 %v8972_v42, %v1005_v59  ;;  %v1268_v26 = vmax.f32 %v1140_v62, 0.0  ;;  %v614_v59 = vmul.f32 %v8934_v15, %v456_v18 }
  0xd1   : > { %2493 = vmatmul.bf16.gmra.mxu3 %v9186_v46  ;;  %11496 = vst [vmem:[#allocation17_spill] sm:$0xff] %v9217_v8  ;;  %v883_v58 = vmul.f32 %v8926_v11, %v748_v37  ;;  %v884_v21 = vmul.f32 %v8928_v12, %v748_v37 }
  0xd2   : > { %v1139_v51 = vadd.f32 %v8972_v42, %v1001_v49  ;;  %8465 = vset.pattern.permute.xlu2 %v8554_v0  ;;  %v1271_v41 = vmax.f32 %v1143_v63, 0.0  ;;  %v612_v49 = vmul.f32 %v8930_v13, %v456_v18  ;;  %v9229_v62 = vpack.c.bf16 %v1272_v44, %v1268_v26  ;;  %v8219_v26 = vld [vmem:[%s11324_s3 + $0x384] sm:$0xf]  ;;  %v7405_v44 = vld [vmem:[%s11324_s3 + $0x390] sm:$0xf0] }
  0xd3   : > { %815 = vperm.xlu2 %8465, %v398_v53   ;;  %v615_v53 = vmul.f32 %v8938_v17, %v456_v18  ;;  %v1008_v63 = vadd.f32 %v880_v48, %v613_v5  ;;  %v1009_v4 = vadd.f32 %v881_v56, %v614_v59 }
  0xd4   : > { %v1267_v40 = vmax.f32 %v1139_v51, 0.0  ;;  %11499 = vst [vmem:[#allocation20_spill] sm:$0xff] %v9229_v62  ;;  %v1007_v18 = vadd.f32 %v879_v47, %v612_v49  ;;  %v7408_v49 = vor.u32 %v8219_v26, %v7405_v44 }
  0xd5   : > { %v1010_v39 = vadd.f32 %v882_v57, %v615_v53  ;;  %v1146_v53 = vadd.f32 %v8961_v30, %v1008_v63  ;;  %v752_v63 = vpop.permute.xlu2 %751 }
  0xd6   : > { %555 = vperm.xlu1 %8464, %v400_v27   ;;  %v1266_v27 = vmax.f32 %v1138_v6, 0.0  ;;  %v886_v6 = vmul.f32 %v8942_v19, %v748_v37  ;;  %v9227_v51 = vpack.c.bf16 %v1271_v41, %v1267_v40  ;;  %v7280_v40 = vor.u32 %v8187_v10, %v7277_v20  ;;  %v7021_v41 = vld [vmem:[%s11324_s3 + $0x90] sm:$0xf0]  ;;  %2829 = vmatpush.bf16.msrb.mxu3 %v7408_v49 }
  0xd7   : > { %v1145_v59 = vadd.f32 %v8959_v29, %v1007_v18  ;;  %v621_v10 = vmul.f32 %v8932_v14, %v466_v22  ;;  %v622_v20 = vmul.f32 %v8934_v15, %v466_v22  ;;  %v623_v18 = vmul.f32 %v8938_v17, %v466_v22 }
  0xd8   : > { %v9223_v32 = vpack.c.bf16 %v1270_v28, %v1266_v27  ;;  %11498 = vst [vmem:[#allocation19_spill] sm:$0xff] %v9227_v51  ;;  %v8123_v27 = vld [vmem:[%s11324_s3 + $0x84] sm:$0xf]  ;;  %v1011_v28 = vadd.f32 %v883_v58, %v616_v7  ;;  %v1014_v48 = vadd.f32 %v886_v6, %v619_v25  ;;  %2740 = vmatpush.bf16.msrb.mxu2 %v7280_v40  ;;  %v471_v5 = vpop.permute.xlu1 %470 }
  0xd9   : > { %v7024_v56 = vor.u32 %v8123_v27, %v7021_v41  ;;  %v8155_v7 = vld [vmem:[%s11324_s3 + $0x184] sm:$0xf]  ;;  %v620_v6 = vmul.f32 %v8930_v13, %v466_v22  ;;  %v1273_v27 = vmax.f32 %v1145_v59, 0.0  ;;  %v756_v41 = vpop.permute.xlu0 %755  ;;  %v887_v22 = vmul.f32 %v8926_v11, %v752_v63 }
  0xda   : > { %11497 = vst [vmem:[#allocation18_spill] sm:$0xff] %v9223_v32  ;;  %v888_v49 = vmul.f32 %v8928_v12, %v752_v63 }
  0xdb   : > { %8466 = vset.pattern.permute.xlu2 %v8555_v1  ;;  %2562 = vmatpush.bf16.msrb.mxu0 %v7024_v56  ;;  %v1147_v1 = vadd.f32 %v8972_v42, %v1009_v4  ;;  %v894_v56 = vmul.f32 %v8942_v19, %v756_v41 }
  0xdc   : > { %560 = vperm.xlu2 %8466, %v9206_v31  }
  0xdd   : > { %v1275_v26 = vmax.f32 %v1147_v1, 0.0 }
  0xde   : > { %8467 = vset.pattern.permute.xlu1 %v8554_v0  ;;  %v885_v0 = vmul.f32 %v8936_v16, %v748_v37  ;;  %v1012_v37 = vadd.f32 %v884_v21, %v617_v9  ;;  %v7149_v9 = vld [vmem:[%s11324_s3 + $0x190] sm:$0xf0]  ;;  %v1152_v21 = vadd.f32 %v8974_v50, %v1014_v48  ;;  %v893_v48 = vmul.f32 %v8936_v16, %v756_v41 }
  0xdf   : > { %827 = vperm.xlu1 %8467, %v9206_v31   ;;  %2231 = vmatmul.bf16.gmra.mxu0 %v9217_v8  ;;  %v7152_v57 = vor.u32 %v8155_v7, %v7149_v9  ;;  %v891_v31 = vmul.f32 %v8926_v11, %v756_v41  ;;  %v889_v7 = vmul.f32 %v8936_v16, %v752_v63 }
  0xe0   : > { %2320 = vmatmul.bf16.gmra.mxu1 %v9223_v32  ;;  %2409 = vmatmul.bf16.gmra.mxu2 %v9227_v51  ;;  %v1013_v47 = vadd.f32 %v885_v0, %v618_v24  ;;  %v1149_v24 = vadd.f32 %v8959_v29, %v1011_v28  ;;  %v1150_v25 = vadd.f32 %v8961_v30, %v1012_v37  ;;  %v1274_v37 = vmax.f32 %v1146_v53, 0.0 }
  0xe1   : > { %2498 = vmatmul.bf16.gmra.mxu3 %v9229_v62  ;;  %2651 = vmatpush.bf16.msrb.mxu1 %v7152_v57  ;;  %v1148_v0 = vadd.f32 %v8974_v50, %v1010_v39  ;;  %v1280_v39 = vmax.f32 %v1152_v21, 0.0  ;;  %v890_v9 = vmul.f32 %v8942_v19, %v752_v63  ;;  %v624_v57 = vmul.f32 %v8930_v13, %v471_v5  ;;  %v476_v21 = vpop.permute.xlu1 %475 }
  0xe2   : > { %v1151_v58 = vadd.f32 %v8972_v42, %v1013_v47  ;;  %v1277_v28 = vmax.f32 %v1149_v24, 0.0  ;;  %v1278_v40 = vmax.f32 %v1150_v25, 0.0  ;;  %v892_v47 = vmul.f32 %v8928_v12, %v756_v41 }
  0xe3   : > { %v1276_v44 = vmax.f32 %v1148_v0, 0.0  ;;  %v625_v24 = vmul.f32 %v8932_v14, %v471_v5  ;;  %v626_v53 = vmul.f32 %v8934_v15, %v471_v5  ;;  %v1019_v63 = vadd.f32 %v891_v31, %v624_v57 }
  0xe4   : > { %v1279_v4 = vmax.f32 %v1151_v58, 0.0  ;;  %v9283_v25 = vpack.c.bf16 %v1277_v28, %v1273_v27  ;;  %v9285_v59 = vpack.c.bf16 %v1278_v40, %v1274_v37  ;;  %v627_v58 = vmul.f32 %v8938_v17, %v471_v5 }
  0xe5   : > { %v9291_v0 = vpack.c.bf16 %v1280_v39, %v1276_v44  ;;  %v1020_v27 = vadd.f32 %v892_v47, %v625_v24  ;;  %v1015_v28 = vadd.f32 %v887_v22, %v620_v6  ;;  %v1016_v37 = vadd.f32 %v888_v49, %v621_v10  ;;  %v760_v47 = vpop.permute.xlu0 %759 }
  0xe6   : > { %11500 = vst [vmem:[#allocation21_spill] sm:$0xff] %v9283_v25  ;;  %v9289_v1 = vpack.c.bf16 %v1279_v4, %v1275_v26  ;;  %v1021_v40 = vadd.f32 %v893_v48, %v626_v53  ;;  %v1022_v41 = vadd.f32 %v894_v56, %v627_v58  ;;  %v1017_v5 = vadd.f32 %v889_v7, %v622_v20  ;;  %v481_v26 = vpop.permute.xlu2 %480 }
  0xe7   : > { %11501 = vst [vmem:[#allocation22_spill] sm:$0xff] %v9285_v59  ;;  %v1018_v62 = vadd.f32 %v890_v9, %v623_v18  ;;  %v1157_v4 = vadd.f32 %v8959_v29, %v1019_v63  ;;  %v1158_v44 = vadd.f32 %v8961_v30, %v1020_v27  ;;  %v1153_v39 = vadd.f32 %v8959_v29, %v1015_v28 }
  0xe8   : > { %11502 = vst [vmem:[#allocation23_spill] sm:$0xff] %v9289_v1  ;;  %v1160_v31 = vadd.f32 %v8974_v50, %v1022_v41  ;;  %v1155_v6 = vadd.f32 %v8972_v42, %v1017_v5  ;;  %v895_v53 = vmul.f32 %v8926_v11, %v760_v47  ;;  %v896_v58 = vmul.f32 %v8928_v12, %v760_v47 }
  0xe9   : > { %11503 = vst [vmem:[#allocation24_spill] sm:$0xff] %v9291_v0  ;;  %v1156_v10 = vadd.f32 %v8974_v50, %v1018_v62  ;;  %v764_v20 = vpop.permute.xlu1 %763  ;;  %v1281_v18 = vmax.f32 %v1153_v39, 0.0  ;;  %v1285_v48 = vmax.f32 %v1157_v4, 0.0  ;;  %v1286_v22 = vmax.f32 %v1158_v44, 0.0 }
  0xea   : > { %v1283_v7 = vmax.f32 %v1155_v6, 0.0  ;;  %v1288_v24 = vmax.f32 %v1160_v31, 0.0  ;;  %v897_v63 = vmul.f32 %v8936_v16, %v760_v47  ;;  %v632_v27 = vmul.f32 %v8930_v13, %v481_v26 }
  0xeb   : > { %v1284_v57 = vmax.f32 %v1156_v10, 0.0  ;;  %v633_v62 = vmul.f32 %v8932_v14, %v481_v26  ;;  %v634_v28 = vmul.f32 %v8934_v15, %v481_v26  ;;  %v901_v5 = vmul.f32 %v8936_v16, %v764_v20 }
  0xec   : > { %v902_v4 = vmul.f32 %v8942_v19, %v764_v20  ;;  %v628_v31 = vmul.f32 %v8930_v13, %v476_v21  ;;  %v630_v6 = vmul.f32 %v8934_v15, %v476_v21  ;;  %v631_v10 = vmul.f32 %v8938_v17, %v476_v21 }
  0xed   : > { %v9322_v39 = vpack.c.bf16 %v1288_v24, %v1284_v57  ;;  %v8215_v24 = vld [vmem:[%s11324_s3 + $0x364] sm:$0xf] }
  0xee   : > { %v486_v49 = vpop.permute.xlu2 %485 }
  0xef   : > { %2236 = vmatmul.bf16.gmra.mxu0 %v9283_v25  ;;  %11507 = vst [vmem:[#allocation28_spill] sm:$0xff] %v9322_v39 }
  0xf0   : > { %2325 = vmatmul.bf16.gmra.mxu1 %v9285_v59  ;;  %2414 = vmatmul.bf16.gmra.mxu2 %v9289_v1  ;;  %v1154_v59 = vadd.f32 %v8961_v30, %v1016_v37  ;;  %v1159_v1 = vadd.f32 %v8972_v42, %v1021_v40  ;;  %v899_v37 = vmul.f32 %v8926_v11, %v764_v20 }
  0xf1   : > { %2503 = vmatmul.bf16.gmra.mxu3 %v9291_v0  ;;  %v9314_v40 = vpack.c.bf16 %v1285_v48, %v1281_v18  ;;  %v898_v18 = vmul.f32 %v8942_v19, %v760_v47  ;;  %v768_v48 = vpop.permute.xlu1 %767  ;;  %v7005_v47 = vld [vmem:[%s11324_s3 + $0x70] sm:$0xf0] }
  0xf2   : > { %v1282_v56 = vmax.f32 %v1154_v59, 0.0  ;;  %v1287_v9 = vmax.f32 %v1159_v1, 0.0  ;;  %v635_v59 = vmul.f32 %v8938_v17, %v481_v26  ;;  %v900_v1 = vmul.f32 %v8928_v12, %v764_v20  ;;  %v8183_v20 = vld [vmem:[%s11324_s3 + $0x264] sm:$0xf] }
  0xf3   : > { %11504 = vst [vmem:[#allocation25_spill] sm:$0xff] %v9314_v40  ;;  %v629_v26 = vmul.f32 %v8932_v14, %v476_v21  ;;  %v8119_v21 = vld [vmem:[%s11324_s3 + $0x64] sm:$0xf] }
  0xf4   : > { %v9316_v41 = vpack.c.bf16 %v1286_v22, %v1282_v56  ;;  %v9320_v44 = vpack.c.bf16 %v1287_v9, %v1283_v7  ;;  %v1027_v56 = vadd.f32 %v899_v37, %v632_v27  ;;  %v1028_v22 = vadd.f32 %v900_v1, %v633_v62  ;;  %v7261_v7 = vld [vmem:[%s11324_s3 + $0x270] sm:$0xf0] }
  0xf5   : > { %v1029_v9 = vadd.f32 %v901_v5, %v634_v28  ;;  %v1030_v57 = vadd.f32 %v902_v4, %v635_v59  ;;  %v7389_v27 = vld [vmem:[%s11324_s3 + $0x370] sm:$0xf0]  ;;  %v1023_v62 = vadd.f32 %v895_v53, %v628_v31  ;;  %v1024_v37 = vadd.f32 %v896_v58, %v629_v26 }
  0xf6   : > { %11505 = vst [vmem:[#allocation26_spill] sm:$0xff] %v9316_v41  ;;  %v1025_v1 = vadd.f32 %v897_v63, %v630_v6  ;;  %v7008_v0 = vor.u32 %v8119_v21, %v7005_v47  ;;  %v1165_v28 = vadd.f32 %v8959_v29, %v1027_v56  ;;  %v1166_v59 = vadd.f32 %v8961_v30, %v1028_v22  ;;  %v491_v6 = vpop.permute.xlu0 %490 }
  0xf7   : > { %11506 = vst [vmem:[#allocation27_spill] sm:$0xff] %v9320_v44  ;;  %v637_v5 = vmul.f32 %v8932_v14, %v486_v49  ;;  %v7392_v4 = vor.u32 %v8215_v24, %v7389_v27  ;;  %v1167_v25 = vadd.f32 %v8972_v42, %v1029_v9  ;;  %v1168_v51 = vadd.f32 %v8974_v50, %v1030_v57 }
  0xf8   : > { %v638_v53 = vmul.f32 %v8934_v15, %v486_v49  ;;  %2563 = vmatpush.bf16.msrb.mxu0 %v7008_v0  ;;  %v1161_v58 = vadd.f32 %v8959_v29, %v1023_v62  ;;  %v1162_v63 = vadd.f32 %v8961_v30, %v1024_v37  ;;  %v1163_v31 = vadd.f32 %v8972_v42, %v1025_v1  ;;  %v8151_v0 = vld [vmem:[%s11324_s3 + $0x164] sm:$0xf] }
  0xf9   : > { %v639_v26 = vmul.f32 %v8938_v17, %v486_v49  ;;  %2830 = vmatpush.bf16.msrb.mxu3 %v7392_v4  ;;  %v1293_v22 = vmax.f32 %v1165_v28, 0.0  ;;  %v641_v47 = vmul.f32 %v8932_v14, %v491_v6  ;;  %v1295_v57 = vmax.f32 %v1167_v25, 0.0 }
  0xfa   : > { %v9375_v9 = vpop.permute.xlu1 %495  ;;  %v1296_v24 = vmax.f32 %v1168_v51, 0.0  ;;  %v642_v27 = vmul.f32 %v8934_v15, %v491_v6  ;;  %v1289_v62 = vmax.f32 %v1161_v58, 0.0  ;;  %v1290_v37 = vmax.f32 %v1162_v63, 0.0 }
  0xfb   : > { %v1291_v1 = vmax.f32 %v1163_v31, 0.0  ;;  %v903_v4 = vmul.f32 %v8926_v11, %v768_v48  ;;  %v905_v28 = vmul.f32 %v8936_v16, %v768_v48 }
  0xfc   : > { %v9383_v32 = vpack.c.bf16 %v1293_v22, %v1289_v62 }
  0xfd   : > { %v9387_v58 = vpack.c.bf16 %v1295_v57, %v1291_v1  ;;  %v1033_v46 = vadd.f32 %v905_v28, %v638_v53 }
  0xfe   : > { %11508 = vst [vmem:[#allocation29_spill] sm:$0xff] %v9383_v32 }
  0xff   : > { %2241 = vmatmul.bf16.gmra.mxu0 %v9314_v40  ;;  %v7264_v40 = vor.u32 %v8183_v20, %v7261_v7  ;;  %v1294_v7 = vmax.f32 %v1166_v59, 0.0  ;;  %11510 = vst [vmem:[#allocation31_spill] sm:$0xff] %v9387_v58 }
 0x100   : > { %2330 = vmatmul.bf16.gmra.mxu1 %v9316_v41  ;;  %2419 = vmatmul.bf16.gmra.mxu2 %v9320_v44  ;;  %v636_v44 = vmul.f32 %v8930_v13, %v486_v49  ;;  %v772_v41 = vpop.permute.xlu2 %771 }
 0x101   : > { %2508 = vmatmul.bf16.gmra.mxu3 %v9322_v39  ;;  %v1026_v39 = vadd.f32 %v898_v18, %v631_v10  ;;  %2741 = vmatpush.bf16.msrb.mxu2 %v7264_v40  ;;  %v907_v18 = vmul.f32 %v8926_v11, %v772_v41  ;;  %v908_v20 = vmul.f32 %v8928_v12, %v772_v41  ;;  %v7133_v40 = vld [vmem:[%s11324_s3 + $0x170] sm:$0xf0] }
 0x102   : > { %v909_v56 = vmul.f32 %v8936_v16, %v772_v41  ;;  %v910_v49 = vmul.f32 %v8942_v19, %v772_v41  ;;  %v7136_v21 = vor.u32 %v8151_v0, %v7133_v40  ;;  %v904_v41 = vmul.f32 %v8928_v12, %v768_v48 }
 0x103   : > { %v1164_v10 = vadd.f32 %v8974_v50, %v1026_v39  ;;  %v640_v39 = vmul.f32 %v8930_v13, %v491_v6  ;;  %v906_v0 = vmul.f32 %v8942_v19, %v768_v48  ;;  %v643_v40 = vmul.f32 %v8938_v17, %v491_v6 }
 0x104   : > { %2652 = vmatpush.bf16.msrb.mxu1 %v7136_v21  ;;  %v9385_v51 = vpack.c.bf16 %v1294_v7, %v1290_v37  ;;  %v1036_v21 = vadd.f32 %v908_v20, %v641_v47  ;;  %v1037_v8 = vadd.f32 %v909_v56, %v642_v27  ;;  %v1032_v48 = vadd.f32 %v904_v41, %v637_v5  ;;  %v780_v5 = vpop.permute.xlu1 %779  ;;  %v776_v41 = vpop.permute.xlu0 %775 }
 0x105   : > { %v1292_v59 = vmax.f32 %v1164_v10, 0.0  ;;  %v1035_v31 = vadd.f32 %v907_v18, %v640_v39  ;;  %v1031_v10 = vadd.f32 %v903_v4, %v636_v44  ;;  %v1034_v6 = vadd.f32 %v906_v0, %v639_v26  ;;  %v1553_v26 = vld [vmem:[%s11325_s4] sm:$0xf] }
 0x106   : > { %11509 = vst [vmem:[#allocation30_spill] sm:$0xff] %v9385_v51  ;;  %v1038_v22 = vadd.f32 %v910_v49, %v643_v40  ;;  %v1174_v57 = vadd.f32 %v8961_v30, %v1036_v21  ;;  %v1170_v20 = vadd.f32 %v8961_v30, %v1032_v48  ;;  %v1171_v56 = vadd.f32 %v8972_v42, %v1033_v46 }
 0x107   : > { %v9389_v63 = vpack.c.bf16 %v1296_v24, %v1292_v59  ;;  %v1173_v7 = vadd.f32 %v8959_v29, %v1035_v31  ;;  %v1169_v18 = vadd.f32 %v8959_v29, %v1031_v10  ;;  %v1175_v44 = vadd.f32 %v8972_v42, %v1037_v8 }
 0x108   : > { %v501_v25 = vpop.permute.xlu2 %500  ;;  %v1172_v53 = vadd.f32 %v8974_v50, %v1034_v6  ;;  %v1176_v39 = vadd.f32 %v8974_v50, %v1038_v22  ;;  %v1302_v27 = vmax.f32 %v1174_v57, 0.0  ;;  %v1298_v37 = vmax.f32 %v1170_v20, 0.0 }
 0x109   : > { %11511 = vst [vmem:[#allocation32_spill] sm:$0xff] %v9389_v63  ;;  %v648_v49 = vmul.f32 %v8930_v13, %v501_v25  ;;  %v649_v47 = vmul.f32 %v8932_v14, %v501_v25  ;;  %v1301_v24 = vmax.f32 %v1173_v7, 0.0  ;;  %v1297_v46 = vmax.f32 %v1169_v18, 0.0 }
 0x10a   : > { %v1299_v8 = vmax.f32 %v1171_v56, 0.0  ;;  %v1303_v1 = vmax.f32 %v1175_v44, 0.0  ;;  %v650_v4 = vmul.f32 %v8934_v15, %v501_v25  ;;  %v9411_v28 = vperm.slane %v1553_v26, 0 }
 0x10b   : > { %v1300_v59 = vmax.f32 %v1172_v53, 0.0  ;;  %v1304_v0 = vmax.f32 %v1176_v39, 0.0  ;;  %v644_v40 = vmul.f32 %v8930_v13, %v9375_v9  ;;  %v645_v31 = vmul.f32 %v8932_v14, %v9375_v9 }
 0x10c   : > { %v911_v21 = vmul.f32 %v8926_v11, %v776_v41  ;;  %v912_v10 = vmul.f32 %v8928_v12, %v776_v41  ;;  %v646_v48 = vmul.f32 %v8934_v15, %v9375_v9  ;;  %v651_v6 = vmul.f32 %v8938_v17, %v501_v25 }
 0x10d   : > { %v913_v22 = vmul.f32 %v8936_v16, %v776_v41  ;;  %v914_v7 = vmul.f32 %v8942_v19, %v776_v41  ;;  %v647_v57 = vmul.f32 %v8938_v17, %v9375_v9  ;;  %v9426_v56 = vpack.c.bf16 %v1301_v24, %v1297_v46 }
 0x10e   : > { %v9428_v44 = vpack.c.bf16 %v1302_v27, %v1298_v37  ;;  %v9430_v53 = vpack.c.bf16 %v1303_v1, %v1299_v8  ;;  %v915_v39 = vmul.f32 %v8926_v11, %v780_v5  ;;  %v916_v26 = vmul.f32 %v8928_v12, %v780_v5 }
 0x10f   : > { %2246 = vmatmul.bf16.gmra.mxu0 %v9383_v32  ;;  %11512 = vst [vmem:[#allocation33_spill] sm:$0xff] %v9426_v56  ;;  %v917_v41 = vmul.f32 %v8936_v16, %v780_v5  ;;  %v918_v9 = vmul.f32 %v8942_v19, %v780_v5  ;;  %v1039_v24 = vadd.f32 %v911_v21, %v644_v40  ;;  %v788_v32 = vpop.permute.xlu0 %787 }
 0x110   : > { %2335 = vmatmul.bf16.gmra.mxu1 %v9385_v51  ;;  %2424 = vmatmul.bf16.gmra.mxu2 %v9387_v58  ;;  %v9408_v62 = vpop.permute.xlu2 %505  ;;  %11513 = vst [vmem:[#allocation34_spill] sm:$0xff] %v9428_v44  ;;  %v9439_v58 = vpop.permute.xlu1 %510  ;;  %v1040_v46 = vadd.f32 %v912_v10, %v645_v31  ;;  %v1041_v27 = vadd.f32 %v913_v22, %v646_v48 }
 0x111   : > { %2513 = vmatmul.bf16.gmra.mxu3 %v9389_v63  ;;  %11514 = vst [vmem:[#allocation35_spill] sm:$0xff] %v9430_v53  ;;  %v9435_v63 = vpack.c.bf16 %v1304_v0, %v1300_v59  ;;  %v652_v8 = vmul.f32 %v8930_v13, %v9408_v62  ;;  %v653_v1 = vmul.f32 %v8932_v14, %v9408_v62 }
 0x112   : > { %v1043_v5 = vadd.f32 %v915_v39, %v648_v49  ;;  %v1044_v59 = vadd.f32 %v916_v26, %v649_v47  ;;  %v654_v0 = vmul.f32 %v8934_v15, %v9408_v62  ;;  %v1042_v40 = vadd.f32 %v914_v7, %v647_v57  ;;  %v7245_v49 = vld [vmem:[%s11324_s3 + $0x250] sm:$0xf0]  ;;  %v8115_v47 = vld [vmem:[%s11324_s3 + $0x44] sm:$0xf] }
 0x113   : > { %11515 = vst [vmem:[#allocation36_spill] sm:$0xff] %v9435_v63  ;;  %v1045_v31 = vadd.f32 %v917_v41, %v650_v4  ;;  %v1046_v21 = vadd.f32 %v918_v9, %v651_v6  ;;  %v9452_v10 = vadd.f32 %v8959_v29, %v1039_v24  ;;  %v9455_v48 = vadd.f32 %v8961_v30, %v1040_v46  ;;  %v6989_v26 = vld [vmem:[%s11324_s3 + $0x50] sm:$0xf0] }
 0x114   : > { %v9467_v4 = vadd.f32 %v8972_v42, %v1041_v27  ;;  %v7373_v41 = vld [vmem:[%s11324_s3 + $0x350] sm:$0xf0]  ;;  %v1180_v51 = vadd.f32 %v8974_v50, %v1042_v40 }
 0x115   : > { %v1183_v23 = vadd.f32 %v8972_v42, %v1045_v31  ;;  %v1184_v43 = vadd.f32 %v8974_v50, %v1046_v21  ;;  %v1305_v31 = vmax.f32 %v9452_v10, 0.0  ;;  %v8147_v21 = vld [vmem:[%s11324_s3 + $0x144] sm:$0xf]  ;;  %v656_v10 = vmul.f32 %v8930_v13, %v9439_v58 }
 0x118   : > { %v784_v22 = vpop.permute.xlu2 %783 }
 0x119   : > { %v919_v6 = vmul.f32 %v8926_v11, %v784_v22  ;;  %v920_v7 = vmul.f32 %v8928_v12, %v784_v22  ;;  %v921_v57 = vmul.f32 %v8936_v16, %v784_v22 }
 0x11b   : > { %v1048_v40 = vadd.f32 %v920_v7, %v653_v1  ;;  %v1311_v1 = vmax.f32 %v1183_v23, 0.0  ;;  %v923_v7 = vmul.f32 %v8926_v11, %v788_v32  ;;  %v658_v23 = vmul.f32 %v8934_v15, %v9439_v58 }
 0x11c   : > { %v2212_v18 = vpop.f32.mrf.mxu0 }
 0x11d   : > { %v2301_v20 = vpop.f32.mrf.mxu1  ;;  %v2213_v25 = vadd.f32 %v2212_v18, %v9411_v28  ;;  %v8179_v18 = vld [vmem:[%s11324_s3 + $0x244] sm:$0xf] }
 0x11e   : > { %v7248_v27 = vor.u32 %v8179_v18, %v7245_v49  ;;  %v1049_v49 = vadd.f32 %v921_v57, %v654_v0  ;;  %v1308_v0 = vmax.f32 %v1180_v51, 0.0  ;;  %v924_v57 = vmul.f32 %v8928_v12, %v788_v32 }
 0x11f   : > { %v2302_v37 = vadd.f32 %v2301_v20, %v2213_v25  ;;  %2251 = vmatmul.bf16.gmra.mxu0 %v9426_v56  ;;  %v8211_v25 = vld [vmem:[%s11324_s3 + $0x344] sm:$0xf]  ;;  %v1182_v56 = vadd.f32 %v8961_v30, %v1044_v59  ;;  %v1047_v59 = vadd.f32 %v919_v6, %v652_v8  ;;  %v1307_v8 = vmax.f32 %v9467_v4, 0.0 }
 0x120   : > { %2340 = vmatmul.bf16.gmra.mxu1 %v9428_v44  ;;  %2429 = vmatmul.bf16.gmra.mxu2 %v9430_v53  ;;  %v7376_v53 = vor.u32 %v8211_v25, %v7373_v41  ;;  %v1181_v44 = vadd.f32 %v8959_v29, %v1043_v5  ;;  %v922_v5 = vmul.f32 %v8942_v19, %v784_v22  ;;  %v1306_v22 = vmax.f32 %v9455_v48, 0.0 }
 0x121   : > { %2518 = vmatmul.bf16.gmra.mxu3 %v9435_v63  ;;  %v6992_v63 = vor.u32 %v8115_v47, %v6989_v26  ;;  %2742 = vmatpush.bf16.msrb.mxu2 %v7248_v27  ;;  %v9492_v47 = vpop.permute.xlu1 %515  ;;  %v1312_v6 = vmax.f32 %v1184_v43, 0.0  ;;  %v926_v43 = vmul.f32 %v8942_v19, %v788_v32  ;;  %v659_v26 = vmul.f32 %v8938_v17, %v9439_v58 }
 0x122   : > { %2831 = vmatpush.bf16.msrb.mxu3 %v7376_v53  ;;  %v9520_v27 = vpack.c.bf16 %v1311_v1, %v1307_v8 }
 0x123   : > { %v2390_v20 = vpop.f32.mrf.mxu2  ;;  %2564 = vmatpush.bf16.msrb.mxu0 %v6992_v63  ;;  %v7117_v63 = vld [vmem:[%s11324_s3 + $0x150] sm:$0xf0]  ;;  %v1054_v8 = vadd.f32 %v926_v43, %v659_v26 }
 0x124   : > { %v2479_v39 = vpop.f32.mrf.mxu3  ;;  %v2391_v9 = vadd.f32 %v2390_v20, %v2302_v37  ;;  %v2214_v24 = vpop.f32.mrf.mxu0  ;;  %v655_v37 = vmul.f32 %v8938_v17, %v9408_v62  ;;  %v1309_v62 = vmax.f32 %v1181_v44, 0.0  ;;  %v7120_v53 = vor.u32 %v8147_v21, %v7117_v63  ;;  %11518 = vst [vmem:[#allocation39_spill] sm:$0xff] %v9520_v27 }
 0x125   : > { %v2303_v46 = vpop.f32.mrf.mxu1  ;;  %v2215_v45 = vadd.f32 %v2214_v24, %v9411_v28  ;;  %v925_v20 = vmul.f32 %v8936_v16, %v788_v32  ;;  %v9522_v21 = vpack.c.bf16 %v1312_v6, %v1308_v0  ;;  %v1051_v63 = vadd.f32 %v923_v7, %v656_v10  ;;  %v792_v32 = vpop.permute.xlu0 %791 }
 0x126   : > { %v9487_v3 = vadd.f32 %v2479_v39, %v2391_v9  ;;  %2653 = vmatpush.bf16.msrb.mxu1 %v7120_v53  ;;  %v9516_v41 = vpack.c.bf16 %v1309_v62, %v1305_v31  ;;  %v1050_v24 = vadd.f32 %v922_v5, %v655_v37  ;;  %v521_v62 = vpop.permute.xlu2 %520  ;;  %v1186_v37 = vadd.f32 %v8961_v30, %v1048_v40 }
 0x127   : > { %v2304_v18 = vadd.f32 %v2303_v46, %v2215_v45  ;;  %v1310_v45 = vmax.f32 %v1182_v56, 0.0  ;;  %v657_v56 = vmul.f32 %v8932_v14, %v9439_v58  ;;  %11519 = vst [vmem:[#allocation40_spill] sm:$0xff] %v9522_v21  ;;  %v1185_v58 = vadd.f32 %v8959_v29, %v1047_v59 }
 0x128   : > { %11516 = vst [vmem:[#allocation37_spill] sm:$0xff] %v9516_v41  ;;  %v3627_v31 = vmax.f32 %v9487_v3, 0.0  ;;  %v1187_v5 = vadd.f32 %v8972_v42, %v1049_v49  ;;  %v1188_v1 = vadd.f32 %v8974_v50, %v1050_v24  ;;  %v927_v59 = vmul.f32 %v8926_v11, %v792_v32 }
 0x129   : > { %v9518_v9 = vpack.c.bf16 %v1310_v45, %v1306_v22  ;;  %v1052_v53 = vadd.f32 %v924_v57, %v657_v56  ;;  %v1053_v45 = vadd.f32 %v925_v20, %v658_v23  ;;  %v796_v0 = vpop.permute.xlu1 %795  ;;  %v928_v6 = vmul.f32 %v8928_v12, %v792_v32 }
 0x12a   : > { %v1189_v10 = vadd.f32 %v8959_v29, %v1051_v63  ;;  %v664_v7 = vmul.f32 %v8930_v13, %v521_v62  ;;  %v665_v57 = vmul.f32 %v8932_v14, %v521_v62  ;;  %v929_v40 = vmul.f32 %v8936_v16, %v792_v32 }
 0x12b   : > { %v2392_v39 = vpop.f32.mrf.mxu2  ;;  %11517 = vst [vmem:[#allocation38_spill] sm:$0xff] %v9518_v9  ;;  %v667_v56 = vmul.f32 %v8938_v17, %v521_v62  ;;  %v930_v26 = vmul.f32 %v8942_v19, %v792_v32  ;;  %v660_v24 = vmul.f32 %v8930_v13, %v9492_v47  ;;  %v933_v32 = vmul.f32 %v8936_v16, %v796_v0 }
 0x12c   : > { %v2481_v44 = vpop.f32.mrf.mxu3  ;;  %v2393_v51 = vadd.f32 %v2392_v39, %v2304_v18  ;;  %v2217_v48 = vpop.f32.mrf.mxu0  ;;  %v1190_v39 = vadd.f32 %v8961_v30, %v1052_v53  ;;  %v1313_v53 = vmax.f32 %v1185_v58, 0.0  ;;  %v1315_v58 = vmax.f32 %v1187_v5, 0.0 }
 0x12d   : > { %v2306_v4 = vpop.f32.mrf.mxu1  ;;  %v2218_v25 = vadd.f32 %v2217_v48, %v9411_v28  ;;  %v1191_v48 = vadd.f32 %v8972_v42, %v1053_v45  ;;  %v662_v45 = vmul.f32 %v8934_v15, %v9492_v47 }
 0x12e   : > { %v2482_v46 = vadd.f32 %v2481_v44, %v2393_v51  ;;  %v666_v44 = vmul.f32 %v8934_v15, %v521_v62 }
 0x12f   : > { %v2307_v18 = vadd.f32 %v2306_v4, %v2218_v25  ;;  %2256 = vmatmul.bf16.gmra.mxu0 %v9516_v41  ;;  %v1192_v4 = vadd.f32 %v8974_v50, %v1054_v8  ;;  %v1314_v8 = vmax.f32 %v1186_v37, 0.0 }
 0x130   : > { %2345 = vmatmul.bf16.gmra.mxu1 %v9518_v9  ;;  %v3631_v22 = vmax.f32 %v2482_v46, 0.0  ;;  %2434 = vmatmul.bf16.gmra.mxu2 %v9520_v27  ;;  %v931_v46 = vmul.f32 %v8926_v11, %v796_v0  ;;  %v9560_v27 = vpop.permute.xlu2 %525  ;;  %v1061_v37 = vadd.f32 %v933_v32, %v666_v44 }
 0x131   : > { %2523 = vmatmul.bf16.gmra.mxu3 %v9522_v21  ;;  %v1055_v21 = vadd.f32 %v927_v59, %v660_v24 }
 0x132   : > { %v9535_v3 = vpack.c.bf16 %v3631_v22, %v3627_v31  ;;  %v932_v31 = vmul.f32 %v8928_v12, %v796_v0  ;;  %v1317_v22 = vmax.f32 %v1189_v10, 0.0  ;;  %v1320_v10 = vmax.f32 %v1192_v4, 0.0 }
 0x133   : > { %v2395_v49 = vpop.f32.mrf.mxu2 }
 0x134   : > { %11520 = vst [vmem:[#allocation41_spill] sm:$0xff] %v9535_v3  ;;  %v2484_v20 = vpop.f32.mrf.mxu3  ;;  %v2396_v23 = vadd.f32 %v2395_v49, %v2307_v18  ;;  %v2219_v43 = vpop.f32.mrf.mxu0  ;;  %v661_v18 = vmul.f32 %v8932_v14, %v9492_v47  ;;  %v1318_v49 = vmax.f32 %v1190_v39, 0.0  ;;  %v1059_v3 = vadd.f32 %v931_v46, %v664_v7 }
 0x135   : > { %v2308_v51 = vpop.f32.mrf.mxu1  ;;  %v2220_v25 = vadd.f32 %v2219_v43, %v9411_v28  ;;  %v663_v43 = vmul.f32 %v8938_v17, %v9492_v47  ;;  %v9562_v61 = vpack.c.bf16 %v1317_v22, %v1313_v53  ;;  %v1057_v39 = vadd.f32 %v929_v40, %v662_v45 }
 0x136   : > { %v2485_v63 = vadd.f32 %v2484_v20, %v2396_v23  ;;  %v934_v20 = vmul.f32 %v8942_v19, %v796_v0  ;;  %v1319_v23 = vmax.f32 %v1191_v48, 0.0  ;;  %v1056_v9 = vadd.f32 %v928_v6, %v661_v18 }
 0x137   : > { %v2309_v62 = vadd.f32 %v2308_v51, %v2220_v25  ;;  %v1316_v51 = vmax.f32 %v1188_v1, 0.0  ;;  %v1060_v25 = vadd.f32 %v932_v31, %v665_v57  ;;  %v9564_v0 = vpack.c.bf16 %v1318_v49, %v1314_v8 }
 0x138   : > { %v1062_v5 = vadd.f32 %v934_v20, %v667_v56  ;;  %v1058_v7 = vadd.f32 %v930_v26, %v663_v43  ;;  %v9567_v48 = vpack.c.bf16 %v1319_v23, %v1315_v58  ;;  %v1197_v1 = vadd.f32 %v8959_v29, %v1059_v3  ;;  %v804_v23 = vpop.permute.xlu2 %803 }
 0x139   : > { %v1193_v6 = vadd.f32 %v8959_v29, %v1055_v21  ;;  %v9571_v4 = vpack.c.bf16 %v1320_v10, %v1316_v51  ;;  %v1198_v40 = vadd.f32 %v8961_v30, %v1060_v25  ;;  %v1199_v56 = vadd.f32 %v8972_v42, %v1061_v37  ;;  %v531_v51 = vpop.permute.xlu0 %530  ;;  %v8175_v25 = vld [vmem:[%s11324_s3 + $0x224] sm:$0xf]  ;;  %v7229_v37 = vld [vmem:[%s11324_s3 + $0x230] sm:$0xf0] }
 0x13a   : > { %v1195_v26 = vadd.f32 %v8972_v42, %v1057_v39  ;;  %v3635_v24 = vmax.f32 %v2485_v63, 0.0  ;;  %v1325_v46 = vmax.f32 %v1197_v1, 0.0  ;;  %v8111_v39 = vld [vmem:[%s11324_s3 + $0x24] sm:$0xf]  ;;  %v6973_v1 = vld [vmem:[%s11324_s3 + $0x30] sm:$0xf0] }
 0x13b   : > { %v2397_v41 = vpop.f32.mrf.mxu2  ;;  %v1321_v21 = vmax.f32 %v1193_v6, 0.0  ;;  %v1326_v63 = vmax.f32 %v1198_v40, 0.0  ;;  %v1327_v8 = vmax.f32 %v1199_v56, 0.0  ;;  %v8207_v6 = vld [vmem:[%s11324_s3 + $0x324] sm:$0xf]  ;;  %v669_v40 = vmul.f32 %v8932_v14, %v9560_v27 }
 0x13c   : > { %v2486_v2 = vpop.f32.mrf.mxu3  ;;  %v2398_v60 = vadd.f32 %v2397_v41, %v2309_v62  ;;  %v2222_v47 = vpop.f32.mrf.mxu0  ;;  %v1194_v41 = vadd.f32 %v8961_v30, %v1056_v9  ;;  %v1323_v32 = vmax.f32 %v1195_v26, 0.0  ;;  %v8143_v26 = vld [vmem:[%s11324_s3 + $0x124] sm:$0xf] }
 0x13d   : > { %v2311_v55 = vpop.f32.mrf.mxu1  ;;  %v2223_v59 = vadd.f32 %v2222_v47, %v9411_v28  ;;  %v800_v9 = vpop.permute.xlu1 %799  ;;  %v9594_v10 = vpack.c.bf16 %v1325_v46, %v1321_v21  ;;  %v668_v47 = vmul.f32 %v8930_v13, %v9560_v27  ;;  %v7232_v21 = vor.u32 %v8175_v25, %v7229_v37 }
 0x13e   : > { %v2487_v57 = vadd.f32 %v2486_v2, %v2398_v60  ;;  %v9582_v60 = vadd.f32 %v8974_v50, %v1062_v5  ;;  %v9585_v2 = vadd.f32 %v8974_v50, %v1058_v7  ;;  %v1322_v31 = vmax.f32 %v1194_v41, 0.0 }
 0x13f   : > { %v2312_v44 = vadd.f32 %v2311_v55, %v2223_v59  ;;  %2261 = vmatmul.bf16.gmra.mxu0 %v9562_v61  ;;  %11522 = vst [vmem:[#allocation43_spill] sm:$0xff] %v9594_v10  ;;  %v935_v5 = vmul.f32 %v8926_v11, %v800_v9  ;;  %v670_v41 = vmul.f32 %v8934_v15, %v9560_v27 }
 0x140   : > { %2350 = vmatmul.bf16.gmra.mxu1 %v9564_v0  ;;  %v3639_v3 = vmax.f32 %v2487_v57, 0.0  ;;  %2439 = vmatmul.bf16.gmra.mxu2 %v9567_v48  ;;  %v1324_v43 = vmax.f32 %v9585_v2, 0.0  ;;  %v1328_v20 = vmax.f32 %v9582_v60, 0.0  ;;  %v9608_v59 = vpack.c.bf16 %v1326_v63, %v1322_v31  ;;  %v7357_v57 = vld [vmem:[%s11324_s3 + $0x330] sm:$0xf0] }
 0x141   : > { %2528 = vmatmul.bf16.gmra.mxu3 %v9571_v4  ;;  %v9624_v56 = vpack.c.bf16 %v1327_v8, %v1323_v32  ;;  %v940_v60 = vmul.f32 %v8928_v12, %v804_v23  ;;  %v672_v2 = vmul.f32 %v8930_v13, %v531_v51  ;;  %v673_v46 = vmul.f32 %v8932_v14, %v531_v51 }
 0x142   : > { %v9587_v55 = vpack.c.bf16 %v3639_v3, %v3635_v24  ;;  %11523 = vst [vmem:[#allocation44_spill] sm:$0xff] %v9608_v59  ;;  %v7101_v24 = vld [vmem:[%s11324_s3 + $0x130] sm:$0xf0]  ;;  %v939_v3 = vmul.f32 %v8926_v11, %v804_v23  ;;  %v671_v63 = vmul.f32 %v8938_v17, %v9560_v27  ;;  %2743 = vmatpush.bf16.msrb.mxu2 %v7232_v21 }
 0x143   : > { %v2400_v53 = vpop.f32.mrf.mxu2  ;;  %11524 = vst [vmem:[#allocation45_spill] sm:$0xff] %v9624_v56  ;;  %v7104_v31 = vor.u32 %v8143_v26, %v7101_v24  ;;  %v674_v25 = vmul.f32 %v8934_v15, %v531_v51  ;;  %v942_v27 = vmul.f32 %v8942_v19, %v804_v23  ;;  %v9645_v24 = vpack.c.bf16 %v1328_v20, %v1324_v43 }
 0x144   : > { %11521 = vst [vmem:[#allocation42_spill] sm:$0xff] %v9587_v55  ;;  %v2489_v18 = vpop.f32.mrf.mxu3  ;;  %v2401_v62 = vadd.f32 %v2400_v53, %v2312_v44  ;;  %v2224_v22 = vpop.f32.mrf.mxu0  ;;  %v936_v44 = vmul.f32 %v8928_v12, %v800_v9  ;;  %v6976_v53 = vor.u32 %v8111_v39, %v6973_v1 }
 0x145   : > { %v2313_v45 = vpop.f32.mrf.mxu1  ;;  %v2225_v49 = vadd.f32 %v2224_v22, %v9411_v28  ;;  %v938_v22 = vmul.f32 %v8942_v19, %v800_v9  ;;  %2654 = vmatpush.bf16.msrb.mxu1 %v7104_v31  ;;  %11525 = vst [vmem:[#allocation46_spill] sm:$0xff] %v9645_v24 }
 0x146   : > { %v9592_v58 = vadd.f32 %v2489_v18, %v2401_v62  ;;  %v7360_v18 = vor.u32 %v8207_v6, %v7357_v57  ;;  %v937_v62 = vmul.f32 %v8936_v16, %v800_v9  ;;  %2565 = vmatpush.bf16.msrb.mxu0 %v6976_v53  ;;  %v1064_v1 = vadd.f32 %v936_v44, %v669_v40  ;;  %v536_v57 = vpop.permute.xlu1 %535 }
 0x147   : > { %v2314_v7 = vadd.f32 %v2313_v45, %v2225_v49  ;;  %v1063_v45 = vadd.f32 %v935_v5, %v668_v47  ;;  %v941_v49 = vmul.f32 %v8936_v16, %v804_v23  ;;  %v675_v6 = vmul.f32 %v8938_v17, %v531_v51 }
 0x148   : > { %2832 = vmatpush.bf16.msrb.mxu3 %v7360_v18  ;;  %v1067_v47 = vadd.f32 %v939_v3, %v672_v2  ;;  %v1068_v5 = vadd.f32 %v940_v60, %v673_v46  ;;  %v3643_v40 = vmax.f32 %v9592_v58, 0.0  ;;  %v1202_v43 = vadd.f32 %v8961_v30, %v1064_v1 }
 0x149   : > { %v1069_v23 = vadd.f32 %v941_v49, %v674_v25  ;;  %v1201_v51 = vadd.f32 %v8959_v29, %v1063_v45  ;;  %v1070_v3 = vadd.f32 %v942_v27, %v675_v6  ;;  %v676_v27 = vmul.f32 %v8930_v13, %v536_v57 }
 0x14a   : > { %v1205_v20 = vadd.f32 %v8959_v29, %v1067_v47  ;;  %v1206_v60 = vadd.f32 %v8961_v30, %v1068_v5  ;;  %v677_v5 = vmul.f32 %v8932_v14, %v536_v57 }
 0x14b   : > { %v2402_v32 = vpop.f32.mrf.mxu2  ;;  %v1207_v53 = vadd.f32 %v8972_v42, %v1069_v23  ;;  %v808_v23 = vpop.permute.xlu0 %807 }
 0x14c   : > { %v2491_v8 = vpop.f32.mrf.mxu3  ;;  %v2403_v37 = vadd.f32 %v2402_v32, %v2314_v7  ;;  %v2227_v55 = vpop.f32.mrf.mxu0  ;;  %v1065_v7 = vadd.f32 %v937_v62, %v670_v41  ;;  %v1329_v32 = vmax.f32 %v1201_v51, 0.0  ;;  %v1333_v25 = vmax.f32 %v1205_v20, 0.0 }
 0x14d   : > { %v2316_v39 = vpop.f32.mrf.mxu1  ;;  %v2228_v9 = vadd.f32 %v2227_v55, %v9411_v28  ;;  %v1066_v55 = vadd.f32 %v938_v22, %v671_v63  ;;  %v1208_v22 = vadd.f32 %v8974_v50, %v1070_v3  ;;  %v1335_v47 = vmax.f32 %v1207_v53, 0.0 }
 0x14e   : > { %v2492_v26 = vadd.f32 %v2491_v8, %v2403_v37  ;;  %v1203_v46 = vadd.f32 %v8972_v42, %v1065_v7  ;;  %v541_v8 = vpop.permute.xlu2 %540  ;;  %v1330_v37 = vmax.f32 %v1202_v43, 0.0  ;;  %v812_v6 = vpop.permute.xlu1 %811 }
 0x14f   : > { %v2317_v21 = vadd.f32 %v2316_v39, %v2228_v9  ;;  %2266 = vmatmul.bf16.gmra.mxu0 %v9594_v10  ;;  %v1204_v62 = vadd.f32 %v8974_v50, %v1066_v55  ;;  %v1334_v39 = vmax.f32 %v1206_v60, 0.0  ;;  %v1336_v51 = vmax.f32 %v1208_v22, 0.0 }
 0x150   : > { %2355 = vmatmul.bf16.gmra.mxu1 %v9608_v59  ;;  %v3647_v44 = vmax.f32 %v2492_v26, 0.0  ;;  %2444 = vmatmul.bf16.gmra.mxu2 %v9624_v56  ;;  %v1331_v9 = vmax.f32 %v1203_v46, 0.0  ;;  %v678_v26 = vmul.f32 %v8934_v15, %v536_v57  ;;  %v681_v3 = vmul.f32 %v8932_v14, %v541_v8 }
 0x151   : > { %2533 = vmatmul.bf16.gmra.mxu3 %v9645_v24  ;;  %v1332_v7 = vmax.f32 %v1204_v62, 0.0  ;;  %v9670_v55 = vpack.c.bf16 %v1334_v39, %v1330_v37  ;;  %v682_v43 = vmul.f32 %v8934_v15, %v541_v8  ;;  %v947_v20 = vmul.f32 %v8926_v11, %v812_v6 }
 0x152   : > { %v9656_v2 = vpack.c.bf16 %v3647_v44, %v3643_v40  ;;  %v680_v40 = vmul.f32 %v8930_v13, %v541_v8  ;;  %v9668_v44 = vpack.c.bf16 %v1333_v25, %v1329_v32  ;;  %v948_v60 = vmul.f32 %v8928_v12, %v812_v6 }
 0x153   : > { %v2405_v41 = vpop.f32.mrf.mxu2  ;;  %11528 = vst [vmem:[#allocation49_spill] sm:$0xff] %v9670_v55  ;;  %v943_v46 = vmul.f32 %v8926_v11, %v808_v23  ;;  %v949_v62 = vmul.f32 %v8936_v16, %v812_v6  ;;  %v950_v22 = vmul.f32 %v8942_v19, %v812_v6  ;;  %v945_v25 = vmul.f32 %v8936_v16, %v808_v23 }
 0x154   : > { %11526 = vst [vmem:[#allocation47_spill] sm:$0xff] %v9656_v2  ;;  %v2494_v58 = vpop.f32.mrf.mxu3  ;;  %v2406_v18 = vadd.f32 %v2405_v41, %v2317_v21  ;;  %v2229_v31 = vpop.f32.mrf.mxu0  ;;  %v679_v21 = vmul.f32 %v8938_v17, %v536_v57  ;;  %v683_v57 = vmul.f32 %v8938_v17, %v541_v8  ;;  %v946_v37 = vmul.f32 %v8942_v19, %v808_v23 }
 0x155   : > { %v2318_v63 = vpop.f32.mrf.mxu1  ;;  %v2230_v45 = vadd.f32 %v2229_v31, %v9411_v28  ;;  %11527 = vst [vmem:[#allocation48_spill] sm:$0xff] %v9668_v44  ;;  %v9686_v39 = vpack.c.bf16 %v1336_v51, %v1332_v7  ;;  %v1073_v51 = vadd.f32 %v945_v25, %v678_v26 }
 0x156   : > { %v2495_v49 = vadd.f32 %v2494_v58, %v2406_v18  ;;  %v546_v6 = vpop.permute.xlu2 %545  ;;  %v551_v7 = vpop.permute.xlu1 %550 }
 0x157   : > { %v2319_v1 = vadd.f32 %v2318_v63, %v2230_v45  ;;  %v9678_v63 = vpack.c.bf16 %v1335_v47, %v1331_v9  ;;  %v944_v45 = vmul.f32 %v8928_v12, %v808_v23  ;;  %11530 = vst [vmem:[#allocation51_spill] sm:$0xff] %v9686_v39  ;;  %v1071_v47 = vadd.f32 %v943_v46, %v676_v27  ;;  %v8107_v27 = vld [vmem:[%s11324_s3 + $0x4] sm:$0xf] }
 0x158   : > { %v3651_v9 = vmax.f32 %v2495_v49, 0.0  ;;  %v1078_v23 = vadd.f32 %v950_v22, %v683_v57  ;;  %v7213_v49 = vld [vmem:[%s11324_s3 + $0x210] sm:$0xf0]  ;;  %v9706_v26 = vmul.f32 %v8930_v13, %v546_v6  ;;  %v8203_v46 = vld [vmem:[%s11324_s3 + $0x304] sm:$0xf] }
 0x159   : > { %11529 = vst [vmem:[#allocation50_spill] sm:$0xff] %v9678_v63  ;;  %v6957_v57 = vld [vmem:[%s11324_s3 + $0x10] sm:$0xf0] }
 0x15b   : > { %v2407_v41 = vpop.f32.mrf.mxu2 }
 0x15c   : > { %v2496_v58 = vpop.f32.mrf.mxu3  ;;  %v2408_v53 = vadd.f32 %v2407_v41, %v2319_v1  ;;  %v2232_v18 = vpop.f32.mrf.mxu0  ;;  %v1075_v1 = vadd.f32 %v947_v20, %v680_v40  ;;  %v1076_v41 = vadd.f32 %v948_v60, %v681_v3  ;;  %v1074_v40 = vadd.f32 %v946_v37, %v679_v21  ;;  %v8171_v20 = vld [vmem:[%s11324_s3 + $0x204] sm:$0xf] }
 0x15d   : > { %v2321_v31 = vpop.f32.mrf.mxu1  ;;  %v2233_v32 = vadd.f32 %v2232_v18, %v9411_v28  ;;  %v1077_v18 = vadd.f32 %v949_v62, %v682_v43  ;;  %v7216_v60 = vor.u32 %v8171_v20, %v7213_v49 }
 0x15e   : > { %v2497_v8 = vadd.f32 %v2496_v58, %v2408_v53  ;;  %v1072_v58 = vadd.f32 %v944_v45, %v677_v5  ;;  %v1213_v43 = vadd.f32 %v8959_v29, %v1075_v1  ;;  %v1214_v5 = vadd.f32 %v8961_v30, %v1076_v41  ;;  %v7341_v53 = vld [vmem:[%s11324_s3 + $0x310] sm:$0xf0] }
 0x15f   : > { %v2322_v2 = vadd.f32 %v2321_v31, %v2233_v32  ;;  %2271 = vmatmul.bf16.gmra.mxu0 %v9668_v44  ;;  %v1209_v31 = vadd.f32 %v8959_v29, %v1071_v47  ;;  %v6960_v32 = vor.u32 %v8107_v27, %v6957_v57  ;;  %v7344_v25 = vor.u32 %v8203_v46, %v7341_v53  ;;  %v816_v53 = vpop.permute.xlu2 %815  ;;  %v556_v44 = vpop.permute.xlu1 %555 }
 0x160   : > { %2360 = vmatmul.bf16.gmra.mxu1 %v9670_v55  ;;  %v3655_v24 = vmax.f32 %v2497_v8, 0.0  ;;  %2449 = vmatmul.bf16.gmra.mxu2 %v9678_v63  ;;  %v1215_v37 = vadd.f32 %v8972_v42, %v1077_v18  ;;  %v1216_v8 = vadd.f32 %v8974_v50, %v1078_v23  ;;  %v1210_v1 = vadd.f32 %v8961_v30, %v1072_v58 }
 0x161   : > { %2538 = vmatmul.bf16.gmra.mxu3 %v9686_v39  ;;  %2744 = vmatpush.bf16.msrb.mxu2 %v7216_v60  ;;  %v1212_v20 = vadd.f32 %v8974_v50, %v1074_v40  ;;  %v686_v47 = vmul.f32 %v8934_v15, %v546_v6  ;;  %v687_v18 = vmul.f32 %v8938_v17, %v546_v6  ;;  %v1337_v60 = vmax.f32 %v1209_v31, 0.0  ;;  %v7085_v40 = vld [vmem:[%s11324_s3 + $0x110] sm:$0xf0] }
 0x162   : > { %v9692_v3 = vpack.c.bf16 %v3655_v24, %v3651_v9  ;;  %v1211_v9 = vadd.f32 %v8972_v42, %v1073_v51  ;;  %2566 = vmatpush.bf16.msrb.mxu0 %v6960_v32  ;;  %2833 = vmatpush.bf16.msrb.mxu3 %v7344_v25  ;;  %v688_v23 = vmul.f32 %v8930_v13, %v551_v7  ;;  %v8139_v51 = vld [vmem:[%s11324_s3 + $0x104] sm:$0xf]  ;;  %v1338_v57 = vmax.f32 %v1210_v1, 0.0 }
 0x163   : > { %v2410_v24 = vpop.f32.mrf.mxu2  ;;  %v689_v58 = vmul.f32 %v8932_v14, %v551_v7  ;;  %v1342_v46 = vmax.f32 %v1214_v5, 0.0  ;;  %v1340_v32 = vmax.f32 %v1212_v20, 0.0  ;;  %v1344_v25 = vmax.f32 %v1216_v8, 0.0 }
 0x164   : > { %11531 = vst [vmem:[#allocation52_spill] sm:$0xff] %v9692_v3  ;;  %v2499_v21 = vpop.f32.mrf.mxu3  ;;  %v2411_v62 = vadd.f32 %v2410_v24, %v2322_v2  ;;  %v2234_v22 = vpop.f32.mrf.mxu0  ;;  %v685_v2 = vmul.f32 %v8932_v14, %v546_v6  ;;  %v690_v24 = vmul.f32 %v8934_v15, %v551_v7  ;;  %v7088_v6 = vor.u32 %v8139_v51, %v7085_v40 }
 0x165   : > { %v2323_v45 = vpop.f32.mrf.mxu1  ;;  %v2235_v41 = vadd.f32 %v2234_v22, %v9411_v28  ;;  %v1339_v22 = vmax.f32 %v1211_v9, 0.0  ;;  %v691_v31 = vmul.f32 %v8938_v17, %v551_v7  ;;  %v952_v3 = vmul.f32 %v8928_v12, %v816_v53 }
 0x166   : > { %v2500_v49 = vadd.f32 %v2499_v21, %v2411_v62  ;;  %v1341_v21 = vmax.f32 %v1213_v43, 0.0  ;;  %v820_v62 = vpop.permute.xlu0 %819  ;;  %v953_v39 = vmul.f32 %v8936_v16, %v816_v53  ;;  %2655 = vmatpush.bf16.msrb.mxu1 %v7088_v6  ;;  %v954_v43 = vmul.f32 %v8942_v19, %v816_v53 }
 0x167   : > { %v2324_v27 = vadd.f32 %v2323_v45, %v2235_v41  ;;  %v1343_v45 = vmax.f32 %v1215_v37, 0.0  ;;  %v951_v41 = vmul.f32 %v8926_v11, %v816_v53  ;;  %v955_v5 = vmul.f32 %v8926_v11, %v820_v62 }
 0x168   : > { %v956_v1 = vmul.f32 %v8928_v12, %v820_v62  ;;  %v957_v7 = vmul.f32 %v8936_v16, %v820_v62  ;;  %v9745_v51 = vpack.c.bf16 %v1341_v21, %v1337_v60  ;;  %v9747_v40 = vpack.c.bf16 %v1342_v46, %v1338_v57 }
 0x169   : > { %v958_v6 = vmul.f32 %v8942_v19, %v820_v62  ;;  %v9750_v53 = vpack.c.bf16 %v1343_v45, %v1339_v22  ;;  %v9752_v59 = vpack.c.bf16 %v1344_v25, %v1340_v32  ;;  %v3659_v60 = vmax.f32 %v2500_v49, 0.0 }
 0x16a   : > { %v1081_v57 = vadd.f32 %v953_v39, %v686_v47  ;;  %v1084_v46 = vadd.f32 %v956_v1, %v689_v58  ;;  %v1082_v62 = vadd.f32 %v954_v43, %v687_v18  ;;  %v1085_v22 = vadd.f32 %v957_v7, %v690_v24  ;;  %v561_v18 = vpop.permute.xlu2 %560 }
 0x16b   : > { %v2412_v63 = vpop.f32.mrf.mxu2  ;;  %11532 = vst [vmem:[#allocation53_spill] sm:$0xff] %v9750_v53  ;;  %v1086_v45 = vadd.f32 %v958_v6, %v691_v31  ;;  %v693_v43 = vmul.f32 %v8932_v14, %v556_v44  ;;  %v696_v7 = vmul.f32 %v8930_v13, %v561_v18  ;;  %v698_v6 = vmul.f32 %v8934_v15, %v561_v18 }
 0x16c   : > { %v2501_v55 = vpop.f32.mrf.mxu3  ;;  %v2413_v37 = vadd.f32 %v2412_v63, %v2324_v27  ;;  %v2237_v9 = vpop.f32.mrf.mxu0  ;;  %11533 = vst [vmem:[#allocation54_spill] sm:$0xff] %v9752_v59  ;;  %v1079_v63 = vadd.f32 %v951_v41, %v9706_v26  ;;  %v1080_v27 = vadd.f32 %v952_v3, %v685_v2  ;;  %v1219_v2 = vadd.f32 %v8972_v42, %v1081_v57 }
 0x16d   : > { %v2326_v8 = vpop.f32.mrf.mxu1  ;;  %v2238_v20 = vadd.f32 %v2237_v9, %v9411_v28  ;;  %v1222_v47 = vadd.f32 %v8961_v30, %v1084_v46  ;;  %v1220_v58 = vadd.f32 %v8974_v50, %v1082_v62  ;;  %v1223_v24 = vadd.f32 %v8972_v42, %v1085_v22 }
 0x16e   : > { %v2502_v56 = vadd.f32 %v2501_v55, %v2413_v37  ;;  %v1083_v55 = vadd.f32 %v955_v5, %v688_v23  ;;  %v1217_v9 = vadd.f32 %v8959_v29, %v1079_v63  ;;  %v1218_v3 = vadd.f32 %v8961_v30, %v1080_v27  ;;  %v828_v63 = vpop.permute.xlu1 %827  ;;  %v824_v27 = vpop.permute.xlu0 %823 }
 0x16f   : > { %v2327_v10 = vadd.f32 %v2326_v8, %v2238_v20  ;;  %2276 = vmatmul.bf16.gmra.mxu0 %v9745_v51  ;;  %v1224_v31 = vadd.f32 %v8974_v50, %v1086_v45  ;;  %v694_v5 = vmul.f32 %v8934_v15, %v556_v44  ;;  %v695_v8 = vmul.f32 %v8938_v17, %v556_v44 }
 0x170   : > { %2365 = vmatmul.bf16.gmra.mxu1 %v9747_v40  ;;  %v3663_v21 = vmax.f32 %v2502_v56, 0.0  ;;  %2454 = vmatmul.bf16.gmra.mxu2 %v9750_v53  ;;  %v1221_v39 = vadd.f32 %v8959_v29, %v1083_v55  ;;  %v697_v20 = vmul.f32 %v8932_v14, %v561_v18  ;;  %v1346_v57 = vmax.f32 %v1218_v3, 0.0 }
 0x171   : > { %2543 = vmatmul.bf16.gmra.mxu3 %v9752_v59  ;;  %v1350_v55 = vmax.f32 %v1222_v47, 0.0  ;;  %v1347_v46 = vmax.f32 %v1219_v2, 0.0  ;;  %v1351_v62 = vmax.f32 %v1223_v24, 0.0  ;;  %v1348_v22 = vmax.f32 %v1220_v58, 0.0 }
 0x172   : > { %v9759_v32 = vpack.c.bf16 %v3663_v21, %v3659_v60  ;;  %v1345_v60 = vmax.f32 %v1217_v9, 0.0  ;;  %v1349_v21 = vmax.f32 %v1221_v39, 0.0  ;;  %v1352_v45 = vmax.f32 %v1224_v31, 0.0 }
 0x173   : > { %v2415_v25 = vpop.f32.mrf.mxu2  ;;  %v959_v14 = vmul.f32 %v8926_v11, %v824_v27  ;;  %v960_v9 = vmul.f32 %v8928_v12, %v824_v27  ;;  %v961_v3 = vmul.f32 %v8936_v16, %v824_v27  ;;  %v966_v39 = vmul.f32 %v8942_v19, %v828_v63 }
 0x174   : > { %11534 = vst [vmem:[#allocation55_spill] sm:$0xff] %v9759_v32  ;;  %v2504_v37 = vpop.f32.mrf.mxu3  ;;  %v2416_v26 = vadd.f32 %v2415_v25, %v2327_v10  ;;  %v2239_v56 = vpop.f32.mrf.mxu0  ;;  %v692_v10 = vmul.f32 %v8930_v13, %v556_v44  ;;  %v699_v25 = vmul.f32 %v8938_v17, %v561_v18  ;;  %v963_v44 = vmul.f32 %v8926_v11, %v828_v63 }
 0x175   : > { %v2328_v49 = vpop.f32.mrf.mxu1  ;;  %v2240_v23 = vadd.f32 %v2239_v56, %v9411_v28  ;;  %v964_v13 = vmul.f32 %v8928_v12, %v828_v63  ;;  %v9786_v47 = vpack.c.bf16 %v1349_v21, %v1345_v60  ;;  %v9788_v18 = vpack.c.bf16 %v1350_v55, %v1346_v57 }
 0x176   : > { %v2505_v41 = vadd.f32 %v2504_v37, %v2416_v26  ;;  %v965_v26 = vmul.f32 %v8936_v16, %v828_v63  ;;  %v962_v11 = vmul.f32 %v8942_v19, %v824_v27  ;;  %v9791_v58 = vpack.c.bf16 %v1351_v62, %v1347_v46  ;;  %v8138_v62 = vld [vmem:[%s11324_s3 + $0xf4] sm:$0xf0] }
 0x177   : > { %v2329_v1 = vadd.f32 %v2328_v49, %v2240_v23  ;;  %11535 = vst [vmem:[#allocation56_spill] sm:$0xff] %v9788_v18  ;;  %v9793_v24 = vpack.c.bf16 %v1352_v45, %v1348_v22  ;;  %v1091_v12 = vadd.f32 %v963_v44, %v696_v7  ;;  %v1092_v16 = vadd.f32 %v964_v13, %v697_v20  ;;  %v7331_v7 = vld [vmem:[%s11324_s3 + $0x2e8] sm:$0xf]  ;;  %v8234_v45 = vld [vmem:[%s11324_s3 + $0x3f4] sm:$0xf0] }
 0x178   : > { %11536 = vst [vmem:[#allocation57_spill] sm:$0xff] %v9791_v58  ;;  %v3667_v63 = vmax.f32 %v2505_v41, 0.0  ;;  %v1093_v19 = vadd.f32 %v965_v26, %v698_v6  ;;  %v1094_v27 = vadd.f32 %v966_v39, %v699_v25  ;;  %v1088_v21 = vadd.f32 %v960_v9, %v693_v43  ;;  %v8202_v41 = vld [vmem:[%s11324_s3 + $0x2f4] sm:$0xf0]  ;;  %v7459_v22 = vld [vmem:[%s11324_s3 + $0x3e8] sm:$0xf] }
 0x179   : > { %11537 = vst [vmem:[#allocation58_spill] sm:$0xff] %v9793_v24  ;;  %v1089_v57 = vadd.f32 %v961_v3, %v694_v5  ;;  %v1090_v55 = vadd.f32 %v962_v11, %v695_v8  ;;  %v1229_v20 = vadd.f32 %v8959_v29, %v1091_v12  ;;  %v1230_v43 = vadd.f32 %v8961_v30, %v1092_v16  ;;  %v7203_v11 = vld [vmem:[%s11324_s3 + $0x1e8] sm:$0xf] }
 0x17a   : > { %v7332_v6 = vor.u32 %v8202_v41, %v7331_v7  ;;  %v1231_v26 = vadd.f32 %v8972_v42, %v1093_v19  ;;  %v1232_v9 = vadd.f32 %v8974_v50, %v1094_v27  ;;  %v1226_v3 = vadd.f32 %v8961_v30, %v1088_v21  ;;  %v8170_v30 = vld [vmem:[%s11324_s3 + $0x1f4] sm:$0xf0] }
 0x17b   : > { %v2417_v37 = vpop.f32.mrf.mxu2 }
 0x17c   : > { %v2506_v15 = vpop.f32.mrf.mxu3  ;;  %v2418_v56 = vadd.f32 %v2417_v37, %v2329_v1  ;;  %v2242_v49 = vpop.f32.mrf.mxu0  ;;  %v1087_v1 = vadd.f32 %v959_v14, %v692_v10  ;;  %v7075_v10 = vld [vmem:[%s11324_s3 + $0xe8] sm:$0xf]  ;;  %3093 = vmatpush.bf16.msra.mxu2 %v7332_v6  ;;  %v1354_v16 = vmax.f32 %v1226_v3, 0.0 }
 0x17d   : > { %v2331_v2 = vpop.f32.mrf.mxu1  ;;  %v2243_v17 = vadd.f32 %v2242_v49, %v9411_v28  ;;  %v7076_v37 = vor.u32 %v8138_v62, %v7075_v10  ;;  %v1227_v49 = vadd.f32 %v8972_v42, %v1089_v57  ;;  %v1359_v42 = vmax.f32 %v1231_v26, 0.0 }
 0x17e   : > { %v2507_v23 = vadd.f32 %v2506_v15, %v2418_v56  ;;  %v1225_v25 = vadd.f32 %v8959_v29, %v1087_v1  ;;  %v7460_v15 = vor.u32 %v8234_v45, %v7459_v22  ;;  %v1360_v1 = vmax.f32 %v1232_v9, 0.0 }
 0x17f   : > { %v2332_v31 = vadd.f32 %v2331_v2, %v2243_v17  ;;  %2281 = vmatmul.bf16.gmra.mxu0 %v9786_v47  ;;  %v1228_v2 = vadd.f32 %v8974_v50, %v1090_v55  ;;  %v1357_v17 = vmax.f32 %v1229_v20, 0.0  ;;  %v1355_v50 = vmax.f32 %v1227_v49, 0.0 }
 0x180   : > { %2370 = vmatmul.bf16.gmra.mxu1 %v9788_v18  ;;  %v3671_v60 = vmax.f32 %v2507_v23, 0.0  ;;  %2459 = vmatmul.bf16.gmra.mxu2 %v9791_v58  ;;  %v1358_v23 = vmax.f32 %v1230_v43, 0.0  ;;  %v1353_v12 = vmax.f32 %v1225_v25, 0.0 }
 0x181   : > { %2548 = vmatmul.bf16.gmra.mxu3 %v9793_v24  ;;  %2915 = vmatpush.bf16.msra.mxu0 %v7076_v37  ;;  %v9839_v20 = vpack.c.bf16 %v1359_v42, %v1355_v50  ;;  %v8134_v50 = vld [vmem:[%s11324_s3 + $0xd4] sm:$0xf0] }
 0x182   : > { %v9799_v46 = vpack.c.bf16 %v3671_v60, %v3667_v63  ;;  %3182 = vmatpush.bf16.msra.mxu3 %v7460_v15  ;;  %v1356_v63 = vmax.f32 %v1228_v2, 0.0  ;;  %v9835_v7 = vpack.c.bf16 %v1357_v17, %v1353_v12  ;;  %v9837_v41 = vpack.c.bf16 %v1358_v23, %v1354_v16  ;;  %v7315_v23 = vld [vmem:[%s11324_s3 + $0x2c8] sm:$0xf]  ;;  %v8198_v12 = vld [vmem:[%s11324_s3 + $0x2d4] sm:$0xf0] }
 0x183   : > { %v2420_v5 = vpop.f32.mrf.mxu2  ;;  %v7059_v16 = vld [vmem:[%s11324_s3 + $0xc8] sm:$0xf] }
 0x184   : > { %11538 = vst [vmem:[#allocation59_spill] sm:$0xff] %v9799_v46  ;;  %v2509_v8 = vpop.f32.mrf.mxu3  ;;  %v2421_v44 = vadd.f32 %v2420_v5, %v2332_v31  ;;  %v2244_v13 = vpop.f32.mrf.mxu0  ;;  %v7204_v31 = vor.u32 %v8170_v30, %v7203_v11  ;;  %v9841_v43 = vpack.c.bf16 %v1360_v1, %v1356_v63  ;;  %v7316_v1 = vor.u32 %v8198_v12, %v7315_v23  ;;  %v7443_v63 = vld [vmem:[%s11324_s3 + $0x3c8] sm:$0xf]  ;;  %v8154_v46 = vld [vmem:[%s11324_s3 + $0x174] sm:$0xf0] }
 0x185   : > { %v2333_v14 = vpop.f32.mrf.mxu1  ;;  %v2245_v56 = vadd.f32 %v2244_v13, %v9411_v28 }
 0x186   : > { %v2510_v39 = vadd.f32 %v2509_v8, %v2421_v44  ;;  %3004 = vmatpush.bf16.msra.mxu1 %v7204_v31  ;;  %3094 = vmatpush.bf16.msra.mxu2 %v7316_v1 }
 0x187   : > { %v2334_v29 = vadd.f32 %v2333_v14, %v2245_v56 }
 0x188   : > { %v3675_v8 = vmax.f32 %v2510_v39, 0.0 }
 0x18b   : > { %v2422_v60 = vpop.f32.mrf.mxu2 }
 0x18c   : > { %v2511_v19 = vpop.f32.mrf.mxu3  ;;  %v2423_v27 = vadd.f32 %v2422_v60, %v2334_v29  ;;  %v2247_v21 = vpop.f32.mrf.mxu0  ;;  %v8230_v60 = vld [vmem:[%s11324_s3 + $0x3d4] sm:$0xf0] }
 0x18d   : > { %v2336_v57 = vpop.f32.mrf.mxu1  ;;  %v2248_v55 = vadd.f32 %v2247_v21, %v9411_v28 }
 0x18e   : > { %v2512_v10 = vadd.f32 %v2511_v19, %v2423_v27 }
 0x18f   : > { %v2337_v5 = vadd.f32 %v2336_v57, %v2248_v55  ;;  %2286 = vmatmul.bf16.gmra.mxu0 %v9835_v7  ;;  %v7060_v57 = vor.u32 %v8134_v50, %v7059_v16  ;;  %v7444_v55 = vor.u32 %v8230_v60, %v7443_v63 }
 0x190   : > { %2375 = vmatmul.bf16.gmra.mxu1 %v9837_v41  ;;  %v3679_v6 = vmax.f32 %v2512_v10, 0.0  ;;  %2464 = vmatmul.bf16.gmra.mxu2 %v9839_v20 }
 0x191   : > { %2553 = vmatmul.bf16.gmra.mxu3 %v9841_v43  ;;  %2916 = vmatpush.bf16.msra.mxu0 %v7060_v57  ;;  %v11543_v57 = vld [vmem:[#allocation9_spill] sm:$0xff] }
 0x192   : > { %v9847_v62 = vpack.c.bf16 %v3679_v6, %v3675_v8  ;;  %3183 = vmatpush.bf16.msra.mxu3 %v7444_v55  ;;  %v7187_v6 = vld [vmem:[%s11324_s3 + $0x1c8] sm:$0xf]  ;;  %v11544_v55 = vld [vmem:[#allocation10_spill] sm:$0xff] }
 0x193   : > { %v2425_v22 = vpop.f32.mrf.mxu2 }
 0x194   : > { %11539 = vst [vmem:[#allocation60_spill] sm:$0xff] %v9847_v62  ;;  %v2514_v45 = vpop.f32.mrf.mxu3  ;;  %v2426_v25 = vadd.f32 %v2425_v22, %v2337_v5  ;;  %v2249_v44 = vpop.f32.mrf.mxu0  ;;  %v8166_v22 = vld [vmem:[%s11324_s3 + $0x1d4] sm:$0xf0]  ;;  %v7139_v62 = vld [vmem:[%s11324_s3 + $0x168] sm:$0xf] }
 0x195   : > { %v2338_v13 = vpop.f32.mrf.mxu1  ;;  %v2250_v14 = vadd.f32 %v2249_v44, %v9411_v28 }
 0x196   : > { %v2515_v37 = vadd.f32 %v2514_v45, %v2426_v25  ;;  %v7188_v45 = vor.u32 %v8166_v22, %v7187_v6  ;;  %v11546_v6 = vld [vmem:[#allocation12_spill] sm:$0xff] }
 0x197   : > { %v2339_v15 = vadd.f32 %v2338_v13, %v2250_v14 }
 0x198   : > { %v3683_v17 = vmax.f32 %v2515_v37, 0.0  ;;  %3005 = vmatpush.bf16.msra.mxu1 %v7188_v45  ;;  %v7299_v45 = vld [vmem:[%s11324_s3 + $0x2a8] sm:$0xf] }
 0x19b   : > { %v2427_v26 = vpop.f32.mrf.mxu2 }
 0x19c   : > { %v2516_v9 = vpop.f32.mrf.mxu3  ;;  %v2428_v3 = vadd.f32 %v2427_v26, %v2339_v15  ;;  %v2252_v56 = vpop.f32.mrf.mxu0 }
 0x19d   : > { %v2341_v49 = vpop.f32.mrf.mxu1  ;;  %v2253_v2 = vadd.f32 %v2252_v56, %v9411_v28 }
 0x19e   : > { %v2517_v39 = vadd.f32 %v2516_v9, %v2428_v3 }
 0x19f   : > { %v2342_v29 = vadd.f32 %v2341_v49, %v2253_v2  ;;  %2567 = vmatmul.bf16.vlgmr.msrb.gmra.mxu0 %v8998_v33  ;;  %v11541_v49 = vld [vmem:[#allocation8_spill] sm:$0xff] }
 0x1a0   : > { %2656 = vmatmul.bf16.vlgmr.msrb.gmra.mxu1 %v9000_v34  ;;  %v3687_v11 = vmax.f32 %v2517_v39, 0.0  ;;  %2745 = vmatmul.bf16.vlgmr.msrb.gmra.mxu2 %v9002_v35 }
 0x1a1   : > { %2834 = vmatmul.bf16.vlgmr.msrb.gmra.mxu3 %v9004_v36 }
 0x1a2   : > { %v9855_v30 = vpack.c.bf16 %v3687_v11, %v3683_v17 }
 0x1a3   : > { %v2430_v31 = vpop.f32.mrf.mxu2 }
 0x1a4   : > { %11540 = vst [vmem:[#allocation61_spill] sm:$0xff] %v9855_v30  ;;  %v2519_v42 = vpop.f32.mrf.mxu3  ;;  %v2431_v19 = vadd.f32 %v2430_v31, %v2342_v29  ;;  %v2254_v27 = vpop.f32.mrf.mxu0 }
 0x1a5   : > { %v2343_v21 = vpop.f32.mrf.mxu1  ;;  %v2255_v10 = vadd.f32 %v2254_v27, %v9411_v28 }
 0x1a6   : > { %v2520_v5 = vadd.f32 %v2519_v42, %v2431_v19 }
 0x1a7   : > { %v2344_v8 = vadd.f32 %v2343_v21, %v2255_v10 }
 0x1a8   : > { %v3691_v3 = vmax.f32 %v2520_v5, 0.0 }
 0x1ab   : > { %v2432_v25 = vpop.f32.mrf.mxu2 }
 0x1ac   : > { %v2521_v44 = vpop.f32.mrf.mxu3  ;;  %v2433_v13 = vadd.f32 %v2432_v25, %v2344_v8  ;;  %v2257_v14 = vpop.f32.mrf.mxu0  ;;  %v11545_v8 = vld [vmem:[#allocation11_spill] sm:$0xff] }
 0x1ad   : > { %v2346_v37 = vpop.f32.mrf.mxu1  ;;  %v2258_v15 = vadd.f32 %v2257_v14, %v9411_v28  ;;  %v8194_v25 = vld [vmem:[%s11324_s3 + $0x2b4] sm:$0xf0] }
 0x1ae   : > { %v2522_v26 = vadd.f32 %v2521_v44, %v2433_v13  ;;  %v7043_v44 = vld [vmem:[%s11324_s3 + $0xa8] sm:$0xf] }
 0x1af   : > { %v2347_v9 = vadd.f32 %v2346_v37, %v2258_v15  ;;  %2572 = vmatmul.bf16.gmra.mxu0 %v9068_v38  ;;  %v7300_v37 = vor.u32 %v8194_v25, %v7299_v45  ;;  %v8130_v15 = vld [vmem:[%s11324_s3 + $0xb4] sm:$0xf0]  ;;  %v11549_v45 = vld [vmem:[#allocation14_spill] sm:$0xff] }
 0x1b0   : > { %2661 = vmatmul.bf16.gmra.mxu1 %v9070_v52  ;;  %v3695_v56 = vmax.f32 %v2522_v26, 0.0  ;;  %2750 = vmatmul.bf16.gmra.mxu2 %v9074_v54  ;;  %v7427_v26 = vld [vmem:[%s11324_s3 + $0x3a8] sm:$0xf] }
 0x1b1   : > { %2839 = vmatmul.bf16.gmra.mxu3 %v11541_v49  ;;  %3095 = vmatpush.bf16.msra.mxu2 %v7300_v37 }
 0x1b2   : > { %v9887_v2 = vpack.c.bf16 %v3695_v56, %v3691_v3 }
 0x1b3   : > { %v2435_v39 = vpop.f32.mrf.mxu2 }
 0x1b4   : > { %11542 = vst [vmem:[#allocation8_spill] sm:$0xff] %v9887_v2  ;;  %v2524_v29 = vpop.f32.mrf.mxu3  ;;  %v2436_v17 = vadd.f32 %v2435_v39, %v2347_v9  ;;  %v2259_v11 = vpop.f32.mrf.mxu0  ;;  %v8226_v9 = vld [vmem:[%s11324_s3 + $0x3b4] sm:$0xf0] }
 0x1b5   : > { %v2348_v23 = vpop.f32.mrf.mxu1  ;;  %v2260_v12 = vadd.f32 %v2259_v11, %v9411_v28 }
 0x1b6   : > { %v2525_v16 = vadd.f32 %v2524_v29, %v2436_v17  ;;  %v7044_v29 = vor.u32 %v8130_v15, %v7043_v44  ;;  %v7428_v17 = vor.u32 %v8226_v9, %v7427_v26 }
 0x1b7   : > { %v2349_v31 = vadd.f32 %v2348_v23, %v2260_v12 }
 0x1b8   : > { %v3699_v10 = vmax.f32 %v2525_v16, 0.0  ;;  %2917 = vmatpush.bf16.msra.mxu0 %v7044_v29  ;;  %3184 = vmatpush.bf16.msra.mxu3 %v7428_v17  ;;  %v7171_v16 = vld [vmem:[%s11324_s3 + $0x1a8] sm:$0xf] }
 0x1bb   : > { %v2437_v42 = vpop.f32.mrf.mxu2 }
 0x1bc   : > { %v2526_v1 = vpop.f32.mrf.mxu3  ;;  %v2438_v50 = vadd.f32 %v2437_v42, %v2349_v31  ;;  %v2262_v63 = vpop.f32.mrf.mxu0  ;;  %v8162_v31 = vld [vmem:[%s11324_s3 + $0x1b4] sm:$0xf0] }
 0x1bd   : > { %v2351_v60 = vpop.f32.mrf.mxu1  ;;  %v2263_v19 = vadd.f32 %v2262_v63, %v9411_v28  ;;  %v7172_v42 = vor.u32 %v8162_v31, %v7171_v16 }
 0x1be   : > { %v2527_v27 = vadd.f32 %v2526_v1, %v2438_v50 }
 0x1bf   : > { %v2352_v21 = vadd.f32 %v2351_v60, %v2263_v19  ;;  %2577 = vmatmul.bf16.gmra.mxu0 %v11543_v57  ;;  %3006 = vmatpush.bf16.msra.mxu1 %v7172_v42 }
 0x1c0   : > { %2666 = vmatmul.bf16.gmra.mxu1 %v11544_v55  ;;  %v3703_v5 = vmax.f32 %v2527_v27, 0.0  ;;  %2755 = vmatmul.bf16.gmra.mxu2 %v11545_v8 }
 0x1c1   : > { %2844 = vmatmul.bf16.gmra.mxu3 %v11546_v6 }
 0x1c2   : > { %v9895_v22 = vpack.c.bf16 %v3703_v5, %v3699_v10  ;;  %v11548_v5 = vld [vmem:[#allocation13_spill] sm:$0xff] }
 0x1c3   : > { %v2440_v13 = vpop.f32.mrf.mxu2 }
 0x1c4   : > { %11547 = vst [vmem:[#allocation9_spill] sm:$0xff] %v9895_v22  ;;  %v2529_v14 = vpop.f32.mrf.mxu3  ;;  %v2441_v3 = vadd.f32 %v2440_v13, %v2352_v21  ;;  %v2264_v56 = vpop.f32.mrf.mxu0  ;;  %v11550_v13 = vld [vmem:[#allocation15_spill] sm:$0xff] }
 0x1c5   : > { %v2353_v39 = vpop.f32.mrf.mxu1  ;;  %v2265_v11 = vadd.f32 %v2264_v56, %v9411_v28 }
 0x1c6   : > { %v2530_v23 = vadd.f32 %v2529_v14, %v2441_v3  ;;  %v11551_v14 = vld [vmem:[#allocation16_spill] sm:$0xff] }
 0x1c7   : > { %v2354_v12 = vadd.f32 %v2353_v39, %v2265_v11 }
 0x1c8   : > { %v3707_v25 = vmax.f32 %v2530_v23, 0.0 }
 0x1cb   : > { %v2442_v1 = vpop.f32.mrf.mxu2 }
 0x1cc   : > { %v2531_v50 = vpop.f32.mrf.mxu3  ;;  %v2443_v63 = vadd.f32 %v2442_v1, %v2354_v12  ;;  %v2267_v60 = vpop.f32.mrf.mxu0 }
 0x1cd   : > { %v2356_v19 = vpop.f32.mrf.mxu1  ;;  %v2268_v27 = vadd.f32 %v2267_v60, %v9411_v28  ;;  %v11554_v60 = vld [vmem:[#allocation18_spill] sm:$0xff] }
 0x1ce   : > { %v2532_v21 = vadd.f32 %v2531_v50, %v2443_v63  ;;  %v11553_v63 = vld [vmem:[#allocation17_spill] sm:$0xff] }
 0x1cf   : > { %v2357_v10 = vadd.f32 %v2356_v19, %v2268_v27  ;;  %2582 = vmatmul.bf16.gmra.mxu0 %v11548_v5 }
 0x1d0   : > { %2671 = vmatmul.bf16.gmra.mxu1 %v11549_v45  ;;  %v3711_v44 = vmax.f32 %v2532_v21, 0.0  ;;  %2760 = vmatmul.bf16.gmra.mxu2 %v11550_v13  ;;  %v11555_v21 = vld [vmem:[#allocation19_spill] sm:$0xff] }
 0x1d1   : > { %2849 = vmatmul.bf16.gmra.mxu3 %v11551_v14 }
 0x1d2   : > { %v9927_v37 = vpack.c.bf16 %v3711_v44, %v3707_v25  ;;  %v7283_v44 = vld [vmem:[%s11324_s3 + $0x288] sm:$0xf] }
 0x1d3   : > { %v2445_v15 = vpop.f32.mrf.mxu2 }
 0x1d4   : > { %11552 = vst [vmem:[#allocation10_spill] sm:$0xff] %v9927_v37  ;;  %v2534_v26 = vpop.f32.mrf.mxu3  ;;  %v2446_v9 = vadd.f32 %v2445_v15, %v2357_v10  ;;  %v2269_v3 = vpop.f32.mrf.mxu0  ;;  %v11556_v10 = vld [vmem:[#allocation20_spill] sm:$0xff]  ;;  %v8190_v15 = vld [vmem:[%s11324_s3 + $0x294] sm:$0xf0] }
 0x1d5   : > { %v2358_v56 = vpop.f32.mrf.mxu1  ;;  %v2270_v39 = vadd.f32 %v2269_v3, %v9411_v28 }
 0x1d6   : > { %v2535_v29 = vadd.f32 %v2534_v26, %v2446_v9  ;;  %v7027_v26 = vld [vmem:[%s11324_s3 + $0x88] sm:$0xf] }
 0x1d7   : > { %v2359_v17 = vadd.f32 %v2358_v56, %v2270_v39  ;;  %v7284_v56 = vor.u32 %v8190_v15, %v7283_v44  ;;  %v8126_v39 = vld [vmem:[%s11324_s3 + $0x94] sm:$0xf0] }
 0x1d8   : > { %v3715_v19 = vmax.f32 %v2535_v29, 0.0  ;;  %v7411_v29 = vld [vmem:[%s11324_s3 + $0x388] sm:$0xf]  ;;  %v8158_v44 = vld [vmem:[%s11324_s3 + $0x194] sm:$0xf0] }
 0x1d9   : > { %3096 = vmatpush.bf16.msra.mxu2 %v7284_v56 }
 0x1db   : > { %v2447_v11 = vpop.f32.mrf.mxu2 }
 0x1dc   : > { %v2536_v12 = vpop.f32.mrf.mxu3  ;;  %v2448_v16 = vadd.f32 %v2447_v11, %v2359_v17  ;;  %v2272_v23 = vpop.f32.mrf.mxu0  ;;  %v8222_v17 = vld [vmem:[%s11324_s3 + $0x394] sm:$0xf0] }
 0x1dd   : > { %v2361_v31 = vpop.f32.mrf.mxu1  ;;  %v2273_v42 = vadd.f32 %v2272_v23, %v9411_v28  ;;  %v7028_v23 = vor.u32 %v8126_v39, %v7027_v26 }
 0x1de   : > { %v2537_v1 = vadd.f32 %v2536_v12, %v2448_v16 }
 0x1df   : > { %v2362_v50 = vadd.f32 %v2361_v31, %v2273_v42  ;;  %2587 = vmatmul.bf16.gmra.mxu0 %v11553_v63  ;;  %v7412_v31 = vor.u32 %v8222_v17, %v7411_v29 }
 0x1e0   : > { %2676 = vmatmul.bf16.gmra.mxu1 %v11554_v60  ;;  %v3719_v27 = vmax.f32 %v2537_v1, 0.0  ;;  %2765 = vmatmul.bf16.gmra.mxu2 %v11555_v21 }
 0x1e1   : > { %2854 = vmatmul.bf16.gmra.mxu3 %v11556_v10  ;;  %2918 = vmatpush.bf16.msra.mxu0 %v7028_v23 }
 0x1e2   : > { %v9935_v25 = vpack.c.bf16 %v3719_v27, %v3715_v19  ;;  %3185 = vmatpush.bf16.msra.mxu3 %v7412_v31  ;;  %v7155_v27 = vld [vmem:[%s11324_s3 + $0x188] sm:$0xf]  ;;  %v11560_v31 = vld [vmem:[#allocation23_spill] sm:$0xff] }
 0x1e3   : > { %v2450_v9 = vpop.f32.mrf.mxu2 }
 0x1e4   : > { %11557 = vst [vmem:[#allocation11_spill] sm:$0xff] %v9935_v25  ;;  %v2539_v3 = vpop.f32.mrf.mxu3  ;;  %v2451_v11 = vadd.f32 %v2450_v9, %v2362_v50  ;;  %v2274_v12 = vpop.f32.mrf.mxu0  ;;  %v7156_v50 = vor.u32 %v8158_v44, %v7155_v27 }
 0x1e5   : > { %v2363_v16 = vpop.f32.mrf.mxu1  ;;  %v2275_v42 = vadd.f32 %v2274_v12, %v9411_v28  ;;  %v11559_v12 = vld [vmem:[#allocation22_spill] sm:$0xff] }
 0x1e6   : > { %v2540_v1 = vadd.f32 %v2539_v3, %v2451_v11  ;;  %3007 = vmatpush.bf16.msra.mxu1 %v7156_v50  ;;  %v11558_v11 = vld [vmem:[#allocation21_spill] sm:$0xff] }
 0x1e7   : > { %v2364_v19 = vadd.f32 %v2363_v16, %v2275_v42  ;;  %v11561_v42 = vld [vmem:[#allocation24_spill] sm:$0xff] }
 0x1e8   : > { %v3723_v16 = vmax.f32 %v2540_v1, 0.0 }
 0x1eb   : > { %v2452_v15 = vpop.f32.mrf.mxu2 }
 0x1ec   : > { %v2541_v9 = vpop.f32.mrf.mxu3  ;;  %v2453_v26 = vadd.f32 %v2452_v15, %v2364_v19  ;;  %v2277_v39 = vpop.f32.mrf.mxu0 }
 0x1ed   : > { %v2366_v29 = vpop.f32.mrf.mxu1  ;;  %v2278_v3 = vadd.f32 %v2277_v39, %v9411_v28 }
 0x1ee   : > { %v2542_v56 = vadd.f32 %v2541_v9, %v2453_v26 }
 0x1ef   : > { %v2367_v17 = vadd.f32 %v2366_v29, %v2278_v3  ;;  %2592 = vmatmul.bf16.gmra.mxu0 %v11558_v11 }
 0x1f0   : > { %2681 = vmatmul.bf16.gmra.mxu1 %v11559_v12  ;;  %v3727_v23 = vmax.f32 %v2542_v56, 0.0  ;;  %2770 = vmatmul.bf16.gmra.mxu2 %v11560_v31 }
 0x1f1   : > { %2859 = vmatmul.bf16.gmra.mxu3 %v11561_v42 }
 0x1f2   : > { %v9967_v27 = vpack.c.bf16 %v3727_v23, %v3723_v16  ;;  %v11563_v16 = vld [vmem:[#allocation25_spill] sm:$0xff]  ;;  %v11564_v23 = vld [vmem:[#allocation26_spill] sm:$0xff] }
 0x1f3   : > { %v2455_v44 = vpop.f32.mrf.mxu2 }
 0x1f4   : > { %11562 = vst [vmem:[#allocation12_spill] sm:$0xff] %v9967_v27  ;;  %v2544_v19 = vpop.f32.mrf.mxu3  ;;  %v2456_v50 = vadd.f32 %v2455_v44, %v2367_v17  ;;  %v2279_v15 = vpop.f32.mrf.mxu0  ;;  %v11565_v27 = vld [vmem:[#allocation27_spill] sm:$0xff] }
 0x1f5   : > { %v2368_v25 = vpop.f32.mrf.mxu1  ;;  %v2280_v9 = vadd.f32 %v2279_v15, %v9411_v28  ;;  %v11566_v15 = vld [vmem:[#allocation28_spill] sm:$0xff] }
 0x1f6   : > { %v2545_v26 = vadd.f32 %v2544_v19, %v2456_v50  ;;  %v7267_v19 = vld [vmem:[%s11324_s3 + $0x268] sm:$0xf] }
 0x1f7   : > { %v2369_v39 = vadd.f32 %v2368_v25, %v2280_v9 }
 0x1f8   : > { %v3731_v17 = vmax.f32 %v2545_v26, 0.0  ;;  %v8122_v26 = vld [vmem:[%s11324_s3 + $0x74] sm:$0xf0] }
 0x1fb   : > { %v2457_v29 = vpop.f32.mrf.mxu2 }
 0x1fc   : > { %v2546_v3 = vpop.f32.mrf.mxu3  ;;  %v2458_v37 = vadd.f32 %v2457_v29, %v2369_v39  ;;  %v2282_v1 = vpop.f32.mrf.mxu0  ;;  %v7395_v39 = vld [vmem:[%s11324_s3 + $0x368] sm:$0xf]  ;;  %v8218_v29 = vld [vmem:[%s11324_s3 + $0x374] sm:$0xf0] }
 0x1fd   : > { %v2371_v56 = vpop.f32.mrf.mxu1  ;;  %v2283_v22 = vadd.f32 %v2282_v1, %v9411_v28 }
 0x1fe   : > { %v2547_v2 = vadd.f32 %v2546_v3, %v2458_v37  ;;  %v7011_v37 = vld [vmem:[%s11324_s3 + $0x68] sm:$0xf] }
 0x1ff   : > { %v2372_v30 = vadd.f32 %v2371_v56, %v2283_v22  ;;  %2597 = vmatmul.bf16.gmra.mxu0 %v11563_v16  ;;  %v8186_v22 = vld [vmem:[%s11324_s3 + $0x274] sm:$0xf0] }
 0x200   : > { %2686 = vmatmul.bf16.gmra.mxu1 %v11564_v23  ;;  %v3735_v44 = vmax.f32 %v2547_v2, 0.0  ;;  %2775 = vmatmul.bf16.gmra.mxu2 %v11565_v27  ;;  %v7268_v9 = vor.u32 %v8186_v22, %v7267_v19 }
 0x201   : > { %2864 = vmatmul.bf16.gmra.mxu3 %v11566_v15 }
 0x202   : > { %v9975_v25 = vpack.c.bf16 %v3735_v44, %v3731_v17  ;;  %v7012_v17 = vor.u32 %v8122_v26, %v7011_v37  ;;  %v7396_v44 = vor.u32 %v8218_v29, %v7395_v39  ;;  %3097 = vmatpush.bf16.msra.mxu2 %v7268_v9 }
 0x203   : > { %v2460_v50 = vpop.f32.mrf.mxu2 }
 0x204   : > { %11567 = vst [vmem:[#allocation13_spill] sm:$0xff] %v9975_v25  ;;  %v2549_v2 = vpop.f32.mrf.mxu3  ;;  %v2461_v3 = vadd.f32 %v2460_v50, %v2372_v30  ;;  %v2284_v1 = vpop.f32.mrf.mxu0  ;;  %2919 = vmatpush.bf16.msra.mxu0 %v7012_v17  ;;  %3186 = vmatpush.bf16.msra.mxu3 %v7396_v44  ;;  %v7140_v30 = vor.u32 %v8154_v46, %v7139_v62  ;;  %v11570_v17 = vld [vmem:[#allocation31_spill] sm:$0xff]  ;;  %v11571_v44 = vld [vmem:[#allocation32_spill] sm:$0xff] }
 0x205   : > { %v2373_v56 = vpop.f32.mrf.mxu1  ;;  %v2285_v25 = vadd.f32 %v2284_v1, %v9411_v28 }
 0x206   : > { %v2550_v19 = vadd.f32 %v2549_v2, %v2461_v3  ;;  %3008 = vmatpush.bf16.msra.mxu1 %v7140_v30  ;;  %v11569_v3 = vld [vmem:[#allocation30_spill] sm:$0xff] }
 0x207   : > { %v2374_v22 = vadd.f32 %v2373_v56, %v2285_v25  ;;  %v11568_v25 = vld [vmem:[#allocation29_spill] sm:$0xff] }
 0x208   : > { %v3739_v1 = vmax.f32 %v2550_v19, 0.0  ;;  %v10013_v19 = vld [vmem:[%s11325_s4] sm:$0xf] }
 0x209   : > { %11573 = vst [vmem:[#allocation15_spill] sm:$0xff] %v10013_v19 }
 0x20b   : > { %v2462_v50 = vpop.f32.mrf.mxu2 }
 0x20c   : > { %v2551_v32 = vpop.f32.mrf.mxu3  ;;  %v2463_v37 = vadd.f32 %v2462_v50, %v2374_v22  ;;  %v2287_v26 = vpop.f32.mrf.mxu0 }
 0x20d   : > { %v2376_v39 = vpop.f32.mrf.mxu1  ;;  %v2288_v2 = vadd.f32 %v2287_v26, %v9411_v28 }
 0x20e   : > { %v2552_v9 = vadd.f32 %v2551_v32, %v2463_v37 }
 0x20f   : > { %v2377_v29 = vadd.f32 %v2376_v39, %v2288_v2  ;;  %2602 = vmatmul.bf16.gmra.mxu0 %v11568_v25  ;;  %v10016_v39 = vperm.slane %v10013_v19, 1 }
 0x210   : > { %2691 = vmatmul.bf16.gmra.mxu1 %v11569_v3  ;;  %v3743_v56 = vmax.f32 %v2552_v9, 0.0  ;;  %2780 = vmatmul.bf16.gmra.mxu2 %v11570_v17  ;;  %v8150_v17 = vld [vmem:[%s11324_s3 + $0x154] sm:$0xf0] }
 0x211   : > { %2869 = vmatmul.bf16.gmra.mxu3 %v11571_v44 }
 0x212   : > { %v10007_v46 = vpack.c.bf16 %v3743_v56, %v3739_v1 }
 0x213   : > { %v2465_v62 = vpop.f32.mrf.mxu2 }
 0x214   : > { %11572 = vst [vmem:[#allocation14_spill] sm:$0xff] %v10007_v46  ;;  %v2554_v22 = vpop.f32.mrf.mxu3  ;;  %v2466_v30 = vadd.f32 %v2465_v62, %v2377_v29  ;;  %v2289_v50 = vpop.f32.mrf.mxu0 }
 0x215   : > { %v2378_v15 = vpop.f32.mrf.mxu1  ;;  %v2290_v32 = vadd.f32 %v2289_v50, %v9411_v28  ;;  %v11574_v28 = vld [vmem:[#allocation33_spill] sm:$0xff]  ;;  %v11576_v50 = vld [vmem:[#allocation35_spill] sm:$0xff] }
 0x216   : > { %v2555_v37 = vadd.f32 %v2554_v22, %v2466_v30 }
 0x217   : > { %v2379_v26 = vadd.f32 %v2378_v15, %v2290_v32  ;;  %v11575_v15 = vld [vmem:[#allocation34_spill] sm:$0xff]  ;;  %v11577_v32 = vld [vmem:[#allocation36_spill] sm:$0xff] }
 0x218   : > { %v3747_v22 = vmax.f32 %v2555_v37, 0.0 }
 0x21b   : > { %v2467_v2 = vpop.f32.mrf.mxu2 }
 0x21c   : > { %v2556_v9 = vpop.f32.mrf.mxu3  ;;  %v2468_v1 = vadd.f32 %v2467_v2, %v2379_v26  ;;  %v2568_v56 = vpop.f32.mrf.mxu0  ;;  %v7251_v26 = vld [vmem:[%s11324_s3 + $0x248] sm:$0xf] }
 0x21d   : > { %v2657_v46 = vpop.f32.mrf.mxu1  ;;  %v2569_v29 = vadd.f32 %v2568_v56, %v10016_v39  ;;  %v6995_v2 = vld [vmem:[%s11324_s3 + $0x48] sm:$0xf]  ;;  %v8118_v56 = vld [vmem:[%s11324_s3 + $0x54] sm:$0xf0] }
 0x21e   : > { %v2557_v62 = vadd.f32 %v2556_v9, %v2468_v1 }
 0x21f   : > { %v2658_v44 = vadd.f32 %v2657_v46, %v2569_v29  ;;  %2607 = vmatmul.bf16.gmra.mxu0 %v11574_v28  ;;  %v8182_v46 = vld [vmem:[%s11324_s3 + $0x254] sm:$0xf0]  ;;  %v7379_v29 = vld [vmem:[%s11324_s3 + $0x348] sm:$0xf] }
 0x220   : > { %2696 = vmatmul.bf16.gmra.mxu1 %v11575_v15  ;;  %v3751_v30 = vmax.f32 %v2557_v62, 0.0  ;;  %2785 = vmatmul.bf16.gmra.mxu2 %v11576_v50  ;;  %v7252_v1 = vor.u32 %v8182_v46, %v7251_v26  ;;  %v8214_v62 = vld [vmem:[%s11324_s3 + $0x354] sm:$0xf0]  ;;  %v7123_v28 = vld [vmem:[%s11324_s3 + $0x148] sm:$0xf] }
 0x221   : > { %2874 = vmatmul.bf16.gmra.mxu3 %v11577_v32  ;;  %v6996_v32 = vor.u32 %v8118_v56, %v6995_v2  ;;  %v7380_v50 = vor.u32 %v8214_v62, %v7379_v29 }
 0x222   : > { %v10023_v19 = vpack.c.bf16 %v3751_v30, %v3747_v22  ;;  %3098 = vmatpush.bf16.msra.mxu2 %v7252_v1 }
 0x223   : > { %v2746_v37 = vpop.f32.mrf.mxu2  ;;  %2920 = vmatpush.bf16.msra.mxu0 %v6996_v32  ;;  %3187 = vmatpush.bf16.msra.mxu3 %v7380_v50 }
 0x224   : > { %11578 = vst [vmem:[#allocation16_spill] sm:$0xff] %v10023_v19  ;;  %v2835_v9 = vpop.f32.mrf.mxu3  ;;  %v2747_v22 = vadd.f32 %v2746_v37, %v2658_v44  ;;  %v2570_v30 = vpop.f32.mrf.mxu0  ;;  %v7124_v44 = vor.u32 %v8150_v17, %v7123_v28 }
 0x225   : > { %v2659_v19 = vpop.f32.mrf.mxu1  ;;  %v2571_v15 = vadd.f32 %v2570_v30, %v10016_v39  ;;  %v11582_v30 = vld [vmem:[#allocation40_spill] sm:$0xff] }
 0x226   : > { %v2836_v26 = vadd.f32 %v2835_v9, %v2747_v22  ;;  %3009 = vmatpush.bf16.msra.mxu1 %v7124_v44  ;;  %v11581_v22 = vld [vmem:[#allocation39_spill] sm:$0xff] }
 0x227   : > { %v2660_v46 = vadd.f32 %v2659_v19, %v2571_v15  ;;  %v11579_v19 = vld [vmem:[#allocation37_spill] sm:$0xff]  ;;  %v11580_v15 = vld [vmem:[#allocation38_spill] sm:$0xff] }
 0x228   : > { %v3628_v1 = vmax.f32 %v2836_v26, 0.0 }
 0x22b   : > { %v2748_v37 = vpop.f32.mrf.mxu2 }
 0x22c   : > { %v2837_v3 = vpop.f32.mrf.mxu3  ;;  %v2749_v2 = vadd.f32 %v2748_v37, %v2660_v46  ;;  %v2573_v56 = vpop.f32.mrf.mxu0 }
 0x22d   : > { %v2662_v29 = vpop.f32.mrf.mxu1  ;;  %v2574_v9 = vadd.f32 %v2573_v56, %v10016_v39 }
 0x22e   : > { %v2838_v32 = vadd.f32 %v2837_v3, %v2749_v2 }
 0x22f   : > { %v2663_v50 = vadd.f32 %v2662_v29, %v2574_v9  ;;  %2612 = vmatmul.bf16.gmra.mxu0 %v11579_v19 }
 0x230   : > { %2701 = vmatmul.bf16.gmra.mxu1 %v11580_v15  ;;  %v3632_v62 = vmax.f32 %v2838_v32, 0.0  ;;  %2790 = vmatmul.bf16.gmra.mxu2 %v11581_v22 }
 0x231   : > { %2879 = vmatmul.bf16.gmra.mxu3 %v11582_v30 }
 0x232   : > { %v10055_v17 = vpack.c.bf16 %v3632_v62, %v3628_v1  ;;  %v7235_v62 = vld [vmem:[%s11324_s3 + $0x228] sm:$0xf] }
 0x233   : > { %v2751_v28 = vpop.f32.mrf.mxu2 }
 0x234   : > { %11583 = vst [vmem:[#allocation17_spill] sm:$0xff] %v10055_v17  ;;  %v2840_v46 = vpop.f32.mrf.mxu3  ;;  %v2752_v44 = vadd.f32 %v2751_v28, %v2663_v50  ;;  %v2575_v37 = vpop.f32.mrf.mxu0 }
 0x235   : > { %v2664_v25 = vpop.f32.mrf.mxu1  ;;  %v2576_v3 = vadd.f32 %v2575_v37, %v10016_v39  ;;  %v7363_v37 = vld [vmem:[%s11324_s3 + $0x328] sm:$0xf] }
 0x236   : > { %v2841_v2 = vadd.f32 %v2840_v46, %v2752_v44  ;;  %v8114_v44 = vld [vmem:[%s11324_s3 + $0x34] sm:$0xf0] }
 0x237   : > { %v2665_v56 = vadd.f32 %v2664_v25, %v2576_v3  ;;  %v8210_v3 = vld [vmem:[%s11324_s3 + $0x334] sm:$0xf0] }
 0x238   : > { %v3636_v50 = vmax.f32 %v2841_v2, 0.0 }
 0x23b   : > { %v2753_v29 = vpop.f32.mrf.mxu2 }
 0x23c   : > { %v2842_v9 = vpop.f32.mrf.mxu3  ;;  %v2754_v15 = vadd.f32 %v2753_v29, %v2665_v56  ;;  %v2578_v26 = vpop.f32.mrf.mxu0 }
 0x23d   : > { %v2667_v32 = vpop.f32.mrf.mxu1  ;;  %v2579_v22 = vadd.f32 %v2578_v26, %v10016_v39  ;;  %v7364_v26 = vor.u32 %v8210_v3, %v7363_v37 }
 0x23e   : > { %v2843_v19 = vadd.f32 %v2842_v9, %v2754_v15  ;;  %v8178_v15 = vld [vmem:[%s11324_s3 + $0x234] sm:$0xf0] }
 0x23f   : > { %v2668_v30 = vadd.f32 %v2667_v32, %v2579_v22  ;;  %2617 = vmatmul.bf16.gmra.mxu0 %v9562_v61  ;;  %v6979_v22 = vld [vmem:[%s11324_s3 + $0x28] sm:$0xf]  ;;  %v7236_v46 = vor.u32 %v8178_v15, %v7235_v62  ;;  %3188 = vmatpush.bf16.msra.mxu3 %v7364_v26  ;;  %v8146_v15 = vld [vmem:[%s11324_s3 + $0x134] sm:$0xf0] }
 0x240   : > { %2706 = vmatmul.bf16.gmra.mxu1 %v9564_v0  ;;  %v3640_v1 = vmax.f32 %v2843_v19, 0.0  ;;  %2795 = vmatmul.bf16.gmra.mxu2 %v9567_v48  ;;  %v6980_v9 = vor.u32 %v8114_v44, %v6979_v22  ;;  %v7107_v62 = vld [vmem:[%s11324_s3 + $0x128] sm:$0xf] }
 0x241   : > { %2884 = vmatmul.bf16.gmra.mxu3 %v9571_v4  ;;  %3099 = vmatpush.bf16.msra.mxu2 %v7236_v46  ;;  %v11587_v26 = vld [vmem:[#allocation45_spill] sm:$0xff] }
 0x242   : > { %v10063_v25 = vpack.c.bf16 %v3640_v1, %v3636_v50  ;;  %2921 = vmatpush.bf16.msra.mxu0 %v6980_v9 }
 0x243   : > { %v2756_v28 = vpop.f32.mrf.mxu2 }
 0x244   : > { %11584 = vst [vmem:[#allocation18_spill] sm:$0xff] %v10063_v25  ;;  %v2845_v19 = vpop.f32.mrf.mxu3  ;;  %v2757_v2 = vadd.f32 %v2756_v28, %v2668_v30  ;;  %v2580_v56 = vpop.f32.mrf.mxu0  ;;  %v7108_v30 = vor.u32 %v8146_v15, %v7107_v62 }
 0x245   : > { %v2669_v29 = vpop.f32.mrf.mxu1  ;;  %v2581_v32 = vadd.f32 %v2580_v56, %v10016_v39  ;;  %v11586_v56 = vld [vmem:[#allocation44_spill] sm:$0xff] }
 0x246   : > { %v2846_v50 = vadd.f32 %v2845_v19, %v2757_v2  ;;  %3010 = vmatpush.bf16.msra.mxu1 %v7108_v30  ;;  %v11585_v2 = vld [vmem:[#allocation43_spill] sm:$0xff] }
 0x247   : > { %v2670_v1 = vadd.f32 %v2669_v29, %v2581_v32  ;;  %v11588_v32 = vld [vmem:[#allocation46_spill] sm:$0xff] }
 0x248   : > { %v3644_v29 = vmax.f32 %v2846_v50, 0.0 }
 0x24b   : > { %v2758_v28 = vpop.f32.mrf.mxu2 }
 0x24c   : > { %v2847_v25 = vpop.f32.mrf.mxu3  ;;  %v2759_v22 = vadd.f32 %v2758_v28, %v2670_v1  ;;  %v2583_v44 = vpop.f32.mrf.mxu0 }
 0x24d   : > { %v2672_v37 = vpop.f32.mrf.mxu1  ;;  %v2584_v19 = vadd.f32 %v2583_v44, %v10016_v39 }
 0x24e   : > { %v2848_v46 = vadd.f32 %v2847_v25, %v2759_v22 }
 0x24f   : > { %v2673_v3 = vadd.f32 %v2672_v37, %v2584_v19  ;;  %2622 = vmatmul.bf16.gmra.mxu0 %v11585_v2 }
 0x250   : > { %2711 = vmatmul.bf16.gmra.mxu1 %v11586_v56  ;;  %v3648_v9 = vmax.f32 %v2848_v46, 0.0  ;;  %2800 = vmatmul.bf16.gmra.mxu2 %v11587_v26 }
 0x251   : > { %2889 = vmatmul.bf16.gmra.mxu3 %v11588_v32 }
 0x252   : > { %v10095_v62 = vpack.c.bf16 %v3648_v9, %v3644_v29  ;;  %v11590_v29 = vld [vmem:[#allocation48_spill] sm:$0xff]  ;;  %v11591_v9 = vld [vmem:[#allocation49_spill] sm:$0xff] }
 0x253   : > { %v2761_v15 = vpop.f32.mrf.mxu2 }
 0x254   : > { %11589 = vst [vmem:[#allocation19_spill] sm:$0xff] %v10095_v62  ;;  %v2850_v1 = vpop.f32.mrf.mxu3  ;;  %v2762_v30 = vadd.f32 %v2761_v15, %v2673_v3  ;;  %v2585_v28 = vpop.f32.mrf.mxu0  ;;  %v11592_v62 = vld [vmem:[#allocation50_spill] sm:$0xff] }
 0x255   : > { %v2674_v17 = vpop.f32.mrf.mxu1  ;;  %v2586_v25 = vadd.f32 %v2585_v28, %v10016_v39  ;;  %v11593_v28 = vld [vmem:[#allocation51_spill] sm:$0xff] }
 0x256   : > { %v2851_v22 = vadd.f32 %v2850_v1, %v2762_v30  ;;  %v7219_v1 = vld [vmem:[%s11324_s3 + $0x208] sm:$0xf] }
 0x257   : > { %v2675_v44 = vadd.f32 %v2674_v17, %v2586_v25 }
 0x258   : > { %v3652_v3 = vmax.f32 %v2851_v22, 0.0  ;;  %v8110_v22 = vld [vmem:[%s11324_s3 + $0x14] sm:$0xf0] }
 0x25b   : > { %v2763_v37 = vpop.f32.mrf.mxu2 }
 0x25c   : > { %v2852_v19 = vpop.f32.mrf.mxu3  ;;  %v2764_v56 = vadd.f32 %v2763_v37, %v2675_v44  ;;  %v2588_v50 = vpop.f32.mrf.mxu0  ;;  %v7347_v44 = vld [vmem:[%s11324_s3 + $0x308] sm:$0xf]  ;;  %v8206_v37 = vld [vmem:[%s11324_s3 + $0x314] sm:$0xf0] }
 0x25d   : > { %v2677_v46 = vpop.f32.mrf.mxu1  ;;  %v2589_v26 = vadd.f32 %v2588_v50, %v10016_v39 }
 0x25e   : > { %v2853_v2 = vadd.f32 %v2852_v19, %v2764_v56  ;;  %v8174_v56 = vld [vmem:[%s11324_s3 + $0x214] sm:$0xf0] }
 0x25f   : > { %v2678_v32 = vadd.f32 %v2677_v46, %v2589_v26  ;;  %2627 = vmatmul.bf16.gmra.mxu0 %v11590_v29  ;;  %v6963_v26 = vld [vmem:[%s11324_s3 + $0x8] sm:$0xf]  ;;  %v7220_v25 = vor.u32 %v8174_v56, %v7219_v1 }
 0x260   : > { %2716 = vmatmul.bf16.gmra.mxu1 %v11591_v9  ;;  %v3656_v15 = vmax.f32 %v2853_v2, 0.0  ;;  %2805 = vmatmul.bf16.gmra.mxu2 %v11592_v62  ;;  %v8142_v62 = vld [vmem:[%s11324_s3 + $0x114] sm:$0xf0] }
 0x261   : > { %2894 = vmatmul.bf16.gmra.mxu3 %v11593_v28  ;;  %3100 = vmatpush.bf16.msra.mxu2 %v7220_v25  ;;  %v7091_v28 = vld [vmem:[%s11324_s3 + $0x108] sm:$0xf] }
 0x262   : > { %v10103_v17 = vpack.c.bf16 %v3656_v15, %v3652_v3  ;;  %v6964_v3 = vor.u32 %v8110_v22, %v6963_v26  ;;  %v7348_v15 = vor.u32 %v8206_v37, %v7347_v44 }
 0x263   : > { %v2766_v30 = vpop.f32.mrf.mxu2 }
 0x264   : > { %11594 = vst [vmem:[#allocation20_spill] sm:$0xff] %v10103_v17  ;;  %v2855_v2 = vpop.f32.mrf.mxu3  ;;  %v2767_v19 = vadd.f32 %v2766_v30, %v2678_v32  ;;  %v2590_v50 = vpop.f32.mrf.mxu0  ;;  %2922 = vmatpush.bf16.msra.mxu0 %v6964_v3  ;;  %3189 = vmatpush.bf16.msra.mxu3 %v7348_v15  ;;  %v7092_v32 = vor.u32 %v8142_v62, %v7091_v28 }
 0x265   : > { %v2679_v46 = vpop.f32.mrf.mxu1  ;;  %v2591_v17 = vadd.f32 %v2590_v50, %v10016_v39 }
 0x266   : > { %v2856_v1 = vadd.f32 %v2855_v2, %v2767_v19  ;;  %3011 = vmatpush.bf16.msra.mxu1 %v7092_v32 }
 0x267   : > { %v2680_v56 = vadd.f32 %v2679_v46, %v2591_v17 }
 0x268   : > { %v3660_v17 = vmax.f32 %v2856_v1, 0.0 }
 0x26b   : > { %v2768_v30 = vpop.f32.mrf.mxu2 }
 0x26c   : > { %v2857_v9 = vpop.f32.mrf.mxu3  ;;  %v2769_v26 = vadd.f32 %v2768_v30, %v2680_v56  ;;  %v2593_v22 = vpop.f32.mrf.mxu0 }
 0x26d   : > { %v2682_v44 = vpop.f32.mrf.mxu1  ;;  %v2594_v2 = vadd.f32 %v2593_v22, %v10016_v39 }
 0x26e   : > { %v2858_v25 = vadd.f32 %v2857_v9, %v2769_v26 }
 0x26f   : > { %v2683_v37 = vadd.f32 %v2682_v44, %v2594_v2  ;;  %2632 = vmatmul.bf16.gmra.mxu0 %v9745_v51 }
 0x270   : > { %2721 = vmatmul.bf16.gmra.mxu1 %v9747_v40  ;;  %v3664_v19 = vmax.f32 %v2858_v25, 0.0  ;;  %2810 = vmatmul.bf16.gmra.mxu2 %v9750_v53 }
 0x271   : > { %2899 = vmatmul.bf16.gmra.mxu3 %v9752_v59 }
 0x272   : > { %v10135_v62 = vpack.c.bf16 %v3664_v19, %v3660_v17 }
 0x273   : > { %v2771_v28 = vpop.f32.mrf.mxu2 }
 0x274   : > { %11595 = vst [vmem:[#allocation21_spill] sm:$0xff] %v10135_v62  ;;  %v2860_v50 = vpop.f32.mrf.mxu3  ;;  %v2772_v46 = vadd.f32 %v2771_v28, %v2683_v37  ;;  %v2595_v3 = vpop.f32.mrf.mxu0  ;;  %v8200_v28 = vld [vmem:[%s11324_s3 + $0x2ec] sm:$0xf] }
 0x275   : > { %v2684_v15 = vpop.f32.mrf.mxu1  ;;  %v2596_v9 = vadd.f32 %v2595_v3, %v10016_v39 }
 0x276   : > { %v2861_v56 = vadd.f32 %v2860_v50, %v2772_v46  ;;  %v7333_v50 = vld [vmem:[%s11324_s3 + $0x2f8] sm:$0xf0]  ;;  %v8136_v46 = vld [vmem:[%s11324_s3 + $0xec] sm:$0xf] }
 0x277   : > { %v2685_v32 = vadd.f32 %v2684_v15, %v2596_v9  ;;  %v7336_v9 = vor.u32 %v8200_v28, %v7333_v50  ;;  %v8168_v28 = vld [vmem:[%s11324_s3 + $0x1ec] sm:$0xf]  ;;  %v7205_v50 = vld [vmem:[%s11324_s3 + $0x1f8] sm:$0xf0] }
 0x278   : > { %v3668_v37 = vmax.f32 %v2861_v56, 0.0  ;;  %v7077_v56 = vld [vmem:[%s11324_s3 + $0xf8] sm:$0xf0] }
 0x279   : > { %3449 = vmatpush.bf16.msrb.mxu2 %v7336_v9 }
 0x27b   : > { %v2773_v30 = vpop.f32.mrf.mxu2 }
 0x27c   : > { %v2862_v26 = vpop.f32.mrf.mxu3  ;;  %v2774_v22 = vadd.f32 %v2773_v30, %v2685_v32  ;;  %v2598_v1 = vpop.f32.mrf.mxu0  ;;  %v8232_v32 = vld [vmem:[%s11324_s3 + $0x3ec] sm:$0xf]  ;;  %v7461_v30 = vld [vmem:[%s11324_s3 + $0x3f8] sm:$0xf0] }
 0x27d   : > { %v2687_v44 = vpop.f32.mrf.mxu1  ;;  %v2599_v2 = vadd.f32 %v2598_v1, %v10016_v39 }
 0x27e   : > { %v2863_v25 = vadd.f32 %v2862_v26, %v2774_v22 }
 0x27f   : > { %v2688_v59 = vadd.f32 %v2687_v44, %v2599_v2  ;;  %2637 = vmatmul.bf16.gmra.mxu0 %v9786_v47  ;;  %v7080_v44 = vor.u32 %v8136_v46, %v7077_v56  ;;  %v7464_v2 = vor.u32 %v8232_v32, %v7461_v30 }
 0x280   : > { %2726 = vmatmul.bf16.gmra.mxu1 %v9788_v18  ;;  %v3672_v17 = vmax.f32 %v2863_v25, 0.0  ;;  %2815 = vmatmul.bf16.gmra.mxu2 %v9791_v58 }
 0x281   : > { %2904 = vmatmul.bf16.gmra.mxu3 %v9793_v24  ;;  %3271 = vmatpush.bf16.msrb.mxu0 %v7080_v44 }
 0x282   : > { %v10143_v19 = vpack.c.bf16 %v3672_v17, %v3668_v37  ;;  %3538 = vmatpush.bf16.msrb.mxu3 %v7464_v2 }
 0x283   : > { %v2776_v3 = vpop.f32.mrf.mxu2 }
 0x284   : > { %11596 = vst [vmem:[#allocation22_spill] sm:$0xff] %v10143_v19  ;;  %v2865_v15 = vpop.f32.mrf.mxu3  ;;  %v2777_v26 = vadd.f32 %v2776_v3, %v2688_v59  ;;  %v2600_v22 = vpop.f32.mrf.mxu0  ;;  %v7208_v59 = vor.u32 %v8168_v28, %v7205_v50 }
 0x285   : > { %v2689_v1 = vpop.f32.mrf.mxu1  ;;  %v2601_v25 = vadd.f32 %v2600_v22, %v10016_v39 }
 0x286   : > { %v2866_v37 = vadd.f32 %v2865_v15, %v2777_v26  ;;  %3360 = vmatpush.bf16.msrb.mxu1 %v7208_v59 }
 0x287   : > { %v2690_v17 = vadd.f32 %v2689_v1, %v2601_v25 }
 0x288   : > { %v3676_v26 = vmax.f32 %v2866_v37, 0.0 }
 0x28b   : > { %v2778_v3 = vpop.f32.mrf.mxu2 }
 0x28c   : > { %v2867_v19 = vpop.f32.mrf.mxu3  ;;  %v2779_v46 = vadd.f32 %v2778_v3, %v2690_v17  ;;  %v2603_v56 = vpop.f32.mrf.mxu0 }
 0x28d   : > { %v2692_v32 = vpop.f32.mrf.mxu1  ;;  %v2604_v15 = vadd.f32 %v2603_v56, %v10016_v39 }
 0x28e   : > { %v2868_v9 = vadd.f32 %v2867_v19, %v2779_v46 }
 0x28f   : > { %v2693_v30 = vadd.f32 %v2692_v32, %v2604_v15  ;;  %2642 = vmatmul.bf16.gmra.mxu0 %v9835_v7 }
 0x290   : > { %2731 = vmatmul.bf16.gmra.mxu1 %v9837_v41  ;;  %v3680_v22 = vmax.f32 %v2868_v9, 0.0  ;;  %2820 = vmatmul.bf16.gmra.mxu2 %v9839_v20 }
 0x291   : > { %2909 = vmatmul.bf16.gmra.mxu3 %v9841_v43 }
 0x292   : > { %v10175_v1 = vpack.c.bf16 %v3680_v22, %v3676_v26 }
 0x293   : > { %v2781_v44 = vpop.f32.mrf.mxu2 }
 0x294   : > { %11597 = vst [vmem:[#allocation23_spill] sm:$0xff] %v10175_v1  ;;  %v2870_v2 = vpop.f32.mrf.mxu3  ;;  %v2782_v25 = vadd.f32 %v2781_v44, %v2693_v30  ;;  %v2605_v17 = vpop.f32.mrf.mxu0  ;;  %v8196_v44 = vld [vmem:[%s11324_s3 + $0x2cc] sm:$0xf] }
 0x295   : > { %v2694_v28 = vpop.f32.mrf.mxu1  ;;  %v2606_v19 = vadd.f32 %v2605_v17, %v10016_v39 }
 0x296   : > { %v2871_v50 = vadd.f32 %v2870_v2, %v2782_v25  ;;  %v7317_v2 = vld [vmem:[%s11324_s3 + $0x2d8] sm:$0xf0]  ;;  %v8132_v25 = vld [vmem:[%s11324_s3 + $0xcc] sm:$0xf] }
 0x297   : > { %v2695_v59 = vadd.f32 %v2694_v28, %v2606_v19  ;;  %v7320_v19 = vor.u32 %v8196_v44, %v7317_v2  ;;  %v8164_v44 = vld [vmem:[%s11324_s3 + $0x1cc] sm:$0xf]  ;;  %v7189_v2 = vld [vmem:[%s11324_s3 + $0x1d8] sm:$0xf0] }
 0x298   : > { %v3684_v30 = vmax.f32 %v2871_v50, 0.0  ;;  %v7061_v50 = vld [vmem:[%s11324_s3 + $0xd8] sm:$0xf0] }
 0x299   : > { %3450 = vmatpush.bf16.msrb.mxu2 %v7320_v19 }
 0x29b   : > { %v2783_v3 = vpop.f32.mrf.mxu2 }
 0x29c   : > { %v2872_v46 = vpop.f32.mrf.mxu3  ;;  %v2784_v56 = vadd.f32 %v2783_v3, %v2695_v59  ;;  %v2608_v37 = vpop.f32.mrf.mxu0  ;;  %v8228_v59 = vld [vmem:[%s11324_s3 + $0x3cc] sm:$0xf]  ;;  %v7445_v3 = vld [vmem:[%s11324_s3 + $0x3d8] sm:$0xf0] }
 0x29d   : > { %v2697_v32 = vpop.f32.mrf.mxu1  ;;  %v2609_v15 = vadd.f32 %v2608_v37, %v10016_v39 }
 0x29e   : > { %v2873_v9 = vadd.f32 %v2872_v46, %v2784_v56 }
 0x29f   : > { %v2698_v62 = vadd.f32 %v2697_v32, %v2609_v15  ;;  %2923 = vmatmul.bf16.vlgmr.msra.gmra.mxu0 %v8998_v33  ;;  %v7064_v32 = vor.u32 %v8132_v25, %v7061_v50  ;;  %v7448_v15 = vor.u32 %v8228_v59, %v7445_v3 }
 0x2a0   : > { %3012 = vmatmul.bf16.vlgmr.msra.gmra.mxu1 %v9000_v34  ;;  %v3688_v26 = vmax.f32 %v2873_v9, 0.0  ;;  %3101 = vmatmul.bf16.vlgmr.msra.gmra.mxu2 %v9002_v35 }
 0x2a1   : > { %3190 = vmatmul.bf16.vlgmr.msra.gmra.mxu3 %v9004_v36  ;;  %3272 = vmatpush.bf16.msrb.mxu0 %v7064_v32 }
 0x2a2   : > { %v10183_v22 = vpack.c.bf16 %v3688_v26, %v3684_v30  ;;  %3539 = vmatpush.bf16.msrb.mxu3 %v7448_v15 }
 0x2a3   : > { %v2786_v17 = vpop.f32.mrf.mxu2 }
 0x2a4   : > { %11598 = vst [vmem:[#allocation24_spill] sm:$0xff] %v10183_v22  ;;  %v2875_v28 = vpop.f32.mrf.mxu3  ;;  %v2787_v46 = vadd.f32 %v2786_v17, %v2698_v62  ;;  %v2610_v56 = vpop.f32.mrf.mxu0  ;;  %v7192_v62 = vor.u32 %v8164_v44, %v7189_v2 }
 0x2a5   : > { %v2699_v37 = vpop.f32.mrf.mxu1  ;;  %v2611_v9 = vadd.f32 %v2610_v56, %v10016_v39 }
 0x2a6   : > { %v2876_v30 = vadd.f32 %v2875_v28, %v2787_v46  ;;  %3361 = vmatpush.bf16.msrb.mxu1 %v7192_v62 }
 0x2a7   : > { %v2700_v26 = vadd.f32 %v2699_v37, %v2611_v9 }
 0x2a8   : > { %v3692_v46 = vmax.f32 %v2876_v30, 0.0 }
 0x2ab   : > { %v2788_v17 = vpop.f32.mrf.mxu2 }
 0x2ac   : > { %v2877_v22 = vpop.f32.mrf.mxu3  ;;  %v2789_v25 = vadd.f32 %v2788_v17, %v2700_v26  ;;  %v2613_v50 = vpop.f32.mrf.mxu0 }
 0x2ad   : > { %v2702_v59 = vpop.f32.mrf.mxu1  ;;  %v2614_v28 = vadd.f32 %v2613_v50, %v10016_v39 }
 0x2ae   : > { %v2878_v19 = vadd.f32 %v2877_v22, %v2789_v25 }
 0x2af   : > { %v2703_v3 = vadd.f32 %v2702_v59, %v2614_v28  ;;  %2928 = vmatmul.bf16.gmra.mxu0 %v9068_v38 }
 0x2b0   : > { %3017 = vmatmul.bf16.gmra.mxu1 %v9070_v52  ;;  %v3696_v56 = vmax.f32 %v2878_v19, 0.0  ;;  %3106 = vmatmul.bf16.gmra.mxu2 %v9074_v54 }
 0x2b1   : > { %3195 = vmatmul.bf16.gmra.mxu3 %v11541_v49 }
 0x2b2   : > { %v10215_v37 = vpack.c.bf16 %v3696_v56, %v3692_v46 }
 0x2b3   : > { %v2791_v32 = vpop.f32.mrf.mxu2 }
 0x2b4   : > { %11599 = vst [vmem:[#allocation25_spill] sm:$0xff] %v10215_v37  ;;  %v2880_v15 = vpop.f32.mrf.mxu3  ;;  %v2792_v9 = vadd.f32 %v2791_v32, %v2703_v3  ;;  %v2615_v26 = vpop.f32.mrf.mxu0  ;;  %v8192_v32 = vld [vmem:[%s11324_s3 + $0x2ac] sm:$0xf] }
 0x2b5   : > { %v2704_v44 = vpop.f32.mrf.mxu1  ;;  %v2616_v22 = vadd.f32 %v2615_v26, %v10016_v39 }
 0x2b6   : > { %v2881_v2 = vadd.f32 %v2880_v15, %v2792_v9  ;;  %v7301_v15 = vld [vmem:[%s11324_s3 + $0x2b8] sm:$0xf0]  ;;  %v8128_v9 = vld [vmem:[%s11324_s3 + $0xac] sm:$0xf] }
 0x2b7   : > { %v2705_v62 = vadd.f32 %v2704_v44, %v2616_v22  ;;  %v7304_v22 = vor.u32 %v8192_v32, %v7301_v15  ;;  %v8160_v32 = vld [vmem:[%s11324_s3 + $0x1ac] sm:$0xf]  ;;  %v7173_v15 = vld [vmem:[%s11324_s3 + $0x1b8] sm:$0xf0] }
 0x2b8   : > { %v3700_v3 = vmax.f32 %v2881_v2, 0.0  ;;  %v7045_v2 = vld [vmem:[%s11324_s3 + $0xb8] sm:$0xf0] }
 0x2b9   : > { %3451 = vmatpush.bf16.msrb.mxu2 %v7304_v22 }
 0x2bb   : > { %v2793_v17 = vpop.f32.mrf.mxu2 }
 0x2bc   : > { %v2882_v25 = vpop.f32.mrf.mxu3  ;;  %v2794_v50 = vadd.f32 %v2793_v17, %v2705_v62  ;;  %v2618_v30 = vpop.f32.mrf.mxu0  ;;  %v8224_v62 = vld [vmem:[%s11324_s3 + $0x3ac] sm:$0xf]  ;;  %v7429_v17 = vld [vmem:[%s11324_s3 + $0x3b8] sm:$0xf0] }
 0x2bd   : > { %v2707_v59 = vpop.f32.mrf.mxu1  ;;  %v2619_v28 = vadd.f32 %v2618_v30, %v10016_v39 }
 0x2be   : > { %v2883_v19 = vadd.f32 %v2882_v25, %v2794_v50 }
 0x2bf   : > { %v2708_v1 = vadd.f32 %v2707_v59, %v2619_v28  ;;  %2933 = vmatmul.bf16.gmra.mxu0 %v11543_v57  ;;  %v7048_v59 = vor.u32 %v8128_v9, %v7045_v2  ;;  %v7432_v28 = vor.u32 %v8224_v62, %v7429_v17 }
 0x2c0   : > { %3022 = vmatmul.bf16.gmra.mxu1 %v11544_v55  ;;  %v3704_v46 = vmax.f32 %v2883_v19, 0.0  ;;  %3111 = vmatmul.bf16.gmra.mxu2 %v11545_v8 }
 0x2c1   : > { %3200 = vmatmul.bf16.gmra.mxu3 %v11546_v6  ;;  %3273 = vmatpush.bf16.msrb.mxu0 %v7048_v59 }
 0x2c2   : > { %v10223_v56 = vpack.c.bf16 %v3704_v46, %v3700_v3  ;;  %3540 = vmatpush.bf16.msrb.mxu3 %v7432_v28 }
 0x2c3   : > { %v2796_v26 = vpop.f32.mrf.mxu2 }
 0x2c4   : > { %11600 = vst [vmem:[#allocation26_spill] sm:$0xff] %v10223_v56  ;;  %v2885_v44 = vpop.f32.mrf.mxu3  ;;  %v2797_v25 = vadd.f32 %v2796_v26, %v2708_v1  ;;  %v2620_v50 = vpop.f32.mrf.mxu0  ;;  %v7176_v1 = vor.u32 %v8160_v32, %v7173_v15 }
 0x2c5   : > { %v2709_v30 = vpop.f32.mrf.mxu1  ;;  %v2621_v19 = vadd.f32 %v2620_v50, %v10016_v39 }
 0x2c6   : > { %v2886_v3 = vadd.f32 %v2885_v44, %v2797_v25  ;;  %3362 = vmatpush.bf16.msrb.mxu1 %v7176_v1 }
 0x2c7   : > { %v2710_v46 = vadd.f32 %v2709_v30, %v2621_v19 }
 0x2c8   : > { %v3708_v25 = vmax.f32 %v2886_v3, 0.0 }
 0x2cb   : > { %v2798_v26 = vpop.f32.mrf.mxu2 }
 0x2cc   : > { %v2887_v56 = vpop.f32.mrf.mxu3  ;;  %v2799_v9 = vadd.f32 %v2798_v26, %v2710_v46  ;;  %v2623_v2 = vpop.f32.mrf.mxu0 }
 0x2cd   : > { %v2712_v62 = vpop.f32.mrf.mxu1  ;;  %v2624_v44 = vadd.f32 %v2623_v2, %v10016_v39 }
 0x2ce   : > { %v2888_v22 = vadd.f32 %v2887_v56, %v2799_v9 }
 0x2cf   : > { %v2713_v17 = vadd.f32 %v2712_v62, %v2624_v44  ;;  %2938 = vmatmul.bf16.gmra.mxu0 %v11548_v5 }
 0x2d0   : > { %3027 = vmatmul.bf16.gmra.mxu1 %v11549_v45  ;;  %v3712_v50 = vmax.f32 %v2888_v22, 0.0  ;;  %3116 = vmatmul.bf16.gmra.mxu2 %v11550_v13 }
 0x2d1   : > { %3205 = vmatmul.bf16.gmra.mxu3 %v11551_v14 }
 0x2d2   : > { %v10255_v30 = vpack.c.bf16 %v3712_v50, %v3708_v25 }
 0x2d3   : > { %v2801_v59 = vpop.f32.mrf.mxu2 }
 0x2d4   : > { %11601 = vst [vmem:[#allocation27_spill] sm:$0xff] %v10255_v30  ;;  %v2890_v28 = vpop.f32.mrf.mxu3  ;;  %v2802_v19 = vadd.f32 %v2801_v59, %v2713_v17  ;;  %v2625_v46 = vpop.f32.mrf.mxu0  ;;  %v8188_v59 = vld [vmem:[%s11324_s3 + $0x28c] sm:$0xf] }
 0x2d5   : > { %v2714_v32 = vpop.f32.mrf.mxu1  ;;  %v2626_v56 = vadd.f32 %v2625_v46, %v10016_v39 }
 0x2d6   : > { %v2891_v15 = vadd.f32 %v2890_v28, %v2802_v19  ;;  %v7285_v28 = vld [vmem:[%s11324_s3 + $0x298] sm:$0xf0]  ;;  %v8124_v19 = vld [vmem:[%s11324_s3 + $0x8c] sm:$0xf] }
 0x2d7   : > { %v2715_v1 = vadd.f32 %v2714_v32, %v2626_v56  ;;  %v7288_v56 = vor.u32 %v8188_v59, %v7285_v28  ;;  %v8156_v59 = vld [vmem:[%s11324_s3 + $0x18c] sm:$0xf]  ;;  %v7157_v28 = vld [vmem:[%s11324_s3 + $0x198] sm:$0xf0] }
 0x2d8   : > { %v3716_v17 = vmax.f32 %v2891_v15, 0.0  ;;  %v7029_v15 = vld [vmem:[%s11324_s3 + $0x98] sm:$0xf0] }
 0x2d9   : > { %3452 = vmatpush.bf16.msrb.mxu2 %v7288_v56 }
 0x2db   : > { %v2803_v26 = vpop.f32.mrf.mxu2 }
 0x2dc   : > { %v2892_v9 = vpop.f32.mrf.mxu3  ;;  %v2804_v2 = vadd.f32 %v2803_v26, %v2715_v1  ;;  %v2628_v3 = vpop.f32.mrf.mxu0  ;;  %v8220_v1 = vld [vmem:[%s11324_s3 + $0x38c] sm:$0xf]  ;;  %v7413_v26 = vld [vmem:[%s11324_s3 + $0x398] sm:$0xf0] }
 0x2dd   : > { %v2717_v62 = vpop.f32.mrf.mxu1  ;;  %v2629_v44 = vadd.f32 %v2628_v3, %v10016_v39 }
 0x2de   : > { %v2893_v22 = vadd.f32 %v2892_v9, %v2804_v2 }
 0x2df   : > { %v2718_v37 = vadd.f32 %v2717_v62, %v2629_v44  ;;  %2943 = vmatmul.bf16.gmra.mxu0 %v11553_v63  ;;  %v7032_v62 = vor.u32 %v8124_v19, %v7029_v15  ;;  %v7416_v44 = vor.u32 %v8220_v1, %v7413_v26 }
 0x2e0   : > { %3032 = vmatmul.bf16.gmra.mxu1 %v11554_v60  ;;  %v3720_v25 = vmax.f32 %v2893_v22, 0.0  ;;  %3121 = vmatmul.bf16.gmra.mxu2 %v11555_v21 }
 0x2e1   : > { %3210 = vmatmul.bf16.gmra.mxu3 %v11556_v10  ;;  %3274 = vmatpush.bf16.msrb.mxu0 %v7032_v62 }
 0x2e2   : > { %v10263_v50 = vpack.c.bf16 %v3720_v25, %v3716_v17  ;;  %3541 = vmatpush.bf16.msrb.mxu3 %v7416_v44 }
 0x2e3   : > { %v2806_v46 = vpop.f32.mrf.mxu2 }
 0x2e4   : > { %11602 = vst [vmem:[#allocation48_spill] sm:$0xff] %v10263_v50  ;;  %v2895_v32 = vpop.f32.mrf.mxu3  ;;  %v2807_v9 = vadd.f32 %v2806_v46, %v2718_v37  ;;  %v2630_v2 = vpop.f32.mrf.mxu0  ;;  %v7160_v37 = vor.u32 %v8156_v59, %v7157_v28 }
 0x2e5   : > { %v2719_v3 = vpop.f32.mrf.mxu1  ;;  %v2631_v22 = vadd.f32 %v2630_v2, %v10016_v39 }
 0x2e6   : > { %v2896_v17 = vadd.f32 %v2895_v32, %v2807_v9  ;;  %3363 = vmatpush.bf16.msrb.mxu1 %v7160_v37 }
 0x2e7   : > { %v2720_v25 = vadd.f32 %v2719_v3, %v2631_v22 }
 0x2e8   : > { %v3724_v9 = vmax.f32 %v2896_v17, 0.0 }
 0x2eb   : > { %v2808_v46 = vpop.f32.mrf.mxu2 }
 0x2ec   : > { %v2897_v50 = vpop.f32.mrf.mxu3  ;;  %v2809_v19 = vadd.f32 %v2808_v46, %v2720_v25  ;;  %v2633_v15 = vpop.f32.mrf.mxu0 }
 0x2ed   : > { %v2722_v1 = vpop.f32.mrf.mxu1  ;;  %v2634_v32 = vadd.f32 %v2633_v15, %v10016_v39 }
 0x2ee   : > { %v2898_v56 = vadd.f32 %v2897_v50, %v2809_v19 }
 0x2ef   : > { %v2723_v26 = vadd.f32 %v2722_v1, %v2634_v32  ;;  %2948 = vmatmul.bf16.gmra.mxu0 %v11558_v11 }
 0x2f0   : > { %3037 = vmatmul.bf16.gmra.mxu1 %v11559_v12  ;;  %v3728_v2 = vmax.f32 %v2898_v56, 0.0  ;;  %3126 = vmatmul.bf16.gmra.mxu2 %v11560_v31 }
 0x2f1   : > { %3215 = vmatmul.bf16.gmra.mxu3 %v11561_v42 }
 0x2f2   : > { %v10295_v3 = vpack.c.bf16 %v3728_v2, %v3724_v9  ;;  %v11604_v2 = vld [vmem:[#allocation28_spill] sm:$0xff] }
 0x2f3   : > { %v2811_v62 = vpop.f32.mrf.mxu2 }
 0x2f4   : > { %11603 = vst [vmem:[#allocation62_spill] sm:$0xff] %v10295_v3  ;;  %v2900_v44 = vpop.f32.mrf.mxu3  ;;  %v2812_v22 = vadd.f32 %v2811_v62, %v2723_v26  ;;  %v2635_v25 = vpop.f32.mrf.mxu0 }
 0x2f5   : > { %v2724_v59 = vpop.f32.mrf.mxu1  ;;  %v2636_v50 = vadd.f32 %v2635_v25, %v10016_v39  ;;  %v8120_v25 = vld [vmem:[%s11324_s3 + $0x6c] sm:$0xf] }
 0x2f6   : > { %v2901_v28 = vadd.f32 %v2900_v44, %v2812_v22  ;;  %v8184_v44 = vld [vmem:[%s11324_s3 + $0x26c] sm:$0xf]  ;;  %v7269_v22 = vld [vmem:[%s11324_s3 + $0x278] sm:$0xf0] }
 0x2f7   : > { %v2725_v37 = vadd.f32 %v2724_v59, %v2636_v50 }
 0x2f8   : > { %v3732_v26 = vmax.f32 %v2901_v28, 0.0  ;;  %v7272_v28 = vor.u32 %v8184_v44, %v7269_v22  ;;  %v8152_v22 = vld [vmem:[%s11324_s3 + $0x16c] sm:$0xf] }
 0x2fa   : > { %3453 = vmatpush.bf16.msrb.mxu2 %v7272_v28 }
 0x2fb   : > { %v2813_v46 = vpop.f32.mrf.mxu2 }
 0x2fc   : > { %v2902_v19 = vpop.f32.mrf.mxu3  ;;  %v2814_v15 = vadd.f32 %v2813_v46, %v2725_v37  ;;  %v2638_v17 = vpop.f32.mrf.mxu0  ;;  %v7013_v37 = vld [vmem:[%s11324_s3 + $0x78] sm:$0xf0]  ;;  %v8216_v46 = vld [vmem:[%s11324_s3 + $0x36c] sm:$0xf] }
 0x2fd   : > { %v2727_v1 = vpop.f32.mrf.mxu1  ;;  %v2639_v32 = vadd.f32 %v2638_v17, %v10016_v39 }
 0x2fe   : > { %v2903_v56 = vadd.f32 %v2902_v19, %v2814_v15  ;;  %v7397_v19 = vld [vmem:[%s11324_s3 + $0x378] sm:$0xf0] }
 0x2ff   : > { %v2728_v30 = vadd.f32 %v2727_v1, %v2639_v32  ;;  %2953 = vmatmul.bf16.gmra.mxu0 %v11563_v16  ;;  %v7016_v32 = vor.u32 %v8120_v25, %v7013_v37 }
 0x300   : > { %3042 = vmatmul.bf16.gmra.mxu1 %v11564_v23  ;;  %v3736_v9 = vmax.f32 %v2903_v56, 0.0  ;;  %3131 = vmatmul.bf16.gmra.mxu2 %v11565_v27  ;;  %v7400_v56 = vor.u32 %v8216_v46, %v7397_v19 }
 0x301   : > { %3220 = vmatmul.bf16.gmra.mxu3 %v11604_v2  ;;  %3275 = vmatpush.bf16.msrb.mxu0 %v7016_v32 }
 0x302   : > { %v10303_v62 = vpack.c.bf16 %v3736_v9, %v3732_v26  ;;  %3542 = vmatpush.bf16.msrb.mxu3 %v7400_v56  ;;  %v11608_v56 = vld [vmem:[#allocation31_spill] sm:$0xff] }
 0x303   : > { %v2816_v59 = vpop.f32.mrf.mxu2 }
 0x304   : > { %11605 = vst [vmem:[#allocation63_spill] sm:$0xff] %v10303_v62  ;;  %v2905_v50 = vpop.f32.mrf.mxu3  ;;  %v2817_v15 = vadd.f32 %v2816_v59, %v2728_v30  ;;  %v2640_v17 = vpop.f32.mrf.mxu0  ;;  %v7141_v62 = vld [vmem:[%s11324_s3 + $0x178] sm:$0xf0] }
 0x305   : > { %v2729_v1 = vpop.f32.mrf.mxu1  ;;  %v2641_v26 = vadd.f32 %v2640_v17, %v10016_v39  ;;  %v7144_v30 = vor.u32 %v8152_v22, %v7141_v62  ;;  %v11607_v17 = vld [vmem:[#allocation30_spill] sm:$0xff] }
 0x306   : > { %v2906_v9 = vadd.f32 %v2905_v50, %v2817_v15  ;;  %v11606_v15 = vld [vmem:[#allocation29_spill] sm:$0xff] }
 0x307   : > { %v2730_v44 = vadd.f32 %v2729_v1, %v2641_v26  ;;  %3364 = vmatpush.bf16.msrb.mxu1 %v7144_v30  ;;  %v11609_v26 = vld [vmem:[#allocation32_spill] sm:$0xff] }
 0x308   : > { %v3740_v1 = vmax.f32 %v2906_v9, 0.0 }
 0x30b   : > { %v2818_v59 = vpop.f32.mrf.mxu2 }
 0x30c   : > { %v2907_v3 = vpop.f32.mrf.mxu3  ;;  %v2819_v25 = vadd.f32 %v2818_v59, %v2730_v44  ;;  %v2643_v37 = vpop.f32.mrf.mxu0 }
 0x30d   : > { %v2732_v46 = vpop.f32.mrf.mxu1  ;;  %v2644_v50 = vadd.f32 %v2643_v37, %v10016_v39 }
 0x30e   : > { %v2908_v28 = vadd.f32 %v2907_v3, %v2819_v25 }
 0x30f   : > { %v2733_v19 = vadd.f32 %v2732_v46, %v2644_v50  ;;  %2958 = vmatmul.bf16.gmra.mxu0 %v11606_v15  ;;  %v11611_v46 = vld [vmem:[#allocation15_spill] sm:$0xff] }
 0x310   : > { %3047 = vmatmul.bf16.gmra.mxu1 %v11607_v17  ;;  %v3744_v32 = vmax.f32 %v2908_v28, 0.0  ;;  %3136 = vmatmul.bf16.gmra.mxu2 %v11608_v56  ;;  %v10339_v50 = vperm.slane %v11611_v46, 2  ;;  %v8212_v46 = vld [vmem:[%s11324_s3 + $0x34c] sm:$0xf] }
 0x311   : > { %3225 = vmatmul.bf16.gmra.mxu3 %v11609_v26  ;;  %v11612_v26 = vld [vmem:[#allocation33_spill] sm:$0xff] }
 0x312   : > { %v10335_v62 = vpack.c.bf16 %v3744_v32, %v3740_v1 }
 0x313   : > { %v2821_v22 = vpop.f32.mrf.mxu2 }
 0x314   : > { %11610 = vst [vmem:[#allocation64_spill] sm:$0xff] %v10335_v62  ;;  %v2910_v44 = vpop.f32.mrf.mxu3  ;;  %v2822_v30 = vadd.f32 %v2821_v22, %v2733_v19  ;;  %v2645_v59 = vpop.f32.mrf.mxu0  ;;  %v11613_v19 = vld [vmem:[#allocation34_spill] sm:$0xff] }
 0x315   : > { %v2734_v2 = vpop.f32.mrf.mxu1  ;;  %v2646_v3 = vadd.f32 %v2645_v59, %v10016_v39  ;;  %v8180_v59 = vld [vmem:[%s11324_s3 + $0x24c] sm:$0xf] }
 0x316   : > { %v2911_v25 = vadd.f32 %v2910_v44, %v2822_v30  ;;  %v11614_v44 = vld [vmem:[#allocation35_spill] sm:$0xff] }
 0x317   : > { %v2735_v37 = vadd.f32 %v2734_v2, %v2646_v3  ;;  %v11615_v2 = vld [vmem:[#allocation36_spill] sm:$0xff] }
 0x318   : > { %v3748_v22 = vmax.f32 %v2911_v25, 0.0 }
 0x31b   : > { %v2823_v9 = vpop.f32.mrf.mxu2 }
 0x31c   : > { %v2912_v28 = vpop.f32.mrf.mxu3  ;;  %v2824_v17 = vadd.f32 %v2823_v9, %v2735_v37  ;;  %v2924_v56 = vpop.f32.mrf.mxu0  ;;  %v6997_v37 = vld [vmem:[%s11324_s3 + $0x58] sm:$0xf0] }
 0x31d   : > { %v3013_v15 = vpop.f32.mrf.mxu1  ;;  %v2925_v1 = vadd.f32 %v2924_v56, %v10339_v50  ;;  %v7381_v9 = vld [vmem:[%s11324_s3 + $0x358] sm:$0xf0] }
 0x31e   : > { %v2913_v32 = vadd.f32 %v2912_v28, %v2824_v17  ;;  %v8116_v17 = vld [vmem:[%s11324_s3 + $0x4c] sm:$0xf] }
 0x31f   : > { %v3014_v62 = vadd.f32 %v3013_v15, %v2925_v1  ;;  %2963 = vmatmul.bf16.gmra.mxu0 %v11612_v26  ;;  %v7253_v15 = vld [vmem:[%s11324_s3 + $0x258] sm:$0xf0] }
 0x320   : > { %3052 = vmatmul.bf16.gmra.mxu1 %v11613_v19  ;;  %v3752_v39 = vmax.f32 %v2913_v32, 0.0  ;;  %3141 = vmatmul.bf16.gmra.mxu2 %v11614_v44  ;;  %v7256_v25 = vor.u32 %v8180_v59, %v7253_v15  ;;  %v7125_v44 = vld [vmem:[%s11324_s3 + $0x158] sm:$0xf0] }
 0x321   : > { %3230 = vmatmul.bf16.gmra.mxu3 %v11615_v2  ;;  %v8148_v2 = vld [vmem:[%s11324_s3 + $0x14c] sm:$0xf] }
 0x322   : > { %v10346_v30 = vpack.c.bf16 %v3752_v39, %v3748_v22  ;;  %v7000_v22 = vor.u32 %v8116_v17, %v6997_v37  ;;  %v7384_v39 = vor.u32 %v8212_v46, %v7381_v9  ;;  %3454 = vmatpush.bf16.msrb.mxu2 %v7256_v25 }
 0x323   : > { %v3102_v56 = vpop.f32.mrf.mxu2 }
 0x324   : > { %11616 = vst [vmem:[#allocation15_spill] sm:$0xff] %v10346_v30  ;;  %v3191_v3 = vpop.f32.mrf.mxu3  ;;  %v3103_v28 = vadd.f32 %v3102_v56, %v3014_v62  ;;  %v2926_v1 = vpop.f32.mrf.mxu0  ;;  %3276 = vmatpush.bf16.msrb.mxu0 %v7000_v22  ;;  %3543 = vmatpush.bf16.msrb.mxu3 %v7384_v39  ;;  %v7128_v62 = vor.u32 %v8148_v2, %v7125_v44  ;;  %v11619_v22 = vld [vmem:[#allocation39_spill] sm:$0xff]  ;;  %v11620_v39 = vld [vmem:[#allocation40_spill] sm:$0xff] }
 0x325   : > { %v3015_v32 = vpop.f32.mrf.mxu1  ;;  %v2927_v30 = vadd.f32 %v2926_v1, %v10339_v50 }
 0x326   : > { %v3192_v59 = vadd.f32 %v3191_v3, %v3103_v28  ;;  %3365 = vmatpush.bf16.msrb.mxu1 %v7128_v62  ;;  %v11618_v28 = vld [vmem:[#allocation38_spill] sm:$0xff] }
 0x327   : > { %v3016_v15 = vadd.f32 %v3015_v32, %v2927_v30  ;;  %v11617_v30 = vld [vmem:[#allocation37_spill] sm:$0xff] }
 0x328   : > { %v3629_v1 = vmax.f32 %v3192_v59, 0.0 }
 0x32b   : > { %v3104_v56 = vpop.f32.mrf.mxu2 }
 0x32c   : > { %v3193_v19 = vpop.f32.mrf.mxu3  ;;  %v3105_v17 = vadd.f32 %v3104_v56, %v3016_v15  ;;  %v2929_v37 = vpop.f32.mrf.mxu0 }
 0x32d   : > { %v3018_v46 = vpop.f32.mrf.mxu1  ;;  %v2930_v3 = vadd.f32 %v2929_v37, %v10339_v50 }
 0x32e   : > { %v3194_v25 = vadd.f32 %v3193_v19, %v3105_v17 }
 0x32f   : > { %v3019_v9 = vadd.f32 %v3018_v46, %v2930_v3  ;;  %2968 = vmatmul.bf16.gmra.mxu0 %v11617_v30 }
 0x330   : > { %3057 = vmatmul.bf16.gmra.mxu1 %v11618_v28  ;;  %v3633_v32 = vmax.f32 %v3194_v25, 0.0  ;;  %3146 = vmatmul.bf16.gmra.mxu2 %v11619_v22 }
 0x331   : > { %3235 = vmatmul.bf16.gmra.mxu3 %v11620_v39 }
 0x332   : > { %v10378_v44 = vpack.c.bf16 %v3633_v32, %v3629_v1  ;;  %v8176_v32 = vld [vmem:[%s11324_s3 + $0x22c] sm:$0xf] }
 0x333   : > { %v3107_v2 = vpop.f32.mrf.mxu2 }
 0x334   : > { %11621 = vst [vmem:[#allocation65_spill] sm:$0xff] %v10378_v44  ;;  %v3196_v15 = vpop.f32.mrf.mxu3  ;;  %v3108_v62 = vadd.f32 %v3107_v2, %v3019_v9  ;;  %v2931_v56 = vpop.f32.mrf.mxu0 }
 0x335   : > { %v3020_v26 = vpop.f32.mrf.mxu1  ;;  %v2932_v19 = vadd.f32 %v2931_v56, %v10339_v50  ;;  %v8208_v56 = vld [vmem:[%s11324_s3 + $0x32c] sm:$0xf] }
 0x336   : > { %v3197_v17 = vadd.f32 %v3196_v15, %v3108_v62  ;;  %v6981_v62 = vld [vmem:[%s11324_s3 + $0x38] sm:$0xf0] }
 0x337   : > { %v3021_v37 = vadd.f32 %v3020_v26, %v2932_v19  ;;  %v7365_v19 = vld [vmem:[%s11324_s3 + $0x338] sm:$0xf0] }
 0x338   : > { %v3637_v9 = vmax.f32 %v3197_v17, 0.0 }
 0x33b   : > { %v3109_v46 = vpop.f32.mrf.mxu2 }
 0x33c   : > { %v3198_v3 = vpop.f32.mrf.mxu3  ;;  %v3110_v28 = vadd.f32 %v3109_v46, %v3021_v37  ;;  %v2934_v59 = vpop.f32.mrf.mxu0 }
 0x33d   : > { %v3023_v25 = vpop.f32.mrf.mxu1  ;;  %v2935_v22 = vadd.f32 %v2934_v59, %v10339_v50  ;;  %v7368_v59 = vor.u32 %v8208_v56, %v7365_v19 }
 0x33e   : > { %v3199_v30 = vadd.f32 %v3198_v3, %v3110_v28  ;;  %v7237_v28 = vld [vmem:[%s11324_s3 + $0x238] sm:$0xf0] }
 0x33f   : > { %v3024_v39 = vadd.f32 %v3023_v25, %v2935_v22  ;;  %2973 = vmatmul.bf16.gmra.mxu0 %v9562_v61  ;;  %v8112_v22 = vld [vmem:[%s11324_s3 + $0x2c] sm:$0xf]  ;;  %v7240_v15 = vor.u32 %v8176_v32, %v7237_v28  ;;  %3544 = vmatpush.bf16.msrb.mxu3 %v7368_v59  ;;  %v7109_v28 = vld [vmem:[%s11324_s3 + $0x138] sm:$0xf0] }
 0x340   : > { %3062 = vmatmul.bf16.gmra.mxu1 %v9564_v0  ;;  %v3641_v1 = vmax.f32 %v3199_v30, 0.0  ;;  %3151 = vmatmul.bf16.gmra.mxu2 %v9567_v48  ;;  %v6984_v3 = vor.u32 %v8112_v22, %v6981_v62  ;;  %v8144_v32 = vld [vmem:[%s11324_s3 + $0x12c] sm:$0xf] }
 0x341   : > { %3240 = vmatmul.bf16.gmra.mxu3 %v9571_v4  ;;  %3455 = vmatpush.bf16.msrb.mxu2 %v7240_v15  ;;  %v11625_v59 = vld [vmem:[#allocation45_spill] sm:$0xff] }
 0x342   : > { %v10386_v26 = vpack.c.bf16 %v3641_v1, %v3637_v9  ;;  %3277 = vmatpush.bf16.msrb.mxu0 %v6984_v3 }
 0x343   : > { %v3112_v2 = vpop.f32.mrf.mxu2 }
 0x344   : > { %11622 = vst [vmem:[#allocation66_spill] sm:$0xff] %v10386_v26  ;;  %v3201_v30 = vpop.f32.mrf.mxu3  ;;  %v3113_v17 = vadd.f32 %v3112_v2, %v3024_v39  ;;  %v2936_v37 = vpop.f32.mrf.mxu0  ;;  %v7112_v39 = vor.u32 %v8144_v32, %v7109_v28 }
 0x345   : > { %v3025_v46 = vpop.f32.mrf.mxu1  ;;  %v2937_v25 = vadd.f32 %v2936_v37, %v10339_v50  ;;  %v11624_v37 = vld [vmem:[#allocation44_spill] sm:$0xff] }
 0x346   : > { %v3202_v9 = vadd.f32 %v3201_v30, %v3113_v17  ;;  %3366 = vmatpush.bf16.msrb.mxu1 %v7112_v39  ;;  %v11623_v17 = vld [vmem:[#allocation43_spill] sm:$0xff] }
 0x347   : > { %v3026_v1 = vadd.f32 %v3025_v46, %v2937_v25  ;;  %v11626_v25 = vld [vmem:[#allocation46_spill] sm:$0xff] }
 0x348   : > { %v3645_v46 = vmax.f32 %v3202_v9, 0.0 }
 0x34b   : > { %v3114_v2 = vpop.f32.mrf.mxu2 }
 0x34c   : > { %v3203_v26 = vpop.f32.mrf.mxu3  ;;  %v3115_v22 = vadd.f32 %v3114_v2, %v3026_v1  ;;  %v2939_v62 = vpop.f32.mrf.mxu0 }
 0x34d   : > { %v3028_v56 = vpop.f32.mrf.mxu1  ;;  %v2940_v30 = vadd.f32 %v2939_v62, %v10339_v50 }
 0x34e   : > { %v3204_v15 = vadd.f32 %v3203_v26, %v3115_v22 }
 0x34f   : > { %v3029_v19 = vadd.f32 %v3028_v56, %v2940_v30  ;;  %2978 = vmatmul.bf16.gmra.mxu0 %v11623_v17 }
 0x350   : > { %3067 = vmatmul.bf16.gmra.mxu1 %v11624_v37  ;;  %v3649_v3 = vmax.f32 %v3204_v15, 0.0  ;;  %3156 = vmatmul.bf16.gmra.mxu2 %v11625_v59 }
 0x351   : > { %3245 = vmatmul.bf16.gmra.mxu3 %v11626_v25 }
 0x352   : > { %v10418_v32 = vpack.c.bf16 %v3649_v3, %v3645_v46  ;;  %v11628_v46 = vld [vmem:[#allocation49_spill] sm:$0xff] }
 0x353   : > { %v3117_v28 = vpop.f32.mrf.mxu2 }
 0x354   : > { %11627 = vst [vmem:[#allocation67_spill] sm:$0xff] %v10418_v32  ;;  %v3206_v1 = vpop.f32.mrf.mxu3  ;;  %v3118_v39 = vadd.f32 %v3117_v28, %v3029_v19  ;;  %v2941_v2 = vpop.f32.mrf.mxu0  ;;  %v11629_v28 = vld [vmem:[#allocation50_spill] sm:$0xff]  ;;  %v8140_v32 = vld [vmem:[%s11324_s3 + $0x10c] sm:$0xf] }
 0x355   : > { %v3030_v44 = vpop.f32.mrf.mxu1  ;;  %v2942_v26 = vadd.f32 %v2941_v2, %v10339_v50  ;;  %v11630_v2 = vld [vmem:[#allocation51_spill] sm:$0xff] }
 0x356   : > { %v3207_v22 = vadd.f32 %v3206_v1, %v3118_v39  ;;  %v8172_v1 = vld [vmem:[%s11324_s3 + $0x20c] sm:$0xf] }
 0x357   : > { %v3031_v62 = vadd.f32 %v3030_v44, %v2942_v26 }
 0x358   : > { %v3653_v19 = vmax.f32 %v3207_v22, 0.0  ;;  %v6965_v22 = vld [vmem:[%s11324_s3 + $0x18] sm:$0xf0] }
 0x35b   : > { %v3119_v56 = vpop.f32.mrf.mxu2 }
 0x35c   : > { %v3208_v30 = vpop.f32.mrf.mxu3  ;;  %v3120_v37 = vadd.f32 %v3119_v56, %v3031_v62  ;;  %v2944_v9 = vpop.f32.mrf.mxu0  ;;  %v8204_v62 = vld [vmem:[%s11324_s3 + $0x30c] sm:$0xf]  ;;  %v7349_v56 = vld [vmem:[%s11324_s3 + $0x318] sm:$0xf0] }
 0x35d   : > { %v3033_v15 = vpop.f32.mrf.mxu1  ;;  %v2945_v59 = vadd.f32 %v2944_v9, %v10339_v50 }
 0x35e   : > { %v3209_v17 = vadd.f32 %v3208_v30, %v3120_v37  ;;  %v7221_v37 = vld [vmem:[%s11324_s3 + $0x218] sm:$0xf0] }
 0x35f   : > { %v3034_v25 = vadd.f32 %v3033_v15, %v2945_v59  ;;  %2983 = vmatmul.bf16.gmra.mxu0 %v11590_v29  ;;  %v8108_v59 = vld [vmem:[%s11324_s3 + $0xc] sm:$0xf]  ;;  %v7224_v26 = vor.u32 %v8172_v1, %v7221_v37 }
 0x360   : > { %3072 = vmatmul.bf16.gmra.mxu1 %v11628_v46  ;;  %v3657_v3 = vmax.f32 %v3209_v17, 0.0  ;;  %3161 = vmatmul.bf16.gmra.mxu2 %v11629_v28 }
 0x361   : > { %3250 = vmatmul.bf16.gmra.mxu3 %v11630_v2  ;;  %3456 = vmatpush.bf16.msrb.mxu2 %v7224_v26  ;;  %v7093_v2 = vld [vmem:[%s11324_s3 + $0x118] sm:$0xf0] }
 0x362   : > { %v10426_v44 = vpack.c.bf16 %v3657_v3, %v3653_v19  ;;  %v6968_v19 = vor.u32 %v8108_v59, %v6965_v22  ;;  %v7352_v3 = vor.u32 %v8204_v62, %v7349_v56 }
 0x363   : > { %v3122_v39 = vpop.f32.mrf.mxu2 }
 0x364   : > { %11631 = vst [vmem:[#allocation49_spill] sm:$0xff] %v10426_v44  ;;  %v3211_v17 = vpop.f32.mrf.mxu3  ;;  %v3123_v30 = vadd.f32 %v3122_v39, %v3034_v25  ;;  %v2946_v9 = vpop.f32.mrf.mxu0  ;;  %3278 = vmatpush.bf16.msrb.mxu0 %v6968_v19  ;;  %3545 = vmatpush.bf16.msrb.mxu3 %v7352_v3  ;;  %v7096_v25 = vor.u32 %v8140_v32, %v7093_v2 }
 0x365   : > { %v3035_v15 = vpop.f32.mrf.mxu1  ;;  %v2947_v44 = vadd.f32 %v2946_v9, %v10339_v50  ;;  %v11632_v9 = vld [vmem:[#allocation54_spill] sm:$0xff] }
 0x366   : > { %v3212_v1 = vadd.f32 %v3211_v17, %v3123_v30  ;;  %3367 = vmatpush.bf16.msrb.mxu1 %v7096_v25 }
 0x367   : > { %v3036_v37 = vadd.f32 %v3035_v15, %v2947_v44 }
 0x368   : > { %v3661_v44 = vmax.f32 %v3212_v1, 0.0 }
 0x36b   : > { %v3124_v39 = vpop.f32.mrf.mxu2 }
 0x36c   : > { %v3213_v28 = vpop.f32.mrf.mxu3  ;;  %v3125_v59 = vadd.f32 %v3124_v39, %v3036_v37  ;;  %v2949_v22 = vpop.f32.mrf.mxu0 }
 0x36d   : > { %v3038_v62 = vpop.f32.mrf.mxu1  ;;  %v2950_v17 = vadd.f32 %v2949_v22, %v10339_v50 }
 0x36e   : > { %v3214_v26 = vadd.f32 %v3213_v28, %v3125_v59 }
 0x36f   : > { %v3039_v56 = vadd.f32 %v3038_v62, %v2950_v17  ;;  %2988 = vmatmul.bf16.gmra.mxu0 %v9745_v51 }
 0x370   : > { %3077 = vmatmul.bf16.gmra.mxu1 %v9747_v40  ;;  %v3665_v30 = vmax.f32 %v3214_v26, 0.0  ;;  %3166 = vmatmul.bf16.gmra.mxu2 %v9750_v53 }
 0x371   : > { %3255 = vmatmul.bf16.gmra.mxu3 %v11632_v9 }
 0x372   : > { %v10458_v32 = vpack.c.bf16 %v3665_v30, %v3661_v44 }
 0x373   : > { %v3127_v2 = vpop.f32.mrf.mxu2 }
 0x374   : > { %11633 = vst [vmem:[#allocation68_spill] sm:$0xff] %v10458_v32  ;;  %v3216_v15 = vpop.f32.mrf.mxu3  ;;  %v3128_v19 = vadd.f32 %v3127_v2, %v3039_v56  ;;  %v2951_v3 = vpop.f32.mrf.mxu0  ;;  %v7835_v2 = vld [vmem:[#allocation2 + $0x2e0] sm:$0xf] }
 0x375   : > { %v3040_v37 = vpop.f32.mrf.mxu1  ;;  %v2952_v28 = vadd.f32 %v2951_v3, %v10339_v50 }
 0x376   : > { %v3217_v25 = vadd.f32 %v3216_v15, %v3128_v19  ;;  %v8329_v15 = vld [vmem:[#allocation2 + $0x2ec] sm:$0xf0]  ;;  %v7579_v19 = vld [vmem:[#allocation2 + $0xe0] sm:$0xf] }
 0x377   : > { %v3041_v39 = vadd.f32 %v3040_v37, %v2952_v28  ;;  %v7836_v28 = vor.u32 %v8329_v15, %v7835_v2 }
 0x378   : > { %v3669_v56 = vmax.f32 %v3217_v25, 0.0 }
 0x379   : > { %4775 = vmatpush.bf16.msra.mxu2 %v7836_v28 }
 0x37b   : > { %v3129_v59 = vpop.f32.mrf.mxu2 }
 0x37c   : > { %v3218_v22 = vpop.f32.mrf.mxu3  ;;  %v3130_v62 = vadd.f32 %v3129_v59, %v3041_v39  ;;  %v2954_v1 = vpop.f32.mrf.mxu0  ;;  %v8265_v39 = vld [vmem:[#allocation2 + $0xec] sm:$0xf0]  ;;  %v7963_v59 = vld [vmem:[#allocation2 + $0x3e0] sm:$0xf] }
 0x37d   : > { %v3043_v17 = vpop.f32.mrf.mxu1  ;;  %v2955_v26 = vadd.f32 %v2954_v1, %v10339_v50  ;;  %v7580_v25 = vor.u32 %v8265_v39, %v7579_v19 }
 0x37e   : > { %v3219_v53 = vadd.f32 %v3218_v22, %v3130_v62  ;;  %v8361_v22 = vld [vmem:[#allocation2 + $0x3ec] sm:$0xf0] }
 0x37f   : > { %v3044_v9 = vadd.f32 %v3043_v17, %v2955_v26  ;;  %2993 = vmatmul.bf16.gmra.mxu0 %v9786_v47 }
 0x380   : > { %3082 = vmatmul.bf16.gmra.mxu1 %v9788_v18  ;;  %v3673_v44 = vmax.f32 %v3219_v53, 0.0  ;;  %3171 = vmatmul.bf16.gmra.mxu2 %v9791_v58  ;;  %v7964_v53 = vor.u32 %v8361_v22, %v7963_v59 }
 0x381   : > { %3260 = vmatmul.bf16.gmra.mxu3 %v9793_v24  ;;  %4597 = vmatpush.bf16.msra.mxu0 %v7580_v25 }
 0x382   : > { %v10466_v30 = vpack.c.bf16 %v3673_v44, %v3669_v56  ;;  %4864 = vmatpush.bf16.msra.mxu3 %v7964_v53  ;;  %v7707_v44 = vld [vmem:[#allocation2 + $0x1e0] sm:$0xf] }
 0x383   : > { %v3132_v3 = vpop.f32.mrf.mxu2 }
 0x384   : > { %11634 = vst [vmem:[#allocation69_spill] sm:$0xff] %v10466_v30  ;;  %v3221_v37 = vpop.f32.mrf.mxu3  ;;  %v3133_v62 = vadd.f32 %v3132_v3, %v3044_v9  ;;  %v2956_v1 = vpop.f32.mrf.mxu0  ;;  %v8297_v30 = vld [vmem:[#allocation2 + $0x1ec] sm:$0xf0] }
 0x385   : > { %v3045_v17 = vpop.f32.mrf.mxu1  ;;  %v2957_v26 = vadd.f32 %v2956_v1, %v10339_v50  ;;  %v7708_v24 = vor.u32 %v8297_v30, %v7707_v44 }
 0x386   : > { %v3222_v32 = vadd.f32 %v3221_v37, %v3133_v62 }
 0x387   : > { %v3046_v56 = vadd.f32 %v3045_v17, %v2957_v26  ;;  %4686 = vmatpush.bf16.msra.mxu1 %v7708_v24 }
 0x388   : > { %v3677_v37 = vmax.f32 %v3222_v32, 0.0 }
 0x38b   : > { %v3134_v58 = vpop.f32.mrf.mxu2 }
 0x38c   : > { %v3223_v2 = vpop.f32.mrf.mxu3  ;;  %v3135_v15 = vadd.f32 %v3134_v58, %v3046_v56  ;;  %v2959_v18 = vpop.f32.mrf.mxu0 }
 0x38d   : > { %v3048_v9 = vpop.f32.mrf.mxu1  ;;  %v2960_v3 = vadd.f32 %v2959_v18, %v10339_v50 }
 0x38e   : > { %v3224_v19 = vadd.f32 %v3223_v2, %v3135_v15 }
 0x38f   : > { %v3049_v39 = vadd.f32 %v3048_v9, %v2960_v3  ;;  %2998 = vmatmul.bf16.gmra.mxu0 %v9835_v7 }
 0x390   : > { %3087 = vmatmul.bf16.gmra.mxu1 %v9837_v41  ;;  %v3681_v28 = vmax.f32 %v3224_v19, 0.0  ;;  %3176 = vmatmul.bf16.gmra.mxu2 %v9839_v20 }
 0x391   : > { %3265 = vmatmul.bf16.gmra.mxu3 %v9841_v43 }
 0x392   : > { %v10474_v30 = vpack.c.bf16 %v3681_v28, %v3677_v37  ;;  %v8325_v37 = vld [vmem:[#allocation2 + $0x2cc] sm:$0xf0]  ;;  %v7563_v28 = vld [vmem:[#allocation2 + $0xc0] sm:$0xf] }
 0x393   : > { %v3137_v24 = vpop.f32.mrf.mxu2 }
 0x394   : > { %11635 = vst [vmem:[#allocation70_spill] sm:$0xff] %v10474_v30  ;;  %v3226_v58 = vpop.f32.mrf.mxu3  ;;  %v3138_v59 = vadd.f32 %v3137_v24, %v3049_v39  ;;  %v2961_v22 = vpop.f32.mrf.mxu0  ;;  %v7819_v39 = vld [vmem:[#allocation2 + $0x2c0] sm:$0xf] }
 0x395   : > { %v3050_v62 = vpop.f32.mrf.mxu1  ;;  %v2962_v18 = vadd.f32 %v2961_v22, %v10339_v50  ;;  %v8261_v22 = vld [vmem:[#allocation2 + $0xcc] sm:$0xf0] }
 0x396   : > { %v3227_v1 = vadd.f32 %v3226_v58, %v3138_v59  ;;  %v7820_v59 = vor.u32 %v8325_v37, %v7819_v39 }
 0x397   : > { %v3051_v17 = vadd.f32 %v3050_v62, %v2962_v18  ;;  %v7947_v62 = vld [vmem:[#allocation2 + $0x3c0] sm:$0xf]  ;;  %v8357_v18 = vld [vmem:[#allocation2 + $0x3cc] sm:$0xf0] }
 0x398   : > { %v3685_v9 = vmax.f32 %v3227_v1, 0.0  ;;  %v7564_v1 = vor.u32 %v8261_v22, %v7563_v28  ;;  %4776 = vmatpush.bf16.msra.mxu2 %v7820_v59 }
 0x39a   : > { %4598 = vmatpush.bf16.msra.mxu0 %v7564_v1 }
 0x39b   : > { %v3139_v25 = vpop.f32.mrf.mxu2 }
 0x39c   : > { %v3228_v53 = vpop.f32.mrf.mxu3  ;;  %v3140_v26 = vadd.f32 %v3139_v25, %v3051_v17  ;;  %v2964_v32 = vpop.f32.mrf.mxu0  ;;  %v7948_v25 = vor.u32 %v8357_v18, %v7947_v62 }
 0x39d   : > { %v3053_v56 = vpop.f32.mrf.mxu1  ;;  %v2965_v44 = vadd.f32 %v2964_v32, %v10339_v50  ;;  %v8293_v32 = vld [vmem:[#allocation2 + $0x1cc] sm:$0xf0] }
 0x39e   : > { %v3229_v2 = vadd.f32 %v3228_v53, %v3140_v26  ;;  %4865 = vmatpush.bf16.msra.mxu3 %v7948_v25  ;;  %v7691_v26 = vld [vmem:[#allocation2 + $0x1c0] sm:$0xf] }
 0x39f   : > { %v3054_v15 = vadd.f32 %v3053_v56, %v2965_v44  ;;  %3279 = vmatmul.bf16.vlgmr.msrb.gmra.mxu0 %v8998_v33  ;;  %v7692_v56 = vor.u32 %v8293_v32, %v7691_v26 }
 0x3a0   : > { %3368 = vmatmul.bf16.vlgmr.msrb.gmra.mxu1 %v9000_v34  ;;  %v3689_v3 = vmax.f32 %v3229_v2, 0.0  ;;  %3457 = vmatmul.bf16.vlgmr.msrb.gmra.mxu2 %v9002_v35 }
 0x3a1   : > { %3546 = vmatmul.bf16.vlgmr.msrb.gmra.mxu3 %v9004_v36  ;;  %4687 = vmatpush.bf16.msra.mxu1 %v7692_v56 }
 0x3a2   : > { %v10482_v19 = vpack.c.bf16 %v3689_v3, %v3685_v9 }
 0x3a3   : > { %v3142_v24 = vpop.f32.mrf.mxu2 }
 0x3a4   : > { %v3231_v58 = vpop.f32.mrf.mxu3  ;;  %v3143_v33 = vadd.f32 %v3142_v24, %v3054_v15  ;;  %v2966_v17 = vpop.f32.mrf.mxu0 }
 0x3a5   : > { %v3055_v34 = vpop.f32.mrf.mxu1  ;;  %v2967_v35 = vadd.f32 %v2966_v17, %v10339_v50 }
 0x3a6   : > { %v3232_v36 = vadd.f32 %v3231_v58, %v3143_v33 }
 0x3a7   : > { %v3056_v53 = vadd.f32 %v3055_v34, %v2967_v35 }
 0x3a8   : > { %v3693_v24 = vmax.f32 %v3232_v36, 0.0 }
 0x3ab   : > { %v3144_v44 = vpop.f32.mrf.mxu2 }
 0x3ac   : > { %v3233_v2 = vpop.f32.mrf.mxu3  ;;  %v3145_v9 = vadd.f32 %v3144_v44, %v3056_v53  ;;  %v2969_v3 = vpop.f32.mrf.mxu0 }
 0x3ad   : > { %v3058_v15 = vpop.f32.mrf.mxu1  ;;  %v2970_v39 = vadd.f32 %v2969_v3, %v10339_v50  ;;  %v7547_v3 = vld [vmem:[#allocation2 + $0xa0] sm:$0xf] }
 0x3ae   : > { %v3234_v37 = vadd.f32 %v3233_v2, %v3145_v9  ;;  %v7803_v2 = vld [vmem:[#allocation2 + $0x2a0] sm:$0xf]  ;;  %v8321_v9 = vld [vmem:[#allocation2 + $0x2ac] sm:$0xf0] }
 0x3af   : > { %v3059_v28 = vadd.f32 %v3058_v15, %v2970_v39  ;;  %3284 = vmatmul.bf16.gmra.mxu0 %v9068_v38 }
 0x3b0   : > { %3373 = vmatmul.bf16.gmra.mxu1 %v9070_v52  ;;  %v3697_v58 = vmax.f32 %v3234_v37, 0.0  ;;  %3462 = vmatmul.bf16.gmra.mxu2 %v9074_v54  ;;  %v7804_v37 = vor.u32 %v8321_v9, %v7803_v2 }
 0x3b1   : > { %3551 = vmatmul.bf16.gmra.mxu3 %v11541_v49 }
 0x3b2   : > { %v10490_v59 = vpack.c.bf16 %v3697_v58, %v3693_v24  ;;  %v7931_v24 = vld [vmem:[#allocation2 + $0x3a0] sm:$0xf]  ;;  %v8353_v58 = vld [vmem:[#allocation2 + $0x3ac] sm:$0xf0]  ;;  %4777 = vmatpush.bf16.msra.mxu2 %v7804_v37 }
 0x3b3   : > { %v3147_v22 = vpop.f32.mrf.mxu2 }
 0x3b4   : > { %11636 = vst [vmem:[#allocation71_spill] sm:$0xff] %v10490_v59  ;;  %v3236_v62 = vpop.f32.mrf.mxu3  ;;  %v3148_v18 = vadd.f32 %v3147_v22, %v3059_v28  ;;  %v2971_v33 = vpop.f32.mrf.mxu0  ;;  %v8257_v28 = vld [vmem:[#allocation2 + $0xac] sm:$0xf0] }
 0x3b5   : > { %v3060_v17 = vpop.f32.mrf.mxu1  ;;  %v2972_v34 = vadd.f32 %v2971_v33, %v10339_v50 }
 0x3b6   : > { %v3237_v1 = vadd.f32 %v3236_v62, %v3148_v18  ;;  %v7548_v62 = vor.u32 %v8257_v28, %v7547_v3  ;;  %v7932_v18 = vor.u32 %v8353_v58, %v7931_v24 }
 0x3b7   : > { %v3061_v25 = vadd.f32 %v3060_v17, %v2972_v34  ;;  %v7675_v17 = vld [vmem:[#allocation2 + $0x1a0] sm:$0xf]  ;;  %v8289_v34 = vld [vmem:[#allocation2 + $0x1ac] sm:$0xf0] }
 0x3b8   : > { %v3701_v32 = vmax.f32 %v3237_v1, 0.0  ;;  %4599 = vmatpush.bf16.msra.mxu0 %v7548_v62  ;;  %4866 = vmatpush.bf16.msra.mxu3 %v7932_v18  ;;  %v7676_v1 = vor.u32 %v8289_v34, %v7675_v17  ;;  %v7531_v17 = vld [vmem:[#allocation2 + $0x80] sm:$0xf] }
 0x3ba   : > { %4688 = vmatpush.bf16.msra.mxu1 %v7676_v1 }
 0x3bb   : > { %v3149_v38 = vpop.f32.mrf.mxu2 }
 0x3bc   : > { %v3238_v35 = vpop.f32.mrf.mxu3  ;;  %v3150_v52 = vadd.f32 %v3149_v38, %v3061_v25  ;;  %v2974_v36 = vpop.f32.mrf.mxu0 }
 0x3bd   : > { %v3063_v53 = vpop.f32.mrf.mxu1  ;;  %v2975_v54 = vadd.f32 %v2974_v36, %v10339_v50 }
 0x3be   : > { %v3239_v26 = vadd.f32 %v3238_v35, %v3150_v52 }
 0x3bf   : > { %v3064_v49 = vadd.f32 %v3063_v53, %v2975_v54  ;;  %3289 = vmatmul.bf16.gmra.mxu0 %v11543_v57 }
 0x3c0   : > { %3378 = vmatmul.bf16.gmra.mxu1 %v11544_v55  ;;  %v3705_v56 = vmax.f32 %v3239_v26, 0.0  ;;  %3467 = vmatmul.bf16.gmra.mxu2 %v11545_v8 }
 0x3c1   : > { %3556 = vmatmul.bf16.gmra.mxu3 %v11546_v6 }
 0x3c2   : > { %v10498_v44 = vpack.c.bf16 %v3705_v56, %v3701_v32 }
 0x3c3   : > { %v3152_v15 = vpop.f32.mrf.mxu2 }
 0x3c4   : > { %v3241_v39 = vpop.f32.mrf.mxu3  ;;  %v3153_v57 = vadd.f32 %v3152_v15, %v3064_v49  ;;  %v2976_v22 = vpop.f32.mrf.mxu0 }
 0x3c5   : > { %v3065_v55 = vpop.f32.mrf.mxu1  ;;  %v2977_v8 = vadd.f32 %v2976_v22, %v10339_v50 }
 0x3c6   : > { %v3242_v6 = vadd.f32 %v3241_v39, %v3153_v57 }
 0x3c7   : > { %v3066_v33 = vadd.f32 %v3065_v55, %v2977_v8 }
 0x3c8   : > { %v3709_v49 = vmax.f32 %v3242_v6, 0.0  ;;  %v7787_v6 = vld [vmem:[#allocation2 + $0x280] sm:$0xf] }
 0x3cb   : > { %v3154_v25 = vpop.f32.mrf.mxu2 }
 0x3cc   : > { %v3243_v38 = vpop.f32.mrf.mxu3  ;;  %v3155_v35 = vadd.f32 %v3154_v25, %v3066_v33  ;;  %v2979_v52 = vpop.f32.mrf.mxu0  ;;  %v8317_v33 = vld [vmem:[#allocation2 + $0x28c] sm:$0xf0] }
 0x3cd   : > { %v3068_v36 = vpop.f32.mrf.mxu1  ;;  %v2980_v53 = vadd.f32 %v2979_v52, %v10339_v50  ;;  %v7788_v25 = vor.u32 %v8317_v33, %v7787_v6  ;;  %v8349_v52 = vld [vmem:[#allocation2 + $0x38c] sm:$0xf0] }
 0x3ce   : > { %v3244_v54 = vadd.f32 %v3243_v38, %v3155_v35  ;;  %v8253_v38 = vld [vmem:[#allocation2 + $0x8c] sm:$0xf0]  ;;  %v7915_v35 = vld [vmem:[#allocation2 + $0x380] sm:$0xf] }
 0x3cf   : > { %v3069_v26 = vadd.f32 %v3068_v36, %v2980_v53  ;;  %3294 = vmatmul.bf16.gmra.mxu0 %v11548_v5  ;;  %v7532_v53 = vor.u32 %v8253_v38, %v7531_v17  ;;  %4778 = vmatpush.bf16.msra.mxu2 %v7788_v25 }
 0x3d0   : > { %3383 = vmatmul.bf16.gmra.mxu1 %v11549_v45  ;;  %v3713_v32 = vmax.f32 %v3244_v54, 0.0  ;;  %3472 = vmatmul.bf16.gmra.mxu2 %v11550_v13  ;;  %v7916_v54 = vor.u32 %v8349_v52, %v7915_v35  ;;  %v11639_v52 = vld [vmem:[#allocation28_spill] sm:$0xff] }
 0x3d1   : > { %3561 = vmatmul.bf16.gmra.mxu3 %v11551_v14  ;;  %4600 = vmatpush.bf16.msra.mxu0 %v7532_v53  ;;  %v7515_v53 = vld [vmem:[#allocation2 + $0x60] sm:$0xf] }
 0x3d2   : > { %v10506_v56 = vpack.c.bf16 %v3713_v32, %v3709_v49  ;;  %4867 = vmatpush.bf16.msra.mxu3 %v7916_v54  ;;  %v7659_v49 = vld [vmem:[#allocation2 + $0x180] sm:$0xf]  ;;  %v8285_v32 = vld [vmem:[#allocation2 + $0x18c] sm:$0xf0] }
 0x3d3   : > { %v3157_v2 = vpop.f32.mrf.mxu2 }
 0x3d4   : > { %11637 = vst [vmem:[#allocation72_spill] sm:$0xff] %v10506_v56  ;;  %v3246_v9 = vpop.f32.mrf.mxu3  ;;  %v3158_v3 = vadd.f32 %v3157_v2, %v3069_v26  ;;  %v2981_v15 = vpop.f32.mrf.mxu0  ;;  %v7660_v2 = vor.u32 %v8285_v32, %v7659_v49  ;;  %v7899_v49 = vld [vmem:[#allocation2 + $0x360] sm:$0xf]  ;;  %v8345_v32 = vld [vmem:[#allocation2 + $0x36c] sm:$0xf0] }
 0x3d5   : > { %v3070_v39 = vpop.f32.mrf.mxu1  ;;  %v2982_v37 = vadd.f32 %v2981_v15, %v10339_v50 }
 0x3d6   : > { %v3247_v28 = vadd.f32 %v3246_v9, %v3158_v3  ;;  %4689 = vmatpush.bf16.msra.mxu1 %v7660_v2 }
 0x3d7   : > { %v3071_v24 = vadd.f32 %v3070_v39, %v2982_v37 }
 0x3d8   : > { %v3717_v62 = vmax.f32 %v3247_v28, 0.0 }
 0x3db   : > { %v3159_v5 = vpop.f32.mrf.mxu2 }
 0x3dc   : > { %v3248_v58 = vpop.f32.mrf.mxu3  ;;  %v3160_v45 = vadd.f32 %v3159_v5, %v3071_v24  ;;  %v2984_v57 = vpop.f32.mrf.mxu0 }
 0x3dd   : > { %v3073_v22 = vpop.f32.mrf.mxu1  ;;  %v2985_v13 = vadd.f32 %v2984_v57, %v10339_v50 }
 0x3de   : > { %v3249_v55 = vadd.f32 %v3248_v58, %v3160_v45 }
 0x3df   : > { %v3074_v14 = vadd.f32 %v3073_v22, %v2985_v13  ;;  %3299 = vmatmul.bf16.gmra.mxu0 %v11553_v63 }
 0x3e0   : > { %3388 = vmatmul.bf16.gmra.mxu1 %v11554_v60  ;;  %v3721_v18 = vmax.f32 %v3249_v55, 0.0  ;;  %3477 = vmatmul.bf16.gmra.mxu2 %v11555_v21 }
 0x3e1   : > { %3566 = vmatmul.bf16.gmra.mxu3 %v11556_v10 }
 0x3e2   : > { %v10514_v8 = vpack.c.bf16 %v3721_v18, %v3717_v62 }
 0x3e3   : > { %v3162_v34 = vpop.f32.mrf.mxu2 }
 0x3e4   : > { %v3251_v1 = vpop.f32.mrf.mxu3  ;;  %v3163_v63 = vadd.f32 %v3162_v34, %v3074_v14  ;;  %v2986_v36 = vpop.f32.mrf.mxu0 }
 0x3e5   : > { %v3075_v60 = vpop.f32.mrf.mxu1  ;;  %v2987_v21 = vadd.f32 %v2986_v36, %v10339_v50  ;;  %v7771_v36 = vld [vmem:[#allocation2 + $0x260] sm:$0xf] }
 0x3e6   : > { %v3252_v10 = vadd.f32 %v3251_v1, %v3163_v63 }
 0x3e7   : > { %v3076_v26 = vadd.f32 %v3075_v60, %v2987_v21  ;;  %v8313_v60 = vld [vmem:[#allocation2 + $0x26c] sm:$0xf0] }
 0x3e8   : > { %v3725_v58 = vmax.f32 %v3252_v10, 0.0  ;;  %v7772_v10 = vor.u32 %v8313_v60, %v7771_v36  ;;  %v8470_v60 = vld [vmem:[%s11325_s4] sm:$0xf] }
 0x3ea   : > { %4779 = vmatpush.bf16.msra.mxu2 %v7772_v10 }
 0x3eb   : > { %v3164_v9 = vpop.f32.mrf.mxu2 }
 0x3ec   : > { %v3253_v3 = vpop.f32.mrf.mxu3  ;;  %v3165_v15 = vadd.f32 %v3164_v9, %v3076_v26  ;;  %v2989_v39 = vpop.f32.mrf.mxu0  ;;  %v8249_v26 = vld [vmem:[#allocation2 + $0x6c] sm:$0xf0] }
 0x3ed   : > { %v3078_v37 = vpop.f32.mrf.mxu1  ;;  %v2990_v28 = vadd.f32 %v2989_v39, %v10339_v50  ;;  %v7516_v9 = vor.u32 %v8249_v26, %v7515_v53  ;;  %v10544_v53 = vperm.slane %v8470_v60, 3 }
 0x3ee   : > { %v3254_v24 = vadd.f32 %v3253_v3, %v3165_v15  ;;  %v7900_v3 = vor.u32 %v8345_v32, %v7899_v49 }
 0x3ef   : > { %v3079_v5 = vadd.f32 %v3078_v37, %v2990_v28  ;;  %3304 = vmatmul.bf16.gmra.mxu0 %v11558_v11  ;;  %v7643_v37 = vld [vmem:[#allocation2 + $0x160] sm:$0xf]  ;;  %v8281_v28 = vld [vmem:[#allocation2 + $0x16c] sm:$0xf0] }
 0x3f0   : > { %3393 = vmatmul.bf16.gmra.mxu1 %v11559_v12  ;;  %v3729_v45 = vmax.f32 %v3254_v24, 0.0  ;;  %3482 = vmatmul.bf16.gmra.mxu2 %v11560_v31  ;;  %v7644_v24 = vor.u32 %v8281_v28, %v7643_v37  ;;  %v7755_v37 = vld [vmem:[#allocation2 + $0x240] sm:$0xf]  ;;  %v8309_v28 = vld [vmem:[#allocation2 + $0x24c] sm:$0xf0] }
 0x3f1   : > { %3571 = vmatmul.bf16.gmra.mxu3 %v11561_v42  ;;  %4601 = vmatpush.bf16.msra.mxu0 %v7516_v9 }
 0x3f2   : > { %v10522_v57 = vpack.c.bf16 %v3729_v45, %v3725_v58  ;;  %4868 = vmatpush.bf16.msra.mxu3 %v7900_v3  ;;  %4690 = vmatpush.bf16.msra.mxu1 %v7644_v24  ;;  %v7499_v24 = vld [vmem:[#allocation2 + $0x40] sm:$0xf] }
 0x3f3   : > { %v3167_v22 = vpop.f32.mrf.mxu2 }
 0x3f4   : > { %11638 = vst [vmem:[#allocation73_spill] sm:$0xff] %v10522_v57  ;;  %v3256_v13 = vpop.f32.mrf.mxu3  ;;  %v3168_v55 = vadd.f32 %v3167_v22, %v3079_v5  ;;  %v2991_v14 = vpop.f32.mrf.mxu0 }
 0x3f5   : > { %v3080_v62 = vpop.f32.mrf.mxu1  ;;  %v2992_v18 = vadd.f32 %v2991_v14, %v10339_v50 }
 0x3f6   : > { %v3257_v6 = vadd.f32 %v3256_v13, %v3168_v55 }
 0x3f7   : > { %v3081_v33 = vadd.f32 %v3080_v62, %v2992_v18  ;;  %v11640_v18 = vld [vmem:[#allocation29_spill] sm:$0xff] }
 0x3f8   : > { %v3733_v38 = vmax.f32 %v3257_v6, 0.0  ;;  %v11641_v6 = vld [vmem:[#allocation30_spill] sm:$0xff] }
 0x3fb   : > { %v3169_v11 = vpop.f32.mrf.mxu2 }
 0x3fc   : > { %v3258_v17 = vpop.f32.mrf.mxu3  ;;  %v3170_v12 = vadd.f32 %v3169_v11, %v3081_v33  ;;  %v2994_v34 = vpop.f32.mrf.mxu0 }
 0x3fd   : > { %v3083_v1 = vpop.f32.mrf.mxu1  ;;  %v2995_v31 = vadd.f32 %v2994_v34, %v10339_v50 }
 0x3fe   : > { %v3259_v25 = vadd.f32 %v3258_v17, %v3170_v12  ;;  %v11642_v17 = vld [vmem:[#allocation31_spill] sm:$0xff]  ;;  %v11643_v12 = vld [vmem:[#allocation32_spill] sm:$0xff] }
 0x3ff   : > { %v3084_v42 = vadd.f32 %v3083_v1, %v2995_v31  ;;  %3309 = vmatmul.bf16.gmra.mxu0 %v11563_v16 }
 0x400   : > { %3398 = vmatmul.bf16.gmra.mxu1 %v11564_v23  ;;  %v3737_v35 = vmax.f32 %v3259_v25, 0.0  ;;  %3487 = vmatmul.bf16.gmra.mxu2 %v11565_v27 }
 0x401   : > { %3576 = vmatmul.bf16.gmra.mxu3 %v11639_v52 }
 0x402   : > { %v10530_v63 = vpack.c.bf16 %v3737_v35, %v3733_v38 }
 0x403   : > { %v3172_v54 = vpop.f32.mrf.mxu2 }
 0x404   : > { %v3261_v21 = vpop.f32.mrf.mxu3  ;;  %v3173_v16 = vadd.f32 %v3172_v54, %v3084_v42  ;;  %v2996_v2 = vpop.f32.mrf.mxu0 }
 0x405   : > { %v3085_v23 = vpop.f32.mrf.mxu1  ;;  %v2997_v27 = vadd.f32 %v2996_v2, %v10339_v50 }
 0x406   : > { %v3262_v15 = vadd.f32 %v3261_v21, %v3173_v16 }
 0x407   : > { %v3086_v39 = vadd.f32 %v3085_v23, %v2997_v27  ;;  %v11645_v23 = vld [vmem:[#allocation33_spill] sm:$0xff]  ;;  %v11647_v27 = vld [vmem:[#allocation35_spill] sm:$0xff] }
 0x408   : > { %v3741_v33 = vmax.f32 %v3262_v15, 0.0  ;;  %v11648_v15 = vld [vmem:[#allocation36_spill] sm:$0xff] }
 0x40b   : > { %v3174_v5 = vpop.f32.mrf.mxu2 }
 0x40c   : > { %v3263_v58 = vpop.f32.mrf.mxu3  ;;  %v3175_v45 = vadd.f32 %v3174_v5, %v3086_v39  ;;  %v2999_v22 = vpop.f32.mrf.mxu0 }
 0x40d   : > { %v3088_v13 = vpop.f32.mrf.mxu1  ;;  %v3000_v55 = vadd.f32 %v2999_v22, %v10339_v50  ;;  %v8245_v22 = vld [vmem:[#allocation2 + $0x4c] sm:$0xf0] }
 0x40e   : > { %v3264_v14 = vadd.f32 %v3263_v58, %v3175_v45  ;;  %v7756_v45 = vor.u32 %v8309_v28, %v7755_v37 }
 0x40f   : > { %v3089_v62 = vadd.f32 %v3088_v13, %v3000_v55  ;;  %3314 = vmatmul.bf16.gmra.mxu0 %v11640_v18  ;;  %v7883_v13 = vld [vmem:[#allocation2 + $0x340] sm:$0xf]  ;;  %v8341_v55 = vld [vmem:[#allocation2 + $0x34c] sm:$0xf0] }
 0x410   : > { %3403 = vmatmul.bf16.gmra.mxu1 %v11641_v6  ;;  %v3745_v11 = vmax.f32 %v3264_v14, 0.0  ;;  %3492 = vmatmul.bf16.gmra.mxu2 %v11642_v17  ;;  %v7500_v6 = vor.u32 %v8245_v22, %v7499_v24 }
 0x411   : > { %3581 = vmatmul.bf16.gmra.mxu3 %v11643_v12  ;;  %4780 = vmatpush.bf16.msra.mxu2 %v7756_v45 }
 0x412   : > { %v10538_v34 = vpack.c.bf16 %v3745_v11, %v3741_v33  ;;  %v7884_v33 = vor.u32 %v8341_v55, %v7883_v13  ;;  %4602 = vmatpush.bf16.msra.mxu0 %v7500_v6 }
 0x413   : > { %v3177_v1 = vpop.f32.mrf.mxu2 }
 0x414   : > { %11644 = vst [vmem:[#allocation28_spill] sm:$0xff] %v10538_v34  ;;  %v3266_v31 = vpop.f32.mrf.mxu3  ;;  %v3178_v25 = vadd.f32 %v3177_v1, %v3089_v62  ;;  %v3001_v42 = vpop.f32.mrf.mxu0  ;;  %4869 = vmatpush.bf16.msra.mxu3 %v7884_v33  ;;  %v7627_v1 = vld [vmem:[#allocation2 + $0x140] sm:$0xf] }
 0x415   : > { %v3090_v38 = vpop.f32.mrf.mxu1  ;;  %v3002_v35 = vadd.f32 %v3001_v42, %v10339_v50  ;;  %v11646_v50 = vld [vmem:[#allocation34_spill] sm:$0xff] }
 0x416   : > { %v3267_v52 = vadd.f32 %v3266_v31, %v3178_v25  ;;  %v8277_v31 = vld [vmem:[#allocation2 + $0x14c] sm:$0xf0] }
 0x417   : > { %v3091_v36 = vadd.f32 %v3090_v38, %v3002_v35  ;;  %v7628_v25 = vor.u32 %v8277_v31, %v7627_v1 }
 0x418   : > { %v3749_v9 = vmax.f32 %v3267_v52, 0.0 }
 0x419   : > { %4691 = vmatpush.bf16.msra.mxu1 %v7628_v25 }
 0x41b   : > { %v3179_v54 = vpop.f32.mrf.mxu2 }
 0x41c   : > { %v3268_v21 = vpop.f32.mrf.mxu3  ;;  %v3180_v10 = vadd.f32 %v3179_v54, %v3091_v36  ;;  %v3280_v26 = vpop.f32.mrf.mxu0 }
 0x41d   : > { %v3369_v49 = vpop.f32.mrf.mxu1  ;;  %v3281_v32 = vadd.f32 %v3280_v26, %v10544_v53  ;;  %v11650_v26 = vld [vmem:[#allocation38_spill] sm:$0xff] }
 0x41e   : > { %v3269_v16 = vadd.f32 %v3268_v21, %v3180_v10  ;;  %v11649_v10 = vld [vmem:[#allocation37_spill] sm:$0xff] }
 0x41f   : > { %v3370_v2 = vadd.f32 %v3369_v49, %v3281_v32  ;;  %3319 = vmatmul.bf16.gmra.mxu0 %v11645_v23 }
 0x420   : > { %3408 = vmatmul.bf16.gmra.mxu1 %v11646_v50  ;;  %v3753_v3 = vmax.f32 %v3269_v16, 0.0  ;;  %3497 = vmatmul.bf16.gmra.mxu2 %v11647_v27  ;;  %v11651_v16 = vld [vmem:[#allocation39_spill] sm:$0xff] }
 0x421   : > { %3586 = vmatmul.bf16.gmra.mxu3 %v11648_v15 }
 0x422   : > { %v10551_v39 = vpack.c.bf16 %v3753_v3, %v3749_v9 }
 0x423   : > { %v3458_v5 = vpop.f32.mrf.mxu2 }
 0x424   : > { %v3547_v58 = vpop.f32.mrf.mxu3  ;;  %v3459_v14 = vadd.f32 %v3458_v5, %v3370_v2  ;;  %v3282_v62 = vpop.f32.mrf.mxu0  ;;  %v11652_v2 = vld [vmem:[#allocation40_spill] sm:$0xff] }
 0x425   : > { %v3371_v18 = vpop.f32.mrf.mxu1  ;;  %v3283_v11 = vadd.f32 %v3282_v62, %v10544_v53 }
 0x426   : > { %v3548_v17 = vadd.f32 %v3547_v58, %v3459_v14 }
 0x427   : > { %v3372_v12 = vadd.f32 %v3371_v18, %v3283_v11  ;;  %v7739_v11 = vld [vmem:[#allocation2 + $0x220] sm:$0xf] }
 0x428   : > { %v3630_v49 = vmax.f32 %v3548_v17, 0.0  ;;  %v8305_v17 = vld [vmem:[#allocation2 + $0x22c] sm:$0xf0] }
 0x429   : > { %v7740_v25 = vor.u32 %v8305_v17, %v7739_v11 }
 0x42b   : > { %v3460_v42 = vpop.f32.mrf.mxu2  ;;  %4781 = vmatpush.bf16.msra.mxu2 %v7740_v25 }
 0x42c   : > { %v3549_v38 = vpop.f32.mrf.mxu3  ;;  %v3461_v35 = vadd.f32 %v3460_v42, %v3372_v12  ;;  %v3285_v52 = vpop.f32.mrf.mxu0  ;;  %v7483_v12 = vld [vmem:[#allocation2 + $0x20] sm:$0xf]  ;;  %v8241_v42 = vld [vmem:[#allocation2 + $0x2c] sm:$0xf0] }
 0x42d   : > { %v3374_v36 = vpop.f32.mrf.mxu1  ;;  %v3286_v60 = vadd.f32 %v3285_v52, %v10544_v53 }
 0x42e   : > { %v3550_v54 = vadd.f32 %v3549_v38, %v3461_v35  ;;  %v7867_v38 = vld [vmem:[#allocation2 + $0x320] sm:$0xf]  ;;  %v8337_v35 = vld [vmem:[#allocation2 + $0x32c] sm:$0xf0] }
 0x42f   : > { %v3375_v21 = vadd.f32 %v3374_v36, %v3286_v60  ;;  %3324 = vmatmul.bf16.gmra.mxu0 %v11649_v10  ;;  %v7484_v36 = vor.u32 %v8241_v42, %v7483_v12  ;;  %v7868_v60 = vor.u32 %v8337_v35, %v7867_v38  ;;  %v8273_v10 = vld [vmem:[#allocation2 + $0x12c] sm:$0xf0] }
 0x430   : > { %3413 = vmatmul.bf16.gmra.mxu1 %v11650_v26  ;;  %v3634_v32 = vmax.f32 %v3550_v54, 0.0  ;;  %3502 = vmatmul.bf16.gmra.mxu2 %v11651_v16 }
 0x431   : > { %3591 = vmatmul.bf16.gmra.mxu3 %v11652_v2  ;;  %4603 = vmatpush.bf16.msra.mxu0 %v7484_v36  ;;  %v11659_v36 = vld [vmem:[#allocation51_spill] sm:$0xff] }
 0x432   : > { %v10559_v23 = vpack.c.bf16 %v3634_v32, %v3630_v49  ;;  %4870 = vmatpush.bf16.msra.mxu3 %v7868_v60 }
 0x433   : > { %v3463_v50 = vpop.f32.mrf.mxu2 }
 0x434   : > { %11653 = vst [vmem:[#allocation29_spill] sm:$0xff] %v10559_v23  ;;  %v3552_v9 = vpop.f32.mrf.mxu3  ;;  %v3464_v3 = vadd.f32 %v3463_v50, %v3375_v21  ;;  %v3287_v27 = vpop.f32.mrf.mxu0  ;;  %v7611_v21 = vld [vmem:[#allocation2 + $0x120] sm:$0xf] }
 0x435   : > { %v3376_v15 = vpop.f32.mrf.mxu1  ;;  %v3288_v37 = vadd.f32 %v3287_v27, %v10544_v53  ;;  %v7612_v26 = vor.u32 %v8273_v10, %v7611_v21 }
 0x436   : > { %v3553_v28 = vadd.f32 %v3552_v9, %v3464_v3 }
 0x437   : > { %v3377_v24 = vadd.f32 %v3376_v15, %v3288_v37  ;;  %4692 = vmatpush.bf16.msra.mxu1 %v7612_v26  ;;  %v11654_v15 = vld [vmem:[#allocation43_spill] sm:$0xff]  ;;  %v11655_v37 = vld [vmem:[#allocation44_spill] sm:$0xff] }
 0x438   : > { %v3638_v18 = vmax.f32 %v3553_v28, 0.0 }
 0x43b   : > { %v3465_v5 = vpop.f32.mrf.mxu2 }
 0x43c   : > { %v3554_v58 = vpop.f32.mrf.mxu3  ;;  %v3466_v45 = vadd.f32 %v3465_v5, %v3377_v24  ;;  %v3290_v22 = vpop.f32.mrf.mxu0  ;;  %v11656_v5 = vld [vmem:[#allocation45_spill] sm:$0xff] }
 0x43d   : > { %v3379_v13 = vpop.f32.mrf.mxu1  ;;  %v3291_v55 = vadd.f32 %v3290_v22, %v10544_v53 }
 0x43e   : > { %v3555_v14 = vadd.f32 %v3554_v58, %v3466_v45  ;;  %v11657_v58 = vld [vmem:[#allocation46_spill] sm:$0xff] }
 0x43f   : > { %v3380_v62 = vadd.f32 %v3379_v13, %v3291_v55  ;;  %3329 = vmatmul.bf16.gmra.mxu0 %v9562_v61 }
 0x440   : > { %3418 = vmatmul.bf16.gmra.mxu1 %v9564_v0  ;;  %v3642_v6 = vmax.f32 %v3555_v14, 0.0  ;;  %3507 = vmatmul.bf16.gmra.mxu2 %v9567_v48 }
 0x441   : > { %3596 = vmatmul.bf16.gmra.mxu3 %v9571_v4 }
 0x442   : > { %v10567_v33 = vpack.c.bf16 %v3642_v6, %v3638_v18 }
 0x443   : > { %v3468_v1 = vpop.f32.mrf.mxu2 }
 0x444   : > { %v3557_v31 = vpop.f32.mrf.mxu3  ;;  %v3469_v61 = vadd.f32 %v3468_v1, %v3380_v62  ;;  %v3292_v52 = vpop.f32.mrf.mxu0 }
 0x445   : > { %v3381_v0 = vpop.f32.mrf.mxu1  ;;  %v3293_v48 = vadd.f32 %v3292_v52, %v10544_v53 }
 0x446   : > { %v3558_v4 = vadd.f32 %v3557_v31, %v3469_v61 }
 0x447   : > { %v3382_v54 = vadd.f32 %v3381_v0, %v3293_v48  ;;  %v11658_v0 = vld [vmem:[#allocation50_spill] sm:$0xff]  ;;  %v7723_v48 = vld [vmem:[#allocation2 + $0x200] sm:$0xf] }
 0x448   : > { %v3646_v28 = vmax.f32 %v3558_v4, 0.0  ;;  %v8301_v4 = vld [vmem:[#allocation2 + $0x20c] sm:$0xf0] }
 0x449   : > { %v7724_v26 = vor.u32 %v8301_v4, %v7723_v48 }
 0x44b   : > { %v3470_v49 = vpop.f32.mrf.mxu2  ;;  %4782 = vmatpush.bf16.msra.mxu2 %v7724_v26  ;;  %v11662_v26 = vld [vmem:[#allocation56_spill] sm:$0xff] }
 0x44c   : > { %v3559_v32 = vpop.f32.mrf.mxu3  ;;  %v3471_v16 = vadd.f32 %v3470_v49, %v3382_v54  ;;  %v3295_v2 = vpop.f32.mrf.mxu0  ;;  %v7467_v54 = vld [vmem:[#allocation2] sm:$0xf]  ;;  %v8237_v49 = vld [vmem:[#allocation2 + $0xc] sm:$0xf0] }
 0x44d   : > { %v3384_v50 = vpop.f32.mrf.mxu1  ;;  %v3296_v9 = vadd.f32 %v3295_v2, %v10544_v53 }
 0x44e   : > { %v3560_v3 = vadd.f32 %v3559_v32, %v3471_v16  ;;  %v7851_v32 = vld [vmem:[#allocation2 + $0x300] sm:$0xf]  ;;  %v8333_v16 = vld [vmem:[#allocation2 + $0x30c] sm:$0xf0] }
 0x44f   : > { %v3385_v27 = vadd.f32 %v3384_v50, %v3296_v9  ;;  %3334 = vmatmul.bf16.gmra.mxu0 %v11654_v15  ;;  %v7468_v50 = vor.u32 %v8237_v49, %v7467_v54  ;;  %v7852_v9 = vor.u32 %v8333_v16, %v7851_v32  ;;  %v11663_v16 = vld [vmem:[#allocation57_spill] sm:$0xff] }
 0x450   : > { %3423 = vmatmul.bf16.gmra.mxu1 %v11655_v37  ;;  %v3650_v24 = vmax.f32 %v3560_v3, 0.0  ;;  %3512 = vmatmul.bf16.gmra.mxu2 %v11656_v5  ;;  %v7595_v37 = vld [vmem:[#allocation2 + $0x100] sm:$0xf] }
 0x451   : > { %3601 = vmatmul.bf16.gmra.mxu3 %v11657_v58  ;;  %4604 = vmatpush.bf16.msra.mxu0 %v7468_v50  ;;  %v7837_v50 = vld [vmem:[#allocation2 + $0x2f0] sm:$0xf0] }
 0x452   : > { %v10575_v45 = vpack.c.bf16 %v3650_v24, %v3646_v28  ;;  %4871 = vmatpush.bf16.msra.mxu3 %v7852_v9  ;;  %v8269_v28 = vld [vmem:[#allocation2 + $0x10c] sm:$0xf0]  ;;  %v8263_v9 = vld [vmem:[#allocation2 + $0xe4] sm:$0xf] }
 0x453   : > { %v3473_v22 = vpop.f32.mrf.mxu2  ;;  %v7596_v24 = vor.u32 %v8269_v28, %v7595_v37  ;;  %v7581_v37 = vld [vmem:[#allocation2 + $0xf0] sm:$0xf0]  ;;  %v8359_v28 = vld [vmem:[#allocation2 + $0x3e4] sm:$0xf] }
 0x454   : > { %v3562_v13 = vpop.f32.mrf.mxu3  ;;  %v3474_v55 = vadd.f32 %v3473_v22, %v3385_v27  ;;  %v3297_v14 = vpop.f32.mrf.mxu0 }
 0x455   : > { %v3386_v62 = vpop.f32.mrf.mxu1  ;;  %v3298_v18 = vadd.f32 %v3297_v14, %v10544_v53  ;;  %4693 = vmatpush.bf16.msra.mxu1 %v7596_v24  ;;  %v7965_v24 = vld [vmem:[#allocation2 + $0x3f0] sm:$0xf0] }
 0x456   : > { %v3563_v6 = vadd.f32 %v3562_v13, %v3474_v55 }
 0x457   : > { %v3387_v11 = vadd.f32 %v3386_v62, %v3298_v18 }
 0x458   : > { %v3654_v61 = vmax.f32 %v3563_v6, 0.0 }
 0x45b   : > { %v3475_v17 = vpop.f32.mrf.mxu2 }
 0x45c   : > { %v3564_v12 = vpop.f32.mrf.mxu3  ;;  %v3476_v1 = vadd.f32 %v3475_v17, %v3387_v11  ;;  %v3300_v31 = vpop.f32.mrf.mxu0  ;;  %v11660_v17 = vld [vmem:[#allocation53_spill] sm:$0xff] }
 0x45d   : > { %v3389_v25 = vpop.f32.mrf.mxu1  ;;  %v3301_v42 = vadd.f32 %v3300_v31, %v10544_v53 }
 0x45e   : > { %v3565_v38 = vadd.f32 %v3564_v12, %v3476_v1  ;;  %v11661_v12 = vld [vmem:[#allocation54_spill] sm:$0xff] }
 0x45f   : > { %v3390_v35 = vadd.f32 %v3389_v25, %v3301_v42  ;;  %3339 = vmatmul.bf16.gmra.mxu0 %v11590_v29 }
 0x460   : > { %3428 = vmatmul.bf16.gmra.mxu1 %v11628_v46  ;;  %v3658_v52 = vmax.f32 %v3565_v38, 0.0  ;;  %3517 = vmatmul.bf16.gmra.mxu2 %v11658_v0 }
 0x461   : > { %3606 = vmatmul.bf16.gmra.mxu3 %v11659_v36 }
 0x462   : > { %v10583_v60 = vpack.c.bf16 %v3658_v52, %v3654_v61 }
 0x463   : > { %v3478_v21 = vpop.f32.mrf.mxu2 }
 0x464   : > { %v3567_v10 = vpop.f32.mrf.mxu3  ;;  %v3479_v29 = vadd.f32 %v3478_v21, %v3390_v35  ;;  %v3302_v2 = vpop.f32.mrf.mxu0 }
 0x465   : > { %v3391_v46 = vpop.f32.mrf.mxu1  ;;  %v3303_v3 = vadd.f32 %v3302_v2, %v10544_v53 }
 0x466   : > { %v3568_v27 = vadd.f32 %v3567_v10, %v3479_v29  ;;  %v11664_v29 = vld [vmem:[#allocation58_spill] sm:$0xff] }
 0x467   : > { %v3392_v15 = vadd.f32 %v3391_v46, %v3303_v3  ;;  %v8327_v46 = vld [vmem:[#allocation2 + $0x2e4] sm:$0xf] }
 0x468   : > { %v3662_v6 = vmax.f32 %v3568_v27, 0.0 }
 0x46b   : > { %v3480_v5 = vpop.f32.mrf.mxu2 }
 0x46c   : > { %v3569_v58 = vpop.f32.mrf.mxu3  ;;  %v3481_v22 = vadd.f32 %v3480_v5, %v3392_v15  ;;  %v3305_v13 = vpop.f32.mrf.mxu0  ;;  %v7840_v15 = vor.u32 %v8327_v46, %v7837_v50  ;;  %v11666_v46 = vld [vmem:[#allocation41_spill] sm:$0xff] }
 0x46d   : > { %v3394_v55 = vpop.f32.mrf.mxu1  ;;  %v3306_v14 = vadd.f32 %v3305_v13, %v10544_v53  ;;  %v7968_v13 = vor.u32 %v8359_v28, %v7965_v24  ;;  %v11667_v50 = vld [vmem:[#allocation17_spill] sm:$0xff]  ;;  %v7821_v28 = vld [vmem:[#allocation2 + $0x2d0] sm:$0xf0]  ;;  %v8259_v24 = vld [vmem:[#allocation2 + $0xc4] sm:$0xf] }
 0x46e   : > { %v3570_v62 = vadd.f32 %v3569_v58, %v3481_v22  ;;  %v7584_v22 = vor.u32 %v8263_v9, %v7581_v37  ;;  %5131 = vmatpush.bf16.msrb.mxu2 %v7840_v15  ;;  %v8323_v37 = vld [vmem:[#allocation2 + $0x2c4] sm:$0xf] }
 0x46f   : > { %v3395_v18 = vadd.f32 %v3394_v55, %v3306_v14  ;;  %3344 = vmatmul.bf16.gmra.mxu0 %v9745_v51  ;;  %5220 = vmatpush.bf16.msrb.mxu3 %v7968_v13  ;;  %v8355_v13 = vld [vmem:[#allocation2 + $0x3c4] sm:$0xf] }
 0x470   : > { %3433 = vmatmul.bf16.gmra.mxu1 %v9747_v40  ;;  %v3666_v11 = vmax.f32 %v3570_v62, 0.0  ;;  %3522 = vmatmul.bf16.gmra.mxu2 %v11660_v17 }
 0x471   : > { %3611 = vmatmul.bf16.gmra.mxu3 %v11661_v12  ;;  %4953 = vmatpush.bf16.msrb.mxu0 %v7584_v22  ;;  %v7565_v22 = vld [vmem:[#allocation2 + $0xd0] sm:$0xf0] }
 0x472   : > { %v10591_v1 = vpack.c.bf16 %v3666_v11, %v3662_v6  ;;  %v7709_v6 = vld [vmem:[#allocation2 + $0x1f0] sm:$0xf0] }
 0x473   : > { %v3483_v31 = vpop.f32.mrf.mxu2 }
 0x474   : > { %v3572_v25 = vpop.f32.mrf.mxu3  ;;  %v3484_v42 = vadd.f32 %v3483_v31, %v3395_v18  ;;  %v3307_v38 = vpop.f32.mrf.mxu0  ;;  %v8295_v18 = vld [vmem:[#allocation2 + $0x1e4] sm:$0xf] }
 0x475   : > { %v3396_v35 = vpop.f32.mrf.mxu1  ;;  %v3308_v61 = vadd.f32 %v3307_v38, %v10544_v53  ;;  %v7712_v11 = vor.u32 %v8295_v18, %v7709_v6  ;;  %v7568_v6 = vor.u32 %v8259_v24, %v7565_v22 }
 0x476   : > { %v3573_v52 = vadd.f32 %v3572_v25, %v3484_v42 }
 0x477   : > { %v3397_v0 = vadd.f32 %v3396_v35, %v3308_v61  ;;  %5042 = vmatpush.bf16.msrb.mxu1 %v7712_v11  ;;  %4954 = vmatpush.bf16.msrb.mxu0 %v7568_v6  ;;  %v11676_v6 = vld [vmem:[#allocation67_spill] sm:$0xff] }
 0x478   : > { %v3670_v49 = vmax.f32 %v3573_v52, 0.0 }
 0x47b   : > { %v3485_v51 = vpop.f32.mrf.mxu2 }
 0x47c   : > { %v3574_v36 = vpop.f32.mrf.mxu3  ;;  %v3486_v40 = vadd.f32 %v3485_v51, %v3397_v0  ;;  %v3310_v48 = vpop.f32.mrf.mxu0 }
 0x47d   : > { %v3399_v4 = vpop.f32.mrf.mxu1  ;;  %v3311_v54 = vadd.f32 %v3310_v48, %v10544_v53 }
 0x47e   : > { %v3575_v21 = vadd.f32 %v3574_v36, %v3486_v40 }
 0x47f   : > { %v3400_v10 = vadd.f32 %v3399_v4, %v3311_v54  ;;  %3349 = vmatmul.bf16.gmra.mxu0 %v9786_v47 }
 0x480   : > { %3438 = vmatmul.bf16.gmra.mxu1 %v11662_v26  ;;  %v3674_v32 = vmax.f32 %v3575_v21, 0.0  ;;  %3527 = vmatmul.bf16.gmra.mxu2 %v11663_v16 }
 0x481   : > { %3616 = vmatmul.bf16.gmra.mxu3 %v11664_v29 }
 0x482   : > { %v10599_v2 = vpack.c.bf16 %v3674_v32, %v3670_v49 }
 0x483   : > { %v3488_v3 = vpop.f32.mrf.mxu2 }
 0x484   : > { %v3577_v27 = vpop.f32.mrf.mxu3  ;;  %v3489_v47 = vadd.f32 %v3488_v3, %v3400_v10  ;;  %v3312_v5 = vpop.f32.mrf.mxu0 }
 0x485   : > { %v3401_v58 = vpop.f32.mrf.mxu1  ;;  %v3313_v55 = vadd.f32 %v3312_v5, %v10544_v53 }
 0x486   : > { %v3578_v14 = vadd.f32 %v3577_v27, %v3489_v47  ;;  %v11668_v27 = vld [vmem:[#allocation65_spill] sm:$0xff] }
 0x487   : > { %v3402_v62 = vadd.f32 %v3401_v58, %v3313_v55  ;;  %v7824_v58 = vor.u32 %v8323_v37, %v7821_v28  ;;  %v7949_v55 = vld [vmem:[#allocation2 + $0x3d0] sm:$0xf0] }
 0x488   : > { %v3678_v52 = vmax.f32 %v3578_v14, 0.0  ;;  %v7952_v11 = vor.u32 %v8355_v13, %v7949_v55  ;;  %v11674_v55 = vld [vmem:[#allocation47_spill] sm:$0xff] }
 0x489   : > { %5132 = vmatpush.bf16.msrb.mxu2 %v7824_v58 }
 0x48a   : > { %5221 = vmatpush.bf16.msrb.mxu3 %v7952_v11 }
 0x48b   : > { %v3490_v17 = vpop.f32.mrf.mxu2 }
 0x48c   : > { %v3579_v12 = vpop.f32.mrf.mxu3  ;;  %v3491_v31 = vadd.f32 %v3490_v17, %v3402_v62  ;;  %v3315_v25 = vpop.f32.mrf.mxu0 }
 0x48d   : > { %v3404_v42 = vpop.f32.mrf.mxu1  ;;  %v3316_v38 = vadd.f32 %v3315_v25, %v10544_v53  ;;  %v8291_v25 = vld [vmem:[#allocation2 + $0x1c4] sm:$0xf] }
 0x48e   : > { %v3580_v35 = vadd.f32 %v3579_v12, %v3491_v31 }
 0x48f   : > { %v3405_v61 = vadd.f32 %v3404_v42, %v3316_v38  ;;  %3354 = vmatmul.bf16.gmra.mxu0 %v9835_v7  ;;  %v7693_v42 = vld [vmem:[#allocation2 + $0x1d0] sm:$0xf0] }
 0x490   : > { %3443 = vmatmul.bf16.gmra.mxu1 %v9837_v41  ;;  %v3682_v0 = vmax.f32 %v3580_v35, 0.0  ;;  %3532 = vmatmul.bf16.gmra.mxu2 %v9839_v20  ;;  %v7696_v38 = vor.u32 %v8291_v25, %v7693_v42 }
 0x491   : > { %3621 = vmatmul.bf16.gmra.mxu3 %v9841_v43 }
 0x492   : > { %v10607_v51 = vpack.c.bf16 %v3682_v0, %v3678_v52  ;;  %5043 = vmatpush.bf16.msrb.mxu1 %v7696_v38 }
 0x493   : > { %v3493_v36 = vpop.f32.mrf.mxu2 }
 0x494   : > { %11665 = vst [vmem:[#allocation30_spill] sm:$0xff] %v10607_v51  ;;  %v3582_v40 = vpop.f32.mrf.mxu3  ;;  %v3494_v48 = vadd.f32 %v3493_v36, %v3405_v61  ;;  %v3317_v4 = vpop.f32.mrf.mxu0 }
 0x495   : > { %v3406_v54 = vpop.f32.mrf.mxu1  ;;  %v3318_v21 = vadd.f32 %v3317_v4, %v10544_v53 }
 0x496   : > { %v3583_v10 = vadd.f32 %v3582_v40, %v3494_v48 }
 0x497   : > { %v3407_v26 = vadd.f32 %v3406_v54, %v3318_v21  ;;  %v11670_v54 = vld [vmem:[#allocation42_spill] sm:$0xff] }
 0x498   : > { %v3686_v9 = vmax.f32 %v3583_v10, 0.0  ;;  %v11671_v21 = vld [vmem:[#allocation18_spill] sm:$0xff] }
 0x49b   : > { %v3495_v7 = vpop.f32.mrf.mxu2 }
 0x49c   : > { %v3584_v49 = vpop.f32.mrf.mxu3  ;;  %v3496_v41 = vadd.f32 %v3495_v7, %v3407_v26  ;;  %v3320_v32 = vpop.f32.mrf.mxu0  ;;  %v11672_v7 = vld [vmem:[#allocation66_spill] sm:$0xff] }
 0x49d   : > { %v3409_v16 = vpop.f32.mrf.mxu1  ;;  %v3321_v20 = vadd.f32 %v3320_v32, %v10544_v53 }
 0x49e   : > { %v3585_v29 = vadd.f32 %v3584_v49, %v3496_v41 }
 0x49f   : > { %v3410_v43 = vadd.f32 %v3409_v16, %v3321_v20  ;;  %4605 = vmatmul.bf16.vlgmr.msra.gmra.mxu0 %v11666_v46 }
 0x4a0   : > { %4694 = vmatmul.bf16.vlgmr.msra.gmra.mxu1 %v11667_v50  ;;  %v3690_v3 = vmax.f32 %v3585_v29, 0.0  ;;  %4783 = vmatmul.bf16.vlgmr.msra.gmra.mxu2 %v11668_v27 }
 0x4a1   : > { %4872 = vmatmul.bf16.vlgmr.msra.gmra.mxu3 %v10559_v23 }
 0x4a2   : > { %v10615_v15 = vpack.c.bf16 %v3690_v3, %v3686_v9 }
 0x4a3   : > { %v3498_v47 = vpop.f32.mrf.mxu2 }
 0x4a4   : > { %11669 = vst [vmem:[#allocation31_spill] sm:$0xff] %v10615_v15  ;;  %v3587_v5 = vpop.f32.mrf.mxu3  ;;  %v3499_v14 = vadd.f32 %v3498_v47, %v3410_v43  ;;  %v3322_v62 = vpop.f32.mrf.mxu0 }
 0x4a5   : > { %v3411_v18 = vpop.f32.mrf.mxu1  ;;  %v3323_v17 = vadd.f32 %v3322_v62, %v10544_v53 }
 0x4a6   : > { %v3588_v12 = vadd.f32 %v3587_v5, %v3499_v14  ;;  %v11675_v14 = vld [vmem:[#allocation19_spill] sm:$0xff] }
 0x4a7   : > { %v3412_v31 = vadd.f32 %v3411_v18, %v3323_v17  ;;  %v8319_v17 = vld [vmem:[#allocation2 + $0x2a4] sm:$0xf] }
 0x4a8   : > { %v3694_v10 = vmax.f32 %v3588_v12, 0.0  ;;  %v7805_v12 = vld [vmem:[#allocation2 + $0x2b0] sm:$0xf0] }
 0x4a9   : > { %v7808_v38 = vor.u32 %v8319_v17, %v7805_v12 }
 0x4ab   : > { %v3500_v35 = vpop.f32.mrf.mxu2  ;;  %5133 = vmatpush.bf16.msrb.mxu2 %v7808_v38 }
 0x4ac   : > { %v3589_v61 = vpop.f32.mrf.mxu3  ;;  %v3501_v52 = vadd.f32 %v3500_v35, %v3412_v31  ;;  %v3325_v0 = vpop.f32.mrf.mxu0  ;;  %v8255_v31 = vld [vmem:[#allocation2 + $0xa4] sm:$0xf]  ;;  %v7549_v35 = vld [vmem:[#allocation2 + $0xb0] sm:$0xf0] }
 0x4ad   : > { %v3414_v36 = vpop.f32.mrf.mxu1  ;;  %v3326_v40 = vadd.f32 %v3325_v0, %v10544_v53 }
 0x4ae   : > { %v3590_v48 = vadd.f32 %v3589_v61, %v3501_v52  ;;  %v8351_v61 = vld [vmem:[#allocation2 + $0x3a4] sm:$0xf]  ;;  %v7933_v52 = vld [vmem:[#allocation2 + $0x3b0] sm:$0xf0] }
 0x4af   : > { %v3415_v4 = vadd.f32 %v3414_v36, %v3326_v40  ;;  %4610 = vmatmul.bf16.gmra.mxu0 %v11670_v54 }
 0x4b0   : > { %4699 = vmatmul.bf16.gmra.mxu1 %v11671_v21  ;;  %v3698_v26 = vmax.f32 %v3590_v48, 0.0  ;;  %4788 = vmatmul.bf16.gmra.mxu2 %v11672_v7  ;;  %v7552_v48 = vor.u32 %v8255_v31, %v7549_v35 }
 0x4b1   : > { %4877 = vmatmul.bf16.gmra.mxu3 %v10567_v33 }
 0x4b2   : > { %v10623_v49 = vpack.c.bf16 %v3698_v26, %v3694_v10  ;;  %4955 = vmatpush.bf16.msrb.mxu0 %v7552_v48 }
 0x4b3   : > { %v3503_v41 = vpop.f32.mrf.mxu2 }
 0x4b4   : > { %11673 = vst [vmem:[#allocation32_spill] sm:$0xff] %v10623_v49  ;;  %v3592_v32 = vpop.f32.mrf.mxu3  ;;  %v3504_v16 = vadd.f32 %v3503_v41, %v3415_v4  ;;  %v3327_v20 = vpop.f32.mrf.mxu0  ;;  %v7936_v4 = vor.u32 %v8351_v61, %v7933_v52 }
 0x4b5   : > { %v3416_v29 = vpop.f32.mrf.mxu1  ;;  %v3328_v43 = vadd.f32 %v3327_v20, %v10544_v53 }
 0x4b6   : > { %v3593_v9 = vadd.f32 %v3592_v32, %v3504_v16  ;;  %5222 = vmatpush.bf16.msrb.mxu3 %v7936_v4  ;;  %v8287_v32 = vld [vmem:[#allocation2 + $0x1a4] sm:$0xf]  ;;  %v7677_v16 = vld [vmem:[#allocation2 + $0x1b0] sm:$0xf0] }
 0x4b7   : > { %v3417_v3 = vadd.f32 %v3416_v29, %v3328_v43  ;;  %v7680_v20 = vor.u32 %v8287_v32, %v7677_v16  ;;  %v11682_v32 = vld [vmem:[#allocation21_spill] sm:$0xff] }
 0x4b8   : > { %v3702_v62 = vmax.f32 %v3593_v9, 0.0 }
 0x4b9   : > { %5044 = vmatpush.bf16.msrb.mxu1 %v7680_v20 }
 0x4bb   : > { %v3505_v37 = vpop.f32.mrf.mxu2 }
 0x4bc   : > { %v3594_v28 = vpop.f32.mrf.mxu3  ;;  %v3506_v24 = vadd.f32 %v3505_v37, %v3417_v3  ;;  %v3330_v47 = vpop.f32.mrf.mxu0 }
 0x4bd   : > { %v3419_v5 = vpop.f32.mrf.mxu1  ;;  %v3331_v58 = vadd.f32 %v3330_v47, %v10544_v53 }
 0x4be   : > { %v3595_v22 = vadd.f32 %v3594_v28, %v3506_v24 }
 0x4bf   : > { %v3420_v13 = vadd.f32 %v3419_v5, %v3331_v58  ;;  %4615 = vmatmul.bf16.gmra.mxu0 %v11674_v55  ;;  %v11677_v5 = vld [vmem:[#allocation52_spill] sm:$0xff] }
 0x4c0   : > { %4704 = vmatmul.bf16.gmra.mxu1 %v11675_v14  ;;  %v3706_v18 = vmax.f32 %v3595_v22, 0.0  ;;  %4793 = vmatmul.bf16.gmra.mxu2 %v11676_v6  ;;  %v11678_v58 = vld [vmem:[#allocation20_spill] sm:$0xff] }
 0x4c1   : > { %4882 = vmatmul.bf16.gmra.mxu3 %v10575_v45 }
 0x4c2   : > { %v10631_v11 = vpack.c.bf16 %v3706_v18, %v3702_v62  ;;  %v11679_v62 = vld [vmem:[#allocation49_spill] sm:$0xff] }
 0x4c3   : > { %v3508_v25 = vpop.f32.mrf.mxu2 }
 0x4c4   : > { %v3597_v42 = vpop.f32.mrf.mxu3  ;;  %v3509_v0 = vadd.f32 %v3508_v25, %v3420_v13  ;;  %v3332_v36 = vpop.f32.mrf.mxu0 }
 0x4c5   : > { %v3421_v40 = vpop.f32.mrf.mxu1  ;;  %v3333_v10 = vadd.f32 %v3332_v36, %v10544_v53 }
 0x4c6   : > { %v3598_v26 = vadd.f32 %v3597_v42, %v3509_v0 }
 0x4c7   : > { %v3422_v41 = vadd.f32 %v3421_v40, %v3333_v10 }
 0x4c8   : > { %v3710_v22 = vmax.f32 %v3598_v26, 0.0 }
 0x4cb   : > { %v3510_v29 = vpop.f32.mrf.mxu2 }
 0x4cc   : > { %v3599_v43 = vpop.f32.mrf.mxu3  ;;  %v3511_v9 = vadd.f32 %v3510_v29, %v3422_v41  ;;  %v3335_v3 = vpop.f32.mrf.mxu0  ;;  %v11681_v41 = vld [vmem:[#allocation55_spill] sm:$0xff]  ;;  %v11683_v29 = vld [vmem:[#allocation68_spill] sm:$0xff] }
 0x4cd   : > { %v3424_v37 = vpop.f32.mrf.mxu1  ;;  %v3336_v28 = vadd.f32 %v3335_v3, %v10544_v53  ;;  %v7789_v3 = vld [vmem:[#allocation2 + $0x290] sm:$0xf0] }
 0x4ce   : > { %v3600_v24 = vadd.f32 %v3599_v43, %v3511_v9  ;;  %v8315_v9 = vld [vmem:[#allocation2 + $0x284] sm:$0xf] }
 0x4cf   : > { %v3425_v47 = vadd.f32 %v3424_v37, %v3336_v28  ;;  %4620 = vmatmul.bf16.gmra.mxu0 %v11677_v5  ;;  %v8251_v37 = vld [vmem:[#allocation2 + $0x84] sm:$0xf] }
 0x4d0   : > { %4709 = vmatmul.bf16.gmra.mxu1 %v11678_v58  ;;  %v3714_v13 = vmax.f32 %v3600_v24, 0.0  ;;  %4798 = vmatmul.bf16.gmra.mxu2 %v11679_v62 }
 0x4d1   : > { %4887 = vmatmul.bf16.gmra.mxu3 %v10583_v60 }
 0x4d2   : > { %v10639_v18 = vpack.c.bf16 %v3714_v13, %v3710_v22  ;;  %v7533_v22 = vld [vmem:[#allocation2 + $0x90] sm:$0xf0]  ;;  %v8347_v13 = vld [vmem:[#allocation2 + $0x384] sm:$0xf] }
 0x4d3   : > { %v3513_v17 = vpop.f32.mrf.mxu2 }
 0x4d4   : > { %11680 = vst [vmem:[#allocation33_spill] sm:$0xff] %v10639_v18  ;;  %v3602_v12 = vpop.f32.mrf.mxu3  ;;  %v3514_v31 = vadd.f32 %v3513_v17, %v3425_v47  ;;  %v3337_v25 = vpop.f32.mrf.mxu0  ;;  %v7792_v47 = vor.u32 %v8315_v9, %v7789_v3  ;;  %v7917_v17 = vld [vmem:[#allocation2 + $0x390] sm:$0xf0] }
 0x4d5   : > { %v3426_v42 = vpop.f32.mrf.mxu1  ;;  %v3338_v38 = vadd.f32 %v3337_v25, %v10544_v53 }
 0x4d6   : > { %v3603_v35 = vadd.f32 %v3602_v12, %v3514_v31  ;;  %5134 = vmatpush.bf16.msrb.mxu2 %v7792_v47 }
 0x4d7   : > { %v3427_v61 = vadd.f32 %v3426_v42, %v3338_v38  ;;  %v7536_v42 = vor.u32 %v8251_v37, %v7533_v22  ;;  %v7920_v38 = vor.u32 %v8347_v13, %v7917_v17  ;;  %v11684_v37 = vld [vmem:[#allocation59_spill] sm:$0xff]  ;;  %v11686_v22 = vld [vmem:[#allocation69_spill] sm:$0xff] }
 0x4d8   : > { %v3718_v16 = vmax.f32 %v3603_v35, 0.0 }
 0x4d9   : > { %4956 = vmatpush.bf16.msrb.mxu0 %v7536_v42  ;;  %5223 = vmatpush.bf16.msrb.mxu3 %v7920_v38 }
 0x4db   : > { %v3515_v52 = vpop.f32.mrf.mxu2 }
 0x4dc   : > { %v3604_v0 = vpop.f32.mrf.mxu3  ;;  %v3516_v36 = vadd.f32 %v3515_v52, %v3427_v61  ;;  %v3340_v40 = vpop.f32.mrf.mxu0 }
 0x4dd   : > { %v3429_v48 = vpop.f32.mrf.mxu1  ;;  %v3341_v4 = vadd.f32 %v3340_v40, %v10544_v53 }
 0x4de   : > { %v3605_v10 = vadd.f32 %v3604_v0, %v3516_v36  ;;  %v8283_v0 = vld [vmem:[#allocation2 + $0x184] sm:$0xf]  ;;  %v7661_v36 = vld [vmem:[#allocation2 + $0x190] sm:$0xf0] }
 0x4df   : > { %v3430_v26 = vadd.f32 %v3429_v48, %v3341_v4  ;;  %4625 = vmatmul.bf16.gmra.mxu0 %v11681_v41  ;;  %v7664_v40 = vor.u32 %v8283_v0, %v7661_v36 }
 0x4e0   : > { %4714 = vmatmul.bf16.gmra.mxu1 %v11682_v32  ;;  %v3722_v20 = vmax.f32 %v3605_v10, 0.0  ;;  %4803 = vmatmul.bf16.gmra.mxu2 %v11683_v29 }
 0x4e1   : > { %4892 = vmatmul.bf16.gmra.mxu3 %v10591_v1  ;;  %5045 = vmatpush.bf16.msrb.mxu1 %v7664_v40 }
 0x4e2   : > { %v10647_v43 = vpack.c.bf16 %v3722_v20, %v3718_v16 }
 0x4e3   : > { %v3518_v28 = vpop.f32.mrf.mxu2 }
 0x4e4   : > { %v3607_v24 = vpop.f32.mrf.mxu3  ;;  %v3519_v12 = vadd.f32 %v3518_v28, %v3430_v26  ;;  %v3342_v31 = vpop.f32.mrf.mxu0  ;;  %v11685_v28 = vld [vmem:[#allocation22_spill] sm:$0xff] }
 0x4e5   : > { %v3431_v25 = vpop.f32.mrf.mxu1  ;;  %v3343_v35 = vadd.f32 %v3342_v31, %v10544_v53 }
 0x4e6   : > { %v3608_v61 = vadd.f32 %v3607_v24, %v3519_v12 }
 0x4e7   : > { %v3432_v52 = vadd.f32 %v3431_v25, %v3343_v35 }
 0x4e8   : > { %v3726_v24 = vmax.f32 %v3608_v61, 0.0 }
 0x4eb   : > { %v3520_v48 = vpop.f32.mrf.mxu2 }
 0x4ec   : > { %v3609_v4 = vpop.f32.mrf.mxu3  ;;  %v3521_v10 = vadd.f32 %v3520_v48, %v3432_v52  ;;  %v3345_v16 = vpop.f32.mrf.mxu0 }
 0x4ed   : > { %v3434_v26 = vpop.f32.mrf.mxu1  ;;  %v3346_v20 = vadd.f32 %v3345_v16, %v10544_v53 }
 0x4ee   : > { %v3610_v9 = vadd.f32 %v3609_v4, %v3521_v10 }
 0x4ef   : > { %v3435_v3 = vadd.f32 %v3434_v26, %v3346_v20  ;;  %4630 = vmatmul.bf16.gmra.mxu0 %v11684_v37  ;;  %v11688_v26 = vld [vmem:[#allocation60_spill] sm:$0xff]  ;;  %v11689_v20 = vld [vmem:[#allocation23_spill] sm:$0xff] }
 0x4f0   : > { %4719 = vmatmul.bf16.gmra.mxu1 %v11685_v28  ;;  %v3730_v47 = vmax.f32 %v3610_v9, 0.0  ;;  %4808 = vmatmul.bf16.gmra.mxu2 %v11686_v22 }
 0x4f1   : > { %4897 = vmatmul.bf16.gmra.mxu3 %v10599_v2 }
 0x4f2   : > { %v10655_v13 = vpack.c.bf16 %v3730_v47, %v3726_v24  ;;  %v8311_v47 = vld [vmem:[#allocation2 + $0x264] sm:$0xf] }
 0x4f3   : > { %v3523_v17 = vpop.f32.mrf.mxu2 }
 0x4f4   : > { %11687 = vst [vmem:[#allocation34_spill] sm:$0xff] %v10655_v13  ;;  %v3612_v12 = vpop.f32.mrf.mxu3  ;;  %v3524_v31 = vadd.f32 %v3523_v17, %v3435_v3  ;;  %v3347_v25 = vpop.f32.mrf.mxu0  ;;  %v7773_v17 = vld [vmem:[#allocation2 + $0x270] sm:$0xf0] }
 0x4f5   : > { %v3436_v42 = vpop.f32.mrf.mxu1  ;;  %v3348_v38 = vadd.f32 %v3347_v25, %v10544_v53 }
 0x4f6   : > { %v3613_v35 = vadd.f32 %v3612_v12, %v3524_v31  ;;  %v8247_v12 = vld [vmem:[#allocation2 + $0x64] sm:$0xf] }
 0x4f7   : > { %v3437_v52 = vadd.f32 %v3436_v42, %v3348_v38  ;;  %v7776_v42 = vor.u32 %v8311_v47, %v7773_v17  ;;  %v7517_v38 = vld [vmem:[#allocation2 + $0x70] sm:$0xf0] }
 0x4f8   : > { %v3734_v9 = vmax.f32 %v3613_v35, 0.0  ;;  %v7520_v35 = vor.u32 %v8247_v12, %v7517_v38 }
 0x4f9   : > { %5135 = vmatpush.bf16.msrb.mxu2 %v7776_v42  ;;  %v11691_v42 = vld [vmem:[#allocation24_spill] sm:$0xff] }
 0x4fa   : > { %4957 = vmatpush.bf16.msrb.mxu0 %v7520_v35 }
 0x4fb   : > { %v3525_v0 = vpop.f32.mrf.mxu2 }
 0x4fc   : > { %v3614_v36 = vpop.f32.mrf.mxu3  ;;  %v3526_v40 = vadd.f32 %v3525_v0, %v3437_v52  ;;  %v3350_v61 = vpop.f32.mrf.mxu0  ;;  %v8343_v52 = vld [vmem:[#allocation2 + $0x364] sm:$0xf]  ;;  %v7901_v0 = vld [vmem:[#allocation2 + $0x370] sm:$0xf0] }
 0x4fd   : > { %v3439_v48 = vpop.f32.mrf.mxu1  ;;  %v3351_v4 = vadd.f32 %v3350_v61, %v10544_v53 }
 0x4fe   : > { %v3615_v10 = vadd.f32 %v3614_v36, %v3526_v40 }
 0x4ff   : > { %v3440_v16 = vadd.f32 %v3439_v48, %v3351_v4  ;;  %4635 = vmatmul.bf16.gmra.mxu0 %v11688_v26  ;;  %v7904_v48 = vor.u32 %v8343_v52, %v7901_v0  ;;  %v11690_v52 = vld [vmem:[#allocation61_spill] sm:$0xff] }
 0x500   : > { %4724 = vmatmul.bf16.gmra.mxu1 %v11689_v20  ;;  %v3738_v3 = vmax.f32 %v3615_v10, 0.0  ;;  %4813 = vmatmul.bf16.gmra.mxu2 %v10474_v30 }
 0x501   : > { %4902 = vmatmul.bf16.gmra.mxu3 %v10607_v51  ;;  %v7645_v51 = vld [vmem:[#allocation2 + $0x170] sm:$0xf0] }
 0x502   : > { %v10663_v24 = vpack.c.bf16 %v3738_v3, %v3734_v9  ;;  %5224 = vmatpush.bf16.msrb.mxu3 %v7904_v48  ;;  %v8279_v3 = vld [vmem:[#allocation2 + $0x164] sm:$0xf]  ;;  %v10677_v48 = vld [vmem:[%s11327_s6] sm:$0xf] }
 0x503   : > { %v3528_v31 = vpop.f32.mrf.mxu2  ;;  %v7648_v30 = vor.u32 %v8279_v3, %v7645_v51  ;;  %11693 = vst [vmem:[#allocation36_spill] sm:$0xff] %v10677_v48 }
 0x504   : > { %v3617_v25 = vpop.f32.mrf.mxu3  ;;  %v3529_v36 = vadd.f32 %v3528_v31, %v3440_v16  ;;  %v3352_v40 = vpop.f32.mrf.mxu0 }
 0x505   : > { %v3441_v61 = vpop.f32.mrf.mxu1  ;;  %v3353_v4 = vadd.f32 %v3352_v40, %v10544_v53  ;;  %5046 = vmatpush.bf16.msrb.mxu1 %v7648_v30 }
 0x506   : > { %v3618_v10 = vadd.f32 %v3617_v25, %v3529_v36 }
 0x507   : > { %v3442_v9 = vadd.f32 %v3441_v61, %v3353_v4 }
 0x508   : > { %v3742_v25 = vmax.f32 %v3618_v10, 0.0  ;;  %v10680_v10 = vperm.slane %v10677_v48, 0 }
 0x50b   : > { %v3530_v20 = vpop.f32.mrf.mxu2 }
 0x50c   : > { %v3619_v47 = vpop.f32.mrf.mxu3  ;;  %v3531_v17 = vadd.f32 %v3530_v20, %v3442_v9  ;;  %v3355_v26 = vpop.f32.mrf.mxu0 }
 0x50d   : > { %v3444_v16 = vpop.f32.mrf.mxu1  ;;  %v3356_v31 = vadd.f32 %v3355_v26, %v10544_v53 }
 0x50e   : > { %v3620_v12 = vadd.f32 %v3619_v47, %v3531_v17 }
 0x50f   : > { %v3445_v38 = vadd.f32 %v3444_v16, %v3356_v31  ;;  %4640 = vmatmul.bf16.gmra.mxu0 %v11690_v52 }
 0x510   : > { %4729 = vmatmul.bf16.gmra.mxu1 %v11691_v42  ;;  %v3746_v0 = vmax.f32 %v3620_v12, 0.0  ;;  %4818 = vmatmul.bf16.gmra.mxu2 %v10482_v19 }
 0x511   : > { %4907 = vmatmul.bf16.gmra.mxu3 %v10615_v15 }
 0x512   : > { %v10671_v51 = vpack.c.bf16 %v3746_v0, %v3742_v25  ;;  %v11695_v25 = vld [vmem:[#allocation25_spill] sm:$0xff] }
 0x513   : > { %v3533_v30 = vpop.f32.mrf.mxu2 }
 0x514   : > { %11692 = vst [vmem:[#allocation35_spill] sm:$0xff] %v10671_v51  ;;  %v3622_v20 = vpop.f32.mrf.mxu3  ;;  %v3534_v36 = vadd.f32 %v3533_v30, %v3445_v38  ;;  %v3357_v40 = vpop.f32.mrf.mxu0 }
 0x515   : > { %v3446_v61 = vpop.f32.mrf.mxu1  ;;  %v3358_v26 = vadd.f32 %v3357_v40, %v10544_v53  ;;  %v11694_v53 = vld [vmem:[#allocation8_spill] sm:$0xff] }
 0x516   : > { %v3623_v35 = vadd.f32 %v3622_v20, %v3534_v36  ;;  %v8307_v20 = vld [vmem:[#allocation2 + $0x244] sm:$0xf]  ;;  %v7757_v36 = vld [vmem:[#allocation2 + $0x250] sm:$0xf0] }
 0x517   : > { %v3447_v4 = vadd.f32 %v3446_v61, %v3358_v26  ;;  %v7760_v40 = vor.u32 %v8307_v20, %v7757_v36  ;;  %v8243_v61 = vld [vmem:[#allocation2 + $0x44] sm:$0xf]  ;;  %v7501_v26 = vld [vmem:[#allocation2 + $0x50] sm:$0xf0] }
 0x518   : > { %v3750_v0 = vmax.f32 %v3623_v35, 0.0  ;;  %v8275_v36 = vld [vmem:[#allocation2 + $0x144] sm:$0xf] }
 0x519   : > { %5136 = vmatpush.bf16.msrb.mxu2 %v7760_v40 }
 0x51b   : > { %v3535_v9 = vpop.f32.mrf.mxu2 }
 0x51c   : > { %v3624_v3 = vpop.f32.mrf.mxu3  ;;  %v3536_v47 = vadd.f32 %v3535_v9, %v3447_v4  ;;  %v4606_v17 = vpop.f32.mrf.mxu0  ;;  %v8339_v4 = vld [vmem:[#allocation2 + $0x344] sm:$0xf] }
 0x51d   : > { %v4695_v16 = vpop.f32.mrf.mxu1  ;;  %v4607_v31 = vadd.f32 %v4606_v17, %v10680_v10 }
 0x51e   : > { %v3625_v12 = vadd.f32 %v3624_v3, %v3536_v47  ;;  %v7504_v3 = vor.u32 %v8243_v61, %v7501_v26  ;;  %v7885_v47 = vld [vmem:[#allocation2 + $0x350] sm:$0xf0] }
 0x51f   : > { %v4696_v38 = vadd.f32 %v4695_v16, %v4607_v31  ;;  %4645 = vmatmul.bf16.gmra.mxu0 %v11694_v53  ;;  %v7888_v31 = vor.u32 %v8339_v4, %v7885_v47  ;;  %v7629_v53 = vld [vmem:[#allocation2 + $0x150] sm:$0xf0]  ;;  %v11696_v47 = vld [vmem:[#allocation9_spill] sm:$0xff] }
 0x520   : > { %4734 = vmatmul.bf16.gmra.mxu1 %v11695_v25  ;;  %v3754_v30 = vmax.f32 %v3625_v12, 0.0  ;;  %4823 = vmatmul.bf16.gmra.mxu2 %v10490_v59  ;;  %v7632_v48 = vor.u32 %v8275_v36, %v7629_v53 }
 0x521   : > { %4912 = vmatmul.bf16.gmra.mxu3 %v10623_v49  ;;  %4958 = vmatpush.bf16.msrb.mxu0 %v7504_v3  ;;  %v11697_v3 = vld [vmem:[#allocation26_spill] sm:$0xff] }
 0x522   : > { %v10687_v9 = vpack.c.bf16 %v3754_v30, %v3750_v0  ;;  %5225 = vmatpush.bf16.msrb.mxu3 %v7888_v31  ;;  %5047 = vmatpush.bf16.msrb.mxu1 %v7632_v48 }
 0x523   : > { %v4784_v17 = vpop.f32.mrf.mxu2 }
 0x524   : > { %v4873_v16 = vpop.f32.mrf.mxu3  ;;  %v4785_v35 = vadd.f32 %v4784_v17, %v4696_v38  ;;  %v4608_v12 = vpop.f32.mrf.mxu0 }
 0x525   : > { %v4697_v25 = vpop.f32.mrf.mxu1  ;;  %v4609_v49 = vadd.f32 %v4608_v12, %v10680_v10 }
 0x526   : > { %v4874_v59 = vadd.f32 %v4873_v16, %v4785_v35 }
 0x527   : > { %v4698_v20 = vadd.f32 %v4697_v25, %v4609_v49 }
 0x528   : > { %v6021_v17 = vmax.f32 %v4874_v59, 0.0 }
 0x52b   : > { %v4786_v0 = vpop.f32.mrf.mxu2 }
 0x52c   : > { %v4875_v30 = vpop.f32.mrf.mxu3  ;;  %v4787_v61 = vadd.f32 %v4786_v0, %v4698_v20  ;;  %v4611_v26 = vpop.f32.mrf.mxu0 }
 0x52d   : > { %v4700_v15 = vpop.f32.mrf.mxu1  ;;  %v4612_v40 = vadd.f32 %v4611_v26, %v10680_v10 }
 0x52e   : > { %v4876_v38 = vadd.f32 %v4875_v30, %v4787_v61 }
 0x52f   : > { %v4701_v4 = vadd.f32 %v4700_v15, %v4612_v40  ;;  %4650 = vmatmul.bf16.gmra.mxu0 %v11696_v47 }
 0x530   : > { %4739 = vmatmul.bf16.gmra.mxu1 %v11697_v3  ;;  %v6025_v16 = vmax.f32 %v4876_v38, 0.0  ;;  %4828 = vmatmul.bf16.gmra.mxu2 %v10498_v44 }
 0x531   : > { %4917 = vmatmul.bf16.gmra.mxu3 %v10631_v11 }
 0x532   : > { %v10695_v49 = vpack.c.bf16 %v6025_v16, %v6021_v17  ;;  %v11699_v17 = vld [vmem:[#allocation10_spill] sm:$0xff]  ;;  %v11700_v16 = vld [vmem:[#allocation27_spill] sm:$0xff] }
 0x533   : > { %v4789_v48 = vpop.f32.mrf.mxu2 }
 0x534   : > { %11698 = vst [vmem:[#allocation37_spill] sm:$0xff] %v10695_v49  ;;  %v4878_v53 = vpop.f32.mrf.mxu3  ;;  %v4790_v25 = vadd.f32 %v4789_v48, %v4701_v4  ;;  %v4613_v31 = vpop.f32.mrf.mxu0 }
 0x535   : > { %v4702_v35 = vpop.f32.mrf.mxu1  ;;  %v4614_v12 = vadd.f32 %v4613_v31, %v10680_v10 }
 0x536   : > { %v4879_v15 = vadd.f32 %v4878_v53, %v4790_v25  ;;  %v8303_v53 = vld [vmem:[#allocation2 + $0x224] sm:$0xf]  ;;  %v7741_v25 = vld [vmem:[#allocation2 + $0x230] sm:$0xf0] }
 0x537   : > { %v4703_v20 = vadd.f32 %v4702_v35, %v4614_v12  ;;  %v7744_v31 = vor.u32 %v8303_v53, %v7741_v25  ;;  %v8239_v35 = vld [vmem:[#allocation2 + $0x24] sm:$0xf]  ;;  %v7485_v12 = vld [vmem:[#allocation2 + $0x30] sm:$0xf0] }
 0x538   : > { %v6029_v4 = vmax.f32 %v4879_v15, 0.0  ;;  %v8271_v25 = vld [vmem:[#allocation2 + $0x124] sm:$0xf] }
 0x539   : > { %5137 = vmatpush.bf16.msrb.mxu2 %v7744_v31 }
 0x53b   : > { %v4791_v36 = vpop.f32.mrf.mxu2 }
 0x53c   : > { %v4880_v0 = vpop.f32.mrf.mxu3  ;;  %v4792_v30 = vadd.f32 %v4791_v36, %v4703_v20  ;;  %v4616_v59 = vpop.f32.mrf.mxu0  ;;  %v8335_v20 = vld [vmem:[#allocation2 + $0x324] sm:$0xf]  ;;  %v7488_v36 = vor.u32 %v8239_v35, %v7485_v12 }
 0x53d   : > { %v4705_v61 = vpop.f32.mrf.mxu1  ;;  %v4617_v26 = vadd.f32 %v4616_v59, %v10680_v10  ;;  %v7869_v59 = vld [vmem:[#allocation2 + $0x330] sm:$0xf0] }
 0x53e   : > { %v4881_v40 = vadd.f32 %v4880_v0, %v4792_v30  ;;  %4959 = vmatpush.bf16.msrb.mxu0 %v7488_v36  ;;  %v11703_v36 = vld [vmem:[#allocation48_spill] sm:$0xff] }
 0x53f   : > { %v4706_v38 = vadd.f32 %v4705_v61, %v4617_v26  ;;  %4655 = vmatmul.bf16.gmra.mxu0 %v11699_v17  ;;  %v7872_v26 = vor.u32 %v8335_v20, %v7869_v59  ;;  %v11702_v59 = vld [vmem:[#allocation11_spill] sm:$0xff] }
 0x540   : > { %4744 = vmatmul.bf16.gmra.mxu1 %v11700_v16  ;;  %v6033_v48 = vmax.f32 %v4881_v40, 0.0  ;;  %4833 = vmatmul.bf16.gmra.mxu2 %v10506_v56  ;;  %v7613_v16 = vld [vmem:[#allocation2 + $0x130] sm:$0xf0] }
 0x541   : > { %4922 = vmatmul.bf16.gmra.mxu3 %v10639_v18  ;;  %v7616_v17 = vor.u32 %v8271_v25, %v7613_v16 }
 0x542   : > { %v10703_v0 = vpack.c.bf16 %v6033_v48, %v6029_v4  ;;  %5226 = vmatpush.bf16.msrb.mxu3 %v7872_v26 }
 0x543   : > { %v4794_v30 = vpop.f32.mrf.mxu2  ;;  %5048 = vmatpush.bf16.msrb.mxu1 %v7616_v17 }
 0x544   : > { %11701 = vst [vmem:[#allocation38_spill] sm:$0xff] %v10703_v0  ;;  %v4883_v61 = vpop.f32.mrf.mxu3  ;;  %v4795_v15 = vadd.f32 %v4794_v30, %v4706_v38  ;;  %v4618_v40 = vpop.f32.mrf.mxu0 }
 0x545   : > { %v4707_v49 = vpop.f32.mrf.mxu1  ;;  %v4619_v18 = vadd.f32 %v4618_v40, %v10680_v10 }
 0x546   : > { %v4884_v56 = vadd.f32 %v4883_v61, %v4795_v15 }
 0x547   : > { %v4708_v53 = vadd.f32 %v4707_v49, %v4619_v18 }
 0x548   : > { %v6037_v30 = vmax.f32 %v4884_v56, 0.0 }
 0x54b   : > { %v4796_v35 = vpop.f32.mrf.mxu2 }
 0x54c   : > { %v4885_v12 = vpop.f32.mrf.mxu3  ;;  %v4797_v4 = vadd.f32 %v4796_v35, %v4708_v53  ;;  %v4621_v48 = vpop.f32.mrf.mxu0 }
 0x54d   : > { %v4710_v0 = vpop.f32.mrf.mxu1  ;;  %v4622_v31 = vadd.f32 %v4621_v48, %v10680_v10 }
 0x54e   : > { %v4886_v38 = vadd.f32 %v4885_v12, %v4797_v4 }
 0x54f   : > { %v4711_v20 = vadd.f32 %v4710_v0, %v4622_v31  ;;  %4660 = vmatmul.bf16.gmra.mxu0 %v11702_v59 }
 0x550   : > { %4749 = vmatmul.bf16.gmra.mxu1 %v11703_v36  ;;  %v6041_v61 = vmax.f32 %v4886_v38, 0.0  ;;  %4838 = vmatmul.bf16.gmra.mxu2 %v10514_v8 }
 0x551   : > { %4927 = vmatmul.bf16.gmra.mxu3 %v10647_v43 }
 0x552   : > { %v10711_v18 = vpack.c.bf16 %v6041_v61, %v6037_v30  ;;  %v11705_v30 = vld [vmem:[#allocation12_spill] sm:$0xff]  ;;  %v11706_v61 = vld [vmem:[#allocation62_spill] sm:$0xff] }
 0x553   : > { %v4799_v49 = vpop.f32.mrf.mxu2 }
 0x554   : > { %11704 = vst [vmem:[#allocation39_spill] sm:$0xff] %v10711_v18  ;;  %v4888_v17 = vpop.f32.mrf.mxu3  ;;  %v4800_v16 = vadd.f32 %v4799_v49, %v4711_v20  ;;  %v4623_v26 = vpop.f32.mrf.mxu0 }
 0x555   : > { %v4712_v15 = vpop.f32.mrf.mxu1  ;;  %v4624_v40 = vadd.f32 %v4623_v26, %v10680_v10 }
 0x556   : > { %v4889_v0 = vadd.f32 %v4888_v17, %v4800_v16  ;;  %v8299_v17 = vld [vmem:[#allocation2 + $0x204] sm:$0xf]  ;;  %v7725_v16 = vld [vmem:[#allocation2 + $0x210] sm:$0xf0] }
 0x557   : > { %v4713_v53 = vadd.f32 %v4712_v15, %v4624_v40  ;;  %v7728_v26 = vor.u32 %v8299_v17, %v7725_v16  ;;  %v8235_v15 = vld [vmem:[#allocation2 + $0x4] sm:$0xf]  ;;  %v7469_v40 = vld [vmem:[#allocation2 + $0x10] sm:$0xf0] }
 0x558   : > { %v6045_v20 = vmax.f32 %v4889_v0, 0.0  ;;  %v8267_v16 = vld [vmem:[#allocation2 + $0x104] sm:$0xf] }
 0x559   : > { %5138 = vmatpush.bf16.msrb.mxu2 %v7728_v26 }
 0x55b   : > { %v4801_v25 = vpop.f32.mrf.mxu2 }
 0x55c   : > { %v4890_v35 = vpop.f32.mrf.mxu3  ;;  %v4802_v12 = vadd.f32 %v4801_v25, %v4713_v53  ;;  %v4626_v56 = vpop.f32.mrf.mxu0  ;;  %v8331_v53 = vld [vmem:[#allocation2 + $0x304] sm:$0xf]  ;;  %v7472_v25 = vor.u32 %v8235_v15, %v7469_v40 }
 0x55d   : > { %v4715_v4 = vpop.f32.mrf.mxu1  ;;  %v4627_v48 = vadd.f32 %v4626_v56, %v10680_v10  ;;  %v7853_v56 = vld [vmem:[#allocation2 + $0x310] sm:$0xf0] }
 0x55e   : > { %v4891_v31 = vadd.f32 %v4890_v35, %v4802_v12  ;;  %4960 = vmatpush.bf16.msrb.mxu0 %v7472_v25  ;;  %v11709_v25 = vld [vmem:[#allocation63_spill] sm:$0xff] }
 0x55f   : > { %v4716_v38 = vadd.f32 %v4715_v4, %v4627_v48  ;;  %4665 = vmatmul.bf16.gmra.mxu0 %v11705_v30  ;;  %v7856_v48 = vor.u32 %v8331_v53, %v7853_v56  ;;  %v11708_v56 = vld [vmem:[#allocation13_spill] sm:$0xff] }
 0x560   : > { %4754 = vmatmul.bf16.gmra.mxu1 %v11706_v61  ;;  %v6049_v49 = vmax.f32 %v4891_v31, 0.0  ;;  %4843 = vmatmul.bf16.gmra.mxu2 %v10522_v57  ;;  %v7597_v61 = vld [vmem:[#allocation2 + $0x110] sm:$0xf0] }
 0x561   : > { %4932 = vmatmul.bf16.gmra.mxu3 %v10655_v13  ;;  %v7600_v30 = vor.u32 %v8267_v16, %v7597_v61 }
 0x562   : > { %v10719_v35 = vpack.c.bf16 %v6049_v49, %v6045_v20  ;;  %5227 = vmatpush.bf16.msrb.mxu3 %v7856_v48 }
 0x563   : > { %v4804_v12 = vpop.f32.mrf.mxu2  ;;  %5049 = vmatpush.bf16.msrb.mxu1 %v7600_v30 }
 0x564   : > { %11707 = vst [vmem:[#allocation40_spill] sm:$0xff] %v10719_v35  ;;  %v4893_v4 = vpop.f32.mrf.mxu3  ;;  %v4805_v0 = vadd.f32 %v4804_v12, %v4716_v38  ;;  %v4628_v31 = vpop.f32.mrf.mxu0 }
 0x565   : > { %v4717_v18 = vpop.f32.mrf.mxu1  ;;  %v4629_v13 = vadd.f32 %v4628_v31, %v10680_v10 }
 0x566   : > { %v4894_v57 = vadd.f32 %v4893_v4, %v4805_v0 }
 0x567   : > { %v4718_v17 = vadd.f32 %v4717_v18, %v4629_v13 }
 0x568   : > { %v6053_v12 = vmax.f32 %v4894_v57, 0.0 }
 0x56b   : > { %v4806_v15 = vpop.f32.mrf.mxu2 }
 0x56c   : > { %v4895_v40 = vpop.f32.mrf.mxu3  ;;  %v4807_v20 = vadd.f32 %v4806_v15, %v4718_v17  ;;  %v4631_v49 = vpop.f32.mrf.mxu0 }
 0x56d   : > { %v4720_v35 = vpop.f32.mrf.mxu1  ;;  %v4632_v26 = vadd.f32 %v4631_v49, %v10680_v10 }
 0x56e   : > { %v4896_v38 = vadd.f32 %v4895_v40, %v4807_v20 }
 0x56f   : > { %v4721_v53 = vadd.f32 %v4720_v35, %v4632_v26  ;;  %4670 = vmatmul.bf16.gmra.mxu0 %v11708_v56 }
 0x570   : > { %4759 = vmatmul.bf16.gmra.mxu1 %v11709_v25  ;;  %v6057_v4 = vmax.f32 %v4896_v38, 0.0  ;;  %4848 = vmatmul.bf16.gmra.mxu2 %v10530_v63 }
 0x571   : > { %4937 = vmatmul.bf16.gmra.mxu3 %v10663_v24 }
 0x572   : > { %v10727_v13 = vpack.c.bf16 %v6057_v4, %v6053_v12  ;;  %v11711_v12 = vld [vmem:[#allocation14_spill] sm:$0xff]  ;;  %v11712_v4 = vld [vmem:[#allocation64_spill] sm:$0xff] }
 0x573   : > { %v4809_v18 = vpop.f32.mrf.mxu2 }
 0x574   : > { %11710 = vst [vmem:[#allocation43_spill] sm:$0xff] %v10727_v13  ;;  %v4898_v30 = vpop.f32.mrf.mxu3  ;;  %v4810_v61 = vadd.f32 %v4809_v18, %v4721_v53  ;;  %v4633_v48 = vpop.f32.mrf.mxu0 }
 0x575   : > { %v4722_v0 = vpop.f32.mrf.mxu1  ;;  %v4634_v31 = vadd.f32 %v4633_v48, %v10680_v10 }
 0x576   : > { %v4899_v35 = vadd.f32 %v4898_v30, %v4810_v61  ;;  %v7843_v30 = vld [vmem:[#allocation2 + $0x2e8] sm:$0xf]  ;;  %v8330_v61 = vld [vmem:[#allocation2 + $0x2f4] sm:$0xf0] }
 0x577   : > { %v4723_v17 = vadd.f32 %v4722_v0, %v4634_v31  ;;  %v7844_v48 = vor.u32 %v8330_v61, %v7843_v30  ;;  %v7587_v0 = vld [vmem:[#allocation2 + $0xe8] sm:$0xf]  ;;  %v8266_v31 = vld [vmem:[#allocation2 + $0xf4] sm:$0xf0] }
 0x578   : > { %v6061_v53 = vmax.f32 %v4899_v35, 0.0  ;;  %v7715_v61 = vld [vmem:[#allocation2 + $0x1e8] sm:$0xf] }
 0x579   : > { %5487 = vmatpush.bf16.msra.mxu2 %v7844_v48 }
 0x57b   : > { %v4811_v16 = vpop.f32.mrf.mxu2 }
 0x57c   : > { %v4900_v15 = vpop.f32.mrf.mxu3  ;;  %v4812_v40 = vadd.f32 %v4811_v16, %v4723_v17  ;;  %v4636_v57 = vpop.f32.mrf.mxu0  ;;  %v7971_v17 = vld [vmem:[#allocation2 + $0x3e8] sm:$0xf]  ;;  %v7588_v16 = vor.u32 %v8266_v31, %v7587_v0 }
 0x57d   : > { %v4725_v20 = vpop.f32.mrf.mxu1  ;;  %v4637_v49 = vadd.f32 %v4636_v57, %v10680_v10  ;;  %v8362_v57 = vld [vmem:[#allocation2 + $0x3f4] sm:$0xf0] }
 0x57e   : > { %v4901_v26 = vadd.f32 %v4900_v15, %v4812_v40  ;;  %5309 = vmatpush.bf16.msra.mxu0 %v7588_v16  ;;  %v11715_v16 = vld [vmem:[#allocation15_spill] sm:$0xff] }
 0x57f   : > { %v4726_v38 = vadd.f32 %v4725_v20, %v4637_v49  ;;  %4675 = vmatmul.bf16.gmra.mxu0 %v11711_v12  ;;  %v7972_v49 = vor.u32 %v8362_v57, %v7971_v17  ;;  %v11714_v57 = vld [vmem:[#allocation16_spill] sm:$0xff] }
 0x580   : > { %4764 = vmatmul.bf16.gmra.mxu1 %v11712_v4  ;;  %v6065_v18 = vmax.f32 %v4901_v26, 0.0  ;;  %4853 = vmatmul.bf16.gmra.mxu2 %v10538_v34  ;;  %v8298_v4 = vld [vmem:[#allocation2 + $0x1f4] sm:$0xf0] }
 0x581   : > { %4942 = vmatmul.bf16.gmra.mxu3 %v10671_v51  ;;  %v7716_v12 = vor.u32 %v8298_v4, %v7715_v61 }
 0x582   : > { %v10735_v15 = vpack.c.bf16 %v6065_v18, %v6061_v53  ;;  %5576 = vmatpush.bf16.msra.mxu3 %v7972_v49 }
 0x583   : > { %v4814_v40 = vpop.f32.mrf.mxu2  ;;  %5398 = vmatpush.bf16.msra.mxu1 %v7716_v12 }
 0x584   : > { %11713 = vst [vmem:[#allocation44_spill] sm:$0xff] %v10735_v15  ;;  %v4903_v20 = vpop.f32.mrf.mxu3  ;;  %v4815_v35 = vadd.f32 %v4814_v40, %v4726_v38  ;;  %v4638_v26 = vpop.f32.mrf.mxu0 }
 0x585   : > { %v4727_v13 = vpop.f32.mrf.mxu1  ;;  %v4639_v51 = vadd.f32 %v4638_v26, %v10680_v10 }
 0x586   : > { %v4904_v34 = vadd.f32 %v4903_v20, %v4815_v35 }
 0x587   : > { %v4728_v30 = vadd.f32 %v4727_v13, %v4639_v51 }
 0x588   : > { %v6069_v40 = vmax.f32 %v4904_v34, 0.0 }
 0x58b   : > { %v4816_v0 = vpop.f32.mrf.mxu2 }
 0x58c   : > { %v4905_v31 = vpop.f32.mrf.mxu3  ;;  %v4817_v53 = vadd.f32 %v4816_v0, %v4728_v30  ;;  %v4641_v18 = vpop.f32.mrf.mxu0 }
 0x58d   : > { %v4730_v15 = vpop.f32.mrf.mxu1  ;;  %v4642_v48 = vadd.f32 %v4641_v18, %v10680_v10 }
 0x58e   : > { %v4906_v38 = vadd.f32 %v4905_v31, %v4817_v53 }
 0x58f   : > { %v4731_v17 = vadd.f32 %v4730_v15, %v4642_v48  ;;  %4680 = vmatmul.bf16.gmra.mxu0 %v11714_v57 }
 0x590   : > { %4769 = vmatmul.bf16.gmra.mxu1 %v11715_v16  ;;  %v6073_v20 = vmax.f32 %v4906_v38, 0.0  ;;  %4858 = vmatmul.bf16.gmra.mxu2 %v10551_v39 }
 0x591   : > { %4947 = vmatmul.bf16.gmra.mxu3 %v10687_v9 }
 0x592   : > { %v10743_v51 = vpack.c.bf16 %v6073_v20, %v6069_v40  ;;  %v7827_v20 = vld [vmem:[#allocation2 + $0x2c8] sm:$0xf] }
 0x593   : > { %v4819_v13 = vpop.f32.mrf.mxu2 }
 0x594   : > { %11716 = vst [vmem:[#allocation45_spill] sm:$0xff] %v10743_v51  ;;  %v4908_v12 = vpop.f32.mrf.mxu3  ;;  %v4820_v4 = vadd.f32 %v4819_v13, %v4731_v17  ;;  %v4643_v49 = vpop.f32.mrf.mxu0  ;;  %v8326_v13 = vld [vmem:[#allocation2 + $0x2d4] sm:$0xf0] }
 0x595   : > { %v4732_v35 = vpop.f32.mrf.mxu1  ;;  %v4644_v26 = vadd.f32 %v4643_v49, %v10680_v10  ;;  %v8262_v49 = vld [vmem:[#allocation2 + $0xd4] sm:$0xf0] }
 0x596   : > { %v4909_v15 = vadd.f32 %v4908_v12, %v4820_v4  ;;  %v7828_v12 = vor.u32 %v8326_v13, %v7827_v20  ;;  %v7571_v4 = vld [vmem:[#allocation2 + $0xc8] sm:$0xf] }
 0x597   : > { %v4733_v30 = vadd.f32 %v4732_v35, %v4644_v26  ;;  %v7955_v35 = vld [vmem:[#allocation2 + $0x3c8] sm:$0xf]  ;;  %v7572_v26 = vor.u32 %v8262_v49, %v7571_v4 }
 0x598   : > { %v6077_v17 = vmax.f32 %v4909_v15, 0.0  ;;  %5488 = vmatpush.bf16.msra.mxu2 %v7828_v12  ;;  %v7699_v13 = vld [vmem:[#allocation2 + $0x1c8] sm:$0xf] }
 0x599   : > { %5310 = vmatpush.bf16.msra.mxu0 %v7572_v26 }
 0x59b   : > { %v4821_v61 = vpop.f32.mrf.mxu2 }
 0x59c   : > { %v4910_v0 = vpop.f32.mrf.mxu3  ;;  %v4822_v31 = vadd.f32 %v4821_v61, %v4733_v30  ;;  %v4646_v34 = vpop.f32.mrf.mxu0  ;;  %v8358_v30 = vld [vmem:[#allocation2 + $0x3d4] sm:$0xf0] }
 0x59d   : > { %v4735_v53 = vpop.f32.mrf.mxu1  ;;  %v4647_v18 = vadd.f32 %v4646_v34, %v10680_v10  ;;  %v7956_v34 = vor.u32 %v8358_v30, %v7955_v35 }
 0x59e   : > { %v4911_v48 = vadd.f32 %v4910_v0, %v4822_v31 }
 0x59f   : > { %v4736_v38 = vadd.f32 %v4735_v53, %v4647_v18  ;;  %4961 = vmatmul.bf16.vlgmr.msrb.gmra.mxu0 %v11666_v46  ;;  %5577 = vmatpush.bf16.msra.mxu3 %v7956_v34 }
 0x5a0   : > { %5050 = vmatmul.bf16.vlgmr.msrb.gmra.mxu1 %v11667_v50  ;;  %v6081_v40 = vmax.f32 %v4911_v48, 0.0  ;;  %5139 = vmatmul.bf16.vlgmr.msrb.gmra.mxu2 %v11668_v27 }
 0x5a1   : > { %5228 = vmatmul.bf16.vlgmr.msrb.gmra.mxu3 %v10559_v23  ;;  %v8294_v23 = vld [vmem:[#allocation2 + $0x1d4] sm:$0xf0] }
 0x5a2   : > { %v10751_v61 = vpack.c.bf16 %v6081_v40, %v6077_v17  ;;  %v7700_v27 = vor.u32 %v8294_v23, %v7699_v13 }
 0x5a3   : > { %v4824_v0 = vpop.f32.mrf.mxu2 }
 0x5a4   : > { %11717 = vst [vmem:[#allocation46_spill] sm:$0xff] %v10751_v61  ;;  %v4913_v31 = vpop.f32.mrf.mxu3  ;;  %v4825_v15 = vadd.f32 %v4824_v0, %v4736_v38  ;;  %v4648_v53 = vpop.f32.mrf.mxu0  ;;  %5399 = vmatpush.bf16.msra.mxu1 %v7700_v27 }
 0x5a5   : > { %v4737_v18 = vpop.f32.mrf.mxu1  ;;  %v4649_v48 = vadd.f32 %v4648_v53, %v10680_v10 }
 0x5a6   : > { %v4914_v51 = vadd.f32 %v4913_v31, %v4825_v15 }
 0x5a7   : > { %v4738_v20 = vadd.f32 %v4737_v18, %v4649_v48 }
 0x5a8   : > { %v6085_v26 = vmax.f32 %v4914_v51, 0.0 }
 0x5ab   : > { %v4826_v4 = vpop.f32.mrf.mxu2 }
 0x5ac   : > { %v4915_v49 = vpop.f32.mrf.mxu3  ;;  %v4827_v17 = vadd.f32 %v4826_v4, %v4738_v20  ;;  %v4651_v40 = vpop.f32.mrf.mxu0 }
 0x5ad   : > { %v4740_v61 = vpop.f32.mrf.mxu1  ;;  %v4652_v12 = vadd.f32 %v4651_v40, %v10680_v10 }
 0x5ae   : > { %v4916_v38 = vadd.f32 %v4915_v49, %v4827_v17 }
 0x5af   : > { %v4741_v35 = vadd.f32 %v4740_v61, %v4652_v12  ;;  %4966 = vmatmul.bf16.gmra.mxu0 %v11670_v54 }
 0x5b0   : > { %5055 = vmatmul.bf16.gmra.mxu1 %v11671_v21  ;;  %v6089_v30 = vmax.f32 %v4916_v38, 0.0  ;;  %5144 = vmatmul.bf16.gmra.mxu2 %v11672_v7 }
 0x5b1   : > { %5233 = vmatmul.bf16.gmra.mxu3 %v10567_v33 }
 0x5b2   : > { %v10759_v23 = vpack.c.bf16 %v6089_v30, %v6085_v26  ;;  %v8322_v26 = vld [vmem:[#allocation2 + $0x2b4] sm:$0xf0] }
 0x5b3   : > { %v4829_v27 = vpop.f32.mrf.mxu2 }
 0x5b4   : > { %11718 = vst [vmem:[#allocation50_spill] sm:$0xff] %v10759_v23  ;;  %v4918_v0 = vpop.f32.mrf.mxu3  ;;  %v4830_v31 = vadd.f32 %v4829_v27, %v4741_v35  ;;  %v4653_v34 = vpop.f32.mrf.mxu0  ;;  %v7811_v35 = vld [vmem:[#allocation2 + $0x2a8] sm:$0xf] }
 0x5b5   : > { %v4742_v15 = vpop.f32.mrf.mxu1  ;;  %v4654_v53 = vadd.f32 %v4653_v34, %v10680_v10  ;;  %v7812_v30 = vor.u32 %v8322_v26, %v7811_v35  ;;  %v7555_v27 = vld [vmem:[#allocation2 + $0xa8] sm:$0xf]  ;;  %v8290_v26 = vld [vmem:[#allocation2 + $0x1b4] sm:$0xf0] }
 0x5b6   : > { %v4919_v61 = vadd.f32 %v4918_v0, %v4830_v31  ;;  %v8258_v0 = vld [vmem:[#allocation2 + $0xb4] sm:$0xf0]  ;;  %v7939_v31 = vld [vmem:[#allocation2 + $0x3a8] sm:$0xf] }
 0x5b7   : > { %v4743_v18 = vadd.f32 %v4742_v15, %v4654_v53  ;;  %v7556_v34 = vor.u32 %v8258_v0, %v7555_v27  ;;  %v8354_v15 = vld [vmem:[#allocation2 + $0x3b4] sm:$0xf0]  ;;  %5489 = vmatpush.bf16.msra.mxu2 %v7812_v30  ;;  %v7683_v35 = vld [vmem:[#allocation2 + $0x1a8] sm:$0xf] }
 0x5b8   : > { %v6093_v12 = vmax.f32 %v4919_v61, 0.0  ;;  %v7684_v23 = vor.u32 %v8290_v26, %v7683_v35 }
 0x5b9   : > { %5311 = vmatpush.bf16.msra.mxu0 %v7556_v34 }
 0x5ba   : > { %5400 = vmatpush.bf16.msra.mxu1 %v7684_v23 }
 0x5bb   : > { %v4831_v48 = vpop.f32.mrf.mxu2 }
 0x5bc   : > { %v4920_v20 = vpop.f32.mrf.mxu3  ;;  %v4832_v13 = vadd.f32 %v4831_v48, %v4743_v18  ;;  %v4656_v51 = vpop.f32.mrf.mxu0 }
 0x5bd   : > { %v4745_v4 = vpop.f32.mrf.mxu1  ;;  %v4657_v49 = vadd.f32 %v4656_v51, %v10680_v10 }
 0x5be   : > { %v4921_v17 = vadd.f32 %v4920_v20, %v4832_v13  ;;  %v7940_v20 = vor.u32 %v8354_v15, %v7939_v31 }
 0x5bf   : > { %v4746_v40 = vadd.f32 %v4745_v4, %v4657_v49  ;;  %4971 = vmatmul.bf16.gmra.mxu0 %v11674_v55 }
 0x5c0   : > { %5060 = vmatmul.bf16.gmra.mxu1 %v11675_v14  ;;  %v6097_v38 = vmax.f32 %v4921_v17, 0.0  ;;  %5149 = vmatmul.bf16.gmra.mxu2 %v11676_v6 }
 0x5c1   : > { %5238 = vmatmul.bf16.gmra.mxu3 %v10575_v45 }
 0x5c2   : > { %v10767_v53 = vpack.c.bf16 %v6097_v38, %v6093_v12  ;;  %5578 = vmatpush.bf16.msra.mxu3 %v7940_v20 }
 0x5c3   : > { %v4834_v18 = vpop.f32.mrf.mxu2 }
 0x5c4   : > { %11719 = vst [vmem:[#allocation51_spill] sm:$0xff] %v10767_v53  ;;  %v4923_v48 = vpop.f32.mrf.mxu3  ;;  %v4835_v61 = vadd.f32 %v4834_v18, %v4746_v40  ;;  %v4658_v13 = vpop.f32.mrf.mxu0 }
 0x5c5   : > { %v4747_v51 = vpop.f32.mrf.mxu1  ;;  %v4659_v4 = vadd.f32 %v4658_v13, %v10680_v10 }
 0x5c6   : > { %v4924_v49 = vadd.f32 %v4923_v48, %v4835_v61 }
 0x5c7   : > { %v4748_v17 = vadd.f32 %v4747_v51, %v4659_v4 }
 0x5c8   : > { %v6101_v34 = vmax.f32 %v4924_v49, 0.0 }
 0x5cb   : > { %v4836_v27 = vpop.f32.mrf.mxu2 }
 0x5cc   : > { %v4925_v0 = vpop.f32.mrf.mxu3  ;;  %v4837_v12 = vadd.f32 %v4836_v27, %v4748_v17  ;;  %v4661_v38 = vpop.f32.mrf.mxu0 }
 0x5cd   : > { %v4750_v53 = vpop.f32.mrf.mxu1  ;;  %v4662_v30 = vadd.f32 %v4661_v38, %v10680_v10 }
 0x5ce   : > { %v4926_v40 = vadd.f32 %v4925_v0, %v4837_v12 }
 0x5cf   : > { %v4751_v31 = vadd.f32 %v4750_v53, %v4662_v30  ;;  %4976 = vmatmul.bf16.gmra.mxu0 %v11677_v5 }
 0x5d0   : > { %5065 = vmatmul.bf16.gmra.mxu1 %v11678_v58  ;;  %v6105_v15 = vmax.f32 %v4926_v40, 0.0  ;;  %5154 = vmatmul.bf16.gmra.mxu2 %v11679_v62 }
 0x5d1   : > { %5243 = vmatmul.bf16.gmra.mxu3 %v10583_v60 }
 0x5d2   : > { %v10775_v18 = vpack.c.bf16 %v6105_v15, %v6101_v34  ;;  %v8318_v34 = vld [vmem:[#allocation2 + $0x294] sm:$0xf0] }
 0x5d3   : > { %v4839_v23 = vpop.f32.mrf.mxu2 }
 0x5d4   : > { %11720 = vst [vmem:[#allocation53_spill] sm:$0xff] %v10775_v18  ;;  %v4928_v48 = vpop.f32.mrf.mxu3  ;;  %v4840_v20 = vadd.f32 %v4839_v23, %v4751_v31  ;;  %v4663_v61 = vpop.f32.mrf.mxu0  ;;  %v7795_v31 = vld [vmem:[#allocation2 + $0x288] sm:$0xf] }
 0x5d5   : > { %v4752_v13 = vpop.f32.mrf.mxu1  ;;  %v4664_v51 = vadd.f32 %v4663_v61, %v10680_v10  ;;  %v7796_v15 = vor.u32 %v8318_v34, %v7795_v31  ;;  %v7539_v23 = vld [vmem:[#allocation2 + $0x88] sm:$0xf]  ;;  %v8286_v34 = vld [vmem:[#allocation2 + $0x194] sm:$0xf0] }
 0x5d6   : > { %v4929_v53 = vadd.f32 %v4928_v48, %v4840_v20  ;;  %v8254_v48 = vld [vmem:[#allocation2 + $0x94] sm:$0xf0]  ;;  %v7923_v20 = vld [vmem:[#allocation2 + $0x388] sm:$0xf] }
 0x5d7   : > { %v4753_v4 = vadd.f32 %v4752_v13, %v4664_v51  ;;  %v7540_v61 = vor.u32 %v8254_v48, %v7539_v23  ;;  %v8350_v13 = vld [vmem:[#allocation2 + $0x394] sm:$0xf0]  ;;  %5490 = vmatpush.bf16.msra.mxu2 %v7796_v15  ;;  %v7667_v31 = vld [vmem:[#allocation2 + $0x188] sm:$0xf] }
 0x5d8   : > { %v6109_v30 = vmax.f32 %v4929_v53, 0.0  ;;  %v7668_v18 = vor.u32 %v8286_v34, %v7667_v31 }
 0x5d9   : > { %5312 = vmatpush.bf16.msra.mxu0 %v7540_v61 }
 0x5da   : > { %5401 = vmatpush.bf16.msra.mxu1 %v7668_v18 }
 0x5db   : > { %v4841_v17 = vpop.f32.mrf.mxu2 }
 0x5dc   : > { %v4930_v35 = vpop.f32.mrf.mxu3  ;;  %v4842_v26 = vadd.f32 %v4841_v17, %v4753_v4  ;;  %v4666_v49 = vpop.f32.mrf.mxu0 }
 0x5dd   : > { %v4755_v27 = vpop.f32.mrf.mxu1  ;;  %v4667_v0 = vadd.f32 %v4666_v49, %v10680_v10 }
 0x5de   : > { %v4931_v12 = vadd.f32 %v4930_v35, %v4842_v26  ;;  %v7924_v35 = vor.u32 %v8350_v13, %v7923_v20 }
 0x5df   : > { %v4756_v38 = vadd.f32 %v4755_v27, %v4667_v0  ;;  %4981 = vmatmul.bf16.gmra.mxu0 %v11681_v41 }
 0x5e0   : > { %5070 = vmatmul.bf16.gmra.mxu1 %v11682_v32  ;;  %v6113_v40 = vmax.f32 %v4931_v12, 0.0  ;;  %5159 = vmatmul.bf16.gmra.mxu2 %v11683_v29 }
 0x5e1   : > { %5248 = vmatmul.bf16.gmra.mxu3 %v10591_v1 }
 0x5e2   : > { %v10783_v51 = vpack.c.bf16 %v6113_v40, %v6109_v30  ;;  %5579 = vmatpush.bf16.msra.mxu3 %v7924_v35 }
 0x5e3   : > { %v4844_v4 = vpop.f32.mrf.mxu2 }
 0x5e4   : > { %11721 = vst [vmem:[#allocation54_spill] sm:$0xff] %v10783_v51  ;;  %v4933_v17 = vpop.f32.mrf.mxu3  ;;  %v4845_v53 = vadd.f32 %v4844_v4, %v4756_v38  ;;  %v4668_v26 = vpop.f32.mrf.mxu0 }
 0x5e5   : > { %v4757_v49 = vpop.f32.mrf.mxu1  ;;  %v4669_v27 = vadd.f32 %v4668_v26, %v10680_v10 }
 0x5e6   : > { %v4934_v0 = vadd.f32 %v4933_v17, %v4845_v53 }
 0x5e7   : > { %v4758_v12 = vadd.f32 %v4757_v49, %v4669_v27 }
 0x5e8   : > { %v6117_v61 = vmax.f32 %v4934_v0, 0.0 }
 0x5eb   : > { %v4846_v23 = vpop.f32.mrf.mxu2 }
 0x5ec   : > { %v4935_v48 = vpop.f32.mrf.mxu3  ;;  %v4847_v30 = vadd.f32 %v4846_v23, %v4758_v12  ;;  %v4671_v40 = vpop.f32.mrf.mxu0 }
 0x5ed   : > { %v4760_v51 = vpop.f32.mrf.mxu1  ;;  %v4672_v15 = vadd.f32 %v4671_v40, %v10680_v10 }
 0x5ee   : > { %v4936_v38 = vadd.f32 %v4935_v48, %v4847_v30 }
 0x5ef   : > { %v4761_v20 = vadd.f32 %v4760_v51, %v4672_v15  ;;  %4986 = vmatmul.bf16.gmra.mxu0 %v11684_v37  ;;  %v11723_v15 = vld [vmem:[#allocation60_spill] sm:$0xff] }
 0x5f0   : > { %5075 = vmatmul.bf16.gmra.mxu1 %v11685_v28  ;;  %v6121_v13 = vmax.f32 %v4936_v38, 0.0  ;;  %5164 = vmatmul.bf16.gmra.mxu2 %v11686_v22  ;;  %v11724_v38 = vld [vmem:[#allocation23_spill] sm:$0xff] }
 0x5f1   : > { %5253 = vmatmul.bf16.gmra.mxu3 %v10599_v2 }
 0x5f2   : > { %v10791_v4 = vpack.c.bf16 %v6121_v13, %v6117_v61  ;;  %v11725_v13 = vld [vmem:[#allocation70_spill] sm:$0xff] }
 0x5f3   : > { %v4849_v18 = vpop.f32.mrf.mxu2 }
 0x5f4   : > { %11722 = vst [vmem:[#allocation56_spill] sm:$0xff] %v10791_v4  ;;  %v4938_v17 = vpop.f32.mrf.mxu3  ;;  %v4850_v35 = vadd.f32 %v4849_v18, %v4761_v20  ;;  %v4673_v53 = vpop.f32.mrf.mxu0  ;;  %v11726_v18 = vld [vmem:[#allocation30_spill] sm:$0xff] }
 0x5f5   : > { %v4762_v26 = vpop.f32.mrf.mxu1  ;;  %v4674_v49 = vadd.f32 %v4673_v53, %v10680_v10 }
 0x5f6   : > { %v4939_v51 = vadd.f32 %v4938_v17, %v4850_v35  ;;  %v7779_v17 = vld [vmem:[#allocation2 + $0x268] sm:$0xf]  ;;  %v8314_v35 = vld [vmem:[#allocation2 + $0x274] sm:$0xf0] }
 0x5f7   : > { %v4763_v27 = vadd.f32 %v4762_v26, %v4674_v49  ;;  %v7780_v53 = vor.u32 %v8314_v35, %v7779_v17  ;;  %v7523_v26 = vld [vmem:[#allocation2 + $0x68] sm:$0xf]  ;;  %v8250_v49 = vld [vmem:[#allocation2 + $0x74] sm:$0xf0] }
 0x5f8   : > { %v6125_v20 = vmax.f32 %v4939_v51, 0.0  ;;  %v7651_v35 = vld [vmem:[#allocation2 + $0x168] sm:$0xf] }
 0x5f9   : > { %5491 = vmatpush.bf16.msra.mxu2 %v7780_v53 }
 0x5fb   : > { %v4851_v12 = vpop.f32.mrf.mxu2 }
 0x5fc   : > { %v4940_v31 = vpop.f32.mrf.mxu3  ;;  %v4852_v34 = vadd.f32 %v4851_v12, %v4763_v27  ;;  %v4676_v0 = vpop.f32.mrf.mxu0  ;;  %v7907_v27 = vld [vmem:[#allocation2 + $0x368] sm:$0xf]  ;;  %v7524_v12 = vor.u32 %v8250_v49, %v7523_v26 }
 0x5fd   : > { %v4765_v23 = vpop.f32.mrf.mxu1  ;;  %v4677_v48 = vadd.f32 %v4676_v0, %v10680_v10  ;;  %v8346_v0 = vld [vmem:[#allocation2 + $0x374] sm:$0xf0] }
 0x5fe   : > { %v4941_v30 = vadd.f32 %v4940_v31, %v4852_v34  ;;  %5313 = vmatpush.bf16.msra.mxu0 %v7524_v12 }
 0x5ff   : > { %v4766_v40 = vadd.f32 %v4765_v23, %v4677_v48  ;;  %4991 = vmatmul.bf16.gmra.mxu0 %v11723_v15  ;;  %v7908_v48 = vor.u32 %v8346_v0, %v7907_v27 }
 0x600   : > { %5080 = vmatmul.bf16.gmra.mxu1 %v11724_v38  ;;  %v6129_v61 = vmax.f32 %v4941_v30, 0.0  ;;  %5169 = vmatmul.bf16.gmra.mxu2 %v11725_v13  ;;  %v8282_v38 = vld [vmem:[#allocation2 + $0x174] sm:$0xf0] }
 0x601   : > { %5258 = vmatmul.bf16.gmra.mxu3 %v11726_v18  ;;  %v7652_v15 = vor.u32 %v8282_v38, %v7651_v35 }
 0x602   : > { %v10799_v31 = vpack.c.bf16 %v6129_v61, %v6125_v20  ;;  %5580 = vmatpush.bf16.msra.mxu3 %v7908_v48 }
 0x603   : > { %v4854_v34 = vpop.f32.mrf.mxu2  ;;  %5402 = vmatpush.bf16.msra.mxu1 %v7652_v15 }
 0x604   : > { %11727 = vst [vmem:[#allocation57_spill] sm:$0xff] %v10799_v31  ;;  %v4943_v23 = vpop.f32.mrf.mxu3  ;;  %v4855_v51 = vadd.f32 %v4854_v34, %v4766_v40  ;;  %v4678_v30 = vpop.f32.mrf.mxu0 }
 0x605   : > { %v4767_v4 = vpop.f32.mrf.mxu1  ;;  %v4679_v18 = vadd.f32 %v4678_v30, %v10680_v10 }
 0x606   : > { %v4944_v13 = vadd.f32 %v4943_v23, %v4855_v51 }
 0x607   : > { %v4768_v17 = vadd.f32 %v4767_v4, %v4679_v18  ;;  %v11728_v4 = vld [vmem:[#allocation31_spill] sm:$0xff] }
 0x608   : > { %v6133_v12 = vmax.f32 %v4944_v13, 0.0 }
 0x60b   : > { %v4856_v26 = vpop.f32.mrf.mxu2 }
 0x60c   : > { %v4945_v49 = vpop.f32.mrf.mxu3  ;;  %v4857_v20 = vadd.f32 %v4856_v26, %v4768_v17  ;;  %v4681_v61 = vpop.f32.mrf.mxu0  ;;  %v11730_v17 = vld [vmem:[#allocation36_spill] sm:$0xff] }
 0x60d   : > { %v4770_v31 = vpop.f32.mrf.mxu1  ;;  %v4682_v53 = vadd.f32 %v4681_v61, %v10680_v10  ;;  %v10811_v35 = vperm.slane %v11730_v17, 1  ;;  %v8246_v17 = vld [vmem:[#allocation2 + $0x54] sm:$0xf0] }
 0x60e   : > { %v4946_v40 = vadd.f32 %v4945_v49, %v4857_v20 }
 0x60f   : > { %v4771_v27 = vadd.f32 %v4770_v31, %v4682_v53  ;;  %4996 = vmatmul.bf16.gmra.mxu0 %v11690_v52 }
 0x610   : > { %5085 = vmatmul.bf16.gmra.mxu1 %v11691_v42  ;;  %v6137_v0 = vmax.f32 %v4946_v40, 0.0  ;;  %5174 = vmatmul.bf16.gmra.mxu2 %v10482_v19 }
 0x611   : > { %5263 = vmatmul.bf16.gmra.mxu3 %v11728_v4 }
 0x612   : > { %v10807_v38 = vpack.c.bf16 %v6137_v0, %v6133_v12  ;;  %v11731_v0 = vld [vmem:[#allocation8_spill] sm:$0xff] }
 0x613   : > { %v4859_v15 = vpop.f32.mrf.mxu2 }
 0x614   : > { %11729 = vst [vmem:[#allocation58_spill] sm:$0xff] %v10807_v38  ;;  %v4948_v18 = vpop.f32.mrf.mxu3  ;;  %v4860_v34 = vadd.f32 %v4859_v15, %v4771_v27  ;;  %v4683_v23 = vpop.f32.mrf.mxu0  ;;  %v11732_v27 = vld [vmem:[#allocation25_spill] sm:$0xff] }
 0x615   : > { %v4772_v48 = vpop.f32.mrf.mxu1  ;;  %v4684_v51 = vadd.f32 %v4683_v23, %v10680_v10  ;;  %v7763_v23 = vld [vmem:[#allocation2 + $0x248] sm:$0xf] }
 0x616   : > { %v4949_v31 = vadd.f32 %v4948_v18, %v4860_v34  ;;  %v11733_v18 = vld [vmem:[#allocation71_spill] sm:$0xff]  ;;  %v11734_v34 = vld [vmem:[#allocation32_spill] sm:$0xff] }
 0x617   : > { %v4773_v30 = vadd.f32 %v4772_v48, %v4684_v51  ;;  %v8310_v48 = vld [vmem:[#allocation2 + $0x254] sm:$0xf0] }
 0x618   : > { %v6141_v15 = vmax.f32 %v4949_v31, 0.0  ;;  %v7764_v51 = vor.u32 %v8310_v48, %v7763_v23  ;;  %v7635_v48 = vld [vmem:[#allocation2 + $0x148] sm:$0xf] }
 0x61a   : > { %5492 = vmatpush.bf16.msra.mxu2 %v7764_v51 }
 0x61b   : > { %v4861_v13 = vpop.f32.mrf.mxu2 }
 0x61c   : > { %v4950_v26 = vpop.f32.mrf.mxu3  ;;  %v4862_v49 = vadd.f32 %v4861_v13, %v4773_v30  ;;  %v4962_v20 = vpop.f32.mrf.mxu0  ;;  %v7507_v30 = vld [vmem:[#allocation2 + $0x48] sm:$0xf] }
 0x61d   : > { %v5051_v61 = vpop.f32.mrf.mxu1  ;;  %v4963_v53 = vadd.f32 %v4962_v20, %v10811_v35  ;;  %v7891_v13 = vld [vmem:[#allocation2 + $0x348] sm:$0xf]  ;;  %v7508_v38 = vor.u32 %v8246_v17, %v7507_v30  ;;  %v8342_v20 = vld [vmem:[#allocation2 + $0x354] sm:$0xf0] }
 0x61e   : > { %v4951_v40 = vadd.f32 %v4950_v26, %v4862_v49 }
 0x61f   : > { %v5052_v12 = vadd.f32 %v5051_v61, %v4963_v53  ;;  %5001 = vmatmul.bf16.gmra.mxu0 %v11731_v0  ;;  %v7892_v53 = vor.u32 %v8342_v20, %v7891_v13  ;;  %v8278_v0 = vld [vmem:[#allocation2 + $0x154] sm:$0xf0] }
 0x620   : > { %5090 = vmatmul.bf16.gmra.mxu1 %v11732_v27  ;;  %v6145_v10 = vmax.f32 %v4951_v40, 0.0  ;;  %5179 = vmatmul.bf16.gmra.mxu2 %v11733_v18  ;;  %v7636_v4 = vor.u32 %v8278_v0, %v7635_v48 }
 0x621   : > { %5268 = vmatmul.bf16.gmra.mxu3 %v11734_v34  ;;  %5314 = vmatpush.bf16.msra.mxu0 %v7508_v38 }
 0x622   : > { %v10818_v26 = vpack.c.bf16 %v6145_v10, %v6141_v15  ;;  %5581 = vmatpush.bf16.msra.mxu3 %v7892_v53  ;;  %5403 = vmatpush.bf16.msra.mxu1 %v7636_v4 }
 0x623   : > { %v5140_v49 = vpop.f32.mrf.mxu2 }
 0x624   : > { %11735 = vst [vmem:[#allocation41_spill] sm:$0xff] %v10818_v26  ;;  %v5229_v61 = vpop.f32.mrf.mxu3  ;;  %v5141_v31 = vadd.f32 %v5140_v49, %v5052_v12  ;;  %v4964_v40 = vpop.f32.mrf.mxu0 }
 0x625   : > { %v5053_v27 = vpop.f32.mrf.mxu1  ;;  %v4965_v34 = vadd.f32 %v4964_v40, %v10811_v35 }
 0x626   : > { %v5230_v18 = vadd.f32 %v5229_v61, %v5141_v31 }
 0x627   : > { %v5054_v23 = vadd.f32 %v5053_v27, %v4965_v34 }
 0x628   : > { %v6022_v38 = vmax.f32 %v5230_v18, 0.0 }
 0x62b   : > { %v5142_v30 = vpop.f32.mrf.mxu2 }
 0x62c   : > { %v5231_v17 = vpop.f32.mrf.mxu3  ;;  %v5143_v15 = vadd.f32 %v5142_v30, %v5054_v23  ;;  %v4967_v10 = vpop.f32.mrf.mxu0 }
 0x62d   : > { %v5056_v26 = vpop.f32.mrf.mxu1  ;;  %v4968_v51 = vadd.f32 %v4967_v10, %v10811_v35 }
 0x62e   : > { %v5232_v12 = vadd.f32 %v5231_v17, %v5143_v15 }
 0x62f   : > { %v5057_v13 = vadd.f32 %v5056_v26, %v4968_v51  ;;  %5006 = vmatmul.bf16.gmra.mxu0 %v11696_v47  ;;  %v11737_v51 = vld [vmem:[#allocation10_spill] sm:$0xff] }
 0x630   : > { %5095 = vmatmul.bf16.gmra.mxu1 %v11697_v3  ;;  %v6026_v20 = vmax.f32 %v5232_v12, 0.0  ;;  %5184 = vmatmul.bf16.gmra.mxu2 %v10498_v44  ;;  %v11738_v12 = vld [vmem:[#allocation27_spill] sm:$0xff] }
 0x631   : > { %5273 = vmatmul.bf16.gmra.mxu3 %v10631_v11 }
 0x632   : > { %v10826_v0 = vpack.c.bf16 %v6026_v20, %v6022_v38  ;;  %v11739_v20 = vld [vmem:[#allocation72_spill] sm:$0xff] }
 0x633   : > { %v5145_v4 = vpop.f32.mrf.mxu2 }
 0x634   : > { %11736 = vst [vmem:[#allocation17_spill] sm:$0xff] %v10826_v0  ;;  %v5234_v27 = vpop.f32.mrf.mxu3  ;;  %v5146_v34 = vadd.f32 %v5145_v4, %v5057_v13  ;;  %v4969_v49 = vpop.f32.mrf.mxu0  ;;  %v11740_v4 = vld [vmem:[#allocation33_spill] sm:$0xff] }
 0x635   : > { %v5058_v61 = vpop.f32.mrf.mxu1  ;;  %v4970_v53 = vadd.f32 %v4969_v49, %v10811_v35 }
 0x636   : > { %v5235_v26 = vadd.f32 %v5234_v27, %v5146_v34  ;;  %v7747_v27 = vld [vmem:[#allocation2 + $0x228] sm:$0xf]  ;;  %v8306_v34 = vld [vmem:[#allocation2 + $0x234] sm:$0xf0] }
 0x637   : > { %v5059_v31 = vadd.f32 %v5058_v61, %v4970_v53  ;;  %v7748_v49 = vor.u32 %v8306_v34, %v7747_v27  ;;  %v7491_v61 = vld [vmem:[#allocation2 + $0x28] sm:$0xf]  ;;  %v8242_v53 = vld [vmem:[#allocation2 + $0x34] sm:$0xf0] }
 0x638   : > { %v6030_v13 = vmax.f32 %v5235_v26, 0.0  ;;  %v7619_v34 = vld [vmem:[#allocation2 + $0x128] sm:$0xf] }
 0x639   : > { %5493 = vmatpush.bf16.msra.mxu2 %v7748_v49 }
 0x63b   : > { %v5147_v40 = vpop.f32.mrf.mxu2 }
 0x63c   : > { %v5236_v23 = vpop.f32.mrf.mxu3  ;;  %v5148_v48 = vadd.f32 %v5147_v40, %v5059_v31  ;;  %v4972_v18 = vpop.f32.mrf.mxu0  ;;  %v7875_v31 = vld [vmem:[#allocation2 + $0x328] sm:$0xf]  ;;  %v7492_v40 = vor.u32 %v8242_v53, %v7491_v61 }
 0x63d   : > { %v5061_v30 = vpop.f32.mrf.mxu1  ;;  %v4973_v17 = vadd.f32 %v4972_v18, %v10811_v35  ;;  %v8338_v18 = vld [vmem:[#allocation2 + $0x334] sm:$0xf0] }
 0x63e   : > { %v5237_v15 = vadd.f32 %v5236_v23, %v5148_v48  ;;  %5315 = vmatpush.bf16.msra.mxu0 %v7492_v40 }
 0x63f   : > { %v5062_v10 = vadd.f32 %v5061_v30, %v4973_v17  ;;  %5011 = vmatmul.bf16.gmra.mxu0 %v11737_v51  ;;  %v7876_v17 = vor.u32 %v8338_v18, %v7875_v31 }
 0x640   : > { %5100 = vmatmul.bf16.gmra.mxu1 %v11738_v12  ;;  %v6034_v38 = vmax.f32 %v5237_v15, 0.0  ;;  %5189 = vmatmul.bf16.gmra.mxu2 %v11739_v20  ;;  %v8274_v12 = vld [vmem:[#allocation2 + $0x134] sm:$0xf0] }
 0x641   : > { %5278 = vmatmul.bf16.gmra.mxu3 %v11740_v4  ;;  %v7620_v51 = vor.u32 %v8274_v12, %v7619_v34 }
 0x642   : > { %v10834_v23 = vpack.c.bf16 %v6034_v38, %v6030_v13  ;;  %5582 = vmatpush.bf16.msra.mxu3 %v7876_v17 }
 0x643   : > { %v5150_v48 = vpop.f32.mrf.mxu2  ;;  %5404 = vmatpush.bf16.msra.mxu1 %v7620_v51 }
 0x644   : > { %11741 = vst [vmem:[#allocation42_spill] sm:$0xff] %v10834_v23  ;;  %v5239_v30 = vpop.f32.mrf.mxu3  ;;  %v5151_v26 = vadd.f32 %v5150_v48, %v5062_v10  ;;  %v4974_v15 = vpop.f32.mrf.mxu0 }
 0x645   : > { %v5063_v0 = vpop.f32.mrf.mxu1  ;;  %v4975_v4 = vadd.f32 %v4974_v15, %v10811_v35 }
 0x646   : > { %v5240_v20 = vadd.f32 %v5239_v30, %v5151_v26 }
 0x647   : > { %v5064_v27 = vadd.f32 %v5063_v0, %v4975_v4 }
 0x648   : > { %v6038_v40 = vmax.f32 %v5240_v20, 0.0 }
 0x64b   : > { %v5152_v61 = vpop.f32.mrf.mxu2 }
 0x64c   : > { %v5241_v53 = vpop.f32.mrf.mxu3  ;;  %v5153_v13 = vadd.f32 %v5152_v61, %v5064_v27  ;;  %v4977_v38 = vpop.f32.mrf.mxu0 }
 0x64d   : > { %v5066_v23 = vpop.f32.mrf.mxu1  ;;  %v4978_v49 = vadd.f32 %v4977_v38, %v10811_v35 }
 0x64e   : > { %v5242_v10 = vadd.f32 %v5241_v53, %v5153_v13 }
 0x64f   : > { %v5067_v31 = vadd.f32 %v5066_v23, %v4978_v49  ;;  %5016 = vmatmul.bf16.gmra.mxu0 %v11702_v59  ;;  %v11743_v49 = vld [vmem:[#allocation12_spill] sm:$0xff] }
 0x650   : > { %5105 = vmatmul.bf16.gmra.mxu1 %v11703_v36  ;;  %v6042_v18 = vmax.f32 %v5242_v10, 0.0  ;;  %5194 = vmatmul.bf16.gmra.mxu2 %v10514_v8  ;;  %v11744_v10 = vld [vmem:[#allocation62_spill] sm:$0xff] }
 0x651   : > { %5283 = vmatmul.bf16.gmra.mxu3 %v10647_v43 }
 0x652   : > { %v10842_v0 = vpack.c.bf16 %v6042_v18, %v6038_v40  ;;  %v11745_v18 = vld [vmem:[#allocation73_spill] sm:$0xff] }
 0x653   : > { %v5155_v51 = vpop.f32.mrf.mxu2 }
 0x654   : > { %11742 = vst [vmem:[#allocation18_spill] sm:$0xff] %v10842_v0  ;;  %v5244_v12 = vpop.f32.mrf.mxu3  ;;  %v5156_v4 = vadd.f32 %v5155_v51, %v5067_v31  ;;  %v4979_v48 = vpop.f32.mrf.mxu0  ;;  %v11746_v51 = vld [vmem:[#allocation34_spill] sm:$0xff] }
 0x655   : > { %v5068_v30 = vpop.f32.mrf.mxu1  ;;  %v4980_v17 = vadd.f32 %v4979_v48, %v10811_v35 }
 0x656   : > { %v5245_v23 = vadd.f32 %v5244_v12, %v5156_v4  ;;  %v7731_v12 = vld [vmem:[#allocation2 + $0x208] sm:$0xf]  ;;  %v8302_v4 = vld [vmem:[#allocation2 + $0x214] sm:$0xf0] }
 0x657   : > { %v5069_v26 = vadd.f32 %v5068_v30, %v4980_v17  ;;  %v7732_v48 = vor.u32 %v8302_v4, %v7731_v12  ;;  %v7475_v30 = vld [vmem:[#allocation2 + $0x8] sm:$0xf]  ;;  %v8238_v17 = vld [vmem:[#allocation2 + $0x14] sm:$0xf0] }
 0x658   : > { %v6046_v31 = vmax.f32 %v5245_v23, 0.0  ;;  %v7603_v4 = vld [vmem:[#allocation2 + $0x108] sm:$0xf] }
 0x659   : > { %5494 = vmatpush.bf16.msra.mxu2 %v7732_v48 }
 0x65b   : > { %v5157_v15 = vpop.f32.mrf.mxu2 }
 0x65c   : > { %v5246_v27 = vpop.f32.mrf.mxu3  ;;  %v5158_v34 = vadd.f32 %v5157_v15, %v5069_v26  ;;  %v4982_v20 = vpop.f32.mrf.mxu0  ;;  %v7859_v26 = vld [vmem:[#allocation2 + $0x308] sm:$0xf]  ;;  %v7476_v15 = vor.u32 %v8238_v17, %v7475_v30 }
 0x65d   : > { %v5071_v61 = vpop.f32.mrf.mxu1  ;;  %v4983_v53 = vadd.f32 %v4982_v20, %v10811_v35  ;;  %v8334_v20 = vld [vmem:[#allocation2 + $0x314] sm:$0xf0] }
 0x65e   : > { %v5247_v13 = vadd.f32 %v5246_v27, %v5158_v34  ;;  %5316 = vmatpush.bf16.msra.mxu0 %v7476_v15 }
 0x65f   : > { %v5072_v38 = vadd.f32 %v5071_v61, %v4983_v53  ;;  %5021 = vmatmul.bf16.gmra.mxu0 %v11743_v49  ;;  %v7860_v53 = vor.u32 %v8334_v20, %v7859_v26 }
 0x660   : > { %5110 = vmatmul.bf16.gmra.mxu1 %v11744_v10  ;;  %v6050_v40 = vmax.f32 %v5247_v13, 0.0  ;;  %5199 = vmatmul.bf16.gmra.mxu2 %v11745_v18  ;;  %v8270_v10 = vld [vmem:[#allocation2 + $0x114] sm:$0xf0] }
 0x661   : > { %5288 = vmatmul.bf16.gmra.mxu3 %v11746_v51  ;;  %v7604_v49 = vor.u32 %v8270_v10, %v7603_v4 }
 0x662   : > { %v10850_v27 = vpack.c.bf16 %v6050_v40, %v6046_v31  ;;  %5583 = vmatpush.bf16.msra.mxu3 %v7860_v53 }
 0x663   : > { %v5160_v34 = vpop.f32.mrf.mxu2  ;;  %5405 = vmatpush.bf16.msra.mxu1 %v7604_v49 }
 0x664   : > { %11747 = vst [vmem:[#allocation66_spill] sm:$0xff] %v10850_v27  ;;  %v5249_v61 = vpop.f32.mrf.mxu3  ;;  %v5161_v23 = vadd.f32 %v5160_v34, %v5072_v38  ;;  %v4984_v13 = vpop.f32.mrf.mxu0 }
 0x665   : > { %v5073_v0 = vpop.f32.mrf.mxu1  ;;  %v4985_v51 = vadd.f32 %v4984_v13, %v10811_v35 }
 0x666   : > { %v5250_v18 = vadd.f32 %v5249_v61, %v5161_v23 }
 0x667   : > { %v5074_v12 = vadd.f32 %v5073_v0, %v4985_v51 }
 0x668   : > { %v6054_v15 = vmax.f32 %v5250_v18, 0.0 }
 0x66b   : > { %v5162_v30 = vpop.f32.mrf.mxu2 }
 0x66c   : > { %v5251_v17 = vpop.f32.mrf.mxu3  ;;  %v5163_v31 = vadd.f32 %v5162_v30, %v5074_v12  ;;  %v4987_v40 = vpop.f32.mrf.mxu0 }
 0x66d   : > { %v5076_v27 = vpop.f32.mrf.mxu1  ;;  %v4988_v48 = vadd.f32 %v4987_v40, %v10811_v35 }
 0x66e   : > { %v5252_v38 = vadd.f32 %v5251_v17, %v5163_v31 }
 0x66f   : > { %v5077_v26 = vadd.f32 %v5076_v27, %v4988_v48  ;;  %5026 = vmatmul.bf16.gmra.mxu0 %v11708_v56  ;;  %v11749_v48 = vld [vmem:[#allocation14_spill] sm:$0xff] }
 0x670   : > { %5115 = vmatmul.bf16.gmra.mxu1 %v11709_v25  ;;  %v6058_v20 = vmax.f32 %v5252_v38, 0.0  ;;  %5204 = vmatmul.bf16.gmra.mxu2 %v10530_v63  ;;  %v11750_v38 = vld [vmem:[#allocation64_spill] sm:$0xff] }
 0x671   : > { %5293 = vmatmul.bf16.gmra.mxu3 %v10663_v24 }
 0x672   : > { %v10858_v0 = vpack.c.bf16 %v6058_v20, %v6054_v15  ;;  %v11751_v20 = vld [vmem:[#allocation28_spill] sm:$0xff] }
 0x673   : > { %v5165_v49 = vpop.f32.mrf.mxu2 }
 0x674   : > { %11748 = vst [vmem:[#allocation47_spill] sm:$0xff] %v10858_v0  ;;  %v5254_v10 = vpop.f32.mrf.mxu3  ;;  %v5166_v51 = vadd.f32 %v5165_v49, %v5077_v26  ;;  %v4989_v34 = vpop.f32.mrf.mxu0  ;;  %v11752_v49 = vld [vmem:[#allocation35_spill] sm:$0xff] }
 0x675   : > { %v5078_v61 = vpop.f32.mrf.mxu1  ;;  %v4990_v53 = vadd.f32 %v4989_v34, %v10811_v35 }
 0x676   : > { %v5255_v27 = vadd.f32 %v5254_v10, %v5166_v51  ;;  %v8328_v10 = vld [vmem:[#allocation2 + $0x2ec] sm:$0xf]  ;;  %v7845_v51 = vld [vmem:[#allocation2 + $0x2f8] sm:$0xf0] }
 0x677   : > { %v5079_v23 = vadd.f32 %v5078_v61, %v4990_v53  ;;  %v7848_v34 = vor.u32 %v8328_v10, %v7845_v51  ;;  %v8264_v61 = vld [vmem:[#allocation2 + $0xec] sm:$0xf]  ;;  %v7589_v53 = vld [vmem:[#allocation2 + $0xf8] sm:$0xf0] }
 0x678   : > { %v6062_v26 = vmax.f32 %v5255_v27, 0.0  ;;  %v8296_v51 = vld [vmem:[#allocation2 + $0x1ec] sm:$0xf] }
 0x679   : > { %5843 = vmatpush.bf16.msrb.mxu2 %v7848_v34 }
 0x67b   : > { %v5167_v13 = vpop.f32.mrf.mxu2 }
 0x67c   : > { %v5256_v12 = vpop.f32.mrf.mxu3  ;;  %v5168_v4 = vadd.f32 %v5167_v13, %v5079_v23  ;;  %v4992_v18 = vpop.f32.mrf.mxu0  ;;  %v8360_v23 = vld [vmem:[#allocation2 + $0x3ec] sm:$0xf]  ;;  %v7592_v13 = vor.u32 %v8264_v61, %v7589_v53 }
 0x67d   : > { %v5081_v30 = vpop.f32.mrf.mxu1  ;;  %v4993_v17 = vadd.f32 %v4992_v18, %v10811_v35  ;;  %v7973_v18 = vld [vmem:[#allocation2 + $0x3f8] sm:$0xf0] }
 0x67e   : > { %v5257_v31 = vadd.f32 %v5256_v12, %v5168_v4  ;;  %5665 = vmatpush.bf16.msrb.mxu0 %v7592_v13 }
 0x67f   : > { %v5082_v40 = vadd.f32 %v5081_v30, %v4993_v17  ;;  %5031 = vmatmul.bf16.gmra.mxu0 %v11749_v48  ;;  %v7976_v17 = vor.u32 %v8360_v23, %v7973_v18 }
 0x680   : > { %5120 = vmatmul.bf16.gmra.mxu1 %v11750_v38  ;;  %v6066_v15 = vmax.f32 %v5257_v31, 0.0  ;;  %5209 = vmatmul.bf16.gmra.mxu2 %v11751_v20  ;;  %v7717_v38 = vld [vmem:[#allocation2 + $0x1f8] sm:$0xf0] }
 0x681   : > { %5298 = vmatmul.bf16.gmra.mxu3 %v11752_v49  ;;  %v7720_v48 = vor.u32 %v8296_v51, %v7717_v38 }
 0x682   : > { %v10866_v12 = vpack.c.bf16 %v6066_v15, %v6062_v26  ;;  %5932 = vmatpush.bf16.msrb.mxu3 %v7976_v17 }
 0x683   : > { %v5170_v4 = vpop.f32.mrf.mxu2  ;;  %5754 = vmatpush.bf16.msrb.mxu1 %v7720_v48 }
 0x684   : > { %11753 = vst [vmem:[#allocation19_spill] sm:$0xff] %v10866_v12  ;;  %v5259_v30 = vpop.f32.mrf.mxu3  ;;  %v5171_v27 = vadd.f32 %v5170_v4, %v5082_v40  ;;  %v4994_v31 = vpop.f32.mrf.mxu0 }
 0x685   : > { %v5083_v0 = vpop.f32.mrf.mxu1  ;;  %v4995_v49 = vadd.f32 %v4994_v31, %v10811_v35 }
 0x686   : > { %v5260_v20 = vadd.f32 %v5259_v30, %v5171_v27 }
 0x687   : > { %v5084_v10 = vadd.f32 %v5083_v0, %v4995_v49 }
 0x688   : > { %v6070_v13 = vmax.f32 %v5260_v20, 0.0 }
 0x68b   : > { %v5172_v61 = vpop.f32.mrf.mxu2 }
 0x68c   : > { %v5261_v53 = vpop.f32.mrf.mxu3  ;;  %v5173_v26 = vadd.f32 %v5172_v61, %v5084_v10  ;;  %v4997_v15 = vpop.f32.mrf.mxu0 }
 0x68d   : > { %v5086_v12 = vpop.f32.mrf.mxu1  ;;  %v4998_v34 = vadd.f32 %v4997_v15, %v10811_v35 }
 0x68e   : > { %v5262_v40 = vadd.f32 %v5261_v53, %v5173_v26 }
 0x68f   : > { %v5087_v23 = vadd.f32 %v5086_v12, %v4998_v34  ;;  %5036 = vmatmul.bf16.gmra.mxu0 %v11714_v57 }
 0x690   : > { %5125 = vmatmul.bf16.gmra.mxu1 %v11715_v16  ;;  %v6074_v18 = vmax.f32 %v5262_v40, 0.0  ;;  %5214 = vmatmul.bf16.gmra.mxu2 %v10551_v39 }
 0x691   : > { %5303 = vmatmul.bf16.gmra.mxu3 %v10687_v9 }
 0x692   : > { %v10874_v0 = vpack.c.bf16 %v6074_v18, %v6070_v13  ;;  %v11756_v13 = vld [vmem:[#allocation29_spill] sm:$0xff] }
 0x693   : > { %v5175_v48 = vpop.f32.mrf.mxu2  ;;  %v8324_v18 = vld [vmem:[#allocation2 + $0x2cc] sm:$0xf] }
 0x694   : > { %11754 = vst [vmem:[#allocation67_spill] sm:$0xff] %v10874_v0  ;;  %v5264_v38 = vpop.f32.mrf.mxu3  ;;  %v5176_v49 = vadd.f32 %v5175_v48, %v5087_v23  ;;  %v4999_v4 = vpop.f32.mrf.mxu0  ;;  %v11755_v23 = vld [vmem:[#allocation65_spill] sm:$0xff]  ;;  %v7829_v48 = vld [vmem:[#allocation2 + $0x2d8] sm:$0xf0] }
 0x695   : > { %v5088_v30 = vpop.f32.mrf.mxu1  ;;  %v5000_v17 = vadd.f32 %v4999_v4, %v10811_v35  ;;  %v7573_v4 = vld [vmem:[#allocation2 + $0xd8] sm:$0xf0] }
 0x696   : > { %v5265_v12 = vadd.f32 %v5264_v38, %v5176_v49  ;;  %v7832_v38 = vor.u32 %v8324_v18, %v7829_v48  ;;  %v8260_v49 = vld [vmem:[#allocation2 + $0xcc] sm:$0xf] }
 0x697   : > { %v5089_v27 = vadd.f32 %v5088_v30, %v5000_v17  ;;  %v8356_v30 = vld [vmem:[#allocation2 + $0x3cc] sm:$0xf]  ;;  %v7576_v17 = vor.u32 %v8260_v49, %v7573_v4 }
 0x698   : > { %v6078_v34 = vmax.f32 %v5265_v12, 0.0  ;;  %5844 = vmatpush.bf16.msrb.mxu2 %v7832_v38  ;;  %v8292_v48 = vld [vmem:[#allocation2 + $0x1cc] sm:$0xf] }
 0x699   : > { %5666 = vmatpush.bf16.msrb.mxu0 %v7576_v17 }
 0x69b   : > { %v5177_v31 = vpop.f32.mrf.mxu2 }
 0x69c   : > { %v5266_v10 = vpop.f32.mrf.mxu3  ;;  %v5178_v51 = vadd.f32 %v5177_v31, %v5089_v27  ;;  %v5002_v20 = vpop.f32.mrf.mxu0  ;;  %v7957_v27 = vld [vmem:[#allocation2 + $0x3d8] sm:$0xf0] }
 0x69d   : > { %v5091_v61 = vpop.f32.mrf.mxu1  ;;  %v5003_v53 = vadd.f32 %v5002_v20, %v10811_v35  ;;  %v7960_v20 = vor.u32 %v8356_v30, %v7957_v27 }
 0x69e   : > { %v5267_v26 = vadd.f32 %v5266_v10, %v5178_v51 }
 0x69f   : > { %v5092_v15 = vadd.f32 %v5091_v61, %v5003_v53  ;;  %5317 = vmatmul.bf16.vlgmr.msra.gmra.mxu0 %v11666_v46  ;;  %5933 = vmatpush.bf16.msrb.mxu3 %v7960_v20 }
 0x6a0   : > { %5406 = vmatmul.bf16.vlgmr.msra.gmra.mxu1 %v11667_v50  ;;  %v6082_v40 = vmax.f32 %v5267_v26, 0.0  ;;  %5495 = vmatmul.bf16.vlgmr.msra.gmra.mxu2 %v11755_v23 }
 0x6a1   : > { %5584 = vmatmul.bf16.vlgmr.msra.gmra.mxu3 %v11756_v13  ;;  %v7701_v13 = vld [vmem:[#allocation2 + $0x1d8] sm:$0xf0] }
 0x6a2   : > { %v10882_v31 = vpack.c.bf16 %v6082_v40, %v6078_v34  ;;  %v7704_v23 = vor.u32 %v8292_v48, %v7701_v13 }
 0x6a3   : > { %v5180_v10 = vpop.f32.mrf.mxu2 }
 0x6a4   : > { %11757 = vst [vmem:[#allocation52_spill] sm:$0xff] %v10882_v31  ;;  %v5269_v51 = vpop.f32.mrf.mxu3  ;;  %v5181_v12 = vadd.f32 %v5180_v10, %v5092_v15  ;;  %v5004_v61 = vpop.f32.mrf.mxu0  ;;  %5755 = vmatpush.bf16.msrb.mxu1 %v7704_v23 }
 0x6a5   : > { %v5093_v53 = vpop.f32.mrf.mxu1  ;;  %v5005_v26 = vadd.f32 %v5004_v61, %v10811_v35 }
 0x6a6   : > { %v5270_v0 = vadd.f32 %v5269_v51, %v5181_v12 }
 0x6a7   : > { %v5094_v18 = vadd.f32 %v5093_v53, %v5005_v26 }
 0x6a8   : > { %v6086_v17 = vmax.f32 %v5270_v0, 0.0 }
 0x6ab   : > { %v5182_v49 = vpop.f32.mrf.mxu2 }
 0x6ac   : > { %v5271_v4 = vpop.f32.mrf.mxu3  ;;  %v5183_v34 = vadd.f32 %v5182_v49, %v5094_v18  ;;  %v5007_v40 = vpop.f32.mrf.mxu0 }
 0x6ad   : > { %v5096_v31 = vpop.f32.mrf.mxu1  ;;  %v5008_v38 = vadd.f32 %v5007_v40, %v10811_v35 }
 0x6ae   : > { %v5272_v15 = vadd.f32 %v5271_v4, %v5183_v34 }
 0x6af   : > { %v5097_v30 = vadd.f32 %v5096_v31, %v5008_v38  ;;  %5322 = vmatmul.bf16.gmra.mxu0 %v11670_v54 }
 0x6b0   : > { %5411 = vmatmul.bf16.gmra.mxu1 %v11671_v21  ;;  %v6090_v27 = vmax.f32 %v5272_v15, 0.0  ;;  %5500 = vmatmul.bf16.gmra.mxu2 %v11672_v7 }
 0x6b1   : > { %5589 = vmatmul.bf16.gmra.mxu3 %v10567_v33 }
 0x6b2   : > { %v10890_v13 = vpack.c.bf16 %v6090_v27, %v6086_v17  ;;  %v7813_v17 = vld [vmem:[#allocation2 + $0x2b8] sm:$0xf0] }
 0x6b3   : > { %v5185_v23 = vpop.f32.mrf.mxu2 }
 0x6b4   : > { %11758 = vst [vmem:[#allocation20_spill] sm:$0xff] %v10890_v13  ;;  %v5274_v10 = vpop.f32.mrf.mxu3  ;;  %v5186_v51 = vadd.f32 %v5185_v23, %v5097_v30  ;;  %v5009_v20 = vpop.f32.mrf.mxu0  ;;  %v8320_v30 = vld [vmem:[#allocation2 + $0x2ac] sm:$0xf] }
 0x6b5   : > { %v5098_v12 = vpop.f32.mrf.mxu1  ;;  %v5010_v61 = vadd.f32 %v5009_v20, %v10811_v35  ;;  %v7816_v27 = vor.u32 %v8320_v30, %v7813_v17  ;;  %v8256_v23 = vld [vmem:[#allocation2 + $0xac] sm:$0xf]  ;;  %v7685_v17 = vld [vmem:[#allocation2 + $0x1b8] sm:$0xf0] }
 0x6b6   : > { %v5275_v31 = vadd.f32 %v5274_v10, %v5186_v51  ;;  %v7557_v10 = vld [vmem:[#allocation2 + $0xb8] sm:$0xf0]  ;;  %v8352_v51 = vld [vmem:[#allocation2 + $0x3ac] sm:$0xf] }
 0x6b7   : > { %v5099_v53 = vadd.f32 %v5098_v12, %v5010_v61  ;;  %v7560_v20 = vor.u32 %v8256_v23, %v7557_v10  ;;  %v7941_v12 = vld [vmem:[#allocation2 + $0x3b8] sm:$0xf0]  ;;  %5845 = vmatpush.bf16.msrb.mxu2 %v7816_v27  ;;  %v8288_v30 = vld [vmem:[#allocation2 + $0x1ac] sm:$0xf] }
 0x6b8   : > { %v6094_v38 = vmax.f32 %v5275_v31, 0.0  ;;  %v7688_v13 = vor.u32 %v8288_v30, %v7685_v17 }
 0x6b9   : > { %5667 = vmatpush.bf16.msrb.mxu0 %v7560_v20 }
 0x6ba   : > { %5756 = vmatpush.bf16.msrb.mxu1 %v7688_v13 }
 0x6bb   : > { %v5187_v26 = vpop.f32.mrf.mxu2 }
 0x6bc   : > { %v5276_v18 = vpop.f32.mrf.mxu3  ;;  %v5188_v48 = vadd.f32 %v5187_v26, %v5099_v53  ;;  %v5012_v0 = vpop.f32.mrf.mxu0 }
 0x6bd   : > { %v5101_v49 = vpop.f32.mrf.mxu1  ;;  %v5013_v4 = vadd.f32 %v5012_v0, %v10811_v35 }
 0x6be   : > { %v5277_v34 = vadd.f32 %v5276_v18, %v5188_v48  ;;  %v7944_v18 = vor.u32 %v8352_v51, %v7941_v12 }
 0x6bf   : > { %v5102_v40 = vadd.f32 %v5101_v49, %v5013_v4  ;;  %5327 = vmatmul.bf16.gmra.mxu0 %v11674_v55 }
 0x6c0   : > { %5416 = vmatmul.bf16.gmra.mxu1 %v11675_v14  ;;  %v6098_v15 = vmax.f32 %v5277_v34, 0.0  ;;  %5505 = vmatmul.bf16.gmra.mxu2 %v11676_v6 }
 0x6c1   : > { %5594 = vmatmul.bf16.gmra.mxu3 %v10575_v45 }
 0x6c2   : > { %v10898_v61 = vpack.c.bf16 %v6098_v15, %v6094_v38  ;;  %5934 = vmatpush.bf16.msrb.mxu3 %v7944_v18 }
 0x6c3   : > { %v5190_v53 = vpop.f32.mrf.mxu2 }
 0x6c4   : > { %11759 = vst [vmem:[#allocation49_spill] sm:$0xff] %v10898_v61  ;;  %v5279_v26 = vpop.f32.mrf.mxu3  ;;  %v5191_v31 = vadd.f32 %v5190_v53, %v5102_v40  ;;  %v5014_v48 = vpop.f32.mrf.mxu0 }
 0x6c5   : > { %v5103_v0 = vpop.f32.mrf.mxu1  ;;  %v5015_v49 = vadd.f32 %v5014_v48, %v10811_v35 }
 0x6c6   : > { %v5280_v4 = vadd.f32 %v5279_v26, %v5191_v31 }
 0x6c7   : > { %v5104_v34 = vadd.f32 %v5103_v0, %v5015_v49 }
 0x6c8   : > { %v6102_v20 = vmax.f32 %v5280_v4, 0.0 }
 0x6cb   : > { %v5192_v23 = vpop.f32.mrf.mxu2 }
 0x6cc   : > { %v5281_v10 = vpop.f32.mrf.mxu3  ;;  %v5193_v38 = vadd.f32 %v5192_v23, %v5104_v34  ;;  %v5017_v15 = vpop.f32.mrf.mxu0 }
 0x6cd   : > { %v5106_v61 = vpop.f32.mrf.mxu1  ;;  %v5018_v27 = vadd.f32 %v5017_v15, %v10811_v35 }
 0x6ce   : > { %v5282_v40 = vadd.f32 %v5281_v10, %v5193_v38 }
 0x6cf   : > { %v5107_v51 = vadd.f32 %v5106_v61, %v5018_v27  ;;  %5332 = vmatmul.bf16.gmra.mxu0 %v11677_v5 }
 0x6d0   : > { %5421 = vmatmul.bf16.gmra.mxu1 %v11678_v58  ;;  %v6106_v12 = vmax.f32 %v5282_v40, 0.0  ;;  %5510 = vmatmul.bf16.gmra.mxu2 %v11679_v62 }
 0x6d1   : > { %5599 = vmatmul.bf16.gmra.mxu3 %v10583_v60 }
 0x6d2   : > { %v10906_v53 = vpack.c.bf16 %v6106_v12, %v6102_v20  ;;  %v7797_v20 = vld [vmem:[#allocation2 + $0x298] sm:$0xf0] }
 0x6d3   : > { %v5195_v13 = vpop.f32.mrf.mxu2 }
 0x6d4   : > { %11760 = vst [vmem:[#allocation55_spill] sm:$0xff] %v10906_v53  ;;  %v5284_v26 = vpop.f32.mrf.mxu3  ;;  %v5196_v18 = vadd.f32 %v5195_v13, %v5107_v51  ;;  %v5019_v31 = vpop.f32.mrf.mxu0  ;;  %v8316_v51 = vld [vmem:[#allocation2 + $0x28c] sm:$0xf] }
 0x6d5   : > { %v5108_v48 = vpop.f32.mrf.mxu1  ;;  %v5020_v0 = vadd.f32 %v5019_v31, %v10811_v35  ;;  %v7800_v12 = vor.u32 %v8316_v51, %v7797_v20  ;;  %v8252_v13 = vld [vmem:[#allocation2 + $0x8c] sm:$0xf]  ;;  %v7669_v20 = vld [vmem:[#allocation2 + $0x198] sm:$0xf0] }
 0x6d6   : > { %v5285_v61 = vadd.f32 %v5284_v26, %v5196_v18  ;;  %v7541_v26 = vld [vmem:[#allocation2 + $0x98] sm:$0xf0]  ;;  %v8348_v18 = vld [vmem:[#allocation2 + $0x38c] sm:$0xf] }
 0x6d7   : > { %v5109_v49 = vadd.f32 %v5108_v48, %v5020_v0  ;;  %v7544_v31 = vor.u32 %v8252_v13, %v7541_v26  ;;  %v7925_v48 = vld [vmem:[#allocation2 + $0x398] sm:$0xf0]  ;;  %5846 = vmatpush.bf16.msrb.mxu2 %v7800_v12  ;;  %v8284_v51 = vld [vmem:[#allocation2 + $0x18c] sm:$0xf] }
 0x6d8   : > { %v6110_v27 = vmax.f32 %v5285_v61, 0.0  ;;  %v7672_v53 = vor.u32 %v8284_v51, %v7669_v20 }
 0x6d9   : > { %5668 = vmatpush.bf16.msrb.mxu0 %v7544_v31 }
 0x6da   : > { %5757 = vmatpush.bf16.msrb.mxu1 %v7672_v53 }
 0x6db   : > { %v5197_v34 = vpop.f32.mrf.mxu2 }
 0x6dc   : > { %v5286_v30 = vpop.f32.mrf.mxu3  ;;  %v5198_v17 = vadd.f32 %v5197_v34, %v5109_v49  ;;  %v5022_v4 = vpop.f32.mrf.mxu0 }
 0x6dd   : > { %v5111_v23 = vpop.f32.mrf.mxu1  ;;  %v5023_v10 = vadd.f32 %v5022_v4, %v10811_v35 }
 0x6de   : > { %v5287_v38 = vadd.f32 %v5286_v30, %v5198_v17  ;;  %v7928_v30 = vor.u32 %v8348_v18, %v7925_v48 }
 0x6df   : > { %v5112_v15 = vadd.f32 %v5111_v23, %v5023_v10  ;;  %5337 = vmatmul.bf16.gmra.mxu0 %v11681_v41 }
 0x6e0   : > { %5426 = vmatmul.bf16.gmra.mxu1 %v11682_v32  ;;  %v6114_v40 = vmax.f32 %v5287_v38, 0.0  ;;  %5515 = vmatmul.bf16.gmra.mxu2 %v11683_v29 }
 0x6e1   : > { %5604 = vmatmul.bf16.gmra.mxu3 %v10591_v1 }
 0x6e2   : > { %v10914_v0 = vpack.c.bf16 %v6114_v40, %v6110_v27  ;;  %5935 = vmatpush.bf16.msrb.mxu3 %v7928_v30 }
 0x6e3   : > { %v5200_v49 = vpop.f32.mrf.mxu2 }
 0x6e4   : > { %11761 = vst [vmem:[#allocation21_spill] sm:$0xff] %v10914_v0  ;;  %v5289_v34 = vpop.f32.mrf.mxu3  ;;  %v5201_v61 = vadd.f32 %v5200_v49, %v5112_v15  ;;  %v5024_v17 = vpop.f32.mrf.mxu0 }
 0x6e5   : > { %v5113_v4 = vpop.f32.mrf.mxu1  ;;  %v5025_v23 = vadd.f32 %v5024_v17, %v10811_v35 }
 0x6e6   : > { %v5290_v10 = vadd.f32 %v5289_v34, %v5201_v61 }
 0x6e7   : > { %v5114_v38 = vadd.f32 %v5113_v4, %v5025_v23 }
 0x6e8   : > { %v6118_v31 = vmax.f32 %v5290_v10, 0.0 }
 0x6eb   : > { %v5202_v13 = vpop.f32.mrf.mxu2 }
 0x6ec   : > { %v5291_v26 = vpop.f32.mrf.mxu3  ;;  %v5203_v27 = vadd.f32 %v5202_v13, %v5114_v38  ;;  %v5027_v40 = vpop.f32.mrf.mxu0 }
 0x6ed   : > { %v5116_v0 = vpop.f32.mrf.mxu1  ;;  %v5028_v12 = vadd.f32 %v5027_v40, %v10811_v35 }
 0x6ee   : > { %v5292_v15 = vadd.f32 %v5291_v26, %v5203_v27 }
 0x6ef   : > { %v5117_v18 = vadd.f32 %v5116_v0, %v5028_v12  ;;  %5342 = vmatmul.bf16.gmra.mxu0 %v11684_v37  ;;  %v11763_v12 = vld [vmem:[#allocation60_spill] sm:$0xff] }
 0x6f0   : > { %5431 = vmatmul.bf16.gmra.mxu1 %v11685_v28  ;;  %v6122_v48 = vmax.f32 %v5292_v15, 0.0  ;;  %5520 = vmatmul.bf16.gmra.mxu2 %v11686_v22  ;;  %v11764_v15 = vld [vmem:[#allocation23_spill] sm:$0xff] }
 0x6f1   : > { %5609 = vmatmul.bf16.gmra.mxu3 %v10599_v2 }
 0x6f2   : > { %v10922_v49 = vpack.c.bf16 %v6122_v48, %v6118_v31  ;;  %v11765_v48 = vld [vmem:[#allocation70_spill] sm:$0xff] }
 0x6f3   : > { %v5205_v53 = vpop.f32.mrf.mxu2 }
 0x6f4   : > { %11762 = vst [vmem:[#allocation68_spill] sm:$0xff] %v10922_v49  ;;  %v5294_v34 = vpop.f32.mrf.mxu3  ;;  %v5206_v30 = vadd.f32 %v5205_v53, %v5117_v18  ;;  %v5029_v61 = vpop.f32.mrf.mxu0  ;;  %v11766_v53 = vld [vmem:[#allocation30_spill] sm:$0xff] }
 0x6f5   : > { %v5118_v17 = vpop.f32.mrf.mxu1  ;;  %v5030_v4 = vadd.f32 %v5029_v61, %v10811_v35 }
 0x6f6   : > { %v5295_v0 = vadd.f32 %v5294_v34, %v5206_v30  ;;  %v8312_v34 = vld [vmem:[#allocation2 + $0x26c] sm:$0xf]  ;;  %v7781_v30 = vld [vmem:[#allocation2 + $0x278] sm:$0xf0] }
 0x6f7   : > { %v5119_v23 = vadd.f32 %v5118_v17, %v5030_v4  ;;  %v7784_v61 = vor.u32 %v8312_v34, %v7781_v30  ;;  %v8248_v17 = vld [vmem:[#allocation2 + $0x6c] sm:$0xf]  ;;  %v7525_v4 = vld [vmem:[#allocation2 + $0x78] sm:$0xf0] }
 0x6f8   : > { %v6126_v18 = vmax.f32 %v5295_v0, 0.0  ;;  %v8280_v30 = vld [vmem:[#allocation2 + $0x16c] sm:$0xf] }
 0x6f9   : > { %5847 = vmatpush.bf16.msrb.mxu2 %v7784_v61 }
 0x6fb   : > { %v5207_v38 = vpop.f32.mrf.mxu2 }
 0x6fc   : > { %v5296_v51 = vpop.f32.mrf.mxu3  ;;  %v5208_v20 = vadd.f32 %v5207_v38, %v5119_v23  ;;  %v5032_v10 = vpop.f32.mrf.mxu0  ;;  %v8344_v23 = vld [vmem:[#allocation2 + $0x36c] sm:$0xf]  ;;  %v7528_v38 = vor.u32 %v8248_v17, %v7525_v4 }
 0x6fd   : > { %v5121_v13 = vpop.f32.mrf.mxu1  ;;  %v5033_v26 = vadd.f32 %v5032_v10, %v10811_v35  ;;  %v7909_v10 = vld [vmem:[#allocation2 + $0x378] sm:$0xf0] }
 0x6fe   : > { %v5297_v27 = vadd.f32 %v5296_v51, %v5208_v20  ;;  %5669 = vmatpush.bf16.msrb.mxu0 %v7528_v38 }
 0x6ff   : > { %v5122_v40 = vadd.f32 %v5121_v13, %v5033_v26  ;;  %5347 = vmatmul.bf16.gmra.mxu0 %v11763_v12  ;;  %v7912_v26 = vor.u32 %v8344_v23, %v7909_v10 }
 0x700   : > { %5436 = vmatmul.bf16.gmra.mxu1 %v11764_v15  ;;  %v6130_v31 = vmax.f32 %v5297_v27, 0.0  ;;  %5525 = vmatmul.bf16.gmra.mxu2 %v11765_v48  ;;  %v7653_v15 = vld [vmem:[#allocation2 + $0x178] sm:$0xf0] }
 0x701   : > { %5614 = vmatmul.bf16.gmra.mxu3 %v11766_v53  ;;  %v7656_v12 = vor.u32 %v8280_v30, %v7653_v15 }
 0x702   : > { %v10930_v51 = vpack.c.bf16 %v6130_v31, %v6126_v18  ;;  %5936 = vmatpush.bf16.msrb.mxu3 %v7912_v26 }
 0x703   : > { %v5210_v20 = vpop.f32.mrf.mxu2  ;;  %5758 = vmatpush.bf16.msrb.mxu1 %v7656_v12 }
 0x704   : > { %11767 = vst [vmem:[#allocation59_spill] sm:$0xff] %v10930_v51  ;;  %v5299_v13 = vpop.f32.mrf.mxu3  ;;  %v5211_v0 = vadd.f32 %v5210_v20, %v5122_v40  ;;  %v5034_v27 = vpop.f32.mrf.mxu0 }
 0x705   : > { %v5123_v49 = vpop.f32.mrf.mxu1  ;;  %v5035_v53 = vadd.f32 %v5034_v27, %v10811_v35 }
 0x706   : > { %v5300_v48 = vadd.f32 %v5299_v13, %v5211_v0 }
 0x707   : > { %v5124_v34 = vadd.f32 %v5123_v49, %v5035_v53  ;;  %v11768_v49 = vld [vmem:[#allocation31_spill] sm:$0xff] }
 0x708   : > { %v6134_v38 = vmax.f32 %v5300_v48, 0.0  ;;  %v10944_v48 = vld [vmem:[%s11327_s6] sm:$0xf] }
 0x709   : > { %11770 = vst [vmem:[#allocation69_spill] sm:$0xff] %v10944_v48 }
 0x70b   : > { %v5212_v17 = vpop.f32.mrf.mxu2 }
 0x70c   : > { %v5301_v4 = vpop.f32.mrf.mxu3  ;;  %v5213_v18 = vadd.f32 %v5212_v17, %v5124_v34  ;;  %v5037_v31 = vpop.f32.mrf.mxu0  ;;  %v10947_v34 = vperm.slane %v10944_v48, 2 }
 0x70d   : > { %v5126_v51 = vpop.f32.mrf.mxu1  ;;  %v5038_v61 = vadd.f32 %v5037_v31, %v10811_v35 }
 0x70e   : > { %v5302_v40 = vadd.f32 %v5301_v4, %v5213_v18 }
 0x70f   : > { %v5127_v23 = vadd.f32 %v5126_v51, %v5038_v61  ;;  %5352 = vmatmul.bf16.gmra.mxu0 %v11690_v52 }
 0x710   : > { %5441 = vmatmul.bf16.gmra.mxu1 %v11691_v42  ;;  %v6138_v10 = vmax.f32 %v5302_v40, 0.0  ;;  %5530 = vmatmul.bf16.gmra.mxu2 %v10482_v19 }
 0x711   : > { %5619 = vmatmul.bf16.gmra.mxu3 %v11768_v49 }
 0x712   : > { %v10938_v15 = vpack.c.bf16 %v6138_v10, %v6134_v38  ;;  %v11772_v38 = vld [vmem:[#allocation25_spill] sm:$0xff] }
 0x713   : > { %v5215_v12 = vpop.f32.mrf.mxu2 }
 0x714   : > { %11769 = vst [vmem:[#allocation22_spill] sm:$0xff] %v10938_v15  ;;  %v5304_v53 = vpop.f32.mrf.mxu3  ;;  %v5216_v20 = vadd.f32 %v5215_v12, %v5127_v23  ;;  %v5039_v13 = vpop.f32.mrf.mxu0  ;;  %v8340_v15 = vld [vmem:[#allocation2 + $0x34c] sm:$0xf] }
 0x715   : > { %v5128_v26 = vpop.f32.mrf.mxu1  ;;  %v5040_v0 = vadd.f32 %v5039_v13, %v10811_v35  ;;  %v11771_v35 = vld [vmem:[#allocation8_spill] sm:$0xff]  ;;  %v8308_v13 = vld [vmem:[#allocation2 + $0x24c] sm:$0xf] }
 0x716   : > { %v5305_v51 = vadd.f32 %v5304_v53, %v5216_v20  ;;  %v11773_v53 = vld [vmem:[#allocation71_spill] sm:$0xff]  ;;  %v11774_v20 = vld [vmem:[#allocation32_spill] sm:$0xff] }
 0x717   : > { %v5129_v27 = vadd.f32 %v5128_v26, %v5040_v0  ;;  %v7765_v26 = vld [vmem:[#allocation2 + $0x258] sm:$0xf0] }
 0x718   : > { %v6142_v10 = vmax.f32 %v5305_v51, 0.0  ;;  %v7768_v0 = vor.u32 %v8308_v13, %v7765_v26  ;;  %v8276_v26 = vld [vmem:[#allocation2 + $0x14c] sm:$0xf] }
 0x71a   : > { %5848 = vmatpush.bf16.msrb.mxu2 %v7768_v0 }
 0x71b   : > { %v5217_v30 = vpop.f32.mrf.mxu2 }
 0x71c   : > { %v5306_v17 = vpop.f32.mrf.mxu3  ;;  %v5218_v4 = vadd.f32 %v5217_v30, %v5129_v27  ;;  %v5318_v18 = vpop.f32.mrf.mxu0  ;;  %v8244_v27 = vld [vmem:[#allocation2 + $0x4c] sm:$0xf]  ;;  %v7509_v30 = vld [vmem:[#allocation2 + $0x58] sm:$0xf0] }
 0x71d   : > { %v5407_v31 = vpop.f32.mrf.mxu1  ;;  %v5319_v61 = vadd.f32 %v5318_v18, %v10947_v34  ;;  %v7512_v48 = vor.u32 %v8244_v27, %v7509_v30  ;;  %v7893_v18 = vld [vmem:[#allocation2 + $0x358] sm:$0xf0] }
 0x71e   : > { %v5307_v40 = vadd.f32 %v5306_v17, %v5218_v4 }
 0x71f   : > { %v5408_v23 = vadd.f32 %v5407_v31, %v5319_v61  ;;  %5357 = vmatmul.bf16.gmra.mxu0 %v11771_v35  ;;  %v7896_v61 = vor.u32 %v8340_v15, %v7893_v18  ;;  %v7637_v35 = vld [vmem:[#allocation2 + $0x158] sm:$0xf0] }
 0x720   : > { %5446 = vmatmul.bf16.gmra.mxu1 %v11772_v38  ;;  %v6146_v12 = vmax.f32 %v5307_v40, 0.0  ;;  %5535 = vmatmul.bf16.gmra.mxu2 %v11773_v53  ;;  %v7640_v49 = vor.u32 %v8276_v26, %v7637_v35 }
 0x721   : > { %5624 = vmatmul.bf16.gmra.mxu3 %v11774_v20  ;;  %5670 = vmatpush.bf16.msrb.mxu0 %v7512_v48 }
 0x722   : > { %v10954_v17 = vpack.c.bf16 %v6146_v12, %v6142_v10  ;;  %5937 = vmatpush.bf16.msrb.mxu3 %v7896_v61  ;;  %5759 = vmatpush.bf16.msrb.mxu1 %v7640_v49 }
 0x723   : > { %v5496_v4 = vpop.f32.mrf.mxu2 }
 0x724   : > { %11775 = vst [vmem:[#allocation61_spill] sm:$0xff] %v10954_v17  ;;  %v5585_v31 = vpop.f32.mrf.mxu3  ;;  %v5497_v51 = vadd.f32 %v5496_v4, %v5408_v23  ;;  %v5320_v40 = vpop.f32.mrf.mxu0 }
 0x725   : > { %v5409_v38 = vpop.f32.mrf.mxu1  ;;  %v5321_v20 = vadd.f32 %v5320_v40, %v10947_v34 }
 0x726   : > { %v5586_v53 = vadd.f32 %v5585_v31, %v5497_v51 }
 0x727   : > { %v5410_v13 = vadd.f32 %v5409_v38, %v5321_v20 }
 0x728   : > { %v6023_v48 = vmax.f32 %v5586_v53, 0.0 }
 0x72b   : > { %v5498_v27 = vpop.f32.mrf.mxu2 }
 0x72c   : > { %v5587_v30 = vpop.f32.mrf.mxu3  ;;  %v5499_v10 = vadd.f32 %v5498_v27, %v5410_v13  ;;  %v5323_v12 = vpop.f32.mrf.mxu0 }
 0x72d   : > { %v5412_v17 = vpop.f32.mrf.mxu1  ;;  %v5324_v15 = vadd.f32 %v5323_v12, %v10947_v34 }
 0x72e   : > { %v5588_v23 = vadd.f32 %v5587_v30, %v5499_v10 }
 0x72f   : > { %v5413_v0 = vadd.f32 %v5412_v17, %v5324_v15  ;;  %5362 = vmatmul.bf16.gmra.mxu0 %v11696_v47  ;;  %v11777_v15 = vld [vmem:[#allocation10_spill] sm:$0xff] }
 0x730   : > { %5451 = vmatmul.bf16.gmra.mxu1 %v11697_v3  ;;  %v6027_v18 = vmax.f32 %v5588_v23, 0.0  ;;  %5540 = vmatmul.bf16.gmra.mxu2 %v10498_v44  ;;  %v11778_v23 = vld [vmem:[#allocation27_spill] sm:$0xff] }
 0x731   : > { %5629 = vmatmul.bf16.gmra.mxu3 %v10631_v11 }
 0x732   : > { %v10962_v35 = vpack.c.bf16 %v6027_v18, %v6023_v48  ;;  %v11779_v18 = vld [vmem:[#allocation72_spill] sm:$0xff] }
 0x733   : > { %v5501_v49 = vpop.f32.mrf.mxu2 }
 0x734   : > { %11776 = vst [vmem:[#allocation24_spill] sm:$0xff] %v10962_v35  ;;  %v5590_v38 = vpop.f32.mrf.mxu3  ;;  %v5502_v20 = vadd.f32 %v5501_v49, %v5413_v0  ;;  %v5325_v4 = vpop.f32.mrf.mxu0  ;;  %v11780_v49 = vld [vmem:[#allocation33_spill] sm:$0xff] }
 0x735   : > { %v5414_v31 = vpop.f32.mrf.mxu1  ;;  %v5326_v61 = vadd.f32 %v5325_v4, %v10947_v34 }
 0x736   : > { %v5591_v17 = vadd.f32 %v5590_v38, %v5502_v20  ;;  %v8304_v38 = vld [vmem:[#allocation2 + $0x22c] sm:$0xf]  ;;  %v7749_v20 = vld [vmem:[#allocation2 + $0x238] sm:$0xf0] }
 0x737   : > { %v5415_v51 = vadd.f32 %v5414_v31, %v5326_v61  ;;  %v7752_v4 = vor.u32 %v8304_v38, %v7749_v20  ;;  %v8240_v31 = vld [vmem:[#allocation2 + $0x2c] sm:$0xf]  ;;  %v7493_v61 = vld [vmem:[#allocation2 + $0x38] sm:$0xf0] }
 0x738   : > { %v6031_v0 = vmax.f32 %v5591_v17, 0.0  ;;  %v8272_v20 = vld [vmem:[#allocation2 + $0x12c] sm:$0xf] }
 0x739   : > { %5849 = vmatpush.bf16.msrb.mxu2 %v7752_v4 }
 0x73b   : > { %v5503_v40 = vpop.f32.mrf.mxu2 }
 0x73c   : > { %v5592_v13 = vpop.f32.mrf.mxu3  ;;  %v5504_v26 = vadd.f32 %v5503_v40, %v5415_v51  ;;  %v5328_v53 = vpop.f32.mrf.mxu0  ;;  %v8336_v51 = vld [vmem:[#allocation2 + $0x32c] sm:$0xf]  ;;  %v7496_v40 = vor.u32 %v8240_v31, %v7493_v61 }
 0x73d   : > { %v5417_v27 = vpop.f32.mrf.mxu1  ;;  %v5329_v30 = vadd.f32 %v5328_v53, %v10947_v34  ;;  %v7877_v53 = vld [vmem:[#allocation2 + $0x338] sm:$0xf0] }
 0x73e   : > { %v5593_v10 = vadd.f32 %v5592_v13, %v5504_v26  ;;  %5671 = vmatpush.bf16.msrb.mxu0 %v7496_v40 }
 0x73f   : > { %v5418_v12 = vadd.f32 %v5417_v27, %v5329_v30  ;;  %5367 = vmatmul.bf16.gmra.mxu0 %v11777_v15  ;;  %v7880_v30 = vor.u32 %v8336_v51, %v7877_v53 }
 0x740   : > { %5456 = vmatmul.bf16.gmra.mxu1 %v11778_v23  ;;  %v6035_v48 = vmax.f32 %v5593_v10, 0.0  ;;  %5545 = vmatmul.bf16.gmra.mxu2 %v11779_v18  ;;  %v7621_v23 = vld [vmem:[#allocation2 + $0x138] sm:$0xf0] }
 0x741   : > { %5634 = vmatmul.bf16.gmra.mxu3 %v11780_v49  ;;  %v7624_v15 = vor.u32 %v8272_v20, %v7621_v23 }
 0x742   : > { %v10970_v13 = vpack.c.bf16 %v6035_v48, %v6031_v0  ;;  %5938 = vmatpush.bf16.msrb.mxu3 %v7880_v30 }
 0x743   : > { %v5506_v26 = vpop.f32.mrf.mxu2  ;;  %5760 = vmatpush.bf16.msrb.mxu1 %v7624_v15 }
 0x744   : > { %11781 = vst [vmem:[#allocation9_spill] sm:$0xff] %v10970_v13  ;;  %v5595_v27 = vpop.f32.mrf.mxu3  ;;  %v5507_v17 = vadd.f32 %v5506_v26, %v5418_v12  ;;  %v5330_v10 = vpop.f32.mrf.mxu0 }
 0x745   : > { %v5419_v35 = vpop.f32.mrf.mxu1  ;;  %v5331_v49 = vadd.f32 %v5330_v10, %v10947_v34 }
 0x746   : > { %v5596_v18 = vadd.f32 %v5595_v27, %v5507_v17 }
 0x747   : > { %v5420_v38 = vadd.f32 %v5419_v35, %v5331_v49 }
 0x748   : > { %v6039_v40 = vmax.f32 %v5596_v18, 0.0 }
 0x74b   : > { %v5508_v31 = vpop.f32.mrf.mxu2 }
 0x74c   : > { %v5597_v61 = vpop.f32.mrf.mxu3  ;;  %v5509_v0 = vadd.f32 %v5508_v31, %v5420_v38  ;;  %v5333_v48 = vpop.f32.mrf.mxu0 }
 0x74d   : > { %v5422_v13 = vpop.f32.mrf.mxu1  ;;  %v5334_v4 = vadd.f32 %v5333_v48, %v10947_v34 }
 0x74e   : > { %v5598_v12 = vadd.f32 %v5597_v61, %v5509_v0 }
 0x74f   : > { %v5423_v51 = vadd.f32 %v5422_v13, %v5334_v4  ;;  %5372 = vmatmul.bf16.gmra.mxu0 %v11702_v59  ;;  %v11783_v4 = vld [vmem:[#allocation12_spill] sm:$0xff] }
 0x750   : > { %5461 = vmatmul.bf16.gmra.mxu1 %v11703_v36  ;;  %v6043_v53 = vmax.f32 %v5598_v12, 0.0  ;;  %5550 = vmatmul.bf16.gmra.mxu2 %v10514_v8  ;;  %v11784_v12 = vld [vmem:[#allocation62_spill] sm:$0xff] }
 0x751   : > { %5639 = vmatmul.bf16.gmra.mxu3 %v10647_v43 }
 0x752   : > { %v10978_v35 = vpack.c.bf16 %v6043_v53, %v6039_v40  ;;  %v11785_v53 = vld [vmem:[#allocation73_spill] sm:$0xff] }
 0x753   : > { %v5511_v15 = vpop.f32.mrf.mxu2 }
 0x754   : > { %11782 = vst [vmem:[#allocation26_spill] sm:$0xff] %v10978_v35  ;;  %v5600_v23 = vpop.f32.mrf.mxu3  ;;  %v5512_v49 = vadd.f32 %v5511_v15, %v5423_v51  ;;  %v5335_v26 = vpop.f32.mrf.mxu0  ;;  %v11786_v15 = vld [vmem:[#allocation34_spill] sm:$0xff] }
 0x755   : > { %v5424_v27 = vpop.f32.mrf.mxu1  ;;  %v5336_v30 = vadd.f32 %v5335_v26, %v10947_v34 }
 0x756   : > { %v5601_v13 = vadd.f32 %v5600_v23, %v5512_v49  ;;  %v8300_v23 = vld [vmem:[#allocation2 + $0x20c] sm:$0xf]  ;;  %v7733_v49 = vld [vmem:[#allocation2 + $0x218] sm:$0xf0] }
 0x757   : > { %v5425_v17 = vadd.f32 %v5424_v27, %v5336_v30  ;;  %v7736_v26 = vor.u32 %v8300_v23, %v7733_v49  ;;  %v8236_v27 = vld [vmem:[#allocation2 + $0xc] sm:$0xf]  ;;  %v7477_v30 = vld [vmem:[#allocation2 + $0x18] sm:$0xf0] }
 0x758   : > { %v6047_v51 = vmax.f32 %v5601_v13, 0.0  ;;  %v8268_v49 = vld [vmem:[#allocation2 + $0x10c] sm:$0xf] }
 0x759   : > { %5850 = vmatpush.bf16.msrb.mxu2 %v7736_v26 }
 0x75b   : > { %v5513_v10 = vpop.f32.mrf.mxu2 }
 0x75c   : > { %v5602_v38 = vpop.f32.mrf.mxu3  ;;  %v5514_v20 = vadd.f32 %v5513_v10, %v5425_v17  ;;  %v5338_v18 = vpop.f32.mrf.mxu0  ;;  %v8332_v17 = vld [vmem:[#allocation2 + $0x30c] sm:$0xf]  ;;  %v7480_v10 = vor.u32 %v8236_v27, %v7477_v30 }
 0x75d   : > { %v5427_v31 = vpop.f32.mrf.mxu1  ;;  %v5339_v61 = vadd.f32 %v5338_v18, %v10947_v34  ;;  %v7861_v18 = vld [vmem:[#allocation2 + $0x318] sm:$0xf0] }
 0x75e   : > { %v5603_v0 = vadd.f32 %v5602_v38, %v5514_v20  ;;  %5672 = vmatpush.bf16.msrb.mxu0 %v7480_v10 }
 0x75f   : > { %v5428_v48 = vadd.f32 %v5427_v31, %v5339_v61  ;;  %5377 = vmatmul.bf16.gmra.mxu0 %v11783_v4  ;;  %v7864_v61 = vor.u32 %v8332_v17, %v7861_v18 }
 0x760   : > { %5466 = vmatmul.bf16.gmra.mxu1 %v11784_v12  ;;  %v6051_v40 = vmax.f32 %v5603_v0, 0.0  ;;  %5555 = vmatmul.bf16.gmra.mxu2 %v11785_v53  ;;  %v7605_v12 = vld [vmem:[#allocation2 + $0x118] sm:$0xf0] }
 0x761   : > { %5644 = vmatmul.bf16.gmra.mxu3 %v11786_v15  ;;  %v7608_v4 = vor.u32 %v8268_v49, %v7605_v12 }
 0x762   : > { %v10986_v38 = vpack.c.bf16 %v6051_v40, %v6047_v51  ;;  %5939 = vmatpush.bf16.msrb.mxu3 %v7864_v61 }
 0x763   : > { %v5516_v20 = vpop.f32.mrf.mxu2  ;;  %5761 = vmatpush.bf16.msrb.mxu1 %v7608_v4 }
 0x764   : > { %11787 = vst [vmem:[#allocation11_spill] sm:$0xff] %v10986_v38  ;;  %v5605_v31 = vpop.f32.mrf.mxu3  ;;  %v5517_v13 = vadd.f32 %v5516_v20, %v5428_v48  ;;  %v5340_v0 = vpop.f32.mrf.mxu0 }
 0x765   : > { %v5429_v35 = vpop.f32.mrf.mxu1  ;;  %v5341_v15 = vadd.f32 %v5340_v0, %v10947_v34 }
 0x766   : > { %v5606_v53 = vadd.f32 %v5605_v31, %v5517_v13 }
 0x767   : > { %v5430_v23 = vadd.f32 %v5429_v35, %v5341_v15 }
 0x768   : > { %v6055_v10 = vmax.f32 %v5606_v53, 0.0 }
 0x76b   : > { %v5518_v27 = vpop.f32.mrf.mxu2 }
 0x76c   : > { %v5607_v30 = vpop.f32.mrf.mxu3  ;;  %v5519_v51 = vadd.f32 %v5518_v27, %v5430_v23  ;;  %v5343_v40 = vpop.f32.mrf.mxu0 }
 0x76d   : > { %v5432_v38 = vpop.f32.mrf.mxu1  ;;  %v5344_v26 = vadd.f32 %v5343_v40, %v10947_v34 }
 0x76e   : > { %v5608_v48 = vadd.f32 %v5607_v30, %v5519_v51 }
 0x76f   : > { %v5433_v17 = vadd.f32 %v5432_v38, %v5344_v26  ;;  %5382 = vmatmul.bf16.gmra.mxu0 %v11708_v56  ;;  %v11789_v26 = vld [vmem:[#allocation14_spill] sm:$0xff] }
 0x770   : > { %5471 = vmatmul.bf16.gmra.mxu1 %v11709_v25  ;;  %v6059_v18 = vmax.f32 %v5608_v48, 0.0  ;;  %5560 = vmatmul.bf16.gmra.mxu2 %v10530_v63  ;;  %v11790_v48 = vld [vmem:[#allocation64_spill] sm:$0xff] }
 0x771   : > { %5649 = vmatmul.bf16.gmra.mxu3 %v10663_v24 }
 0x772   : > { %v10994_v35 = vpack.c.bf16 %v6059_v18, %v6055_v10  ;;  %v11791_v18 = vld [vmem:[#allocation28_spill] sm:$0xff] }
 0x773   : > { %v5521_v4 = vpop.f32.mrf.mxu2 }
 0x774   : > { %11788 = vst [vmem:[#allocation48_spill] sm:$0xff] %v10994_v35  ;;  %v5610_v12 = vpop.f32.mrf.mxu3  ;;  %v5522_v15 = vadd.f32 %v5521_v4, %v5433_v17  ;;  %v5345_v20 = vpop.f32.mrf.mxu0  ;;  %v11792_v4 = vld [vmem:[#allocation35_spill] sm:$0xff] }
 0x775   : > { %v5434_v31 = vpop.f32.mrf.mxu1  ;;  %v5346_v61 = vadd.f32 %v5345_v20, %v10947_v34  ;;  %v8394_v20 = vld [vmem:[#allocation4 + $0xf8] sm:$0xff] }
 0x776   : > { %v5611_v38 = vadd.f32 %v5610_v12, %v5522_v15  ;;  %v8386_v12 = vld [vmem:[#allocation4 + $0xb8] sm:$0xff]  ;;  %6740 = vmatpush.bf16.msra.mxu3 %v8394_v20 }
 0x777   : > { %v5435_v13 = vadd.f32 %v5434_v31, %v5346_v61  ;;  %v8370_v15 = vld [vmem:[#allocation4 + $0x38] sm:$0xff]  ;;  %6651 = vmatpush.bf16.msra.mxu2 %v8386_v12 }
 0x778   : > { %v6063_v17 = vmax.f32 %v5611_v38, 0.0  ;;  %6473 = vmatpush.bf16.msra.mxu0 %v8370_v15 }
 0x77b   : > { %v5523_v0 = vpop.f32.mrf.mxu2 }
 0x77c   : > { %v5612_v23 = vpop.f32.mrf.mxu3  ;;  %v5524_v49 = vadd.f32 %v5523_v0, %v5435_v13  ;;  %v5348_v53 = vpop.f32.mrf.mxu0 }
 0x77d   : > { %v5437_v27 = vpop.f32.mrf.mxu1  ;;  %v5349_v30 = vadd.f32 %v5348_v53, %v10947_v34 }
 0x77e   : > { %v5613_v51 = vadd.f32 %v5612_v23, %v5524_v49 }
 0x77f   : > { %v5438_v40 = vadd.f32 %v5437_v27, %v5349_v30  ;;  %5387 = vmatmul.bf16.gmra.mxu0 %v11789_v26  ;;  %v8378_v30 = vld [vmem:[#allocation4 + $0x78] sm:$0xff] }
 0x780   : > { %5476 = vmatmul.bf16.gmra.mxu1 %v11790_v48  ;;  %v6067_v10 = vmax.f32 %v5613_v51, 0.0  ;;  %5565 = vmatmul.bf16.gmra.mxu2 %v11791_v18 }
 0x781   : > { %5654 = vmatmul.bf16.gmra.mxu3 %v11792_v4  ;;  %6562 = vmatpush.bf16.msra.mxu1 %v8378_v30 }
 0x782   : > { %v11002_v31 = vpack.c.bf16 %v6067_v10, %v6063_v17 }
 0x783   : > { %v5526_v61 = vpop.f32.mrf.mxu2 }
 0x784   : > { %11793 = vst [vmem:[#allocation13_spill] sm:$0xff] %v11002_v31  ;;  %v5615_v13 = vpop.f32.mrf.mxu3  ;;  %v5527_v0 = vadd.f32 %v5526_v61, %v5438_v40  ;;  %v5350_v23 = vpop.f32.mrf.mxu0 }
 0x785   : > { %v5439_v49 = vpop.f32.mrf.mxu1  ;;  %v5351_v38 = vadd.f32 %v5350_v23, %v10947_v34 }
 0x786   : > { %v5616_v53 = vadd.f32 %v5615_v13, %v5527_v0 }
 0x787   : > { %v5440_v27 = vadd.f32 %v5439_v49, %v5351_v38 }
 0x788   : > { %v6071_v40 = vmax.f32 %v5616_v53, 0.0 }
 0x78b   : > { %v5528_v51 = vpop.f32.mrf.mxu2 }
 0x78c   : > { %v5617_v35 = vpop.f32.mrf.mxu3  ;;  %v5529_v4 = vadd.f32 %v5528_v51, %v5440_v27  ;;  %v5353_v18 = vpop.f32.mrf.mxu0 }
 0x78d   : > { %v5442_v12 = vpop.f32.mrf.mxu1  ;;  %v5354_v17 = vadd.f32 %v5353_v18, %v10947_v34 }
 0x78e   : > { %v5618_v10 = vadd.f32 %v5617_v35, %v5529_v4 }
 0x78f   : > { %v5443_v15 = vadd.f32 %v5442_v12, %v5354_v17  ;;  %5392 = vmatmul.bf16.gmra.mxu0 %v11714_v57 }
 0x790   : > { %5481 = vmatmul.bf16.gmra.mxu1 %v11715_v16  ;;  %v6075_v20 = vmax.f32 %v5618_v10, 0.0  ;;  %5570 = vmatmul.bf16.gmra.mxu2 %v10551_v39 }
 0x791   : > { %5659 = vmatmul.bf16.gmra.mxu3 %v10687_v9 }
 0x792   : > { %v11010_v61 = vpack.c.bf16 %v6075_v20, %v6071_v40  ;;  %v11794_v20 = vld [vmem:[#allocation65_spill] sm:$0xff] }
 0x793   : > { %v5531_v13 = vpop.f32.mrf.mxu2 }
 0x794   : > { %v5620_v0 = vpop.f32.mrf.mxu3  ;;  %v5532_v23 = vadd.f32 %v5531_v13, %v5443_v15  ;;  %v5355_v49 = vpop.f32.mrf.mxu0  ;;  %v11795_v13 = vld [vmem:[#allocation29_spill] sm:$0xff] }
 0x795   : > { %v5444_v38 = vpop.f32.mrf.mxu1  ;;  %v5356_v35 = vadd.f32 %v5355_v49, %v10947_v34  ;;  %v8393_v49 = vld [vmem:[#allocation4 + $0xf0] sm:$0xff] }
 0x796   : > { %v5621_v18 = vadd.f32 %v5620_v0, %v5532_v23  ;;  %v8385_v0 = vld [vmem:[#allocation4 + $0xb0] sm:$0xff]  ;;  %6741 = vmatpush.bf16.msra.mxu3 %v8393_v49 }
 0x797   : > { %v5445_v4 = vadd.f32 %v5444_v38, %v5356_v35  ;;  %v8369_v23 = vld [vmem:[#allocation4 + $0x30] sm:$0xff]  ;;  %6652 = vmatpush.bf16.msra.mxu2 %v8385_v0 }
 0x798   : > { %v6079_v15 = vmax.f32 %v5621_v18, 0.0  ;;  %6474 = vmatpush.bf16.msra.mxu0 %v8369_v23 }
 0x79b   : > { %v5533_v27 = vpop.f32.mrf.mxu2 }
 0x79c   : > { %v5622_v30 = vpop.f32.mrf.mxu3  ;;  %v5534_v51 = vadd.f32 %v5533_v27, %v5445_v4  ;;  %v5358_v53 = vpop.f32.mrf.mxu0 }
 0x79d   : > { %v5447_v12 = vpop.f32.mrf.mxu1  ;;  %v5359_v17 = vadd.f32 %v5358_v53, %v10947_v34  ;;  %v8377_v53 = vld [vmem:[#allocation4 + $0x70] sm:$0xff] }
 0x79e   : > { %v5623_v10 = vadd.f32 %v5622_v30, %v5534_v51  ;;  %6563 = vmatpush.bf16.msra.mxu1 %v8377_v53 }
 0x79f   : > { %v5448_v31 = vadd.f32 %v5447_v12, %v5359_v17  ;;  %5673 = vmatmul.bf16.vlgmr.msrb.gmra.mxu0 %v11666_v46 }
 0x7a0   : > { %5762 = vmatmul.bf16.vlgmr.msrb.gmra.mxu1 %v11667_v50  ;;  %v6083_v40 = vmax.f32 %v5623_v10, 0.0  ;;  %5851 = vmatmul.bf16.vlgmr.msrb.gmra.mxu2 %v11794_v20 }
 0x7a1   : > { %5940 = vmatmul.bf16.vlgmr.msrb.gmra.mxu3 %v11795_v13 }
 0x7a2   : > { %v11018_v38 = vpack.c.bf16 %v6083_v40, %v6079_v15 }
 0x7a3   : > { %v5536_v35 = vpop.f32.mrf.mxu2 }
 0x7a4   : > { %v5625_v4 = vpop.f32.mrf.mxu3  ;;  %v5537_v27 = vadd.f32 %v5536_v35, %v5448_v31  ;;  %v5360_v46 = vpop.f32.mrf.mxu0 }
 0x7a5   : > { %v5449_v30 = vpop.f32.mrf.mxu1  ;;  %v5361_v50 = vadd.f32 %v5360_v46, %v10947_v34 }
 0x7a6   : > { %v5626_v18 = vadd.f32 %v5625_v4, %v5537_v27 }
 0x7a7   : > { %v5450_v51 = vadd.f32 %v5449_v30, %v5361_v50 }
 0x7a8   : > { %v6087_v31 = vmax.f32 %v5626_v18, 0.0 }
 0x7ab   : > { %v5538_v12 = vpop.f32.mrf.mxu2 }
 0x7ac   : > { %v5627_v17 = vpop.f32.mrf.mxu3  ;;  %v5539_v10 = vadd.f32 %v5538_v12, %v5450_v51  ;;  %v5363_v20 = vpop.f32.mrf.mxu0 }
 0x7ad   : > { %v5452_v13 = vpop.f32.mrf.mxu1  ;;  %v5364_v15 = vadd.f32 %v5363_v20, %v10947_v34 }
 0x7ae   : > { %v5628_v40 = vadd.f32 %v5627_v17, %v5539_v10 }
 0x7af   : > { %v5453_v0 = vadd.f32 %v5452_v13, %v5364_v15  ;;  %5678 = vmatmul.bf16.gmra.mxu0 %v11670_v54  ;;  %v8384_v15 = vld [vmem:[#allocation4 + $0xa8] sm:$0xff] }
 0x7b0   : > { %5767 = vmatmul.bf16.gmra.mxu1 %v11671_v21  ;;  %v6091_v23 = vmax.f32 %v5628_v40, 0.0  ;;  %5856 = vmatmul.bf16.gmra.mxu2 %v11672_v7  ;;  %v8368_v40 = vld [vmem:[#allocation4 + $0x28] sm:$0xff] }
 0x7b1   : > { %5945 = vmatmul.bf16.gmra.mxu3 %v10567_v33  ;;  %6653 = vmatpush.bf16.msra.mxu2 %v8384_v15 }
 0x7b2   : > { %v11026_v49 = vpack.c.bf16 %v6091_v23, %v6087_v31  ;;  %6475 = vmatpush.bf16.msra.mxu0 %v8368_v40 }
 0x7b3   : > { %v5541_v35 = vpop.f32.mrf.mxu2 }
 0x7b4   : > { %v5630_v4 = vpop.f32.mrf.mxu3  ;;  %v5542_v27 = vadd.f32 %v5541_v35, %v5453_v0  ;;  %v5365_v46 = vpop.f32.mrf.mxu0  ;;  %v8392_v0 = vld [vmem:[#allocation4 + $0xe8] sm:$0xff] }
 0x7b5   : > { %v5454_v30 = vpop.f32.mrf.mxu1  ;;  %v5366_v50 = vadd.f32 %v5365_v46, %v10947_v34  ;;  %6742 = vmatpush.bf16.msra.mxu3 %v8392_v0 }
 0x7b6   : > { %v5631_v51 = vadd.f32 %v5630_v4, %v5542_v27 }
 0x7b7   : > { %v5455_v53 = vadd.f32 %v5454_v30, %v5366_v50 }
 0x7b8   : > { %v6095_v20 = vmax.f32 %v5631_v51, 0.0 }
 0x7bb   : > { %v5543_v54 = vpop.f32.mrf.mxu2 }
 0x7bc   : > { %v5632_v12 = vpop.f32.mrf.mxu3  ;;  %v5544_v21 = vadd.f32 %v5543_v54, %v5455_v53  ;;  %v5368_v18 = vpop.f32.mrf.mxu0 }
 0x7bd   : > { %v5457_v17 = vpop.f32.mrf.mxu1  ;;  %v5369_v7 = vadd.f32 %v5368_v18, %v10947_v34 }
 0x7be   : > { %v5633_v10 = vadd.f32 %v5632_v12, %v5544_v21 }
 0x7bf   : > { %v5458_v33 = vadd.f32 %v5457_v17, %v5369_v7  ;;  %5683 = vmatmul.bf16.gmra.mxu0 %v11674_v55 }
 0x7c0   : > { %5772 = vmatmul.bf16.gmra.mxu1 %v11675_v14  ;;  %v6099_v13 = vmax.f32 %v5633_v10, 0.0  ;;  %5861 = vmatmul.bf16.gmra.mxu2 %v11676_v6  ;;  %v8376_v6 = vld [vmem:[#allocation4 + $0x68] sm:$0xff] }
 0x7c1   : > { %5950 = vmatmul.bf16.gmra.mxu3 %v10575_v45  ;;  %6564 = vmatpush.bf16.msra.mxu1 %v8376_v6  ;;  %v8383_v6 = vld [vmem:[#allocation4 + $0xa0] sm:$0xff] }
 0x7c2   : > { %v11034_v31 = vpack.c.bf16 %v6099_v13, %v6095_v20  ;;  %6654 = vmatpush.bf16.msra.mxu2 %v8383_v6 }
 0x7c3   : > { %v5546_v23 = vpop.f32.mrf.mxu2 }
 0x7c4   : > { %v5635_v35 = vpop.f32.mrf.mxu3  ;;  %v5547_v4 = vadd.f32 %v5546_v23, %v5458_v33  ;;  %v5370_v55 = vpop.f32.mrf.mxu0 }
 0x7c5   : > { %v5459_v27 = vpop.f32.mrf.mxu1  ;;  %v5371_v14 = vadd.f32 %v5370_v55, %v10947_v34 }
 0x7c6   : > { %v5636_v46 = vadd.f32 %v5635_v35, %v5547_v4 }
 0x7c7   : > { %v5460_v30 = vadd.f32 %v5459_v27, %v5371_v14 }
 0x7c8   : > { %v6103_v17 = vmax.f32 %v5636_v46, 0.0 }
 0x7cb   : > { %v5548_v45 = vpop.f32.mrf.mxu2 }
 0x7cc   : > { %v5637_v50 = vpop.f32.mrf.mxu3  ;;  %v5549_v51 = vadd.f32 %v5548_v45, %v5460_v30  ;;  %v5373_v53 = vpop.f32.mrf.mxu0  ;;  %v8367_v45 = vld [vmem:[#allocation4 + $0x20] sm:$0xff] }
 0x7cd   : > { %v5462_v54 = vpop.f32.mrf.mxu1  ;;  %v5374_v12 = vadd.f32 %v5373_v53, %v10947_v34  ;;  %6476 = vmatpush.bf16.msra.mxu0 %v8367_v45 }
 0x7ce   : > { %v5638_v21 = vadd.f32 %v5637_v50, %v5549_v51  ;;  %v8391_v50 = vld [vmem:[#allocation4 + $0xe0] sm:$0xff] }
 0x7cf   : > { %v5463_v18 = vadd.f32 %v5462_v54, %v5374_v12  ;;  %5688 = vmatmul.bf16.gmra.mxu0 %v11677_v5  ;;  %6743 = vmatpush.bf16.msra.mxu3 %v8391_v50 }
 0x7d0   : > { %5777 = vmatmul.bf16.gmra.mxu1 %v11678_v58  ;;  %v6107_v7 = vmax.f32 %v5638_v21, 0.0  ;;  %5866 = vmatmul.bf16.gmra.mxu2 %v11679_v62 }
 0x7d1   : > { %5955 = vmatmul.bf16.gmra.mxu3 %v10583_v60 }
 0x7d2   : > { %v11042_v10 = vpack.c.bf16 %v6107_v7, %v6103_v17 }
 0x7d3   : > { %v5551_v33 = vpop.f32.mrf.mxu2 }
 0x7d4   : > { %v5640_v20 = vpop.f32.mrf.mxu3  ;;  %v5552_v13 = vadd.f32 %v5551_v33, %v5463_v18  ;;  %v5375_v15 = vpop.f32.mrf.mxu0 }
 0x7d5   : > { %v5464_v40 = vpop.f32.mrf.mxu1  ;;  %v5376_v0 = vadd.f32 %v5375_v15, %v10947_v34 }
 0x7d6   : > { %v5641_v23 = vadd.f32 %v5640_v20, %v5552_v13 }
 0x7d7   : > { %v5465_v35 = vadd.f32 %v5464_v40, %v5376_v0 }
 0x7d8   : > { %v6111_v46 = vmax.f32 %v5641_v23, 0.0 }
 0x7db   : > { %v5553_v5 = vpop.f32.mrf.mxu2 }
 0x7dc   : > { %v5642_v4 = vpop.f32.mrf.mxu3  ;;  %v5554_v58 = vadd.f32 %v5553_v5, %v5465_v35  ;;  %v5378_v55 = vpop.f32.mrf.mxu0 }
 0x7dd   : > { %v5467_v27 = vpop.f32.mrf.mxu1  ;;  %v5379_v62 = vadd.f32 %v5378_v55, %v10947_v34 }
 0x7de   : > { %v5643_v14 = vadd.f32 %v5642_v4, %v5554_v58 }
 0x7df   : > { %v5468_v60 = vadd.f32 %v5467_v27, %v5379_v62  ;;  %5693 = vmatmul.bf16.gmra.mxu0 %v11681_v41 }
 0x7e0   : > { %5782 = vmatmul.bf16.gmra.mxu1 %v11682_v32  ;;  %v6115_v30 = vmax.f32 %v5643_v14, 0.0  ;;  %5871 = vmatmul.bf16.gmra.mxu2 %v11683_v29  ;;  %v8375_v29 = vld [vmem:[#allocation4 + $0x60] sm:$0xff] }
 0x7e1   : > { %5960 = vmatmul.bf16.gmra.mxu3 %v10591_v1  ;;  %6565 = vmatpush.bf16.msra.mxu1 %v8375_v29  ;;  %v8390_v29 = vld [vmem:[#allocation4 + $0xd8] sm:$0xff] }
 0x7e2   : > { %v11050_v51 = vpack.c.bf16 %v6115_v30, %v6111_v46  ;;  %6744 = vmatpush.bf16.msra.mxu3 %v8390_v29 }
 0x7e3   : > { %v5556_v53 = vpop.f32.mrf.mxu2 }
 0x7e4   : > { %v5645_v54 = vpop.f32.mrf.mxu3  ;;  %v5557_v12 = vadd.f32 %v5556_v53, %v5468_v60  ;;  %v5380_v41 = vpop.f32.mrf.mxu0  ;;  %v11796_v53 = vld [vmem:[#allocation60_spill] sm:$0xff] }
 0x7e5   : > { %v5469_v21 = vpop.f32.mrf.mxu1  ;;  %v5381_v32 = vadd.f32 %v5380_v41, %v10947_v34 }
 0x7e6   : > { %v5646_v18 = vadd.f32 %v5645_v54, %v5557_v12  ;;  %v11797_v54 = vld [vmem:[#allocation23_spill] sm:$0xff] }
 0x7e7   : > { %v5470_v17 = vadd.f32 %v5469_v21, %v5381_v32  ;;  %v11798_v21 = vld [vmem:[#allocation70_spill] sm:$0xff] }
 0x7e8   : > { %v6119_v23 = vmax.f32 %v5646_v18, 0.0  ;;  %v11799_v32 = vld [vmem:[#allocation30_spill] sm:$0xff]  ;;  %v8382_v18 = vld [vmem:[#allocation4 + $0x98] sm:$0xff] }
 0x7e9   : > { %6655 = vmatpush.bf16.msra.mxu2 %v8382_v18 }
 0x7eb   : > { %v5558_v1 = vpop.f32.mrf.mxu2 }
 0x7ec   : > { %v5647_v7 = vpop.f32.mrf.mxu3  ;;  %v5559_v33 = vadd.f32 %v5558_v1, %v5470_v17  ;;  %v5383_v20 = vpop.f32.mrf.mxu0  ;;  %v8366_v17 = vld [vmem:[#allocation4 + $0x18] sm:$0xff] }
 0x7ed   : > { %v5472_v13 = vpop.f32.mrf.mxu1  ;;  %v5384_v15 = vadd.f32 %v5383_v20, %v10947_v34  ;;  %6477 = vmatpush.bf16.msra.mxu0 %v8366_v17 }
 0x7ee   : > { %v5648_v40 = vadd.f32 %v5647_v7, %v5559_v33 }
 0x7ef   : > { %v5473_v0 = vadd.f32 %v5472_v13, %v5384_v15  ;;  %5698 = vmatmul.bf16.gmra.mxu0 %v11684_v37 }
 0x7f0   : > { %5787 = vmatmul.bf16.gmra.mxu1 %v11685_v28  ;;  %v6123_v35 = vmax.f32 %v5648_v40, 0.0  ;;  %5876 = vmatmul.bf16.gmra.mxu2 %v11686_v22 }
 0x7f1   : > { %5965 = vmatmul.bf16.gmra.mxu3 %v10599_v2 }
 0x7f2   : > { %v11058_v5 = vpack.c.bf16 %v6123_v35, %v6119_v23  ;;  %v8374_v35 = vld [vmem:[#allocation4 + $0x58] sm:$0xff] }
 0x7f3   : > { %v5561_v4 = vpop.f32.mrf.mxu2  ;;  %6566 = vmatpush.bf16.msra.mxu1 %v8374_v35  ;;  %v8365_v35 = vld [vmem:[#allocation4 + $0x10] sm:$0xff] }
 0x7f4   : > { %v5650_v58 = vpop.f32.mrf.mxu3  ;;  %v5562_v55 = vadd.f32 %v5561_v4, %v5473_v0  ;;  %v5385_v27 = vpop.f32.mrf.mxu0  ;;  %6478 = vmatpush.bf16.msra.mxu0 %v8365_v35  ;;  %v11807_v35 = vld [vmem:[#allocation27_spill] sm:$0xff] }
 0x7f5   : > { %v5474_v62 = vpop.f32.mrf.mxu1  ;;  %v5386_v14 = vadd.f32 %v5385_v27, %v10947_v34 }
 0x7f6   : > { %v5651_v60 = vadd.f32 %v5650_v58, %v5562_v55 }
 0x7f7   : > { %v5475_v46 = vadd.f32 %v5474_v62, %v5386_v14 }
 0x7f8   : > { %v6127_v12 = vmax.f32 %v5651_v60, 0.0 }
 0x7fb   : > { %v5563_v37 = vpop.f32.mrf.mxu2 }
 0x7fc   : > { %v5652_v30 = vpop.f32.mrf.mxu3  ;;  %v5564_v28 = vadd.f32 %v5563_v37, %v5475_v46  ;;  %v5388_v6 = vpop.f32.mrf.mxu0 }
 0x7fd   : > { %v5477_v45 = vpop.f32.mrf.mxu1  ;;  %v5389_v22 = vadd.f32 %v5388_v6, %v10947_v34 }
 0x7fe   : > { %v5653_v50 = vadd.f32 %v5652_v30, %v5564_v28  ;;  %v11800_v28 = vld [vmem:[#allocation31_spill] sm:$0xff] }
 0x7ff   : > { %v5478_v2 = vadd.f32 %v5477_v45, %v5389_v22  ;;  %5703 = vmatmul.bf16.gmra.mxu0 %v11796_v53 }
 0x800   : > { %5792 = vmatmul.bf16.gmra.mxu1 %v11797_v54  ;;  %v6131_v41 = vmax.f32 %v5653_v50, 0.0  ;;  %5881 = vmatmul.bf16.gmra.mxu2 %v11798_v21 }
 0x801   : > { %5970 = vmatmul.bf16.gmra.mxu3 %v11799_v32 }
 0x802   : > { %v11066_v1 = vpack.c.bf16 %v6131_v41, %v6127_v12 }
 0x803   : > { %v5566_v7 = vpop.f32.mrf.mxu2 }
 0x804   : > { %v5655_v33 = vpop.f32.mrf.mxu3  ;;  %v5567_v20 = vadd.f32 %v5566_v7, %v5478_v2  ;;  %v5390_v13 = vpop.f32.mrf.mxu0 }
 0x805   : > { %v5479_v15 = vpop.f32.mrf.mxu1  ;;  %v5391_v40 = vadd.f32 %v5390_v13, %v10947_v34  ;;  %v11803_v13 = vld [vmem:[#allocation25_spill] sm:$0xff] }
 0x806   : > { %v5656_v0 = vadd.f32 %v5655_v33, %v5567_v20  ;;  %v11802_v20 = vld [vmem:[#allocation8_spill] sm:$0xff] }
 0x807   : > { %v5480_v23 = vadd.f32 %v5479_v15, %v5391_v40  ;;  %v11804_v40 = vld [vmem:[#allocation71_spill] sm:$0xff] }
 0x808   : > { %v6135_v37 = vmax.f32 %v5656_v0, 0.0  ;;  %v11805_v0 = vld [vmem:[#allocation32_spill] sm:$0xff] }
 0x80b   : > { %v5568_v4 = vpop.f32.mrf.mxu2 }
 0x80c   : > { %v5657_v58 = vpop.f32.mrf.mxu3  ;;  %v5569_v55 = vadd.f32 %v5568_v4, %v5480_v23  ;;  %v5393_v27 = vpop.f32.mrf.mxu0  ;;  %v8381_v23 = vld [vmem:[#allocation4 + $0x90] sm:$0xff] }
 0x80d   : > { %v5482_v62 = vpop.f32.mrf.mxu1  ;;  %v5394_v14 = vadd.f32 %v5393_v27, %v10947_v34  ;;  %v8389_v4 = vld [vmem:[#allocation4 + $0xd0] sm:$0xff]  ;;  %6656 = vmatpush.bf16.msra.mxu2 %v8381_v23 }
 0x80e   : > { %v5658_v60 = vadd.f32 %v5657_v58, %v5569_v55  ;;  %6745 = vmatpush.bf16.msra.mxu3 %v8389_v4  ;;  %v11806_v23 = vld [vmem:[#allocation10_spill] sm:$0xff] }
 0x80f   : > { %v5483_v46 = vadd.f32 %v5482_v62, %v5394_v14  ;;  %5708 = vmatmul.bf16.gmra.mxu0 %v11690_v52  ;;  %v11801_v52 = vld [vmem:[#allocation69_spill] sm:$0xff] }
 0x810   : > { %5797 = vmatmul.bf16.gmra.mxu1 %v11691_v42  ;;  %v6139_v30 = vmax.f32 %v5658_v60, 0.0  ;;  %5886 = vmatmul.bf16.gmra.mxu2 %v10482_v19  ;;  %v11078_v21 = vperm.slane %v11801_v52, 3 }
 0x811   : > { %5975 = vmatmul.bf16.gmra.mxu3 %v11800_v28  ;;  %v8373_v28 = vld [vmem:[#allocation4 + $0x50] sm:$0xff] }
 0x812   : > { %v11074_v6 = vpack.c.bf16 %v6139_v30, %v6135_v37  ;;  %6567 = vmatpush.bf16.msra.mxu1 %v8373_v28 }
 0x813   : > { %v5571_v45 = vpop.f32.mrf.mxu2 }
 0x814   : > { %v5660_v22 = vpop.f32.mrf.mxu3  ;;  %v5572_v50 = vadd.f32 %v5571_v45, %v5483_v46  ;;  %v5395_v2 = vpop.f32.mrf.mxu0 }
 0x815   : > { %v5484_v53 = vpop.f32.mrf.mxu1  ;;  %v5396_v54 = vadd.f32 %v5395_v2, %v10947_v34 }
 0x816   : > { %v5661_v12 = vadd.f32 %v5660_v22, %v5572_v50 }
 0x817   : > { %v5485_v41 = vadd.f32 %v5484_v53, %v5396_v54 }
 0x818   : > { %v6143_v15 = vmax.f32 %v5661_v12, 0.0 }
 0x81b   : > { %v5573_v42 = vpop.f32.mrf.mxu2 }
 0x81c   : > { %v5662_v32 = vpop.f32.mrf.mxu3  ;;  %v5574_v18 = vadd.f32 %v5573_v42, %v5485_v41  ;;  %v5674_v19 = vpop.f32.mrf.mxu0 }
 0x81d   : > { %v5763_v17 = vpop.f32.mrf.mxu1  ;;  %v5675_v29 = vadd.f32 %v5674_v19, %v11078_v21 }
 0x81e   : > { %v5663_v7 = vadd.f32 %v5662_v32, %v5574_v18 }
 0x81f   : > { %v5764_v33 = vadd.f32 %v5763_v17, %v5675_v29  ;;  %5713 = vmatmul.bf16.gmra.mxu0 %v11802_v20 }
 0x820   : > { %5802 = vmatmul.bf16.gmra.mxu1 %v11803_v13  ;;  %v6147_v34 = vmax.f32 %v5663_v7, 0.0  ;;  %5891 = vmatmul.bf16.gmra.mxu2 %v11804_v40 }
 0x821   : > { %5980 = vmatmul.bf16.gmra.mxu3 %v11805_v0 }
 0x822   : > { %v11085_v58 = vpack.c.bf16 %v6147_v34, %v6143_v15 }
 0x823   : > { %v5852_v55 = vpop.f32.mrf.mxu2 }
 0x824   : > { %v5941_v27 = vpop.f32.mrf.mxu3  ;;  %v5853_v62 = vadd.f32 %v5852_v55, %v5764_v33  ;;  %v5676_v14 = vpop.f32.mrf.mxu0 }
 0x825   : > { %v5765_v60 = vpop.f32.mrf.mxu1  ;;  %v5677_v46 = vadd.f32 %v5676_v14, %v11078_v21  ;;  %v8380_v14 = vld [vmem:[#allocation4 + $0x88] sm:$0xff] }
 0x826   : > { %v5942_v37 = vadd.f32 %v5941_v27, %v5853_v62  ;;  %v11808_v27 = vld [vmem:[#allocation72_spill] sm:$0xff]  ;;  %v11809_v62 = vld [vmem:[#allocation33_spill] sm:$0xff]  ;;  %6657 = vmatpush.bf16.msra.mxu2 %v8380_v14 }
 0x827   : > { %v5766_v30 = vadd.f32 %v5765_v60, %v5677_v46  ;;  %v8364_v60 = vld [vmem:[#allocation4 + $0x8] sm:$0xff] }
 0x828   : > { %v6024_v52 = vmax.f32 %v5942_v37, 0.0  ;;  %v8388_v46 = vld [vmem:[#allocation4 + $0xc8] sm:$0xff]  ;;  %6479 = vmatpush.bf16.msra.mxu0 %v8364_v60 }
 0x829   : > { %6746 = vmatpush.bf16.msra.mxu3 %v8388_v46  ;;  %v11812_v46 = vld [vmem:[#allocation73_spill] sm:$0xff] }
 0x82b   : > { %v5854_v45 = vpop.f32.mrf.mxu2 }
 0x82c   : > { %v5943_v22 = vpop.f32.mrf.mxu3  ;;  %v5855_v50 = vadd.f32 %v5854_v45, %v5766_v30  ;;  %v5679_v2 = vpop.f32.mrf.mxu0 }
 0x82d   : > { %v5768_v53 = vpop.f32.mrf.mxu1  ;;  %v5680_v54 = vadd.f32 %v5679_v2, %v11078_v21 }
 0x82e   : > { %v5944_v12 = vadd.f32 %v5943_v22, %v5855_v50 }
 0x82f   : > { %v5769_v41 = vadd.f32 %v5768_v53, %v5680_v54  ;;  %5718 = vmatmul.bf16.gmra.mxu0 %v11696_v47 }
 0x830   : > { %5807 = vmatmul.bf16.gmra.mxu1 %v11697_v3  ;;  %v6028_v42 = vmax.f32 %v5944_v12, 0.0  ;;  %5896 = vmatmul.bf16.gmra.mxu2 %v10498_v44  ;;  %v8372_v12 = vld [vmem:[#allocation4 + $0x48] sm:$0xff] }
 0x831   : > { %5985 = vmatmul.bf16.gmra.mxu3 %v10631_v11  ;;  %6568 = vmatpush.bf16.msra.mxu1 %v8372_v12 }
 0x832   : > { %v11093_v32 = vpack.c.bf16 %v6028_v42, %v6024_v52 }
 0x833   : > { %v5857_v18 = vpop.f32.mrf.mxu2 }
 0x834   : > { %v5946_v19 = vpop.f32.mrf.mxu3  ;;  %v5858_v17 = vadd.f32 %v5857_v18, %v5769_v41  ;;  %v5681_v29 = vpop.f32.mrf.mxu0 }
 0x835   : > { %v5770_v7 = vpop.f32.mrf.mxu1  ;;  %v5682_v33 = vadd.f32 %v5681_v29, %v11078_v21 }
 0x836   : > { %v5947_v20 = vadd.f32 %v5946_v19, %v5858_v17 }
 0x837   : > { %v5771_v13 = vadd.f32 %v5770_v7, %v5682_v33 }
 0x838   : > { %v6032_v4 = vmax.f32 %v5947_v20, 0.0 }
 0x83b   : > { %v5859_v47 = vpop.f32.mrf.mxu2 }
 0x83c   : > { %v5948_v15 = vpop.f32.mrf.mxu3  ;;  %v5860_v3 = vadd.f32 %v5859_v47, %v5771_v13  ;;  %v5684_v34 = vpop.f32.mrf.mxu0 }
 0x83d   : > { %v5773_v40 = vpop.f32.mrf.mxu1  ;;  %v5685_v44 = vadd.f32 %v5684_v34, %v11078_v21 }
 0x83e   : > { %v5949_v0 = vadd.f32 %v5948_v15, %v5860_v3 }
 0x83f   : > { %v5774_v11 = vadd.f32 %v5773_v40, %v5685_v44  ;;  %5723 = vmatmul.bf16.gmra.mxu0 %v11806_v23 }
 0x840   : > { %5812 = vmatmul.bf16.gmra.mxu1 %v11807_v35  ;;  %v6036_v55 = vmax.f32 %v5949_v0, 0.0  ;;  %5901 = vmatmul.bf16.gmra.mxu2 %v11808_v27  ;;  %v11810_v27 = vld [vmem:[#allocation12_spill] sm:$0xff] }
 0x841   : > { %5990 = vmatmul.bf16.gmra.mxu3 %v11809_v62  ;;  %v11811_v62 = vld [vmem:[#allocation62_spill] sm:$0xff] }
 0x842   : > { %v11101_v37 = vpack.c.bf16 %v6036_v55, %v6032_v4 }
 0x843   : > { %v5862_v30 = vpop.f32.mrf.mxu2 }
 0x844   : > { %v5951_v28 = vpop.f32.mrf.mxu3  ;;  %v5863_v45 = vadd.f32 %v5862_v30, %v5774_v11  ;;  %v5686_v22 = vpop.f32.mrf.mxu0  ;;  %v11813_v30 = vld [vmem:[#allocation34_spill] sm:$0xff] }
 0x845   : > { %v5775_v50 = vpop.f32.mrf.mxu1  ;;  %v5687_v2 = vadd.f32 %v5686_v22, %v11078_v21  ;;  %v8387_v22 = vld [vmem:[#allocation4 + $0xc0] sm:$0xff] }
 0x846   : > { %v5952_v53 = vadd.f32 %v5951_v28, %v5863_v45  ;;  %v8379_v28 = vld [vmem:[#allocation4 + $0x80] sm:$0xff]  ;;  %6747 = vmatpush.bf16.msra.mxu3 %v8387_v22 }
 0x847   : > { %v5776_v54 = vadd.f32 %v5775_v50, %v5687_v2  ;;  %v8363_v45 = vld [vmem:[#allocation4] sm:$0xff]  ;;  %6658 = vmatpush.bf16.msra.mxu2 %v8379_v28 }
 0x848   : > { %v6040_v33 = vmax.f32 %v5952_v53, 0.0  ;;  %6480 = vmatpush.bf16.msra.mxu0 %v8363_v45 }
 0x84b   : > { %v5864_v41 = vpop.f32.mrf.mxu2 }
 0x84c   : > { %v5953_v52 = vpop.f32.mrf.mxu3  ;;  %v5865_v42 = vadd.f32 %v5864_v41, %v5776_v54  ;;  %v5689_v18 = vpop.f32.mrf.mxu0 }
 0x84d   : > { %v5778_v19 = vpop.f32.mrf.mxu1  ;;  %v5690_v17 = vadd.f32 %v5689_v18, %v11078_v21 }
 0x84e   : > { %v5954_v29 = vadd.f32 %v5953_v52, %v5865_v42 }
 0x84f   : > { %v5779_v7 = vadd.f32 %v5778_v19, %v5690_v17  ;;  %5728 = vmatmul.bf16.gmra.mxu0 %v11702_v59  ;;  %v8371_v19 = vld [vmem:[#allocation4 + $0x40] sm:$0xff] }
 0x850   : > { %5817 = vmatmul.bf16.gmra.mxu1 %v11703_v36  ;;  %v6044_v20 = vmax.f32 %v5954_v29, 0.0  ;;  %5906 = vmatmul.bf16.gmra.mxu2 %v10514_v8 }
 0x851   : > { %5995 = vmatmul.bf16.gmra.mxu3 %v10647_v43  ;;  %6569 = vmatpush.bf16.msra.mxu1 %v8371_v19 }
 0x852   : > { %v11109_v13 = vpack.c.bf16 %v6044_v20, %v6040_v33 }
 0x853   : > { %v5867_v47 = vpop.f32.mrf.mxu2 }
 0x854   : > { %v5956_v15 = vpop.f32.mrf.mxu3  ;;  %v5868_v3 = vadd.f32 %v5867_v47, %v5779_v7  ;;  %v5691_v34 = vpop.f32.mrf.mxu0 }
 0x855   : > { %v5780_v40 = vpop.f32.mrf.mxu1  ;;  %v5692_v44 = vadd.f32 %v5691_v34, %v11078_v21 }
 0x856   : > { %v5957_v0 = vadd.f32 %v5956_v15, %v5868_v3 }
 0x857   : > { %v5781_v11 = vadd.f32 %v5780_v40, %v5692_v44 }
 0x858   : > { %v6048_v14 = vmax.f32 %v5957_v0, 0.0 }
 0x85b   : > { %v5869_v59 = vpop.f32.mrf.mxu2 }
 0x85c   : > { %v5958_v23 = vpop.f32.mrf.mxu3  ;;  %v5870_v36 = vadd.f32 %v5869_v59, %v5781_v11  ;;  %v5694_v35 = vpop.f32.mrf.mxu0 }
 0x85d   : > { %v5783_v4 = vpop.f32.mrf.mxu1  ;;  %v5695_v8 = vadd.f32 %v5694_v35, %v11078_v21 }
 0x85e   : > { %v5959_v55 = vadd.f32 %v5958_v23, %v5870_v36 }
 0x85f   : > { %v5784_v43 = vadd.f32 %v5783_v4, %v5695_v8  ;;  %5733 = vmatmul.bf16.gmra.mxu0 %v11810_v27 }
 0x860   : > { %5822 = vmatmul.bf16.gmra.mxu1 %v11811_v62  ;;  %v6052_v60 = vmax.f32 %v5959_v55, 0.0  ;;  %5911 = vmatmul.bf16.gmra.mxu2 %v11812_v46  ;;  %v11814_v46 = vld [vmem:[#allocation28_spill] sm:$0xff] }
 0x861   : > { %6000 = vmatmul.bf16.gmra.mxu3 %v11813_v30  ;;  %v11815_v30 = vld [vmem:[#allocation35_spill] sm:$0xff] }
 0x862   : > { %v11117_v50 = vpack.c.bf16 %v6052_v60, %v6048_v14 }
 0x863   : > { %v5872_v2 = vpop.f32.mrf.mxu2 }
 0x864   : > { %v5961_v53 = vpop.f32.mrf.mxu3  ;;  %v5873_v54 = vadd.f32 %v5872_v2, %v5784_v43  ;;  %v5696_v12 = vpop.f32.mrf.mxu0 }
 0x865   : > { %v5785_v41 = vpop.f32.mrf.mxu1  ;;  %v5697_v52 = vadd.f32 %v5696_v12, %v11078_v21 }
 0x866   : > { %v5962_v42 = vadd.f32 %v5961_v53, %v5873_v54 }
 0x867   : > { %v5786_v18 = vadd.f32 %v5785_v41, %v5697_v52 }
 0x868   : > { %v6056_v34 = vmax.f32 %v5962_v42, 0.0 }
 0x86b   : > { %v5874_v17 = vpop.f32.mrf.mxu2 }
 0x86c   : > { %v5963_v29 = vpop.f32.mrf.mxu3  ;;  %v5875_v7 = vadd.f32 %v5874_v17, %v5786_v18  ;;  %v5699_v33 = vpop.f32.mrf.mxu0 }
 0x86d   : > { %v5788_v20 = vpop.f32.mrf.mxu1  ;;  %v5700_v47 = vadd.f32 %v5699_v33, %v11078_v21 }
 0x86e   : > { %v5964_v15 = vadd.f32 %v5963_v29, %v5875_v7 }
 0x86f   : > { %v5789_v3 = vadd.f32 %v5788_v20, %v5700_v47  ;;  %5738 = vmatmul.bf16.gmra.mxu0 %v11708_v56 }
 0x870   : > { %5827 = vmatmul.bf16.gmra.mxu1 %v11709_v25  ;;  %v6060_v40 = vmax.f32 %v5964_v15, 0.0  ;;  %5916 = vmatmul.bf16.gmra.mxu2 %v10530_v63 }
 0x871   : > { %6005 = vmatmul.bf16.gmra.mxu3 %v10663_v24 }
 0x872   : > { %v11125_v44 = vpack.c.bf16 %v6060_v40, %v6056_v34 }
 0x873   : > { %v5877_v0 = vpop.f32.mrf.mxu2 }
 0x874   : > { %v5966_v11 = vpop.f32.mrf.mxu3  ;;  %v5878_v59 = vadd.f32 %v5877_v0, %v5789_v3  ;;  %v5701_v23 = vpop.f32.mrf.mxu0 }
 0x875   : > { %v5790_v36 = vpop.f32.mrf.mxu1  ;;  %v5702_v35 = vadd.f32 %v5701_v23, %v11078_v21 }
 0x876   : > { %v5967_v4 = vadd.f32 %v5966_v11, %v5878_v59 }
 0x877   : > { %v5791_v8 = vadd.f32 %v5790_v36, %v5702_v35 }
 0x878   : > { %v6064_v14 = vmax.f32 %v5967_v4, 0.0 }
 0x87b   : > { %v5879_v56 = vpop.f32.mrf.mxu2 }
 0x87c   : > { %v5968_v55 = vpop.f32.mrf.mxu3  ;;  %v5880_v25 = vadd.f32 %v5879_v56, %v5791_v8  ;;  %v5704_v43 = vpop.f32.mrf.mxu0  ;;  %v11816_v56 = vld [vmem:[#allocation37_spill] sm:$0xff] }
 0x87d   : > { %v5793_v27 = vpop.f32.mrf.mxu1  ;;  %v5705_v63 = vadd.f32 %v5704_v43, %v11078_v21 }
 0x87e   : > { %v5969_v62 = vadd.f32 %v5968_v55, %v5880_v25  ;;  %v11817_v55 = vld [vmem:[#allocation17_spill] sm:$0xff] }
 0x87f   : > { %v5794_v24 = vadd.f32 %v5793_v27, %v5705_v63  ;;  %5743 = vmatmul.bf16.gmra.mxu0 %v11789_v26  ;;  %v11818_v27 = vld [vmem:[#allocation24_spill] sm:$0xff] }
 0x880   : > { %5832 = vmatmul.bf16.gmra.mxu1 %v11790_v48  ;;  %v6068_v60 = vmax.f32 %v5969_v62, 0.0  ;;  %5921 = vmatmul.bf16.gmra.mxu2 %v11814_v46 }
 0x881   : > { %6010 = vmatmul.bf16.gmra.mxu3 %v11815_v30 }
 0x882   : > { %v11133_v28 = vpack.c.bf16 %v6068_v60, %v6064_v14 }
 0x883   : > { %v5882_v45 = vpop.f32.mrf.mxu2 }
 0x884   : > { %v5971_v22 = vpop.f32.mrf.mxu3  ;;  %v5883_v2 = vadd.f32 %v5882_v45, %v5794_v24  ;;  %v5706_v53 = vpop.f32.mrf.mxu0 }
 0x885   : > { %v5795_v54 = vpop.f32.mrf.mxu1  ;;  %v5707_v12 = vadd.f32 %v5706_v53, %v11078_v21 }
 0x886   : > { %v5972_v41 = vadd.f32 %v5971_v22, %v5883_v2 }
 0x887   : > { %v5796_v52 = vadd.f32 %v5795_v54, %v5707_v12 }
 0x888   : > { %v6072_v33 = vmax.f32 %v5972_v41, 0.0 }
 0x88b   : > { %v5884_v26 = vpop.f32.mrf.mxu2 }
 0x88c   : > { %v5973_v42 = vpop.f32.mrf.mxu3  ;;  %v5885_v48 = vadd.f32 %v5884_v26, %v5796_v52  ;;  %v5709_v18 = vpop.f32.mrf.mxu0 }
 0x88d   : > { %v5798_v19 = vpop.f32.mrf.mxu1  ;;  %v5710_v17 = vadd.f32 %v5709_v18, %v11078_v21 }
 0x88e   : > { %v5974_v29 = vadd.f32 %v5973_v42, %v5885_v48  ;;  %v11819_v42 = vld [vmem:[#allocation38_spill] sm:$0xff] }
 0x88f   : > { %v5799_v7 = vadd.f32 %v5798_v19, %v5710_v17  ;;  %5748 = vmatmul.bf16.gmra.mxu0 %v11714_v57  ;;  %v11820_v48 = vld [vmem:[#allocation42_spill] sm:$0xff]  ;;  %v11821_v17 = vld [vmem:[#allocation9_spill] sm:$0xff] }
 0x890   : > { %5837 = vmatmul.bf16.gmra.mxu1 %v11715_v16  ;;  %v6076_v20 = vmax.f32 %v5974_v29, 0.0  ;;  %5926 = vmatmul.bf16.gmra.mxu2 %v10551_v39 }
 0x891   : > { %6015 = vmatmul.bf16.gmra.mxu3 %v10687_v9 }
 0x892   : > { %v11141_v47 = vpack.c.bf16 %v6076_v20, %v6072_v33 }
 0x893   : > { %v5887_v15 = vpop.f32.mrf.mxu2 }
 0x894   : > { %v5976_v3 = vpop.f32.mrf.mxu3  ;;  %v5888_v34 = vadd.f32 %v5887_v15, %v5799_v7  ;;  %v5711_v40 = vpop.f32.mrf.mxu0 }
 0x895   : > { %v5800_v0 = vpop.f32.mrf.mxu1  ;;  %v5712_v11 = vadd.f32 %v5711_v40, %v11078_v21 }
 0x896   : > { %v5977_v59 = vadd.f32 %v5976_v3, %v5888_v34 }
 0x897   : > { %v5801_v23 = vadd.f32 %v5800_v0, %v5712_v11 }
 0x898   : > { %v6080_v25 = vmax.f32 %v5977_v59, 0.0 }
 0x89b   : > { %v5889_v57 = vpop.f32.mrf.mxu2 }
 0x89c   : > { %v5978_v36 = vpop.f32.mrf.mxu3  ;;  %v5890_v16 = vadd.f32 %v5889_v57, %v5801_v23  ;;  %v5714_v35 = vpop.f32.mrf.mxu0 }
 0x89d   : > { %v5803_v4 = vpop.f32.mrf.mxu1  ;;  %v5715_v39 = vadd.f32 %v5714_v35, %v11078_v21 }
 0x89e   : > { %v5979_v8 = vadd.f32 %v5978_v36, %v5890_v16 }
 0x89f   : > { %v5804_v9 = vadd.f32 %v5803_v4, %v5715_v39  ;;  %6481 = vmatmul.bf16.vlgmr.msra.gmra.mxu0 %v11816_v56  ;;  %v11822_v4 = vld [vmem:[#allocation39_spill] sm:$0xff]  ;;  %v11823_v39 = vld [vmem:[#allocation18_spill] sm:$0xff] }
 0x8a0   : > { %6570 = vmatmul.bf16.vlgmr.msra.gmra.mxu1 %v11817_v55  ;;  %v6084_v43 = vmax.f32 %v5979_v8, 0.0  ;;  %6659 = vmatmul.bf16.vlgmr.msra.gmra.mxu2 %v11818_v27  ;;  %v11824_v56 = vld [vmem:[#allocation26_spill] sm:$0xff] }
 0x8a1   : > { %6748 = vmatmul.bf16.vlgmr.msra.gmra.mxu3 %v11093_v32 }
 0x8a2   : > { %v11149_v63 = vpack.c.bf16 %v6084_v43, %v6080_v25 }
 0x8a3   : > { %v5892_v62 = vpop.f32.mrf.mxu2 }
 0x8a4   : > { %v5981_v24 = vpop.f32.mrf.mxu3  ;;  %v5893_v14 = vadd.f32 %v5892_v62, %v5804_v9  ;;  %v5716_v60 = vpop.f32.mrf.mxu0 }
 0x8a5   : > { %v5805_v46 = vpop.f32.mrf.mxu1  ;;  %v5717_v30 = vadd.f32 %v5716_v60, %v11078_v21 }
 0x8a6   : > { %v5982_v45 = vadd.f32 %v5981_v24, %v5893_v14 }
 0x8a7   : > { %v5806_v22 = vadd.f32 %v5805_v46, %v5717_v30 }
 0x8a8   : > { %v6088_v18 = vmax.f32 %v5982_v45, 0.0 }
 0x8ab   : > { %v5894_v2 = vpop.f32.mrf.mxu2 }
 0x8ac   : > { %v5983_v53 = vpop.f32.mrf.mxu3  ;;  %v5895_v54 = vadd.f32 %v5894_v2, %v5806_v22  ;;  %v5719_v12 = vpop.f32.mrf.mxu0 }
 0x8ad   : > { %v5808_v41 = vpop.f32.mrf.mxu1  ;;  %v5720_v52 = vadd.f32 %v5719_v12, %v11078_v21 }
 0x8ae   : > { %v5984_v26 = vadd.f32 %v5983_v53, %v5895_v54 }
 0x8af   : > { %v5809_v32 = vadd.f32 %v5808_v41, %v5720_v52  ;;  %6486 = vmatmul.bf16.gmra.mxu0 %v11819_v42  ;;  %v11825_v41 = vld [vmem:[#allocation40_spill] sm:$0xff]  ;;  %v11826_v52 = vld [vmem:[#allocation66_spill] sm:$0xff]  ;;  %v11827_v42 = vld [vmem:[#allocation11_spill] sm:$0xff] }
 0x8b0   : > { %6575 = vmatmul.bf16.gmra.mxu1 %v11820_v48  ;;  %v6092_v19 = vmax.f32 %v5984_v26, 0.0  ;;  %6664 = vmatmul.bf16.gmra.mxu2 %v11821_v17 }
 0x8b1   : > { %6753 = vmatmul.bf16.gmra.mxu3 %v11101_v37 }
 0x8b2   : > { %v11157_v29 = vpack.c.bf16 %v6092_v19, %v6088_v18 }
 0x8b3   : > { %v5897_v7 = vpop.f32.mrf.mxu2 }
 0x8b4   : > { %v5986_v33 = vpop.f32.mrf.mxu3  ;;  %v5898_v20 = vadd.f32 %v5897_v7, %v5809_v32  ;;  %v5721_v15 = vpop.f32.mrf.mxu0 }
 0x8b5   : > { %v5810_v3 = vpop.f32.mrf.mxu1  ;;  %v5722_v34 = vadd.f32 %v5721_v15, %v11078_v21 }
 0x8b6   : > { %v5987_v40 = vadd.f32 %v5986_v33, %v5898_v20 }
 0x8b7   : > { %v5811_v0 = vadd.f32 %v5810_v3, %v5722_v34 }
 0x8b8   : > { %v6096_v8 = vmax.f32 %v5987_v40, 0.0 }
 0x8bb   : > { %v5899_v11 = vpop.f32.mrf.mxu2 }
 0x8bc   : > { %v5988_v59 = vpop.f32.mrf.mxu3  ;;  %v5900_v23 = vadd.f32 %v5899_v11, %v5811_v0  ;;  %v5724_v57 = vpop.f32.mrf.mxu0 }
 0x8bd   : > { %v5813_v36 = vpop.f32.mrf.mxu1  ;;  %v5725_v16 = vadd.f32 %v5724_v57, %v11078_v21 }
 0x8be   : > { %v5989_v35 = vadd.f32 %v5988_v59, %v5900_v23 }
 0x8bf   : > { %v5814_v37 = vadd.f32 %v5813_v36, %v5725_v16  ;;  %6491 = vmatmul.bf16.gmra.mxu0 %v11822_v4  ;;  %v11828_v36 = vld [vmem:[#allocation43_spill] sm:$0xff]  ;;  %v11830_v4 = vld [vmem:[#allocation48_spill] sm:$0xff] }
 0x8c0   : > { %6580 = vmatmul.bf16.gmra.mxu1 %v11823_v39  ;;  %v6100_v9 = vmax.f32 %v5989_v35, 0.0  ;;  %6669 = vmatmul.bf16.gmra.mxu2 %v11824_v56  ;;  %v11829_v16 = vld [vmem:[#allocation47_spill] sm:$0xff] }
 0x8c1   : > { %6758 = vmatmul.bf16.gmra.mxu3 %v11109_v13 }
 0x8c2   : > { %v11165_v55 = vpack.c.bf16 %v6100_v9, %v6096_v8 }
 0x8c3   : > { %v5902_v25 = vpop.f32.mrf.mxu2 }
 0x8c4   : > { %v5991_v43 = vpop.f32.mrf.mxu3  ;;  %v5903_v27 = vadd.f32 %v5902_v25, %v5814_v37  ;;  %v5726_v62 = vpop.f32.mrf.mxu0 }
 0x8c5   : > { %v5815_v24 = vpop.f32.mrf.mxu1  ;;  %v5727_v14 = vadd.f32 %v5726_v62, %v11078_v21 }
 0x8c6   : > { %v5992_v60 = vadd.f32 %v5991_v43, %v5903_v27 }
 0x8c7   : > { %v5816_v46 = vadd.f32 %v5815_v24, %v5727_v14 }
 0x8c8   : > { %v6104_v26 = vmax.f32 %v5992_v60, 0.0 }
 0x8cb   : > { %v5904_v30 = vpop.f32.mrf.mxu2 }
 0x8cc   : > { %v5993_v45 = vpop.f32.mrf.mxu3  ;;  %v5905_v22 = vadd.f32 %v5904_v30, %v5816_v46  ;;  %v5729_v2 = vpop.f32.mrf.mxu0 }
 0x8cd   : > { %v5818_v53 = vpop.f32.mrf.mxu1  ;;  %v5730_v54 = vadd.f32 %v5729_v2, %v11078_v21 }
 0x8ce   : > { %v5994_v12 = vadd.f32 %v5993_v45, %v5905_v22 }
 0x8cf   : > { %v5819_v13 = vadd.f32 %v5818_v53, %v5730_v54  ;;  %6496 = vmatmul.bf16.gmra.mxu0 %v11825_v41  ;;  %v11831_v53 = vld [vmem:[#allocation44_spill] sm:$0xff]  ;;  %v11832_v54 = vld [vmem:[#allocation19_spill] sm:$0xff]  ;;  %v11833_v41 = vld [vmem:[#allocation13_spill] sm:$0xff] }
 0x8d0   : > { %6585 = vmatmul.bf16.gmra.mxu1 %v11826_v52  ;;  %v6108_v32 = vmax.f32 %v5994_v12, 0.0  ;;  %6674 = vmatmul.bf16.gmra.mxu2 %v11827_v42 }
 0x8d1   : > { %6763 = vmatmul.bf16.gmra.mxu3 %v11117_v50 }
 0x8d2   : > { %v11173_v48 = vpack.c.bf16 %v6108_v32, %v6104_v26 }
 0x8d3   : > { %v5907_v18 = vpop.f32.mrf.mxu2 }
 0x8d4   : > { %v5996_v19 = vpop.f32.mrf.mxu3  ;;  %v5908_v17 = vadd.f32 %v5907_v18, %v5819_v13  ;;  %v5731_v7 = vpop.f32.mrf.mxu0 }
 0x8d5   : > { %v5820_v33 = vpop.f32.mrf.mxu1  ;;  %v5732_v20 = vadd.f32 %v5731_v7, %v11078_v21 }
 0x8d6   : > { %v5997_v15 = vadd.f32 %v5996_v19, %v5908_v17 }
 0x8d7   : > { %v5821_v3 = vadd.f32 %v5820_v33, %v5732_v20 }
 0x8d8   : > { %v6112_v35 = vmax.f32 %v5997_v15, 0.0 }
 0x8db   : > { %v5909_v34 = vpop.f32.mrf.mxu2 }
 0x8dc   : > { %v5998_v40 = vpop.f32.mrf.mxu3  ;;  %v5910_v0 = vadd.f32 %v5909_v34, %v5821_v3  ;;  %v5734_v11 = vpop.f32.mrf.mxu0 }
 0x8dd   : > { %v5823_v59 = vpop.f32.mrf.mxu1  ;;  %v5735_v23 = vadd.f32 %v5734_v11, %v11078_v21 }
 0x8de   : > { %v5999_v57 = vadd.f32 %v5998_v40, %v5910_v0 }
 0x8df   : > { %v5824_v50 = vadd.f32 %v5823_v59, %v5735_v23  ;;  %6501 = vmatmul.bf16.gmra.mxu0 %v11828_v36  ;;  %v11834_v59 = vld [vmem:[#allocation45_spill] sm:$0xff]  ;;  %v11835_v23 = vld [vmem:[#allocation67_spill] sm:$0xff] }
 0x8e0   : > { %6590 = vmatmul.bf16.gmra.mxu1 %v11829_v16  ;;  %v6116_v37 = vmax.f32 %v5999_v57, 0.0  ;;  %6679 = vmatmul.bf16.gmra.mxu2 %v11830_v4 }
 0x8e1   : > { %6768 = vmatmul.bf16.gmra.mxu3 %v11125_v44 }
 0x8e2   : > { %v11181_v39 = vpack.c.bf16 %v6116_v37, %v6112_v35 }
 0x8e3   : > { %v5912_v8 = vpop.f32.mrf.mxu2 }
 0x8e4   : > { %v6001_v9 = vpop.f32.mrf.mxu3  ;;  %v5913_v56 = vadd.f32 %v5912_v8, %v5824_v50  ;;  %v5736_v25 = vpop.f32.mrf.mxu0 }
 0x8e5   : > { %v5825_v43 = vpop.f32.mrf.mxu1  ;;  %v5737_v27 = vadd.f32 %v5736_v25, %v11078_v21 }
 0x8e6   : > { %v6002_v62 = vadd.f32 %v6001_v9, %v5913_v56 }
 0x8e7   : > { %v5826_v24 = vadd.f32 %v5825_v43, %v5737_v27 }
 0x8e8   : > { %v6120_v12 = vmax.f32 %v6002_v62, 0.0 }
 0x8eb   : > { %v5914_v14 = vpop.f32.mrf.mxu2 }
 0x8ec   : > { %v6003_v60 = vpop.f32.mrf.mxu3  ;;  %v5915_v46 = vadd.f32 %v5914_v14, %v5826_v24  ;;  %v5739_v30 = vpop.f32.mrf.mxu0 }
 0x8ed   : > { %v5828_v45 = vpop.f32.mrf.mxu1  ;;  %v5740_v22 = vadd.f32 %v5739_v30, %v11078_v21  ;;  %v11837_v30 = vld [vmem:[#allocation52_spill] sm:$0xff] }
 0x8ee   : > { %v6004_v2 = vadd.f32 %v6003_v60, %v5915_v46  ;;  %v11836_v46 = vld [vmem:[#allocation46_spill] sm:$0xff] }
 0x8ef   : > { %v5829_v44 = vadd.f32 %v5828_v45, %v5740_v22  ;;  %6506 = vmatmul.bf16.gmra.mxu0 %v11831_v53 }
 0x8f0   : > { %6595 = vmatmul.bf16.gmra.mxu1 %v11832_v54  ;;  %v6124_v13 = vmax.f32 %v6004_v2, 0.0  ;;  %6684 = vmatmul.bf16.gmra.mxu2 %v11833_v41 }
 0x8f1   : > { %6773 = vmatmul.bf16.gmra.mxu3 %v11133_v28 }
 0x8f2   : > { %v11189_v52 = vpack.c.bf16 %v6124_v13, %v6120_v12 }
 0x8f3   : > { %v5917_v26 = vpop.f32.mrf.mxu2 }
 0x8f4   : > { %v6006_v32 = vpop.f32.mrf.mxu3  ;;  %v5918_v42 = vadd.f32 %v5917_v26, %v5829_v44  ;;  %v5741_v18 = vpop.f32.mrf.mxu0 }
 0x8f5   : > { %v5830_v19 = vpop.f32.mrf.mxu1  ;;  %v5742_v17 = vadd.f32 %v5741_v18, %v11078_v21 }
 0x8f6   : > { %v6007_v7 = vadd.f32 %v6006_v32, %v5918_v42  ;;  %v11211_v42 = vld [vmem:[%s11329_s8] ss:$0 sm:$0xff] }
 0x8f7   : > { %v5831_v33 = vadd.f32 %v5830_v19, %v5742_v17 }
 0x8f8   : > { %v6128_v57 = vmax.f32 %v6007_v7, 0.0 }
 0x8fb   : > { %v5919_v20 = vpop.f32.mrf.mxu2 }
 0x8fc   : > { %v6008_v15 = vpop.f32.mrf.mxu3  ;;  %v5920_v3 = vadd.f32 %v5919_v20, %v5831_v33  ;;  %v5744_v34 = vpop.f32.mrf.mxu0  ;;  %v11838_v20 = vld [vmem:[#allocation50_spill] sm:$0xff] }
 0x8fd   : > { %v5833_v40 = vpop.f32.mrf.mxu1  ;;  %v5745_v0 = vadd.f32 %v5744_v34, %v11078_v21 }
 0x8fe   : > { %v6009_v11 = vadd.f32 %v6008_v15, %v5920_v3  ;;  %v11839_v15 = vld [vmem:[#allocation20_spill] sm:$0xff] }
 0x8ff   : > { %v5834_v28 = vadd.f32 %v5833_v40, %v5745_v0  ;;  %6511 = vmatmul.bf16.gmra.mxu0 %v11834_v59 }
 0x900   : > { %6600 = vmatmul.bf16.gmra.mxu1 %v11835_v23  ;;  %v6132_v50 = vmax.f32 %v6009_v11, 0.0  ;;  %6689 = vmatmul.bf16.gmra.mxu2 %v11010_v61 }
 0x901   : > { %6778 = vmatmul.bf16.gmra.mxu3 %v11141_v47 }
 0x902   : > { %v11197_v36 = vpack.c.bf16 %v6132_v50, %v6128_v57 }
 0x903   : > { %v5922_v16 = vpop.f32.mrf.mxu2 }
 0x904   : > { %v6011_v35 = vpop.f32.mrf.mxu3  ;;  %v5923_v37 = vadd.f32 %v5922_v16, %v5834_v28  ;;  %v5746_v4 = vpop.f32.mrf.mxu0 }
 0x905   : > { %v5835_v8 = vpop.f32.mrf.mxu1  ;;  %v5747_v9 = vadd.f32 %v5746_v4, %v11078_v21 }
 0x906   : > { %v6012_v56 = vadd.f32 %v6011_v35, %v5923_v37 }
 0x907   : > { %v5836_v25 = vadd.f32 %v5835_v8, %v5747_v9 }
 0x908   : > { %v6136_v45 = vmax.f32 %v6012_v56, 0.0  ;;  %v11840_v56 = vld [vmem:[#allocation51_spill] sm:$0xff] }
 0x90b   : > { %v5924_v43 = vpop.f32.mrf.mxu2 }
 0x90c   : > { %v6013_v27 = vpop.f32.mrf.mxu3  ;;  %v5925_v62 = vadd.f32 %v5924_v43, %v5836_v25  ;;  %v5749_v24 = vpop.f32.mrf.mxu0  ;;  %v11841_v25 = vld [vmem:[#allocation49_spill] sm:$0xff] }
 0x90d   : > { %v5838_v14 = vpop.f32.mrf.mxu1  ;;  %v5750_v61 = vadd.f32 %v5749_v24, %v11078_v21 }
 0x90e   : > { %v6014_v60 = vadd.f32 %v6013_v27, %v5925_v62 }
 0x90f   : > { %v5839_v47 = vadd.f32 %v5838_v14, %v5750_v61  ;;  %6516 = vmatmul.bf16.gmra.mxu0 %v11836_v46 }
 0x910   : > { %6605 = vmatmul.bf16.gmra.mxu1 %v11837_v30  ;;  %v6140_v22 = vmax.f32 %v6014_v60, 0.0  ;;  %6694 = vmatmul.bf16.gmra.mxu2 %v11018_v38 }
 0x911   : > { %6783 = vmatmul.bf16.gmra.mxu3 %v11149_v63 }
 0x912   : > { %v11205_v2 = vpack.c.bf16 %v6140_v22, %v6136_v45 }
 0x913   : > { %v5927_v44 = vpop.f32.mrf.mxu2 }
 0x914   : > { %v6016_v53 = vpop.f32.mrf.mxu3  ;;  %v5928_v54 = vadd.f32 %v5927_v44, %v5839_v47  ;;  %v5751_v12 = vpop.f32.mrf.mxu0 }
 0x915   : > { %v5840_v13 = vpop.f32.mrf.mxu1  ;;  %v5752_v41 = vadd.f32 %v5751_v12, %v11078_v21  ;;  %v11843_v12 = vld [vmem:[#allocation55_spill] sm:$0xff] }
 0x916   : > { %v6017_v26 = vadd.f32 %v6016_v53, %v5928_v54  ;;  %v11842_v54 = vld [vmem:[#allocation53_spill] sm:$0xff] }
 0x917   : > { %v5841_v32 = vadd.f32 %v5840_v13, %v5752_v41 }
 0x918   : > { %v6144_v21 = vmax.f32 %v6017_v26, 0.0 }
 0x91b   : > { %v5929_v18 = vpop.f32.mrf.mxu2 }
 0x91c   : > { %v6018_v38 = vpop.f32.mrf.mxu3  ;;  %v5930_v19 = vadd.f32 %v5929_v18, %v5841_v32  ;;  %v6482_v63 = vpop.f32.mrf.mxu0 }
 0x91d   : > { %v6571_v17 = vpop.f32.mrf.mxu1  ;;  %v6483_v33 = vadd.f32 %v11211_v42, %v6482_v63 }
 0x91e   : > { %v6019_v7 = vadd.f32 %v6018_v38, %v5930_v19 }
 0x91f   : > { %6521 = vmatmul.bf16.gmra.mxu0 %v11838_v20  ;;  %v6572_v34 = vadd.f32 %v6571_v17, %v6483_v33 }
 0x920   : > { %6610 = vmatmul.bf16.gmra.mxu1 %v11839_v15  ;;  %v6148_v3 = vmax.f32 %v6019_v7, 0.0  ;;  %6699 = vmatmul.bf16.gmra.mxu2 %v11026_v49 }
 0x921   : > { %6788 = vmatmul.bf16.gmra.mxu3 %v11157_v29 }
 0x922   : > { %v11218_v40 = vpack.c.bf16 %v6148_v3, %v6144_v21  ;;  %v11844_v3 = vld [vmem:[#allocation54_spill] sm:$0xff] }
 0x923   : > { %v6660_v0 = vpop.f32.mrf.mxu2 }
 0x924   : > { %v6749_v11 = vpop.f32.mrf.mxu3  ;;  %v6661_v28 = vadd.f32 %v6660_v0, %v6572_v34  ;;  %v6484_v59 = vpop.f32.mrf.mxu0  ;;  %v11845_v34 = vld [vmem:[#allocation21_spill] sm:$0xff] }
 0x925   : > { %v6573_v23 = vpop.f32.mrf.mxu1  ;;  %v6485_v49 = vadd.f32 %v11211_v42, %v6484_v59 }
 0x926   : > { %v6750_v57 = vadd.f32 %v6749_v11, %v6661_v28 }
 0x927   : > { %v6574_v29 = vadd.f32 %v6573_v23, %v6485_v49 }
 0x928   : > { %6829 = vst [vmem:[%s11225_s14] sm:$0xff] %v6750_v57 }
 0x92b   : > { %v6662_v50 = vpop.f32.mrf.mxu2 }
 0x92c   : > { %v6751_v16 = vpop.f32.mrf.mxu3  ;;  %v6663_v35 = vadd.f32 %v6662_v50, %v6574_v29  ;;  %v6487_v37 = vpop.f32.mrf.mxu0 }
 0x92d   : > { %v6576_v4 = vpop.f32.mrf.mxu1  ;;  %v6488_v9 = vadd.f32 %v11211_v42, %v6487_v37 }
 0x92e   : > { %v6752_v8 = vadd.f32 %v6751_v16, %v6663_v35 }
 0x92f   : > { %6526 = vmatmul.bf16.gmra.mxu0 %v11840_v56  ;;  %v6577_v43 = vadd.f32 %v6576_v4, %v6488_v9  ;;  %v11846_v9 = vld [vmem:[#allocation56_spill] sm:$0xff] }
 0x930   : > { %6615 = vmatmul.bf16.gmra.mxu1 %v11841_v25  ;;  %6830 = vst [vmem:[%s11225_s14 + $0x8] sm:$0xff] %v6752_v8  ;;  %6704 = vmatmul.bf16.gmra.mxu2 %v11034_v31  ;;  %v11847_v56 = vld [vmem:[#allocation68_spill] sm:$0xff] }
 0x931   : > { %6793 = vmatmul.bf16.gmra.mxu3 %v11165_v55 }
 0x933   : > { %v6665_v27 = vpop.f32.mrf.mxu2 }
 0x934   : > { %v6754_v62 = vpop.f32.mrf.mxu3  ;;  %v6666_v24 = vadd.f32 %v6665_v27, %v6577_v43  ;;  %v6489_v14 = vpop.f32.mrf.mxu0 }
 0x935   : > { %v6578_v61 = vpop.f32.mrf.mxu1  ;;  %v6490_v47 = vadd.f32 %v11211_v42, %v6489_v14 }
 0x936   : > { %v6755_v60 = vadd.f32 %v6754_v62, %v6666_v24 }
 0x937   : > { %v6579_v46 = vadd.f32 %v6578_v61, %v6490_v47 }
 0x938   : > { %6831 = vst [vmem:[%s11225_s14 + $0x10] sm:$0xff] %v6755_v60 }
 0x93b   : > { %v6667_v30 = vpop.f32.mrf.mxu2 }
 0x93c   : > { %v6756_v45 = vpop.f32.mrf.mxu3  ;;  %v6668_v22 = vadd.f32 %v6667_v30, %v6579_v46  ;;  %v6492_v44 = vpop.f32.mrf.mxu0 }
 0x93d   : > { %v6581_v53 = vpop.f32.mrf.mxu1  ;;  %v6493_v55 = vadd.f32 %v11211_v42, %v6492_v44 }
 0x93e   : > { %v6757_v31 = vadd.f32 %v6756_v45, %v6668_v22 }
 0x93f   : > { %6531 = vmatmul.bf16.gmra.mxu0 %v11842_v54  ;;  %v6582_v13 = vadd.f32 %v6581_v53, %v6493_v55  ;;  %v11848_v53 = vld [vmem:[#allocation57_spill] sm:$0xff] }
 0x940   : > { %6620 = vmatmul.bf16.gmra.mxu1 %v11843_v12  ;;  %6832 = vst [vmem:[%s11225_s14 + $0x18] sm:$0xff] %v6757_v31  ;;  %6709 = vmatmul.bf16.gmra.mxu2 %v11042_v10  ;;  %v11849_v31 = vld [vmem:[#allocation59_spill] sm:$0xff] }
 0x941   : > { %6798 = vmatmul.bf16.gmra.mxu3 %v11173_v48 }
 0x943   : > { %v6670_v41 = vpop.f32.mrf.mxu2 }
 0x944   : > { %v6759_v26 = vpop.f32.mrf.mxu3  ;;  %v6671_v32 = vadd.f32 %v6670_v41, %v6582_v13  ;;  %v6494_v18 = vpop.f32.mrf.mxu0 }
 0x945   : > { %v6583_v38 = vpop.f32.mrf.mxu1  ;;  %v6495_v63 = vadd.f32 %v11211_v42, %v6494_v18 }
 0x946   : > { %v6760_v19 = vadd.f32 %v6759_v26, %v6671_v32 }
 0x947   : > { %v6584_v17 = vadd.f32 %v6583_v38, %v6495_v63 }
 0x948   : > { %6833 = vst [vmem:[%s11225_s14 + $0x20] sm:$0xff] %v6760_v19 }
 0x94b   : > { %v6672_v7 = vpop.f32.mrf.mxu2 }
 0x94c   : > { %v6761_v33 = vpop.f32.mrf.mxu3  ;;  %v6673_v20 = vadd.f32 %v6672_v7, %v6584_v17  ;;  %v6497_v15 = vpop.f32.mrf.mxu0 }
 0x94d   : > { %v6586_v21 = vpop.f32.mrf.mxu1  ;;  %v6498_v48 = vadd.f32 %v11211_v42, %v6497_v15  ;;  %v11851_v15 = vld [vmem:[#allocation22_spill] sm:$0xff] }
 0x94e   : > { %v6762_v10 = vadd.f32 %v6761_v33, %v6673_v20  ;;  %v11850_v20 = vld [vmem:[#allocation58_spill] sm:$0xff] }
 0x94f   : > { %6536 = vmatmul.bf16.gmra.mxu0 %v11844_v3  ;;  %v6587_v0 = vadd.f32 %v6586_v21, %v6498_v48 }
 0x950   : > { %6625 = vmatmul.bf16.gmra.mxu1 %v11845_v34  ;;  %6834 = vst [vmem:[%s11225_s14 + $0x28] sm:$0xff] %v6762_v10  ;;  %6714 = vmatmul.bf16.gmra.mxu2 %v11050_v51 }
 0x951   : > { %6803 = vmatmul.bf16.gmra.mxu3 %v11181_v39 }
 0x953   : > { %v6675_v11 = vpop.f32.mrf.mxu2 }
 0x954   : > { %v6764_v28 = vpop.f32.mrf.mxu3  ;;  %v6676_v59 = vadd.f32 %v6675_v11, %v6587_v0  ;;  %v6499_v23 = vpop.f32.mrf.mxu0 }
 0x955   : > { %v6588_v57 = vpop.f32.mrf.mxu1  ;;  %v6500_v29 = vadd.f32 %v11211_v42, %v6499_v23 }
 0x956   : > { %v6765_v49 = vadd.f32 %v6764_v28, %v6676_v59 }
 0x957   : > { %v6589_v50 = vadd.f32 %v6588_v57, %v6500_v29 }
 0x958   : > { %6835 = vst [vmem:[%s11225_s14 + $0x30] sm:$0xff] %v6765_v49 }
 0x95b   : > { %v6677_v16 = vpop.f32.mrf.mxu2 }
 0x95c   : > { %v6766_v35 = vpop.f32.mrf.mxu3  ;;  %v6678_v37 = vadd.f32 %v6677_v16, %v6589_v50  ;;  %v6502_v4 = vpop.f32.mrf.mxu0  ;;  %v11852_v16 = vld [vmem:[#allocation41_spill] sm:$0xff] }
 0x95d   : > { %v6591_v8 = vpop.f32.mrf.mxu1  ;;  %v6503_v39 = vadd.f32 %v11211_v42, %v6502_v4 }
 0x95e   : > { %v6767_v51 = vadd.f32 %v6766_v35, %v6678_v37  ;;  %v11853_v35 = vld [vmem:[#allocation61_spill] sm:$0xff] }
 0x95f   : > { %6541 = vmatmul.bf16.gmra.mxu0 %v11846_v9  ;;  %v6592_v25 = vadd.f32 %v6591_v8, %v6503_v39 }
 0x960   : > { %6630 = vmatmul.bf16.gmra.mxu1 %v11847_v56  ;;  %6836 = vst [vmem:[%s11225_s14 + $0x38] sm:$0xff] %v6767_v51  ;;  %6719 = vmatmul.bf16.gmra.mxu2 %v11058_v5 }
 0x961   : > { %6808 = vmatmul.bf16.gmra.mxu3 %v11189_v52 }
 0x963   : > { %v6680_v43 = vpop.f32.mrf.mxu2 }
 0x964   : > { %v6769_v27 = vpop.f32.mrf.mxu3  ;;  %v6681_v62 = vadd.f32 %v6680_v43, %v6592_v25  ;;  %v6504_v24 = vpop.f32.mrf.mxu0 }
 0x965   : > { %v6593_v14 = vpop.f32.mrf.mxu1  ;;  %v6505_v60 = vadd.f32 %v11211_v42, %v6504_v24 }
 0x966   : > { %v6770_v61 = vadd.f32 %v6769_v27, %v6681_v62 }
 0x967   : > { %v6594_v47 = vadd.f32 %v6593_v14, %v6505_v60 }
 0x968   : > { %6837 = vst [vmem:[%s11225_s14 + $0x40] sm:$0xff] %v6770_v61 }
 0x96b   : > { %v6682_v46 = vpop.f32.mrf.mxu2 }
 0x96c   : > { %v6771_v30 = vpop.f32.mrf.mxu3  ;;  %v6683_v45 = vadd.f32 %v6682_v46, %v6594_v47  ;;  %v6507_v22 = vpop.f32.mrf.mxu0 }
 0x96d   : > { %v6596_v44 = vpop.f32.mrf.mxu1  ;;  %v6508_v52 = vadd.f32 %v11211_v42, %v6507_v22 }
 0x96e   : > { %v6772_v5 = vadd.f32 %v6771_v30, %v6683_v45 }
 0x96f   : > { %6546 = vmatmul.bf16.gmra.mxu0 %v11848_v53  ;;  %v6597_v55 = vadd.f32 %v6596_v44, %v6508_v52 }
 0x970   : > { %6635 = vmatmul.bf16.gmra.mxu1 %v11849_v31  ;;  %6838 = vst [vmem:[%s11225_s14 + $0x48] sm:$0xff] %v6772_v5  ;;  %6724 = vmatmul.bf16.gmra.mxu2 %v11066_v1 }
 0x971   : > { %6813 = vmatmul.bf16.gmra.mxu3 %v11197_v36 }
 0x973   : > { %v6685_v54 = vpop.f32.mrf.mxu2 }
 0x974   : > { %v6774_v12 = vpop.f32.mrf.mxu3  ;;  %v6686_v13 = vadd.f32 %v6685_v54, %v6597_v55  ;;  %v6509_v41 = vpop.f32.mrf.mxu0 }
 0x975   : > { %v6598_v26 = vpop.f32.mrf.mxu1  ;;  %v6510_v18 = vadd.f32 %v11211_v42, %v6509_v41 }
 0x976   : > { %v6775_v32 = vadd.f32 %v6774_v12, %v6686_v13 }
 0x977   : > { %v6599_v38 = vadd.f32 %v6598_v26, %v6510_v18 }
 0x978   : > { %6839 = vst [vmem:[%s11225_s14 + $0x50] sm:$0xff] %v6775_v32 }
 0x97b   : > { %v6687_v19 = vpop.f32.mrf.mxu2 }
 0x97c   : > { %v6776_v63 = vpop.f32.mrf.mxu3  ;;  %v6688_v17 = vadd.f32 %v6687_v19, %v6599_v38  ;;  %v6512_v7 = vpop.f32.mrf.mxu0 }
 0x97d   : > { %v6601_v33 = vpop.f32.mrf.mxu1  ;;  %v6513_v36 = vadd.f32 %v11211_v42, %v6512_v7 }
 0x97e   : > { %v6777_v1 = vadd.f32 %v6776_v63, %v6688_v17 }
 0x97f   : > { %6551 = vmatmul.bf16.gmra.mxu0 %v11850_v20  ;;  %v6602_v21 = vadd.f32 %v6601_v33, %v6513_v36 }
 0x980   : > { %6640 = vmatmul.bf16.gmra.mxu1 %v11851_v15  ;;  %6840 = vst [vmem:[%s11225_s14 + $0x58] sm:$0xff] %v6777_v1  ;;  %6729 = vmatmul.bf16.gmra.mxu2 %v11074_v6 }
 0x981   : > { %6818 = vmatmul.bf16.gmra.mxu3 %v11205_v2 }
 0x983   : > { %v6690_v10 = vpop.f32.mrf.mxu2 }
 0x984   : > { %v6779_v48 = vpop.f32.mrf.mxu3  ;;  %v6691_v3 = vadd.f32 %v6690_v10, %v6602_v21  ;;  %v6514_v34 = vpop.f32.mrf.mxu0 }
 0x985   : > { %v6603_v0 = vpop.f32.mrf.mxu1  ;;  %v6515_v28 = vadd.f32 %v11211_v42, %v6514_v34 }
 0x986   : > { %v6780_v11 = vadd.f32 %v6779_v48, %v6691_v3 }
 0x987   : > { %v6604_v59 = vadd.f32 %v6603_v0, %v6515_v28 }
 0x988   : > { %6841 = vst [vmem:[%s11225_s14 + $0x60] sm:$0xff] %v6780_v11 }
 0x98b   : > { %v6692_v23 = vpop.f32.mrf.mxu2 }
 0x98c   : > { %v6781_v57 = vpop.f32.mrf.mxu3  ;;  %v6693_v49 = vadd.f32 %v6692_v23, %v6604_v59  ;;  %v6517_v29 = vpop.f32.mrf.mxu0 }
 0x98d   : > { %v6606_v50 = vpop.f32.mrf.mxu1  ;;  %v6518_v2 = vadd.f32 %v11211_v42, %v6517_v29 }
 0x98e   : > { %v6782_v6 = vadd.f32 %v6781_v57, %v6693_v49 }
 0x98f   : > { %6556 = vmatmul.bf16.gmra.mxu0 %v11852_v16  ;;  %v6607_v37 = vadd.f32 %v6606_v50, %v6518_v2 }
 0x990   : > { %6645 = vmatmul.bf16.gmra.mxu1 %v11853_v35  ;;  %6842 = vst [vmem:[%s11225_s14 + $0x68] sm:$0xff] %v6782_v6  ;;  %6734 = vmatmul.bf16.gmra.mxu2 %v11085_v58 }
 0x991   : > { %6823 = vmatmul.bf16.gmra.mxu3 %v11218_v40 }
 0x993   : > { %v6695_v4 = vpop.f32.mrf.mxu2 }
 0x994   : > { %v6784_v8 = vpop.f32.mrf.mxu3  ;;  %v6696_v51 = vadd.f32 %v6695_v4, %v6607_v37  ;;  %v6519_v39 = vpop.f32.mrf.mxu0 }
 0x995   : > { %v6608_v9 = vpop.f32.mrf.mxu1  ;;  %v6520_v25 = vadd.f32 %v11211_v42, %v6519_v39 }
 0x996   : > { %v6785_v56 = vadd.f32 %v6784_v8, %v6696_v51 }
 0x997   : > { %v6609_v43 = vadd.f32 %v6608_v9, %v6520_v25 }
 0x998   : > { %6843 = vst [vmem:[%s11225_s14 + $0x70] sm:$0xff] %v6785_v56 }
 0x99b   : > { %v6697_v27 = vpop.f32.mrf.mxu2 }
 0x99c   : > { %v6786_v62 = vpop.f32.mrf.mxu3  ;;  %v6698_v24 = vadd.f32 %v6697_v27, %v6609_v43  ;;  %v6522_v14 = vpop.f32.mrf.mxu0 }
 0x99d   : > { %v6611_v58 = vpop.f32.mrf.mxu1  ;;  %v6523_v40 = vadd.f32 %v11211_v42, %v6522_v14 }
 0x99e   : > { %v6787_v61 = vadd.f32 %v6786_v62, %v6698_v24 }
 0x99f   : > { %v6612_v60 = vadd.f32 %v6611_v58, %v6523_v40 }
 0x9a0   : > { %6844 = vst [vmem:[%s11225_s14 + $0x78] sm:$0xff] %v6787_v61 }
 0x9a3   : > { %v6700_v47 = vpop.f32.mrf.mxu2 }
 0x9a4   : > { %v6789_v46 = vpop.f32.mrf.mxu3  ;;  %v6701_v30 = vadd.f32 %v6700_v47, %v6612_v60  ;;  %v6524_v45 = vpop.f32.mrf.mxu0 }
 0x9a5   : > { %v6613_v22 = vpop.f32.mrf.mxu1  ;;  %v6525_v5 = vadd.f32 %v11211_v42, %v6524_v45 }
 0x9a6   : > { %v6790_v44 = vadd.f32 %v6789_v46, %v6701_v30 }
 0x9a7   : > { %v6614_v52 = vadd.f32 %v6613_v22, %v6525_v5 }
 0x9a8   : > { %6845 = vst [vmem:[%s11225_s14 + $0x80] sm:$0xff] %v6790_v44 }
 0x9ab   : > { %v6702_v53 = vpop.f32.mrf.mxu2 }
 0x9ac   : > { %v6791_v31 = vpop.f32.mrf.mxu3  ;;  %v6703_v55 = vadd.f32 %v6702_v53, %v6614_v52  ;;  %v6527_v54 = vpop.f32.mrf.mxu0 }
 0x9ad   : > { %v6616_v12 = vpop.f32.mrf.mxu1  ;;  %v6528_v41 = vadd.f32 %v11211_v42, %v6527_v54 }
 0x9ae   : > { %v6792_v13 = vadd.f32 %v6791_v31, %v6703_v55 }
 0x9af   : > { %v6617_v26 = vadd.f32 %v6616_v12, %v6528_v41 }
 0x9b0   : > { %6846 = vst [vmem:[%s11225_s14 + $0x88] sm:$0xff] %v6792_v13 }
 0x9b3   : > { %v6705_v32 = vpop.f32.mrf.mxu2 }
 0x9b4   : > { %v6794_v18 = vpop.f32.mrf.mxu3  ;;  %v6706_v38 = vadd.f32 %v6705_v32, %v6617_v26  ;;  %v6529_v19 = vpop.f32.mrf.mxu0 }
 0x9b5   : > { %v6618_v63 = vpop.f32.mrf.mxu1  ;;  %v6530_v7 = vadd.f32 %v11211_v42, %v6529_v19 }
 0x9b6   : > { %v6795_v17 = vadd.f32 %v6794_v18, %v6706_v38 }
 0x9b7   : > { %v6619_v33 = vadd.f32 %v6618_v63, %v6530_v7 }
 0x9b8   : > { %6847 = vst [vmem:[%s11225_s14 + $0x90] sm:$0xff] %v6795_v17 }
 0x9bb   : > { %v6707_v1 = vpop.f32.mrf.mxu2 }
 0x9bc   : > { %v6796_v36 = vpop.f32.mrf.mxu3  ;;  %v6708_v20 = vadd.f32 %v6707_v1, %v6619_v33  ;;  %v6532_v15 = vpop.f32.mrf.mxu0 }
 0x9bd   : > { %v6621_v21 = vpop.f32.mrf.mxu1  ;;  %v6533_v48 = vadd.f32 %v11211_v42, %v6532_v15 }
 0x9be   : > { %v6797_v10 = vadd.f32 %v6796_v36, %v6708_v20 }
 0x9bf   : > { %v6622_v3 = vadd.f32 %v6621_v21, %v6533_v48 }
 0x9c0   : > { %6848 = vst [vmem:[%s11225_s14 + $0x98] sm:$0xff] %v6797_v10 }
 0x9c3   : > { %v6710_v34 = vpop.f32.mrf.mxu2 }
 0x9c4   : > { %v6799_v0 = vpop.f32.mrf.mxu3  ;;  %v6711_v11 = vadd.f32 %v6710_v34, %v6622_v3  ;;  %v6534_v28 = vpop.f32.mrf.mxu0 }
 0x9c5   : > { %v6623_v59 = vpop.f32.mrf.mxu1  ;;  %v6535_v57 = vadd.f32 %v11211_v42, %v6534_v28 }
 0x9c6   : > { %v6800_v23 = vadd.f32 %v6799_v0, %v6711_v11 }
 0x9c7   : > { %v6624_v49 = vadd.f32 %v6623_v59, %v6535_v57 }
 0x9c8   : > { %6849 = vst [vmem:[%s11225_s14 + $0xa0] sm:$0xff] %v6800_v23 }
 0x9cb   : > { %v6712_v29 = vpop.f32.mrf.mxu2 }
 0x9cc   : > { %v6801_v50 = vpop.f32.mrf.mxu3  ;;  %v6713_v6 = vadd.f32 %v6712_v29, %v6624_v49  ;;  %v6537_v2 = vpop.f32.mrf.mxu0 }
 0x9cd   : > { %v6626_v16 = vpop.f32.mrf.mxu1  ;;  %v6538_v37 = vadd.f32 %v11211_v42, %v6537_v2 }
 0x9ce   : > { %v6802_v35 = vadd.f32 %v6801_v50, %v6713_v6 }
 0x9cf   : > { %v6627_v4 = vadd.f32 %v6626_v16, %v6538_v37 }
 0x9d0   : > { %6850 = vst [vmem:[%s11225_s14 + $0xa8] sm:$0xff] %v6802_v35 }
 0x9d3   : > { %v6715_v8 = vpop.f32.mrf.mxu2 }
 0x9d4   : > { %v6804_v51 = vpop.f32.mrf.mxu3  ;;  %v6716_v39 = vadd.f32 %v6715_v8, %v6627_v4  ;;  %v6539_v9 = vpop.f32.mrf.mxu0 }
 0x9d5   : > { %v6628_v56 = vpop.f32.mrf.mxu1  ;;  %v6540_v43 = vadd.f32 %v11211_v42, %v6539_v9 }
 0x9d6   : > { %v6805_v25 = vadd.f32 %v6804_v51, %v6716_v39 }
 0x9d7   : > { %v6629_v27 = vadd.f32 %v6628_v56, %v6540_v43 }
 0x9d8   : > { %6851 = vst [vmem:[%s11225_s14 + $0xb0] sm:$0xff] %v6805_v25 }
 0x9db   : > { %v6717_v62 = vpop.f32.mrf.mxu2 }
 0x9dc   : > { %v6806_v24 = vpop.f32.mrf.mxu3  ;;  %v6718_v14 = vadd.f32 %v6717_v62, %v6629_v27  ;;  %v6542_v58 = vpop.f32.mrf.mxu0 }
 0x9dd   : > { %v6631_v61 = vpop.f32.mrf.mxu1  ;;  %v6543_v60 = vadd.f32 %v11211_v42, %v6542_v58 }
 0x9de   : > { %v6807_v40 = vadd.f32 %v6806_v24, %v6718_v14 }
 0x9df   : > { %v6632_v47 = vadd.f32 %v6631_v61, %v6543_v60 }
 0x9e0   : > { %6852 = vst [vmem:[%s11225_s14 + $0xb8] sm:$0xff] %v6807_v40 }
 0x9e3   : > { %v6720_v46 = vpop.f32.mrf.mxu2 }
 0x9e4   : > { %v6809_v30 = vpop.f32.mrf.mxu3  ;;  %v6721_v45 = vadd.f32 %v6720_v46, %v6632_v47  ;;  %v6544_v22 = vpop.f32.mrf.mxu0 }
 0x9e5   : > { %v6633_v44 = vpop.f32.mrf.mxu1  ;;  %v6545_v52 = vadd.f32 %v11211_v42, %v6544_v22 }
 0x9e6   : > { %v6810_v5 = vadd.f32 %v6809_v30, %v6721_v45 }
 0x9e7   : > { %v6634_v53 = vadd.f32 %v6633_v44, %v6545_v52 }
 0x9e8   : > { %6853 = vst [vmem:[%s11225_s14 + $0xc0] sm:$0xff] %v6810_v5 }
 0x9eb   : > { %v6722_v31 = vpop.f32.mrf.mxu2 }
 0x9ec   : > { %v6811_v55 = vpop.f32.mrf.mxu3  ;;  %v6723_v54 = vadd.f32 %v6722_v31, %v6634_v53  ;;  %v6547_v12 = vpop.f32.mrf.mxu0 }
 0x9ed   : > { %v6636_v13 = vpop.f32.mrf.mxu1  ;;  %v6548_v26 = vadd.f32 %v11211_v42, %v6547_v12 }
 0x9ee   : > { %v6812_v41 = vadd.f32 %v6811_v55, %v6723_v54 }
 0x9ef   : > { %v6637_v32 = vadd.f32 %v6636_v13, %v6548_v26 }
 0x9f0   : > { %6854 = vst [vmem:[%s11225_s14 + $0xc8] sm:$0xff] %v6812_v41 }
 0x9f3   : > { %v6725_v18 = vpop.f32.mrf.mxu2 }
 0x9f4   : > { %v6814_v38 = vpop.f32.mrf.mxu3  ;;  %v6726_v19 = vadd.f32 %v6725_v18, %v6637_v32  ;;  %v6549_v63 = vpop.f32.mrf.mxu0 }
 0x9f5   : > { %v6638_v17 = vpop.f32.mrf.mxu1  ;;  %v6550_v33 = vadd.f32 %v11211_v42, %v6549_v63 }
 0x9f6   : > { %v6815_v7 = vadd.f32 %v6814_v38, %v6726_v19 }
 0x9f7   : > { %v6639_v1 = vadd.f32 %v6638_v17, %v6550_v33 }
 0x9f8   : > { %6855 = vst [vmem:[%s11225_s14 + $0xd0] sm:$0xff] %v6815_v7 }
 0x9fb   : > { %v6727_v36 = vpop.f32.mrf.mxu2 }
 0x9fc   : > { %v6816_v20 = vpop.f32.mrf.mxu3  ;;  %v6728_v15 = vadd.f32 %v6727_v36, %v6639_v1  ;;  %v6552_v21 = vpop.f32.mrf.mxu0 }
 0x9fd   : > { %v6641_v10 = vpop.f32.mrf.mxu1  ;;  %v6553_v3 = vadd.f32 %v11211_v42, %v6552_v21 }
 0x9fe   : > { %v6817_v48 = vadd.f32 %v6816_v20, %v6728_v15 }
 0x9ff   : > { %v6642_v34 = vadd.f32 %v6641_v10, %v6553_v3 }
 0xa00   : > { %6856 = vst [vmem:[%s11225_s14 + $0xd8] sm:$0xff] %v6817_v48 }
 0xa03   : > { %v6730_v0 = vpop.f32.mrf.mxu2 }
 0xa04   : > { %v6819_v11 = vpop.f32.mrf.mxu3  ;;  %v6731_v28 = vadd.f32 %v6730_v0, %v6642_v34  ;;  %v6554_v59 = vpop.f32.mrf.mxu0 }
 0xa05   : > { %v6643_v23 = vpop.f32.mrf.mxu1  ;;  %v6555_v49 = vadd.f32 %v11211_v42, %v6554_v59 }
 0xa06   : > { %v6820_v57 = vadd.f32 %v6819_v11, %v6731_v28 }
 0xa07   : > { %v6644_v29 = vadd.f32 %v6643_v23, %v6555_v49 }
 0xa08   : > { %6857 = vst [vmem:[%s11225_s14 + $0xe0] sm:$0xff] %v6820_v57 }
 0xa0b   : > { %v6732_v50 = vpop.f32.mrf.mxu2 }
 0xa0c   : > { %v6821_v6 = vpop.f32.mrf.mxu3  ;;  %v6733_v2 = vadd.f32 %v6732_v50, %v6644_v29  ;;  %v6557_v16 = vpop.f32.mrf.mxu0 }
 0xa0d   : > { %v6558_v37 = vadd.f32 %v11211_v42, %v6557_v16  ;;  %v6646_v4 = vpop.f32.mrf.mxu1 }
 0xa0e   : > { %v6822_v35 = vadd.f32 %v6821_v6, %v6733_v2 }
 0xa0f   : > { %v6647_v8 = vadd.f32 %v6646_v4, %v6558_v37 }
 0xa10   : > { %6858 = vst [vmem:[%s11225_s14 + $0xe8] sm:$0xff] %v6822_v35 }
 0xa13   : > { %v6735_v51 = vpop.f32.mrf.mxu2 }
 0xa14   : > { %v6824_v39 = vpop.f32.mrf.mxu3  ;;  %v6736_v9 = vadd.f32 %v6735_v51, %v6647_v8  ;;  %v6559_v56 = vpop.f32.mrf.mxu0 }
 0xa15   : > { %v6560_v43 = vadd.f32 %v11211_v42, %v6559_v56  ;;  %v6648_v27 = vpop.f32.mrf.mxu1 }
 0xa16   : > { %v6825_v25 = vadd.f32 %v6824_v39, %v6736_v9 }
 0xa17   : > { %v6649_v62 = vadd.f32 %v6648_v27, %v6560_v43 }
 0xa18   : > { %6859 = vst [vmem:[%s11225_s14 + $0xf0] sm:$0xff] %v6825_v25 }
 0xa1b   : > { %v6737_v24 = vpop.f32.mrf.mxu2 }
 0xa1c   : > { %v6738_v14 = vadd.f32 %v6737_v24, %v6649_v62  ;;  %v6826_v58 = vpop.f32.mrf.mxu3 }
 0xa1e   : > { %v6827_v61 = vadd.f32 %v6826_v58, %v6738_v14 }
 0xa20   : > { %6860 = vst [vmem:[%s11225_s14 + $0xf8] sm:$0xff] %v6827_v61 }
 0xa21 PF: > { %s21_s30 = sadd.s32 1, %s8546_s30  }
 0xa22   : > { %p18_p7 = scmp.ge.s32.totalorder %s21_s30, 4  }
 0xa24   :  { %20 = sbr.rel (!%p18_p7) target bundleno = 2 (0x2), region = 96 }
 0xa29   :  { %6883 = vsyncpa [#allocation3], 1 }
 0xa2a   :  { %6885 = vsyncpa [#allocation3 + $0x1], 1 }
 0xa2b   :  { %6886 = vsyncpa [#allocation5], 1 }

</bundles_post_ra>
